<compile_context>
chip_gen: v6e
topology: v6e:2x2x1
jax: 0.10.0
libtpu: 0.0.40
codegen_flags: <defaults>
</compile_context>

<pallas_src>
from functools import partial

import jax
import jax.numpy as jnp
from jax.experimental import pallas as pl
from jax.experimental.pallas import tpu as pltpu

H = 128           # hidden size (lane-width aligned -> packed-gate slices are aligned)
V = 128           # vocabulary size (lane-dense logits)
L = 8             # input sequence length
MAX_LENGTH = 6    # greedy decode steps
START_TOKEN = 1   # voc.START_token

BF = jnp.bfloat16
F32 = jnp.float32

_VMEM = pl.BlockSpec(memory_space=pltpu.MemorySpace.VMEM)
_SMEM = pl.BlockSpec(memory_space=pltpu.MemorySpace.SMEM)


def _gates(gx, gh, h):
    """torch.nn.GRU cell gates from precomputed gx = x@Wi+bi, gh = h@Wh+bh.

    gx, gh: (1, 3H) f32 packed [r | z | n]; h: (1, H) f32.
    """
    r = jax.nn.sigmoid(gx[:, 0:H] + gh[:, 0:H])
    z = jax.nn.sigmoid(gx[:, H:2 * H] + gh[:, H:2 * H])
    n = jnp.tanh(gx[:, 2 * H:3 * H] + r * gh[:, 2 * H:3 * H])
    return (1.0 - z) * n + z * h


# --------------------- single fused encoder + greedy-decode kernel ------------------ #
def _fused_kernel(seq_ref,                                   # (L,) int32, SMEM
                  emb_ref,                                   # (V, H) bf16
                  wi_f_ref, wh_f_ref, bi_f_ref, bh_f_ref,    # encoder fwd GRU
                  wi_b_ref, wh_b_ref, bi_b_ref, bh_b_ref,    # encoder bwd GRU
                  wi_d_ref, wh_d_ref, bi_d_ref, bh_d_ref,    # decoder GRU
                  wch_ref, wcc_ref, bcat_ref,                # concat layer (split)
                  wout_ref, bout_ref,                        # output head
                  tok_ref, score_ref,                        # outputs (1, max_length)
                  enc_scr, encwcc_scr, embwi_scr,            # VMEM scratch
                  *, max_length):
    # ---- in-kernel embedding gather: one-hot (L,V) built from SMEM token ids,
    #      then a single (L,V)x(V,H) MXU dot (no XLA gather, no HBM round-trip).
    lane_v_L = jax.lax.broadcasted_iota(jnp.int32, (L, V), 1)
    row_col = jax.lax.broadcasted_iota(jnp.int32, (L, 1), 0)
    tok_col = jnp.zeros((L, 1), jnp.int32)
    for t in range(L):
        tok_col = jnp.where(row_col == t, seq_ref[t], tok_col)
    onehot_seq = (lane_v_L == tok_col).astype(BF)                                # (L, V)
    emb_seq = jnp.dot(onehot_seq, emb_ref[...], preferred_element_type=F32)      # (L, H)
    emb_seq_bf = emb_seq.astype(BF)

    # ---- hoisted encoder input projections: two well-shaped 8-sublane matmuls
    #      issued up-front; only the recurrent h@Wh dot stays on the serial chain.
    gxf_all = jnp.dot(emb_seq_bf, wi_f_ref[...], preferred_element_type=F32) + bi_f_ref[...]
    gxb_all = jnp.dot(emb_seq_bf, wi_b_ref[...], preferred_element_type=F32) + bi_b_ref[...]

    # ---- decoder folding A: embWi = emb_table @ Wi_dec, computed once.
    #      Independent of the encoder recurrence -> scheduler overlaps it with
    #      the serial GRU chain. Lives in VMEM scratch (not held in vregs).
    embwi_scr[...] = jnp.dot(emb_ref[...], wi_d_ref[...],
                             preferred_element_type=F32).astype(BF)              # (V, 3H)

    # ---- bidirectional GRU recurrence; the two independent chains are
    #      interleaved so their dots/EUP work co-issue on one core.
    bh_f = bh_f_ref[...]
    bh_b = bh_b_ref[...]
    h_f = jnp.zeros((1, H), F32)
    h_b = jnp.zeros((1, H), F32)
    outs_f = [None] * L
    outs_b = [None] * L
    for t in range(L):
        gh_f = jnp.dot(h_f.astype(BF), wh_f_ref[...], preferred_element_type=F32) + bh_f
        h_f = _gates(gxf_all[t:t + 1, :], gh_f, h_f)
        outs_f[t] = h_f
        tb = L - 1 - t
        gh_b = jnp.dot(h_b.astype(BF), wh_b_ref[...], preferred_element_type=F32) + bh_b
        h_b = _gates(gxb_all[tb:tb + 1, :], gh_b, h_b)
        outs_b[tb] = h_b

    # outputs[:, :, :H] + outputs[:, :, H:] -> single (L, H) value, one store.
    enc = jnp.concatenate([outs_f[t] + outs_b[t] for t in range(L)], axis=0)     # (L, H)
    enc_bf = enc.astype(BF)
    enc_scr[...] = enc_bf
    # ---- decoder folding B: encWcc = enc @ Wcc, computed once.
    encwcc_scr[...] = jnp.dot(enc_bf, wcc_ref[...],
                              preferred_element_type=F32).astype(BF)             # (L, H)

    # ---- greedy decode loop: hidden state / feedback token never leave the core.
    lane_v = jax.lax.broadcasted_iota(jnp.int32, (1, V), 1)
    lane_m = jax.lax.broadcasted_iota(jnp.int32, (1, max_length), 1)
    bi_d = bi_d_ref[...]
    bh_d = bh_d_ref[...]
    bcat = bcat_ref[...]
    bout = bout_ref[...]

    h = h_f                                            # decoder_hidden = encoder_hidden[:n_layers]
    gx = embwi_scr[START_TOKEN:START_TOKEN + 1, :].astype(F32) + bi_d            # START token
    toks = jnp.zeros((1, max_length), jnp.int32)
    scores = jnp.zeros((1, max_length), jnp.float32)

    # Fully unrolled (max_length is small); big matrices stay in VMEM refs /
    # scratch and are indexed at the dot sites, so the live vreg set stays small.
    for step in range(max_length):
        gh = jnp.dot(h.astype(BF), wh_d_ref[...], preferred_element_type=F32) + bh_d
        rnn_out = _gates(gx, gh, h)                                              # (1, H)
        h = rnn_out

        # Luong "dot" attention over encoder outputs (contraction on H, no transpose).
        alog = jnp.einsum('qd,kd->qk', rnn_out.astype(BF), enc_scr[...],
                          preferred_element_type=F32)                            # (1, L)
        alog = alog - jnp.max(alog, axis=1, keepdims=True)
        ea = jnp.exp(alog)
        attn = ea / jnp.sum(ea, axis=1, keepdims=True)                           # exact softmax

        # concat([rnn_out, context]) @ W_concat with the context@Wcc fold:
        # (attn @ enc) @ Wcc == attn @ (enc @ Wcc) == attn @ encWcc.
        cat = jnp.tanh(
            jnp.dot(rnn_out.astype(BF), wch_ref[...], preferred_element_type=F32)
            + jnp.dot(attn.astype(BF), encwcc_scr[...], preferred_element_type=F32)
            + bcat)                                                              # (1, H)
        logits = jnp.dot(cat.astype(BF), wout_ref[...], preferred_element_type=F32) + bout

        # torch.max(softmax(logits), dim=1): argmax on logits (monotone map);
        # max probability = 1 / sum(exp(logits - max_logit))  (exact division).
        m = jnp.max(logits, axis=1, keepdims=True)                               # (1, 1)
        sum_e = jnp.sum(jnp.exp(logits - m), axis=1, keepdims=True)
        score = 1.0 / sum_e                                                      # (1, 1)
        idx = jnp.min(jnp.where(logits == m, lane_v, V), axis=1, keepdims=True)  # (1, 1) i32

        toks = jnp.where(lane_m == step, jnp.broadcast_to(idx, (1, max_length)), toks)
        scores = jnp.where(lane_m == step,
                           jnp.broadcast_to(score, (1, max_length)), scores)

        # Greedy feedback via folding A: next gx = onehot @ embWi + bi
        # (single dot; the data-dependent lookup never leaves the vector units).
        onehot = (lane_v == idx).astype(BF)                                      # (1, V)
        gx = jnp.dot(onehot, embwi_scr[...], preferred_element_type=F32) + bi_d  # (1, 3H)

    tok_ref[...] = toks                                    # single store at the end
    score_ref[...] = scores


def fused_forward(input_seq, embedding, enc_fwd, enc_bwd, dec_params, max_length):
    """One pallas_call for the whole forward pass. Returns (tokens, scores) (1, max_length)."""
    kernel = partial(_fused_kernel, max_length=max_length)
    n_vmem_inputs = 1 + len(enc_fwd) + len(enc_bwd) + len(dec_params)
    return pl.pallas_call(
        kernel,
        out_shape=(jax.ShapeDtypeStruct((1, max_length), jnp.int32),
                   jax.ShapeDtypeStruct((1, max_length), jnp.float32)),
        in_specs=[_SMEM] + [_VMEM] * n_vmem_inputs,
        out_specs=(_VMEM, _VMEM),
        scratch_shapes=[pltpu.VMEM((L, H), BF),          # enc (encoder outputs)
                        pltpu.VMEM((L, H), BF),          # encWcc fold
                        pltpu.VMEM((V, 3 * H), BF)],     # embWi fold
    )(input_seq, embedding, *enc_fwd, *enc_bwd, *dec_params)


# ------------------------------------ model glue ------------------------------------ #
def init_params(key):
    keys = iter(jax.random.split(key, 32))

    def nrm(shape, dtype=F32, scale=0.1):
        return (scale * jax.random.normal(next(keys), shape, dtype=F32)).astype(dtype)

    # Weights (matmul operands) are stored bf16 once at init; biases stay f32.
    embedding = nrm((V, H), BF)

    def gru_params():
        # gate-packed [r | z | n] input/hidden weights & biases
        return (nrm((H, 3 * H), BF), nrm((H, 3 * H), BF),
                nrm((1, 3 * H)), nrm((1, 3 * H)))

    enc_fwd = gru_params()
    enc_bwd = gru_params()
    dec_gru = gru_params()
    wcat_h = nrm((H, H), BF)
    wcat_c = nrm((H, H), BF)
    bcat = nrm((1, H))
    wout = nrm((H, V), BF)
    bout = nrm((1, V))
    dec_params = dec_gru + (wcat_h, wcat_c, bcat, wout, bout)
    return embedding, enc_fwd, enc_bwd, dec_params


@partial(jax.jit, static_argnames=("max_length",))
def greedy_search_decode(input_seq, input_length, max_length, params):
    """Forward pass of GreedySearchDecoder. Returns (all_tokens, all_scores)."""
    embedding, enc_fwd, enc_bwd, dec_params = params
    del input_length  # TODO(synk): pack_padded_sequence masking not modeled; full-length seq assumed.
    toks, scores = fused_forward(input_seq, embedding, enc_fwd, enc_bwd,
                                 dec_params, max_length)
    # TODO(synk): tokens are int32 here (PyTorch uses torch.long / int64).
    return toks.reshape(max_length), scores.reshape(max_length)


if __name__ == "__main__":
    key = jax.random.PRNGKey(0)
    pkey, skey = jax.random.split(key)
    params = init_params(pkey)

    input_seq = jax.random.randint(skey, (L,), 3, V, dtype=jnp.int32)   # (L,) token ids
    input_length = jnp.array([L], dtype=jnp.int32)

    tokens, scores = greedy_search_decode(input_seq, input_length, MAX_LENGTH, params)
    jax.block_until_ready((tokens, scores))

    assert tokens.shape == (MAX_LENGTH,) and tokens.dtype == jnp.int32
    assert scores.shape == (MAX_LENGTH,) and scores.dtype == jnp.float32
    assert bool(jnp.all(tokens >= 0)) and bool(jnp.all(tokens < V))
    assert bool(jnp.all(scores > 0.0)) and bool(jnp.all(scores <= 1.0))
    print("KERNEL_OK")
</pallas_src>

<mosaic_0001>
module attributes {stable_mosaic.version = 11 : i64} {
  func.func @_fused_kernel(%arg0: memref<8xi32, #tpu.memory_space<smem>>, %arg1: memref<128x128xbf16, #tpu.memory_space<vmem>>, %arg2: memref<128x384xbf16, #tpu.memory_space<vmem>>, %arg3: memref<128x384xbf16, #tpu.memory_space<vmem>>, %arg4: memref<1x384xf32, #tpu.memory_space<vmem>>, %arg5: memref<1x384xf32, #tpu.memory_space<vmem>>, %arg6: memref<128x384xbf16, #tpu.memory_space<vmem>>, %arg7: memref<128x384xbf16, #tpu.memory_space<vmem>>, %arg8: memref<1x384xf32, #tpu.memory_space<vmem>>, %arg9: memref<1x384xf32, #tpu.memory_space<vmem>>, %arg10: memref<128x384xbf16, #tpu.memory_space<vmem>>, %arg11: memref<128x384xbf16, #tpu.memory_space<vmem>>, %arg12: memref<1x384xf32, #tpu.memory_space<vmem>>, %arg13: memref<1x384xf32, #tpu.memory_space<vmem>>, %arg14: memref<128x128xbf16, #tpu.memory_space<vmem>>, %arg15: memref<128x128xbf16, #tpu.memory_space<vmem>>, %arg16: memref<1x128xf32, #tpu.memory_space<vmem>>, %arg17: memref<128x128xbf16, #tpu.memory_space<vmem>>, %arg18: memref<1x128xf32, #tpu.memory_space<vmem>>, %arg19: memref<1x6xi32, #tpu.memory_space<vmem>>, %arg20: memref<1x6xf32, #tpu.memory_space<vmem>>, %arg21: memref<8x128xbf16, #tpu.memory_space<vmem>>, %arg22: memref<8x128xbf16, #tpu.memory_space<vmem>>, %arg23: memref<128x384xbf16, #tpu.memory_space<vmem>>) attributes {dimension_semantics = [], scalar_prefetch = 0 : i64, scratch_operands = 3 : i64, tpu.core_type = #tpu.core_type<tc>} {
    %0 = tpu.iota {dimensions = array<i32: 1>} : vector<8x128xi32>
    %1 = tpu.iota {dimensions = array<i32: 0>} : vector<8x1xi32>
    %c0_i32 = arith.constant 0 : i32
    %2 = vector.broadcast %c0_i32 : i32 to vector<8x1xi32>
    %c0_i32_0 = arith.constant 0 : i32
    %3 = vector.broadcast %c0_i32_0 : i32 to vector<8x1xi32>
    %4 = arith.cmpi eq, %1, %3 : vector<8x1xi32>
    %c0 = arith.constant 0 : index
    %5 = memref.load %arg0[%c0] : memref<8xi32, #tpu.memory_space<smem>>
    %6 = vector.broadcast %5 : i32 to vector<8x1xi32>
    %7 = arith.select %4, %6, %2 : vector<8x1xi1>, vector<8x1xi32>
    %c1_i32 = arith.constant 1 : i32
    %8 = vector.broadcast %c1_i32 : i32 to vector<8x1xi32>
    %9 = arith.cmpi eq, %1, %8 : vector<8x1xi32>
    %c1 = arith.constant 1 : index
    %10 = memref.load %arg0[%c1] : memref<8xi32, #tpu.memory_space<smem>>
    %11 = vector.broadcast %10 : i32 to vector<8x1xi32>
    %12 = arith.select %9, %11, %7 : vector<8x1xi1>, vector<8x1xi32>
    %c2_i32 = arith.constant 2 : i32
    %13 = vector.broadcast %c2_i32 : i32 to vector<8x1xi32>
    %14 = arith.cmpi eq, %1, %13 : vector<8x1xi32>
    %c2 = arith.constant 2 : index
    %15 = memref.load %arg0[%c2] : memref<8xi32, #tpu.memory_space<smem>>
    %16 = vector.broadcast %15 : i32 to vector<8x1xi32>
    %17 = arith.select %14, %16, %12 : vector<8x1xi1>, vector<8x1xi32>
    %c3_i32 = arith.constant 3 : i32
    %18 = vector.broadcast %c3_i32 : i32 to vector<8x1xi32>
    %19 = arith.cmpi eq, %1, %18 : vector<8x1xi32>
    %c3 = arith.constant 3 : index
    %20 = memref.load %arg0[%c3] : memref<8xi32, #tpu.memory_space<smem>>
    %21 = vector.broadcast %20 : i32 to vector<8x1xi32>
    %22 = arith.select %19, %21, %17 : vector<8x1xi1>, vector<8x1xi32>
    %c4_i32 = arith.constant 4 : i32
    %23 = vector.broadcast %c4_i32 : i32 to vector<8x1xi32>
    %24 = arith.cmpi eq, %1, %23 : vector<8x1xi32>
    %c4 = arith.constant 4 : index
    %25 = memref.load %arg0[%c4] : memref<8xi32, #tpu.memory_space<smem>>
    %26 = vector.broadcast %25 : i32 to vector<8x1xi32>
    %27 = arith.select %24, %26, %22 : vector<8x1xi1>, vector<8x1xi32>
    %c5_i32 = arith.constant 5 : i32
    %28 = vector.broadcast %c5_i32 : i32 to vector<8x1xi32>
    %29 = arith.cmpi eq, %1, %28 : vector<8x1xi32>
    %c5 = arith.constant 5 : index
    %30 = memref.load %arg0[%c5] : memref<8xi32, #tpu.memory_space<smem>>
    %31 = vector.broadcast %30 : i32 to vector<8x1xi32>
    %32 = arith.select %29, %31, %27 : vector<8x1xi1>, vector<8x1xi32>
    %c6_i32 = arith.constant 6 : i32
    %33 = vector.broadcast %c6_i32 : i32 to vector<8x1xi32>
    %34 = arith.cmpi eq, %1, %33 : vector<8x1xi32>
    %c6 = arith.constant 6 : index
    %35 = memref.load %arg0[%c6] : memref<8xi32, #tpu.memory_space<smem>>
    %36 = vector.broadcast %35 : i32 to vector<8x1xi32>
    %37 = arith.select %34, %36, %32 : vector<8x1xi1>, vector<8x1xi32>
    %c7_i32 = arith.constant 7 : i32
    %38 = vector.broadcast %c7_i32 : i32 to vector<8x1xi32>
    %39 = arith.cmpi eq, %1, %38 : vector<8x1xi32>
    %c7 = arith.constant 7 : index
    %40 = memref.load %arg0[%c7] : memref<8xi32, #tpu.memory_space<smem>>
    %41 = vector.broadcast %40 : i32 to vector<8x1xi32>
    %42 = arith.select %39, %41, %37 : vector<8x1xi1>, vector<8x1xi32>
    %43 = vector.broadcast %42 : vector<8x1xi32> to vector<8x128xi32>
    %44 = arith.cmpi eq, %0, %43 : vector<8x128xi32>
    %45 = arith.extui %44 : vector<8x128xi1> to vector<8x128xi32>
    %46 = arith.sitofp %45 : vector<8x128xi32> to vector<8x128xf32>
    %47 = arith.truncf %46 : vector<8x128xf32> to vector<8x128xbf16>
    %c0_1 = arith.constant 0 : index
    %c0_2 = arith.constant 0 : index
    %48 = vector.load %arg1[%c0_1, %c0_2] : memref<128x128xbf16, #tpu.memory_space<vmem>>, vector<128x128xbf16>
    %cst = arith.constant dense<0.000000e+00> : vector<8x128xf32>
    %49 = tpu.matmul %47, %48, %cst {dimension_numbers = #tpu.dot_dimension_numbers<[1], [0], [0], [1], [0, 0, 1, 1], [], []>} : vector<8x128xbf16>, vector<128x128xbf16>, vector<8x128xf32> -> vector<8x128xf32>
    %50 = arith.truncf %49 : vector<8x128xf32> to vector<8x128xbf16>
    %c0_3 = arith.constant 0 : index
    %c0_4 = arith.constant 0 : index
    %51 = vector.load %arg2[%c0_3, %c0_4] : memref<128x384xbf16, #tpu.memory_space<vmem>>, vector<128x384xbf16>
    %cst_5 = arith.constant dense<0.000000e+00> : vector<8x384xf32>
    %52 = tpu.matmul %50, %51, %cst_5 {dimension_numbers = #tpu.dot_dimension_numbers<[1], [0], [0], [1], [0, 0, 1, 1], [], []>} : vector<8x128xbf16>, vector<128x384xbf16>, vector<8x384xf32> -> vector<8x384xf32>
    %c0_6 = arith.constant 0 : index
    %c0_7 = arith.constant 0 : index
    %53 = vector.load %arg4[%c0_6, %c0_7] : memref<1x384xf32, #tpu.memory_space<vmem>>, vector<1x384xf32>
    %54 = vector.broadcast %53 : vector<1x384xf32> to vector<8x384xf32>
    %55 = arith.addf %52, %54 : vector<8x384xf32>
    %c0_8 = arith.constant 0 : index
    %c0_9 = arith.constant 0 : index
    %56 = vector.load %arg6[%c0_8, %c0_9] : memref<128x384xbf16, #tpu.memory_space<vmem>>, vector<128x384xbf16>
    %cst_10 = arith.constant dense<0.000000e+00> : vector<8x384xf32>
    %57 = tpu.matmul %50, %56, %cst_10 {dimension_numbers = #tpu.dot_dimension_numbers<[1], [0], [0], [1], [0, 0, 1, 1], [], []>} : vector<8x128xbf16>, vector<128x384xbf16>, vector<8x384xf32> -> vector<8x384xf32>
    %c0_11 = arith.constant 0 : index
    %c0_12 = arith.constant 0 : index
    %58 = vector.load %arg8[%c0_11, %c0_12] : memref<1x384xf32, #tpu.memory_space<vmem>>, vector<1x384xf32>
    %59 = vector.broadcast %58 : vector<1x384xf32> to vector<8x384xf32>
    %60 = arith.addf %57, %59 : vector<8x384xf32>
    %c0_13 = arith.constant 0 : index
    %c0_14 = arith.constant 0 : index
    %61 = vector.load %arg1[%c0_13, %c0_14] : memref<128x128xbf16, #tpu.memory_space<vmem>>, vector<128x128xbf16>
    %c0_15 = arith.constant 0 : index
    %c0_16 = arith.constant 0 : index
    %62 = vector.load %arg10[%c0_15, %c0_16] : memref<128x384xbf16, #tpu.memory_space<vmem>>, vector<128x384xbf16>
    %cst_17 = arith.constant dense<0.000000e+00> : vector<128x384xf32>
    %63 = tpu.matmul %61, %62, %cst_17 {dimension_numbers = #tpu.dot_dimension_numbers<[1], [0], [0], [1], [0, 0, 1, 1], [], []>} : vector<128x128xbf16>, vector<128x384xbf16>, vector<128x384xf32> -> vector<128x384xf32>
    %64 = arith.truncf %63 : vector<128x384xf32> to vector<128x384xbf16>
    %c0_18 = arith.constant 0 : index
    %c0_19 = arith.constant 0 : index
    %65 = vector.load %arg23[%c0_18, %c0_19] : memref<128x384xbf16, #tpu.memory_space<vmem>>, vector<128x384xbf16>
    tpu.vector_store %arg23[%c0_18, %c0_19], %64 {strides = array<i32>} : memref<128x384xbf16, #tpu.memory_space<vmem>>, vector<128x384xbf16>,
    %c0_20 = arith.constant 0 : index
    %c0_21 = arith.constant 0 : index
    %66 = vector.load %arg5[%c0_20, %c0_21] : memref<1x384xf32, #tpu.memory_space<vmem>>, vector<1x384xf32>
    %c0_22 = arith.constant 0 : index
    %c0_23 = arith.constant 0 : index
    %67 = vector.load %arg9[%c0_22, %c0_23] : memref<1x384xf32, #tpu.memory_space<vmem>>, vector<1x384xf32>
    %cst_24 = arith.constant 0.000000e+00 : f32
    %68 = vector.broadcast %cst_24 : f32 to vector<1x128xf32>
    %cst_25 = arith.constant 0.000000e+00 : f32
    %69 = vector.broadcast %cst_25 : f32 to vector<1x128xf32>
    %70 = arith.truncf %68 : vector<1x128xf32> to vector<1x128xbf16>
    %c0_26 = arith.constant 0 : index
    %c0_27 = arith.constant 0 : index
    %71 = vector.load %arg3[%c0_26, %c0_27] : memref<128x384xbf16, #tpu.memory_space<vmem>>, vector<128x384xbf16>
    %cst_28 = arith.constant dense<0.000000e+00> : vector<1x384xf32>
    %72 = tpu.matmul %70, %71, %cst_28 {dimension_numbers = #tpu.dot_dimension_numbers<[1], [0], [0], [1], [0, 0, 1, 1], [], []>} : vector<1x128xbf16>, vector<128x384xbf16>, vector<1x384xf32> -> vector<1x384xf32>
    %73 = arith.addf %72, %66 : vector<1x384xf32>
    %74 = vector.extract_strided_slice %55 {offsets = [0, 0], sizes = [1, 384], strides = [1, 1]} : vector<8x384xf32> to vector<1x384xf32>
    %75 = vector.extract_strided_slice %74 {offsets = [0, 0], sizes = [1, 128], strides = [1, 1]} : vector<1x384xf32> to vector<1x128xf32>
    %76 = vector.extract_strided_slice %73 {offsets = [0, 0], sizes = [1, 128], strides = [1, 1]} : vector<1x384xf32> to vector<1x128xf32>
    %77 = arith.addf %75, %76 : vector<1x128xf32>
    %78 = arith.negf %77 : vector<1x128xf32>
    %79 = math.exp %78 : vector<1x128xf32>
    %cst_29 = arith.constant 1.000000e+00 : f32
    %80 = vector.broadcast %cst_29 : f32 to vector<1x128xf32>
    %81 = arith.addf %80, %79 : vector<1x128xf32>
    %82 = arith.divf %80, %81 : vector<1x128xf32>
    %83 = vector.extract_strided_slice %74 {offsets = [0, 128], sizes = [1, 128], strides = [1, 1]} : vector<1x384xf32> to vector<1x128xf32>
    %84 = vector.extract_strided_slice %73 {offsets = [0, 128], sizes = [1, 128], strides = [1, 1]} : vector<1x384xf32> to vector<1x128xf32>
    %85 = arith.addf %83, %84 : vector<1x128xf32>
    %86 = arith.negf %85 : vector<1x128xf32>
    %87 = math.exp %86 : vector<1x128xf32>
    %cst_30 = arith.constant 1.000000e+00 : f32
    %88 = vector.broadcast %cst_30 : f32 to vector<1x128xf32>
    %89 = arith.addf %88, %87 : vector<1x128xf32>
    %90 = arith.divf %88, %89 : vector<1x128xf32>
    %91 = vector.extract_strided_slice %74 {offsets = [0, 256], sizes = [1, 128], strides = [1, 1]} : vector<1x384xf32> to vector<1x128xf32>
    %92 = vector.extract_strided_slice %73 {offsets = [0, 256], sizes = [1, 128], strides = [1, 1]} : vector<1x384xf32> to vector<1x128xf32>
    %93 = arith.mulf %82, %92 : vector<1x128xf32>
    %94 = arith.addf %91, %93 : vector<1x128xf32>
    %95 = math.tanh %94 : vector<1x128xf32>
    %cst_31 = arith.constant 1.000000e+00 : f32
    %96 = vector.broadcast %cst_31 : f32 to vector<1x128xf32>
    %97 = arith.subf %96, %90 : vector<1x128xf32>
    %98 = arith.mulf %97, %95 : vector<1x128xf32>
    %99 = arith.mulf %90, %68 : vector<1x128xf32>
    %100 = arith.addf %98, %99 : vector<1x128xf32>
    %101 = arith.truncf %69 : vector<1x128xf32> to vector<1x128xbf16>
    %c0_32 = arith.constant 0 : index
    %c0_33 = arith.constant 0 : index
    %102 = vector.load %arg7[%c0_32, %c0_33] : memref<128x384xbf16, #tpu.memory_space<vmem>>, vector<128x384xbf16>
    %cst_34 = arith.constant dense<0.000000e+00> : vector<1x384xf32>
    %103 = tpu.matmul %101, %102, %cst_34 {dimension_numbers = #tpu.dot_dimension_numbers<[1], [0], [0], [1], [0, 0, 1, 1], [], []>} : vector<1x128xbf16>, vector<128x384xbf16>, vector<1x384xf32> -> vector<1x384xf32>
    %104 = arith.addf %103, %67 : vector<1x384xf32>
    %105 = vector.extract_strided_slice %60 {offsets = [7, 0], sizes = [1, 384], strides = [1, 1]} : vector<8x384xf32> to vector<1x384xf32>
    %106 = vector.extract_strided_slice %105 {offsets = [0, 0], sizes = [1, 128], strides = [1, 1]} : vector<1x384xf32> to vector<1x128xf32>
    %107 = vector.extract_strided_slice %104 {offsets = [0, 0], sizes = [1, 128], strides = [1, 1]} : vector<1x384xf32> to vector<1x128xf32>
    %108 = arith.addf %106, %107 : vector<1x128xf32>
    %109 = arith.negf %108 : vector<1x128xf32>
    %110 = math.exp %109 : vector<1x128xf32>
    %cst_35 = arith.constant 1.000000e+00 : f32
    %111 = vector.broadcast %cst_35 : f32 to vector<1x128xf32>
    %112 = arith.addf %111, %110 : vector<1x128xf32>
    %113 = arith.divf %111, %112 : vector<1x128xf32>
    %114 = vector.extract_strided_slice %105 {offsets = [0, 128], sizes = [1, 128], strides = [1, 1]} : vector<1x384xf32> to vector<1x128xf32>
    %115 = vector.extract_strided_slice %104 {offsets = [0, 128], sizes = [1, 128], strides = [1, 1]} : vector<1x384xf32> to vector<1x128xf32>
    %116 = arith.addf %114, %115 : vector<1x128xf32>
    %117 = arith.negf %116 : vector<1x128xf32>
    %118 = math.exp %117 : vector<1x128xf32>
    %cst_36 = arith.constant 1.000000e+00 : f32
    %119 = vector.broadcast %cst_36 : f32 to vector<1x128xf32>
    %120 = arith.addf %119, %118 : vector<1x128xf32>
    %121 = arith.divf %119, %120 : vector<1x128xf32>
    %122 = vector.extract_strided_slice %105 {offsets = [0, 256], sizes = [1, 128], strides = [1, 1]} : vector<1x384xf32> to vector<1x128xf32>
    %123 = vector.extract_strided_slice %104 {offsets = [0, 256], sizes = [1, 128], strides = [1, 1]} : vector<1x384xf32> to vector<1x128xf32>
    %124 = arith.mulf %113, %123 : vector<1x128xf32>
    %125 = arith.addf %122, %124 : vector<1x128xf32>
    %126 = math.tanh %125 : vector<1x128xf32>
    %cst_37 = arith.constant 1.000000e+00 : f32
    %127 = vector.broadcast %cst_37 : f32 to vector<1x128xf32>
    %128 = arith.subf %127, %121 : vector<1x128xf32>
    %129 = arith.mulf %128, %126 : vector<1x128xf32>
    %130 = arith.mulf %121, %69 : vector<1x128xf32>
    %131 = arith.addf %129, %130 : vector<1x128xf32>
    %132 = arith.truncf %100 : vector<1x128xf32> to vector<1x128xbf16>
    %c0_38 = arith.constant 0 : index
    %c0_39 = arith.constant 0 : index
    %133 = vector.load %arg3[%c0_38, %c0_39] : memref<128x384xbf16, #tpu.memory_space<vmem>>, vector<128x384xbf16>
    %cst_40 = arith.constant dense<0.000000e+00> : vector<1x384xf32>
    %134 = tpu.matmul %132, %133, %cst_40 {dimension_numbers = #tpu.dot_dimension_numbers<[1], [0], [0], [1], [0, 0, 1, 1], [], []>} : vector<1x128xbf16>, vector<128x384xbf16>, vector<1x384xf32> -> vector<1x384xf32>
    %135 = arith.addf %134, %66 : vector<1x384xf32>
    %136 = vector.extract_strided_slice %55 {offsets = [1, 0], sizes = [1, 384], strides = [1, 1]} : vector<8x384xf32> to vector<1x384xf32>
    %137 = vector.extract_strided_slice %136 {offsets = [0, 0], sizes = [1, 128], strides = [1, 1]} : vector<1x384xf32> to vector<1x128xf32>
    %138 = vector.extract_strided_slice %135 {offsets = [0, 0], sizes = [1, 128], strides = [1, 1]} : vector<1x384xf32> to vector<1x128xf32>
    %139 = arith.addf %137, %138 : vector<1x128xf32>
    %140 = arith.negf %139 : vector<1x128xf32>
    %141 = math.exp %140 : vector<1x128xf32>
    %cst_41 = arith.constant 1.000000e+00 : f32
    %142 = vector.broadcast %cst_41 : f32 to vector<1x128xf32>
    %143 = arith.addf %142, %141 : vector<1x128xf32>
    %144 = arith.divf %142, %143 : vector<1x128xf32>
    %145 = vector.extract_strided_slice %136 {offsets = [0, 128], sizes = [1, 128], strides = [1, 1]} : vector<1x384xf32> to vector<1x128xf32>
    %146 = vector.extract_strided_slice %135 {offsets = [0, 128], sizes = [1, 128], strides = [1, 1]} : vector<1x384xf32> to vector<1x128xf32>
    %147 = arith.addf %145, %146 : vector<1x128xf32>
    %148 = arith.negf %147 : vector<1x128xf32>
    %149 = math.exp %148 : vector<1x128xf32>
    %cst_42 = arith.constant 1.000000e+00 : f32
    %150 = vector.broadcast %cst_42 : f32 to vector<1x128xf32>
    %151 = arith.addf %150, %149 : vector<1x128xf32>
    %152 = arith.divf %150, %151 : vector<1x128xf32>
    %153 = vector.extract_strided_slice %136 {offsets = [0, 256], sizes = [1, 128], strides = [1, 1]} : vector<1x384xf32> to vector<1x128xf32>
    %154 = vector.extract_strided_slice %135 {offsets = [0, 256], sizes = [1, 128], strides = [1, 1]} : vector<1x384xf32> to vector<1x128xf32>
    %155 = arith.mulf %144, %154 : vector<1x128xf32>
    %156 = arith.addf %153, %155 : vector<1x128xf32>
    %157 = math.tanh %156 : vector<1x128xf32>
    %cst_43 = arith.constant 1.000000e+00 : f32
    %158 = vector.broadcast %cst_43 : f32 to vector<1x128xf32>
    %159 = arith.subf %158, %152 : vector<1x128xf32>
    %160 = arith.mulf %159, %157 : vector<1x128xf32>
    %161 = arith.mulf %152, %100 : vector<1x128xf32>
    %162 = arith.addf %160, %161 : vector<1x128xf32>
    %163 = arith.truncf %131 : vector<1x128xf32> to vector<1x128xbf16>
    %c0_44 = arith.constant 0 : index
    %c0_45 = arith.constant 0 : index
    %164 = vector.load %arg7[%c0_44, %c0_45] : memref<128x384xbf16, #tpu.memory_space<vmem>>, vector<128x384xbf16>
    %cst_46 = arith.constant dense<0.000000e+00> : vector<1x384xf32>
    %165 = tpu.matmul %163, %164, %cst_46 {dimension_numbers = #tpu.dot_dimension_numbers<[1], [0], [0], [1], [0, 0, 1, 1], [], []>} : vector<1x128xbf16>, vector<128x384xbf16>, vector<1x384xf32> -> vector<1x384xf32>
    %166 = arith.addf %165, %67 : vector<1x384xf32>
    %167 = vector.extract_strided_slice %60 {offsets = [6, 0], sizes = [1, 384], strides = [1, 1]} : vector<8x384xf32> to vector<1x384xf32>
    %168 = vector.extract_strided_slice %167 {offsets = [0, 0], sizes = [1, 128], strides = [1, 1]} : vector<1x384xf32> to vector<1x128xf32>
    %169 = vector.extract_strided_slice %166 {offsets = [0, 0], sizes = [1, 128], strides = [1, 1]} : vector<1x384xf32> to vector<1x128xf32>
    %170 = arith.addf %168, %169 : vector<1x128xf32>
    %171 = arith.negf %170 : vector<1x128xf32>
    %172 = math.exp %171 : vector<1x128xf32>
    %cst_47 = arith.constant 1.000000e+00 : f32
    %173 = vector.broadcast %cst_47 : f32 to vector<1x128xf32>
    %174 = arith.addf %173, %172 : vector<1x128xf32>
    %175 = arith.divf %173, %174 : vector<1x128xf32>
    %176 = vector.extract_strided_slice %167 {offsets = [0, 128], sizes = [1, 128], strides = [1, 1]} : vector<1x384xf32> to vector<1x128xf32>
    %177 = vector.extract_strided_slice %166 {offsets = [0, 128], sizes = [1, 128], strides = [1, 1]} : vector<1x384xf32> to vector<1x128xf32>
    %178 = arith.addf %176, %177 : vector<1x128xf32>
    %179 = arith.negf %178 : vector<1x128xf32>
    %180 = math.exp %179 : vector<1x128xf32>
    %cst_48 = arith.constant 1.000000e+00 : f32
    %181 = vector.broadcast %cst_48 : f32 to vector<1x128xf32>
    %182 = arith.addf %181, %180 : vector<1x128xf32>
    %183 = arith.divf %181, %182 : vector<1x128xf32>
    %184 = vector.extract_strided_slice %167 {offsets = [0, 256], sizes = [1, 128], strides = [1, 1]} : vector<1x384xf32> to vector<1x128xf32>
    %185 = vector.extract_strided_slice %166 {offsets = [0, 256], sizes = [1, 128], strides = [1, 1]} : vector<1x384xf32> to vector<1x128xf32>
    %186 = arith.mulf %175, %185 : vector<1x128xf32>
    %187 = arith.addf %184, %186 : vector<1x128xf32>
    %188 = math.tanh %187 : vector<1x128xf32>
    %cst_49 = arith.constant 1.000000e+00 : f32
    %189 = vector.broadcast %cst_49 : f32 to vector<1x128xf32>
    %190 = arith.subf %189, %183 : vector<1x128xf32>
    %191 = arith.mulf %190, %188 : vector<1x128xf32>
    %192 = arith.mulf %183, %131 : vector<1x128xf32>
    %193 = arith.addf %191, %192 : vector<1x128xf32>
    %194 = arith.truncf %162 : vector<1x128xf32> to vector<1x128xbf16>
    %c0_50 = arith.constant 0 : index
    %c0_51 = arith.constant 0 : index
    %195 = vector.load %arg3[%c0_50, %c0_51] : memref<128x384xbf16, #tpu.memory_space<vmem>>, vector<128x384xbf16>
    %cst_52 = arith.constant dense<0.000000e+00> : vector<1x384xf32>
    %196 = tpu.matmul %194, %195, %cst_52 {dimension_numbers = #tpu.dot_dimension_numbers<[1], [0], [0], [1], [0, 0, 1, 1], [], []>} : vector<1x128xbf16>, vector<128x384xbf16>, vector<1x384xf32> -> vector<1x384xf32>
    %197 = arith.addf %196, %66 : vector<1x384xf32>
    %198 = vector.extract_strided_slice %55 {offsets = [2, 0], sizes = [1, 384], strides = [1, 1]} : vector<8x384xf32> to vector<1x384xf32>
    %199 = vector.extract_strided_slice %198 {offsets = [0, 0], sizes = [1, 128], strides = [1, 1]} : vector<1x384xf32> to vector<1x128xf32>
    %200 = vector.extract_strided_slice %197 {offsets = [0, 0], sizes = [1, 128], strides = [1, 1]} : vector<1x384xf32> to vector<1x128xf32>
    %201 = arith.addf %199, %200 : vector<1x128xf32>
    %202 = arith.negf %201 : vector<1x128xf32>
    %203 = math.exp %202 : vector<1x128xf32>
    %cst_53 = arith.constant 1.000000e+00 : f32
    %204 = vector.broadcast %cst_53 : f32 to vector<1x128xf32>
    %205 = arith.addf %204, %203 : vector<1x128xf32>
    %206 = arith.divf %204, %205 : vector<1x128xf32>
    %207 = vector.extract_strided_slice %198 {offsets = [0, 128], sizes = [1, 128], strides = [1, 1]} : vector<1x384xf32> to vector<1x128xf32>
    %208 = vector.extract_strided_slice %197 {offsets = [0, 128], sizes = [1, 128], strides = [1, 1]} : vector<1x384xf32> to vector<1x128xf32>
    %209 = arith.addf %207, %208 : vector<1x128xf32>
    %210 = arith.negf %209 : vector<1x128xf32>
    %211 = math.exp %210 : vector<1x128xf32>
    %cst_54 = arith.constant 1.000000e+00 : f32
    %212 = vector.broadcast %cst_54 : f32 to vector<1x128xf32>
    %213 = arith.addf %212, %211 : vector<1x128xf32>
    %214 = arith.divf %212, %213 : vector<1x128xf32>
    %215 = vector.extract_strided_slice %198 {offsets = [0, 256], sizes = [1, 128], strides = [1, 1]} : vector<1x384xf32> to vector<1x128xf32>
    %216 = vector.extract_strided_slice %197 {offsets = [0, 256], sizes = [1, 128], strides = [1, 1]} : vector<1x384xf32> to vector<1x128xf32>
    %217 = arith.mulf %206, %216 : vector<1x128xf32>
    %218 = arith.addf %215, %217 : vector<1x128xf32>
    %219 = math.tanh %218 : vector<1x128xf32>
    %cst_55 = arith.constant 1.000000e+00 : f32
    %220 = vector.broadcast %cst_55 : f32 to vector<1x128xf32>
    %221 = arith.subf %220, %214 : vector<1x128xf32>
    %222 = arith.mulf %221, %219 : vector<1x128xf32>
    %223 = arith.mulf %214, %162 : vector<1x128xf32>
    %224 = arith.addf %222, %223 : vector<1x128xf32>
    %225 = arith.truncf %193 : vector<1x128xf32> to vector<1x128xbf16>
    %c0_56 = arith.constant 0 : index
    %c0_57 = arith.constant 0 : index
    %226 = vector.load %arg7[%c0_56, %c0_57] : memref<128x384xbf16, #tpu.memory_space<vmem>>, vector<128x384xbf16>
    %cst_58 = arith.constant dense<0.000000e+00> : vector<1x384xf32>
    %227 = tpu.matmul %225, %226, %cst_58 {dimension_numbers = #tpu.dot_dimension_numbers<[1], [0], [0], [1], [0, 0, 1, 1], [], []>} : vector<1x128xbf16>, vector<128x384xbf16>, vector<1x384xf32> -> vector<1x384xf32>
    %228 = arith.addf %227, %67 : vector<1x384xf32>
    %229 = vector.extract_strided_slice %60 {offsets = [5, 0], sizes = [1, 384], strides = [1, 1]} : vector<8x384xf32> to vector<1x384xf32>
    %230 = vector.extract_strided_slice %229 {offsets = [0, 0], sizes = [1, 128], strides = [1, 1]} : vector<1x384xf32> to vector<1x128xf32>
    %231 = vector.extract_strided_slice %228 {offsets = [0, 0], sizes = [1, 128], strides = [1, 1]} : vector<1x384xf32> to vector<1x128xf32>
    %232 = arith.addf %230, %231 : vector<1x128xf32>
    %233 = arith.negf %232 : vector<1x128xf32>
    %234 = math.exp %233 : vector<1x128xf32>
    %cst_59 = arith.constant 1.000000e+00 : f32
    %235 = vector.broadcast %cst_59 : f32 to vector<1x128xf32>
    %236 = arith.addf %235, %234 : vector<1x128xf32>
    %237 = arith.divf %235, %236 : vector<1x128xf32>
    %238 = vector.extract_strided_slice %229 {offsets = [0, 128], sizes = [1, 128], strides = [1, 1]} : vector<1x384xf32> to vector<1x128xf32>
    %239 = vector.extract_strided_slice %228 {offsets = [0, 128], sizes = [1, 128], strides = [1, 1]} : vector<1x384xf32> to vector<1x128xf32>
    %240 = arith.addf %238, %239 : vector<1x128xf32>
    %241 = arith.negf %240 : vector<1x128xf32>
    %242 = math.exp %241 : vector<1x128xf32>
    %cst_60 = arith.constant 1.000000e+00 : f32
    %243 = vector.broadcast %cst_60 : f32 to vector<1x128xf32>
    %244 = arith.addf %243, %242 : vector<1x128xf32>
    %245 = arith.divf %243, %244 : vector<1x128xf32>
    %246 = vector.extract_strided_slice %229 {offsets = [0, 256], sizes = [1, 128], strides = [1, 1]} : vector<1x384xf32> to vector<1x128xf32>
    %247 = vector.extract_strided_slice %228 {offsets = [0, 256], sizes = [1, 128], strides = [1, 1]} : vector<1x384xf32> to vector<1x128xf32>
    %248 = arith.mulf %237, %247 : vector<1x128xf32>
    %249 = arith.addf %246, %248 : vector<1x128xf32>
    %250 = math.tanh %249 : vector<1x128xf32>
    %cst_61 = arith.constant 1.000000e+00 : f32
    %251 = vector.broadcast %cst_61 : f32 to vector<1x128xf32>
    %252 = arith.subf %251, %245 : vector<1x128xf32>
    %253 = arith.mulf %252, %250 : vector<1x128xf32>
    %254 = arith.mulf %245, %193 : vector<1x128xf32>
    %255 = arith.addf %253, %254 : vector<1x128xf32>
    %256 = arith.truncf %224 : vector<1x128xf32> to vector<1x128xbf16>
    %c0_62 = arith.constant 0 : index
    %c0_63 = arith.constant 0 : index
    %257 = vector.load %arg3[%c0_62, %c0_63] : memref<128x384xbf16, #tpu.memory_space<vmem>>, vector<128x384xbf16>
    %cst_64 = arith.constant dense<0.000000e+00> : vector<1x384xf32>
    %258 = tpu.matmul %256, %257, %cst_64 {dimension_numbers = #tpu.dot_dimension_numbers<[1], [0], [0], [1], [0, 0, 1, 1], [], []>} : vector<1x128xbf16>, vector<128x384xbf16>, vector<1x384xf32> -> vector<1x384xf32>
    %259 = arith.addf %258, %66 : vector<1x384xf32>
    %260 = vector.extract_strided_slice %55 {offsets = [3, 0], sizes = [1, 384], strides = [1, 1]} : vector<8x384xf32> to vector<1x384xf32>
    %261 = vector.extract_strided_slice %260 {offsets = [0, 0], sizes = [1, 128], strides = [1, 1]} : vector<1x384xf32> to vector<1x128xf32>
    %262 = vector.extract_strided_slice %259 {offsets = [0, 0], sizes = [1, 128], strides = [1, 1]} : vector<1x384xf32> to vector<1x128xf32>
    %263 = arith.addf %261, %262 : vector<1x128xf32>
    %264 = arith.negf %263 : vector<1x128xf32>
    %265 = math.exp %264 : vector<1x128xf32>
    %cst_65 = arith.constant 1.000000e+00 : f32
    %266 = vector.broadcast %cst_65 : f32 to vector<1x128xf32>
    %267 = arith.addf %266, %265 : vector<1x128xf32>
    %268 = arith.divf %266, %267 : vector<1x128xf32>
    %269 = vector.extract_strided_slice %260 {offsets = [0, 128], sizes = [1, 128], strides = [1, 1]} : vector<1x384xf32> to vector<1x128xf32>
    %270 = vector.extract_strided_slice %259 {offsets = [0, 128], sizes = [1, 128], strides = [1, 1]} : vector<1x384xf32> to vector<1x128xf32>
    %271 = arith.addf %269, %270 : vector<1x128xf32>
    %272 = arith.negf %271 : vector<1x128xf32>
    %273 = math.exp %272 : vector<1x128xf32>
    %cst_66 = arith.constant 1.000000e+00 : f32
    %274 = vector.broadcast %cst_66 : f32 to vector<1x128xf32>
    %275 = arith.addf %274, %273 : vector<1x128xf32>
    %276 = arith.divf %274, %275 : vector<1x128xf32>
    %277 = vector.extract_strided_slice %260 {offsets = [0, 256], sizes = [1, 128], strides = [1, 1]} : vector<1x384xf32> to vector<1x128xf32>
    %278 = vector.extract_strided_slice %259 {offsets = [0, 256], sizes = [1, 128], strides = [1, 1]} : vector<1x384xf32> to vector<1x128xf32>
    %279 = arith.mulf %268, %278 : vector<1x128xf32>
    %280 = arith.addf %277, %279 : vector<1x128xf32>
    %281 = math.tanh %280 : vector<1x128xf32>
    %cst_67 = arith.constant 1.000000e+00 : f32
    %282 = vector.broadcast %cst_67 : f32 to vector<1x128xf32>
    %283 = arith.subf %282, %276 : vector<1x128xf32>
    %284 = arith.mulf %283, %281 : vector<1x128xf32>
    %285 = arith.mulf %276, %224 : vector<1x128xf32>
    %286 = arith.addf %284, %285 : vector<1x128xf32>
    %287 = arith.truncf %255 : vector<1x128xf32> to vector<1x128xbf16>
    %c0_68 = arith.constant 0 : index
    %c0_69 = arith.constant 0 : index
    %288 = vector.load %arg7[%c0_68, %c0_69] : memref<128x384xbf16, #tpu.memory_space<vmem>>, vector<128x384xbf16>
    %cst_70 = arith.constant dense<0.000000e+00> : vector<1x384xf32>
    %289 = tpu.matmul %287, %288, %cst_70 {dimension_numbers = #tpu.dot_dimension_numbers<[1], [0], [0], [1], [0, 0, 1, 1], [], []>} : vector<1x128xbf16>, vector<128x384xbf16>, vector<1x384xf32> -> vector<1x384xf32>
    %290 = arith.addf %289, %67 : vector<1x384xf32>
    %291 = vector.extract_strided_slice %60 {offsets = [4, 0], sizes = [1, 384], strides = [1, 1]} : vector<8x384xf32> to vector<1x384xf32>
    %292 = vector.extract_strided_slice %291 {offsets = [0, 0], sizes = [1, 128], strides = [1, 1]} : vector<1x384xf32> to vector<1x128xf32>
    %293 = vector.extract_strided_slice %290 {offsets = [0, 0], sizes = [1, 128], strides = [1, 1]} : vector<1x384xf32> to vector<1x128xf32>
    %294 = arith.addf %292, %293 : vector<1x128xf32>
    %295 = arith.negf %294 : vector<1x128xf32>
    %296 = math.exp %295 : vector<1x128xf32>
    %cst_71 = arith.constant 1.000000e+00 : f32
    %297 = vector.broadcast %cst_71 : f32 to vector<1x128xf32>
    %298 = arith.addf %297, %296 : vector<1x128xf32>
    %299 = arith.divf %297, %298 : vector<1x128xf32>
    %300 = vector.extract_strided_slice %291 {offsets = [0, 128], sizes = [1, 128], strides = [1, 1]} : vector<1x384xf32> to vector<1x128xf32>
    %301 = vector.extract_strided_slice %290 {offsets = [0, 128], sizes = [1, 128], strides = [1, 1]} : vector<1x384xf32> to vector<1x128xf32>
    %302 = arith.addf %300, %301 : vector<1x128xf32>
    %303 = arith.negf %302 : vector<1x128xf32>
    %304 = math.exp %303 : vector<1x128xf32>
    %cst_72 = arith.constant 1.000000e+00 : f32
    %305 = vector.broadcast %cst_72 : f32 to vector<1x128xf32>
    %306 = arith.addf %305, %304 : vector<1x128xf32>
    %307 = arith.divf %305, %306 : vector<1x128xf32>
    %308 = vector.extract_strided_slice %291 {offsets = [0, 256], sizes = [1, 128], strides = [1, 1]} : vector<1x384xf32> to vector<1x128xf32>
    %309 = vector.extract_strided_slice %290 {offsets = [0, 256], sizes = [1, 128], strides = [1, 1]} : vector<1x384xf32> to vector<1x128xf32>
    %310 = arith.mulf %299, %309 : vector<1x128xf32>
    %311 = arith.addf %308, %310 : vector<1x128xf32>
    %312 = math.tanh %311 : vector<1x128xf32>
    %cst_73 = arith.constant 1.000000e+00 : f32
    %313 = vector.broadcast %cst_73 : f32 to vector<1x128xf32>
    %314 = arith.subf %313, %307 : vector<1x128xf32>
    %315 = arith.mulf %314, %312 : vector<1x128xf32>
    %316 = arith.mulf %307, %255 : vector<1x128xf32>
    %317 = arith.addf %315, %316 : vector<1x128xf32>
    %318 = arith.truncf %286 : vector<1x128xf32> to vector<1x128xbf16>
    %c0_74 = arith.constant 0 : index
    %c0_75 = arith.constant 0 : index
    %319 = vector.load %arg3[%c0_74, %c0_75] : memref<128x384xbf16, #tpu.memory_space<vmem>>, vector<128x384xbf16>
    %cst_76 = arith.constant dense<0.000000e+00> : vector<1x384xf32>
    %320 = tpu.matmul %318, %319, %cst_76 {dimension_numbers = #tpu.dot_dimension_numbers<[1], [0], [0], [1], [0, 0, 1, 1], [], []>} : vector<1x128xbf16>, vector<128x384xbf16>, vector<1x384xf32> -> vector<1x384xf32>
    %321 = arith.addf %320, %66 : vector<1x384xf32>
    %322 = vector.extract_strided_slice %55 {offsets = [4, 0], sizes = [1, 384], strides = [1, 1]} : vector<8x384xf32> to vector<1x384xf32>
    %323 = vector.extract_strided_slice %322 {offsets = [0, 0], sizes = [1, 128], strides = [1, 1]} : vector<1x384xf32> to vector<1x128xf32>
    %324 = vector.extract_strided_slice %321 {offsets = [0, 0], sizes = [1, 128], strides = [1, 1]} : vector<1x384xf32> to vector<1x128xf32>
    %325 = arith.addf %323, %324 : vector<1x128xf32>
    %326 = arith.negf %325 : vector<1x128xf32>
    %327 = math.exp %326 : vector<1x128xf32>
    %cst_77 = arith.constant 1.000000e+00 : f32
    %328 = vector.broadcast %cst_77 : f32 to vector<1x128xf32>
    %329 = arith.addf %328, %327 : vector<1x128xf32>
    %330 = arith.divf %328, %329 : vector<1x128xf32>
    %331 = vector.extract_strided_slice %322 {offsets = [0, 128], sizes = [1, 128], strides = [1, 1]} : vector<1x384xf32> to vector<1x128xf32>
    %332 = vector.extract_strided_slice %321 {offsets = [0, 128], sizes = [1, 128], strides = [1, 1]} : vector<1x384xf32> to vector<1x128xf32>
    %333 = arith.addf %331, %332 : vector<1x128xf32>
    %334 = arith.negf %333 : vector<1x128xf32>
    %335 = math.exp %334 : vector<1x128xf32>
    %cst_78 = arith.constant 1.000000e+00 : f32
    %336 = vector.broadcast %cst_78 : f32 to vector<1x128xf32>
    %337 = arith.addf %336, %335 : vector<1x128xf32>
    %338 = arith.divf %336, %337 : vector<1x128xf32>
    %339 = vector.extract_strided_slice %322 {offsets = [0, 256], sizes = [1, 128], strides = [1, 1]} : vector<1x384xf32> to vector<1x128xf32>
    %340 = vector.extract_strided_slice %321 {offsets = [0, 256], sizes = [1, 128], strides = [1, 1]} : vector<1x384xf32> to vector<1x128xf32>
    %341 = arith.mulf %330, %340 : vector<1x128xf32>
    %342 = arith.addf %339, %341 : vector<1x128xf32>
    %343 = math.tanh %342 : vector<1x128xf32>
    %cst_79 = arith.constant 1.000000e+00 : f32
    %344 = vector.broadcast %cst_79 : f32 to vector<1x128xf32>
    %345 = arith.subf %344, %338 : vector<1x128xf32>
    %346 = arith.mulf %345, %343 : vector<1x128xf32>
    %347 = arith.mulf %338, %286 : vector<1x128xf32>
    %348 = arith.addf %346, %347 : vector<1x128xf32>
    %349 = arith.truncf %317 : vector<1x128xf32> to vector<1x128xbf16>
    %c0_80 = arith.constant 0 : index
    %c0_81 = arith.constant 0 : index
    %350 = vector.load %arg7[%c0_80, %c0_81] : memref<128x384xbf16, #tpu.memory_space<vmem>>, vector<128x384xbf16>
    %cst_82 = arith.constant dense<0.000000e+00> : vector<1x384xf32>
    %351 = tpu.matmul %349, %350, %cst_82 {dimension_numbers = #tpu.dot_dimension_numbers<[1], [0], [0], [1], [0, 0, 1, 1], [], []>} : vector<1x128xbf16>, vector<128x384xbf16>, vector<1x384xf32> -> vector<1x384xf32>
    %352 = arith.addf %351, %67 : vector<1x384xf32>
    %353 = vector.extract_strided_slice %60 {offsets = [3, 0], sizes = [1, 384], strides = [1, 1]} : vector<8x384xf32> to vector<1x384xf32>
    %354 = vector.extract_strided_slice %353 {offsets = [0, 0], sizes = [1, 128], strides = [1, 1]} : vector<1x384xf32> to vector<1x128xf32>
    %355 = vector.extract_strided_slice %352 {offsets = [0, 0], sizes = [1, 128], strides = [1, 1]} : vector<1x384xf32> to vector<1x128xf32>
    %356 = arith.addf %354, %355 : vector<1x128xf32>
    %357 = arith.negf %356 : vector<1x128xf32>
    %358 = math.exp %357 : vector<1x128xf32>
    %cst_83 = arith.constant 1.000000e+00 : f32
    %359 = vector.broadcast %cst_83 : f32 to vector<1x128xf32>
    %360 = arith.addf %359, %358 : vector<1x128xf32>
    %361 = arith.divf %359, %360 : vector<1x128xf32>
    %362 = vector.extract_strided_slice %353 {offsets = [0, 128], sizes = [1, 128], strides = [1, 1]} : vector<1x384xf32> to vector<1x128xf32>
    %363 = vector.extract_strided_slice %352 {offsets = [0, 128], sizes = [1, 128], strides = [1, 1]} : vector<1x384xf32> to vector<1x128xf32>
    %364 = arith.addf %362, %363 : vector<1x128xf32>
    %365 = arith.negf %364 : vector<1x128xf32>
    %366 = math.exp %365 : vector<1x128xf32>
    %cst_84 = arith.constant 1.000000e+00 : f32
    %367 = vector.broadcast %cst_84 : f32 to vector<1x128xf32>
    %368 = arith.addf %367, %366 : vector<1x128xf32>
    %369 = arith.divf %367, %368 : vector<1x128xf32>
    %370 = vector.extract_strided_slice %353 {offsets = [0, 256], sizes = [1, 128], strides = [1, 1]} : vector<1x384xf32> to vector<1x128xf32>
    %371 = vector.extract_strided_slice %352 {offsets = [0, 256], sizes = [1, 128], strides = [1, 1]} : vector<1x384xf32> to vector<1x128xf32>
    %372 = arith.mulf %361, %371 : vector<1x128xf32>
    %373 = arith.addf %370, %372 : vector<1x128xf32>
    %374 = math.tanh %373 : vector<1x128xf32>
    %cst_85 = arith.constant 1.000000e+00 : f32
    %375 = vector.broadcast %cst_85 : f32 to vector<1x128xf32>
    %376 = arith.subf %375, %369 : vector<1x128xf32>
    %377 = arith.mulf %376, %374 : vector<1x128xf32>
    %378 = arith.mulf %369, %317 : vector<1x128xf32>
    %379 = arith.addf %377, %378 : vector<1x128xf32>
    %380 = arith.truncf %348 : vector<1x128xf32> to vector<1x128xbf16>
    %c0_86 = arith.constant 0 : index
    %c0_87 = arith.constant 0 : index
    %381 = vector.load %arg3[%c0_86, %c0_87] : memref<128x384xbf16, #tpu.memory_space<vmem>>, vector<128x384xbf16>
    %cst_88 = arith.constant dense<0.000000e+00> : vector<1x384xf32>
    %382 = tpu.matmul %380, %381, %cst_88 {dimension_numbers = #tpu.dot_dimension_numbers<[1], [0], [0], [1], [0, 0, 1, 1], [], []>} : vector<1x128xbf16>, vector<128x384xbf16>, vector<1x384xf32> -> vector<1x384xf32>
    %383 = arith.addf %382, %66 : vector<1x384xf32>
    %384 = vector.extract_strided_slice %55 {offsets = [5, 0], sizes = [1, 384], strides = [1, 1]} : vector<8x384xf32> to vector<1x384xf32>
    %385 = vector.extract_strided_slice %384 {offsets = [0, 0], sizes = [1, 128], strides = [1, 1]} : vector<1x384xf32> to vector<1x128xf32>
    %386 = vector.extract_strided_slice %383 {offsets = [0, 0], sizes = [1, 128], strides = [1, 1]} : vector<1x384xf32> to vector<1x128xf32>
    %387 = arith.addf %385, %386 : vector<1x128xf32>
    %388 = arith.negf %387 : vector<1x128xf32>
    %389 = math.exp %388 : vector<1x128xf32>
    %cst_89 = arith.constant 1.000000e+00 : f32
    %390 = vector.broadcast %cst_89 : f32 to vector<1x128xf32>
    %391 = arith.addf %390, %389 : vector<1x128xf32>
    %392 = arith.divf %390, %391 : vector<1x128xf32>
    %393 = vector.extract_strided_slice %384 {offsets = [0, 128], sizes = [1, 128], strides = [1, 1]} : vector<1x384xf32> to vector<1x128xf32>
    %394 = vector.extract_strided_slice %383 {offsets = [0, 128], sizes = [1, 128], strides = [1, 1]} : vector<1x384xf32> to vector<1x128xf32>
    %395 = arith.addf %393, %394 : vector<1x128xf32>
    %396 = arith.negf %395 : vector<1x128xf32>
    %397 = math.exp %396 : vector<1x128xf32>
    %cst_90 = arith.constant 1.000000e+00 : f32
    %398 = vector.broadcast %cst_90 : f32 to vector<1x128xf32>
    %399 = arith.addf %398, %397 : vector<1x128xf32>
    %400 = arith.divf %398, %399 : vector<1x128xf32>
    %401 = vector.extract_strided_slice %384 {offsets = [0, 256], sizes = [1, 128], strides = [1, 1]} : vector<1x384xf32> to vector<1x128xf32>
    %402 = vector.extract_strided_slice %383 {offsets = [0, 256], sizes = [1, 128], strides = [1, 1]} : vector<1x384xf32> to vector<1x128xf32>
    %403 = arith.mulf %392, %402 : vector<1x128xf32>
    %404 = arith.addf %401, %403 : vector<1x128xf32>
    %405 = math.tanh %404 : vector<1x128xf32>
    %cst_91 = arith.constant 1.000000e+00 : f32
    %406 = vector.broadcast %cst_91 : f32 to vector<1x128xf32>
    %407 = arith.subf %406, %400 : vector<1x128xf32>
    %408 = arith.mulf %407, %405 : vector<1x128xf32>
    %409 = arith.mulf %400, %348 : vector<1x128xf32>
    %410 = arith.addf %408, %409 : vector<1x128xf32>
    %411 = arith.truncf %379 : vector<1x128xf32> to vector<1x128xbf16>
    %c0_92 = arith.constant 0 : index
    %c0_93 = arith.constant 0 : index
    %412 = vector.load %arg7[%c0_92, %c0_93] : memref<128x384xbf16, #tpu.memory_space<vmem>>, vector<128x384xbf16>
    %cst_94 = arith.constant dense<0.000000e+00> : vector<1x384xf32>
    %413 = tpu.matmul %411, %412, %cst_94 {dimension_numbers = #tpu.dot_dimension_numbers<[1], [0], [0], [1], [0, 0, 1, 1], [], []>} : vector<1x128xbf16>, vector<128x384xbf16>, vector<1x384xf32> -> vector<1x384xf32>
    %414 = arith.addf %413, %67 : vector<1x384xf32>
    %415 = vector.extract_strided_slice %60 {offsets = [2, 0], sizes = [1, 384], strides = [1, 1]} : vector<8x384xf32> to vector<1x384xf32>
    %416 = vector.extract_strided_slice %415 {offsets = [0, 0], sizes = [1, 128], strides = [1, 1]} : vector<1x384xf32> to vector<1x128xf32>
    %417 = vector.extract_strided_slice %414 {offsets = [0, 0], sizes = [1, 128], strides = [1, 1]} : vector<1x384xf32> to vector<1x128xf32>
    %418 = arith.addf %416, %417 : vector<1x128xf32>
    %419 = arith.negf %418 : vector<1x128xf32>
    %420 = math.exp %419 : vector<1x128xf32>
    %cst_95 = arith.constant 1.000000e+00 : f32
    %421 = vector.broadcast %cst_95 : f32 to vector<1x128xf32>
    %422 = arith.addf %421, %420 : vector<1x128xf32>
    %423 = arith.divf %421, %422 : vector<1x128xf32>
    %424 = vector.extract_strided_slice %415 {offsets = [0, 128], sizes = [1, 128], strides = [1, 1]} : vector<1x384xf32> to vector<1x128xf32>
    %425 = vector.extract_strided_slice %414 {offsets = [0, 128], sizes = [1, 128], strides = [1, 1]} : vector<1x384xf32> to vector<1x128xf32>
    %426 = arith.addf %424, %425 : vector<1x128xf32>
    %427 = arith.negf %426 : vector<1x128xf32>
    %428 = math.exp %427 : vector<1x128xf32>
    %cst_96 = arith.constant 1.000000e+00 : f32
    %429 = vector.broadcast %cst_96 : f32 to vector<1x128xf32>
    %430 = arith.addf %429, %428 : vector<1x128xf32>
    %431 = arith.divf %429, %430 : vector<1x128xf32>
    %432 = vector.extract_strided_slice %415 {offsets = [0, 256], sizes = [1, 128], strides = [1, 1]} : vector<1x384xf32> to vector<1x128xf32>
    %433 = vector.extract_strided_slice %414 {offsets = [0, 256], sizes = [1, 128], strides = [1, 1]} : vector<1x384xf32> to vector<1x128xf32>
    %434 = arith.mulf %423, %433 : vector<1x128xf32>
    %435 = arith.addf %432, %434 : vector<1x128xf32>
    %436 = math.tanh %435 : vector<1x128xf32>
    %cst_97 = arith.constant 1.000000e+00 : f32
    %437 = vector.broadcast %cst_97 : f32 to vector<1x128xf32>
    %438 = arith.subf %437, %431 : vector<1x128xf32>
    %439 = arith.mulf %438, %436 : vector<1x128xf32>
    %440 = arith.mulf %431, %379 : vector<1x128xf32>
    %441 = arith.addf %439, %440 : vector<1x128xf32>
    %442 = arith.truncf %410 : vector<1x128xf32> to vector<1x128xbf16>
    %c0_98 = arith.constant 0 : index
    %c0_99 = arith.constant 0 : index
    %443 = vector.load %arg3[%c0_98, %c0_99] : memref<128x384xbf16, #tpu.memory_space<vmem>>, vector<128x384xbf16>
    %cst_100 = arith.constant dense<0.000000e+00> : vector<1x384xf32>
    %444 = tpu.matmul %442, %443, %cst_100 {dimension_numbers = #tpu.dot_dimension_numbers<[1], [0], [0], [1], [0, 0, 1, 1], [], []>} : vector<1x128xbf16>, vector<128x384xbf16>, vector<1x384xf32> -> vector<1x384xf32>
    %445 = arith.addf %444, %66 : vector<1x384xf32>
    %446 = vector.extract_strided_slice %55 {offsets = [6, 0], sizes = [1, 384], strides = [1, 1]} : vector<8x384xf32> to vector<1x384xf32>
    %447 = vector.extract_strided_slice %446 {offsets = [0, 0], sizes = [1, 128], strides = [1, 1]} : vector<1x384xf32> to vector<1x128xf32>
    %448 = vector.extract_strided_slice %445 {offsets = [0, 0], sizes = [1, 128], strides = [1, 1]} : vector<1x384xf32> to vector<1x128xf32>
    %449 = arith.addf %447, %448 : vector<1x128xf32>
    %450 = arith.negf %449 : vector<1x128xf32>
    %451 = math.exp %450 : vector<1x128xf32>
    %cst_101 = arith.constant 1.000000e+00 : f32
    %452 = vector.broadcast %cst_101 : f32 to vector<1x128xf32>
    %453 = arith.addf %452, %451 : vector<1x128xf32>
    %454 = arith.divf %452, %453 : vector<1x128xf32>
    %455 = vector.extract_strided_slice %446 {offsets = [0, 128], sizes = [1, 128], strides = [1, 1]} : vector<1x384xf32> to vector<1x128xf32>
    %456 = vector.extract_strided_slice %445 {offsets = [0, 128], sizes = [1, 128], strides = [1, 1]} : vector<1x384xf32> to vector<1x128xf32>
    %457 = arith.addf %455, %456 : vector<1x128xf32>
    %458 = arith.negf %457 : vector<1x128xf32>
    %459 = math.exp %458 : vector<1x128xf32>
    %cst_102 = arith.constant 1.000000e+00 : f32
    %460 = vector.broadcast %cst_102 : f32 to vector<1x128xf32>
    %461 = arith.addf %460, %459 : vector<1x128xf32>
    %462 = arith.divf %460, %461 : vector<1x128xf32>
    %463 = vector.extract_strided_slice %446 {offsets = [0, 256], sizes = [1, 128], strides = [1, 1]} : vector<1x384xf32> to vector<1x128xf32>
    %464 = vector.extract_strided_slice %445 {offsets = [0, 256], sizes = [1, 128], strides = [1, 1]} : vector<1x384xf32> to vector<1x128xf32>
    %465 = arith.mulf %454, %464 : vector<1x128xf32>
    %466 = arith.addf %463, %465 : vector<1x128xf32>
    %467 = math.tanh %466 : vector<1x128xf32>
    %cst_103 = arith.constant 1.000000e+00 : f32
    %468 = vector.broadcast %cst_103 : f32 to vector<1x128xf32>
    %469 = arith.subf %468, %462 : vector<1x128xf32>
    %470 = arith.mulf %469, %467 : vector<1x128xf32>
    %471 = arith.mulf %462, %410 : vector<1x128xf32>
    %472 = arith.addf %470, %471 : vector<1x128xf32>
    %473 = arith.truncf %441 : vector<1x128xf32> to vector<1x128xbf16>
    %c0_104 = arith.constant 0 : index
    %c0_105 = arith.constant 0 : index
    %474 = vector.load %arg7[%c0_104, %c0_105] : memref<128x384xbf16, #tpu.memory_space<vmem>>, vector<128x384xbf16>
    %cst_106 = arith.constant dense<0.000000e+00> : vector<1x384xf32>
    %475 = tpu.matmul %473, %474, %cst_106 {dimension_numbers = #tpu.dot_dimension_numbers<[1], [0], [0], [1], [0, 0, 1, 1], [], []>} : vector<1x128xbf16>, vector<128x384xbf16>, vector<1x384xf32> -> vector<1x384xf32>
    %476 = arith.addf %475, %67 : vector<1x384xf32>
    %477 = vector.extract_strided_slice %60 {offsets = [1, 0], sizes = [1, 384], strides = [1, 1]} : vector<8x384xf32> to vector<1x384xf32>
    %478 = vector.extract_strided_slice %477 {offsets = [0, 0], sizes = [1, 128], strides = [1, 1]} : vector<1x384xf32> to vector<1x128xf32>
    %479 = vector.extract_strided_slice %476 {offsets = [0, 0], sizes = [1, 128], strides = [1, 1]} : vector<1x384xf32> to vector<1x128xf32>
    %480 = arith.addf %478, %479 : vector<1x128xf32>
    %481 = arith.negf %480 : vector<1x128xf32>
    %482 = math.exp %481 : vector<1x128xf32>
    %cst_107 = arith.constant 1.000000e+00 : f32
    %483 = vector.broadcast %cst_107 : f32 to vector<1x128xf32>
    %484 = arith.addf %483, %482 : vector<1x128xf32>
    %485 = arith.divf %483, %484 : vector<1x128xf32>
    %486 = vector.extract_strided_slice %477 {offsets = [0, 128], sizes = [1, 128], strides = [1, 1]} : vector<1x384xf32> to vector<1x128xf32>
    %487 = vector.extract_strided_slice %476 {offsets = [0, 128], sizes = [1, 128], strides = [1, 1]} : vector<1x384xf32> to vector<1x128xf32>
    %488 = arith.addf %486, %487 : vector<1x128xf32>
    %489 = arith.negf %488 : vector<1x128xf32>
    %490 = math.exp %489 : vector<1x128xf32>
    %cst_108 = arith.constant 1.000000e+00 : f32
    %491 = vector.broadcast %cst_108 : f32 to vector<1x128xf32>
    %492 = arith.addf %491, %490 : vector<1x128xf32>
    %493 = arith.divf %491, %492 : vector<1x128xf32>
    %494 = vector.extract_strided_slice %477 {offsets = [0, 256], sizes = [1, 128], strides = [1, 1]} : vector<1x384xf32> to vector<1x128xf32>
    %495 = vector.extract_strided_slice %476 {offsets = [0, 256], sizes = [1, 128], strides = [1, 1]} : vector<1x384xf32> to vector<1x128xf32>
    %496 = arith.mulf %485, %495 : vector<1x128xf32>
    %497 = arith.addf %494, %496 : vector<1x128xf32>
    %498 = math.tanh %497 : vector<1x128xf32>
    %cst_109 = arith.constant 1.000000e+00 : f32
    %499 = vector.broadcast %cst_109 : f32 to vector<1x128xf32>
    %500 = arith.subf %499, %493 : vector<1x128xf32>
    %501 = arith.mulf %500, %498 : vector<1x128xf32>
    %502 = arith.mulf %493, %441 : vector<1x128xf32>
    %503 = arith.addf %501, %502 : vector<1x128xf32>
    %504 = arith.truncf %472 : vector<1x128xf32> to vector<1x128xbf16>
    %c0_110 = arith.constant 0 : index
    %c0_111 = arith.constant 0 : index
    %505 = vector.load %arg3[%c0_110, %c0_111] : memref<128x384xbf16, #tpu.memory_space<vmem>>, vector<128x384xbf16>
    %cst_112 = arith.constant dense<0.000000e+00> : vector<1x384xf32>
    %506 = tpu.matmul %504, %505, %cst_112 {dimension_numbers = #tpu.dot_dimension_numbers<[1], [0], [0], [1], [0, 0, 1, 1], [], []>} : vector<1x128xbf16>, vector<128x384xbf16>, vector<1x384xf32> -> vector<1x384xf32>
    %507 = arith.addf %506, %66 : vector<1x384xf32>
    %508 = vector.extract_strided_slice %55 {offsets = [7, 0], sizes = [1, 384], strides = [1, 1]} : vector<8x384xf32> to vector<1x384xf32>
    %509 = vector.extract_strided_slice %508 {offsets = [0, 0], sizes = [1, 128], strides = [1, 1]} : vector<1x384xf32> to vector<1x128xf32>
    %510 = vector.extract_strided_slice %507 {offsets = [0, 0], sizes = [1, 128], strides = [1, 1]} : vector<1x384xf32> to vector<1x128xf32>
    %511 = arith.addf %509, %510 : vector<1x128xf32>
    %512 = arith.negf %511 : vector<1x128xf32>
    %513 = math.exp %512 : vector<1x128xf32>
    %cst_113 = arith.constant 1.000000e+00 : f32
    %514 = vector.broadcast %cst_113 : f32 to vector<1x128xf32>
    %515 = arith.addf %514, %513 : vector<1x128xf32>
    %516 = arith.divf %514, %515 : vector<1x128xf32>
    %517 = vector.extract_strided_slice %508 {offsets = [0, 128], sizes = [1, 128], strides = [1, 1]} : vector<1x384xf32> to vector<1x128xf32>
    %518 = vector.extract_strided_slice %507 {offsets = [0, 128], sizes = [1, 128], strides = [1, 1]} : vector<1x384xf32> to vector<1x128xf32>
    %519 = arith.addf %517, %518 : vector<1x128xf32>
    %520 = arith.negf %519 : vector<1x128xf32>
    %521 = math.exp %520 : vector<1x128xf32>
    %cst_114 = arith.constant 1.000000e+00 : f32
    %522 = vector.broadcast %cst_114 : f32 to vector<1x128xf32>
    %523 = arith.addf %522, %521 : vector<1x128xf32>
    %524 = arith.divf %522, %523 : vector<1x128xf32>
    %525 = vector.extract_strided_slice %508 {offsets = [0, 256], sizes = [1, 128], strides = [1, 1]} : vector<1x384xf32> to vector<1x128xf32>
    %526 = vector.extract_strided_slice %507 {offsets = [0, 256], sizes = [1, 128], strides = [1, 1]} : vector<1x384xf32> to vector<1x128xf32>
    %527 = arith.mulf %516, %526 : vector<1x128xf32>
    %528 = arith.addf %525, %527 : vector<1x128xf32>
    %529 = math.tanh %528 : vector<1x128xf32>
    %cst_115 = arith.constant 1.000000e+00 : f32
    %530 = vector.broadcast %cst_115 : f32 to vector<1x128xf32>
    %531 = arith.subf %530, %524 : vector<1x128xf32>
    %532 = arith.mulf %531, %529 : vector<1x128xf32>
    %533 = arith.mulf %524, %472 : vector<1x128xf32>
    %534 = arith.addf %532, %533 : vector<1x128xf32>
    %535 = arith.truncf %503 : vector<1x128xf32> to vector<1x128xbf16>
    %c0_116 = arith.constant 0 : index
    %c0_117 = arith.constant 0 : index
    %536 = vector.load %arg7[%c0_116, %c0_117] : memref<128x384xbf16, #tpu.memory_space<vmem>>, vector<128x384xbf16>
    %cst_118 = arith.constant dense<0.000000e+00> : vector<1x384xf32>
    %537 = tpu.matmul %535, %536, %cst_118 {dimension_numbers = #tpu.dot_dimension_numbers<[1], [0], [0], [1], [0, 0, 1, 1], [], []>} : vector<1x128xbf16>, vector<128x384xbf16>, vector<1x384xf32> -> vector<1x384xf32>
    %538 = arith.addf %537, %67 : vector<1x384xf32>
    %539 = vector.extract_strided_slice %60 {offsets = [0, 0], sizes = [1, 384], strides = [1, 1]} : vector<8x384xf32> to vector<1x384xf32>
    %540 = vector.extract_strided_slice %539 {offsets = [0, 0], sizes = [1, 128], strides = [1, 1]} : vector<1x384xf32> to vector<1x128xf32>
    %541 = vector.extract_strided_slice %538 {offsets = [0, 0], sizes = [1, 128], strides = [1, 1]} : vector<1x384xf32> to vector<1x128xf32>
    %542 = arith.addf %540, %541 : vector<1x128xf32>
    %543 = arith.negf %542 : vector<1x128xf32>
    %544 = math.exp %543 : vector<1x128xf32>
    %cst_119 = arith.constant 1.000000e+00 : f32
    %545 = vector.broadcast %cst_119 : f32 to vector<1x128xf32>
    %546 = arith.addf %545, %544 : vector<1x128xf32>
    %547 = arith.divf %545, %546 : vector<1x128xf32>
    %548 = vector.extract_strided_slice %539 {offsets = [0, 128], sizes = [1, 128], strides = [1, 1]} : vector<1x384xf32> to vector<1x128xf32>
    %549 = vector.extract_strided_slice %538 {offsets = [0, 128], sizes = [1, 128], strides = [1, 1]} : vector<1x384xf32> to vector<1x128xf32>
    %550 = arith.addf %548, %549 : vector<1x128xf32>
    %551 = arith.negf %550 : vector<1x128xf32>
    %552 = math.exp %551 : vector<1x128xf32>
    %cst_120 = arith.constant 1.000000e+00 : f32
    %553 = vector.broadcast %cst_120 : f32 to vector<1x128xf32>
    %554 = arith.addf %553, %552 : vector<1x128xf32>
    %555 = arith.divf %553, %554 : vector<1x128xf32>
    %556 = vector.extract_strided_slice %539 {offsets = [0, 256], sizes = [1, 128], strides = [1, 1]} : vector<1x384xf32> to vector<1x128xf32>
    %557 = vector.extract_strided_slice %538 {offsets = [0, 256], sizes = [1, 128], strides = [1, 1]} : vector<1x384xf32> to vector<1x128xf32>
    %558 = arith.mulf %547, %557 : vector<1x128xf32>
    %559 = arith.addf %556, %558 : vector<1x128xf32>
    %560 = math.tanh %559 : vector<1x128xf32>
    %cst_121 = arith.constant 1.000000e+00 : f32
    %561 = vector.broadcast %cst_121 : f32 to vector<1x128xf32>
    %562 = arith.subf %561, %555 : vector<1x128xf32>
    %563 = arith.mulf %562, %560 : vector<1x128xf32>
    %564 = arith.mulf %555, %503 : vector<1x128xf32>
    %565 = arith.addf %563, %564 : vector<1x128xf32>
    %566 = arith.addf %100, %565 : vector<1x128xf32>
    %567 = arith.addf %162, %503 : vector<1x128xf32>
    %568 = arith.addf %224, %441 : vector<1x128xf32>
    %569 = arith.addf %286, %379 : vector<1x128xf32>
    %570 = arith.addf %348, %317 : vector<1x128xf32>
    %571 = arith.addf %410, %255 : vector<1x128xf32>
    %572 = arith.addf %472, %193 : vector<1x128xf32>
    %573 = arith.addf %534, %131 : vector<1x128xf32>
    %574 = tpu.concatenate %566, %567, %568, %569, %570, %571, %572, %573 in 0 : vector<1x128xf32>, vector<1x128xf32>, vector<1x128xf32>, vector<1x128xf32>, vector<1x128xf32>, vector<1x128xf32>, vector<1x128xf32>, vector<1x128xf32> -> vector<8x128xf32>
    %575 = arith.truncf %574 : vector<8x128xf32> to vector<8x128xbf16>
    %c0_122 = arith.constant 0 : index
    %c0_123 = arith.constant 0 : index
    %576 = vector.load %arg21[%c0_122, %c0_123] : memref<8x128xbf16, #tpu.memory_space<vmem>>, vector<8x128xbf16>
    tpu.vector_store %arg21[%c0_122, %c0_123], %575 {strides = array<i32>} : memref<8x128xbf16, #tpu.memory_space<vmem>>, vector<8x128xbf16>,
    %c0_124 = arith.constant 0 : index
    %c0_125 = arith.constant 0 : index
    %577 = vector.load %arg15[%c0_124, %c0_125] : memref<128x128xbf16, #tpu.memory_space<vmem>>, vector<128x128xbf16>
    %cst_126 = arith.constant dense<0.000000e+00> : vector<8x128xf32>
    %578 = tpu.matmul %575, %577, %cst_126 {dimension_numbers = #tpu.dot_dimension_numbers<[1], [0], [0], [1], [0, 0, 1, 1], [], []>} : vector<8x128xbf16>, vector<128x128xbf16>, vector<8x128xf32> -> vector<8x128xf32>
    %579 = arith.truncf %578 : vector<8x128xf32> to vector<8x128xbf16>
    %c0_127 = arith.constant 0 : index
    %c0_128 = arith.constant 0 : index
    %580 = vector.load %arg22[%c0_127, %c0_128] : memref<8x128xbf16, #tpu.memory_space<vmem>>, vector<8x128xbf16>
    tpu.vector_store %arg22[%c0_127, %c0_128], %579 {strides = array<i32>} : memref<8x128xbf16, #tpu.memory_space<vmem>>, vector<8x128xbf16>,
    %581 = tpu.iota {dimensions = array<i32: 1>} : vector<1x128xi32>
    %582 = tpu.iota {dimensions = array<i32: 1>} : vector<1x6xi32>
    %c0_129 = arith.constant 0 : index
    %c0_130 = arith.constant 0 : index
    %583 = vector.load %arg12[%c0_129, %c0_130] : memref<1x384xf32, #tpu.memory_space<vmem>>, vector<1x384xf32>
    %c0_131 = arith.constant 0 : index
    %c0_132 = arith.constant 0 : index
    %584 = vector.load %arg13[%c0_131, %c0_132] : memref<1x384xf32, #tpu.memory_space<vmem>>, vector<1x384xf32>
    %c0_133 = arith.constant 0 : index
    %c0_134 = arith.constant 0 : index
    %585 = vector.load %arg16[%c0_133, %c0_134] : memref<1x128xf32, #tpu.memory_space<vmem>>, vector<1x128xf32>
    %c0_135 = arith.constant 0 : index
    %c0_136 = arith.constant 0 : index
    %586 = vector.load %arg18[%c0_135, %c0_136] : memref<1x128xf32, #tpu.memory_space<vmem>>, vector<1x128xf32>
    %c1_137 = arith.constant 1 : index
    %c0_138 = arith.constant 0 : index
    %587 = vector.load %arg23[%c1_137, %c0_138] : memref<128x384xbf16, #tpu.memory_space<vmem>>, vector<1x384xbf16>
    %588 = arith.extf %587 : vector<1x384xbf16> to vector<1x384xf32>
    %589 = arith.addf %588, %583 : vector<1x384xf32>
    %c0_i32_139 = arith.constant 0 : i32
    %590 = vector.broadcast %c0_i32_139 : i32 to vector<1x6xi32>
    %cst_140 = arith.constant 0.000000e+00 : f32
    %591 = vector.broadcast %cst_140 : f32 to vector<1x6xf32>
    %592 = arith.truncf %534 : vector<1x128xf32> to vector<1x128xbf16>
    %c0_141 = arith.constant 0 : index
    %c0_142 = arith.constant 0 : index
    %593 = vector.load %arg11[%c0_141, %c0_142] : memref<128x384xbf16, #tpu.memory_space<vmem>>, vector<128x384xbf16>
    %cst_143 = arith.constant dense<0.000000e+00> : vector<1x384xf32>
    %594 = tpu.matmul %592, %593, %cst_143 {dimension_numbers = #tpu.dot_dimension_numbers<[1], [0], [0], [1], [0, 0, 1, 1], [], []>} : vector<1x128xbf16>, vector<128x384xbf16>, vector<1x384xf32> -> vector<1x384xf32>
    %595 = arith.addf %594, %584 : vector<1x384xf32>
    %596 = vector.extract_strided_slice %589 {offsets = [0, 0], sizes = [1, 128], strides = [1, 1]} : vector<1x384xf32> to vector<1x128xf32>
    %597 = vector.extract_strided_slice %595 {offsets = [0, 0], sizes = [1, 128], strides = [1, 1]} : vector<1x384xf32> to vector<1x128xf32>
    %598 = arith.addf %596, %597 : vector<1x128xf32>
    %599 = arith.negf %598 : vector<1x128xf32>
    %600 = math.exp %599 : vector<1x128xf32>
    %cst_144 = arith.constant 1.000000e+00 : f32
    %601 = vector.broadcast %cst_144 : f32 to vector<1x128xf32>
    %602 = arith.addf %601, %600 : vector<1x128xf32>
    %603 = arith.divf %601, %602 : vector<1x128xf32>
    %604 = vector.extract_strided_slice %589 {offsets = [0, 128], sizes = [1, 128], strides = [1, 1]} : vector<1x384xf32> to vector<1x128xf32>
    %605 = vector.extract_strided_slice %595 {offsets = [0, 128], sizes = [1, 128], strides = [1, 1]} : vector<1x384xf32> to vector<1x128xf32>
    %606 = arith.addf %604, %605 : vector<1x128xf32>
    %607 = arith.negf %606 : vector<1x128xf32>
    %608 = math.exp %607 : vector<1x128xf32>
    %cst_145 = arith.constant 1.000000e+00 : f32
    %609 = vector.broadcast %cst_145 : f32 to vector<1x128xf32>
    %610 = arith.addf %609, %608 : vector<1x128xf32>
    %611 = arith.divf %609, %610 : vector<1x128xf32>
    %612 = vector.extract_strided_slice %589 {offsets = [0, 256], sizes = [1, 128], strides = [1, 1]} : vector<1x384xf32> to vector<1x128xf32>
    %613 = vector.extract_strided_slice %595 {offsets = [0, 256], sizes = [1, 128], strides = [1, 1]} : vector<1x384xf32> to vector<1x128xf32>
    %614 = arith.mulf %603, %613 : vector<1x128xf32>
    %615 = arith.addf %612, %614 : vector<1x128xf32>
    %616 = math.tanh %615 : vector<1x128xf32>
    %cst_146 = arith.constant 1.000000e+00 : f32
    %617 = vector.broadcast %cst_146 : f32 to vector<1x128xf32>
    %618 = arith.subf %617, %611 : vector<1x128xf32>
    %619 = arith.mulf %618, %616 : vector<1x128xf32>
    %620 = arith.mulf %611, %534 : vector<1x128xf32>
    %621 = arith.addf %619, %620 : vector<1x128xf32>
    %622 = arith.truncf %621 : vector<1x128xf32> to vector<1x128xbf16>
    %c0_147 = arith.constant 0 : index
    %c0_148 = arith.constant 0 : index
    %623 = vector.load %arg21[%c0_147, %c0_148] : memref<8x128xbf16, #tpu.memory_space<vmem>>, vector<8x128xbf16>
    "tpu.trace_start"() <{level = 10 : i32, message = "qd,kd->qk"}> : () -> ()
    %cst_149 = arith.constant dense<0.000000e+00> : vector<1x8xf32>
    %624 = tpu.matmul %622, %623, %cst_149 {dimension_numbers = #tpu.dot_dimension_numbers<[1], [1], [0], [0], [0, 0, 1, 0], [], []>} : vector<1x128xbf16>, vector<8x128xbf16>, vector<1x8xf32> -> vector<1x8xf32>
    "tpu.trace_stop"() : () -> ()
    %cst_150 = arith.constant dense<0xFF800000> : vector<1xf32>
    %625 = vector.multi_reduction <maximumf>, %624, %cst_150 [1] : vector<1x8xf32> to vector<1xf32>
    %626 = vector.shape_cast %625 : vector<1xf32> to vector<1x1xf32>
    %627 = vector.broadcast %626 : vector<1x1xf32> to vector<1x8xf32>
    %628 = arith.subf %624, %627 : vector<1x8xf32>
    %629 = math.exp %628 : vector<1x8xf32>
    %cst_151 = arith.constant dense<0.000000e+00> : vector<1xf32>
    %630 = vector.multi_reduction <add>, %629, %cst_151 [1] : vector<1x8xf32> to vector<1xf32>
    %631 = vector.shape_cast %630 : vector<1xf32> to vector<1x1xf32>
    %632 = vector.broadcast %631 : vector<1x1xf32> to vector<1x8xf32>
    %633 = arith.divf %629, %632 : vector<1x8xf32>
    %634 = arith.truncf %621 : vector<1x128xf32> to vector<1x128xbf16>
    %c0_152 = arith.constant 0 : index
    %c0_153 = arith.constant 0 : index
    %635 = vector.load %arg14[%c0_152, %c0_153] : memref<128x128xbf16, #tpu.memory_space<vmem>>, vector<128x128xbf16>
    %cst_154 = arith.constant dense<0.000000e+00> : vector<1x128xf32>
    %636 = tpu.matmul %634, %635, %cst_154 {dimension_numbers = #tpu.dot_dimension_numbers<[1], [0], [0], [1], [0, 0, 1, 1], [], []>} : vector<1x128xbf16>, vector<128x128xbf16>, vector<1x128xf32> -> vector<1x128xf32>
    %637 = arith.truncf %633 : vector<1x8xf32> to vector<1x8xbf16>
    %c0_155 = arith.constant 0 : index
    %c0_156 = arith.constant 0 : index
    %638 = vector.load %arg22[%c0_155, %c0_156] : memref<8x128xbf16, #tpu.memory_space<vmem>>, vector<8x128xbf16>
    %cst_157 = arith.constant dense<0.000000e+00> : vector<1x128xf32>
    %639 = tpu.matmul %637, %638, %cst_157 {dimension_numbers = #tpu.dot_dimension_numbers<[1], [0], [0], [1], [0, 0, 1, 1], [], []>} : vector<1x8xbf16>, vector<8x128xbf16>, vector<1x128xf32> -> vector<1x128xf32>
    %640 = arith.addf %636, %639 : vector<1x128xf32>
    %641 = arith.addf %640, %585 : vector<1x128xf32>
    %642 = math.tanh %641 : vector<1x128xf32>
    %643 = arith.truncf %642 : vector<1x128xf32> to vector<1x128xbf16>
    %c0_158 = arith.constant 0 : index
    %c0_159 = arith.constant 0 : index
    %644 = vector.load %arg17[%c0_158, %c0_159] : memref<128x128xbf16, #tpu.memory_space<vmem>>, vector<128x128xbf16>
    %cst_160 = arith.constant dense<0.000000e+00> : vector<1x128xf32>
    %645 = tpu.matmul %643, %644, %cst_160 {dimension_numbers = #tpu.dot_dimension_numbers<[1], [0], [0], [1], [0, 0, 1, 1], [], []>} : vector<1x128xbf16>, vector<128x128xbf16>, vector<1x128xf32> -> vector<1x128xf32>
    %646 = arith.addf %645, %586 : vector<1x128xf32>
    %cst_161 = arith.constant dense<0xFF800000> : vector<1xf32>
    %647 = vector.multi_reduction <maximumf>, %646, %cst_161 [1] : vector<1x128xf32> to vector<1xf32>
    %648 = vector.shape_cast %647 : vector<1xf32> to vector<1x1xf32>
    %649 = vector.broadcast %648 : vector<1x1xf32> to vector<1x128xf32>
    %650 = arith.subf %646, %649 : vector<1x128xf32>
    %651 = math.exp %650 : vector<1x128xf32>
    %cst_162 = arith.constant dense<0.000000e+00> : vector<1xf32>
    %652 = vector.multi_reduction <add>, %651, %cst_162 [1] : vector<1x128xf32> to vector<1xf32>
    %653 = vector.shape_cast %652 : vector<1xf32> to vector<1x1xf32>
    %cst_163 = arith.constant 1.000000e+00 : f32
    %654 = vector.broadcast %cst_163 : f32 to vector<1x1xf32>
    %655 = arith.divf %654, %653 : vector<1x1xf32>
    %656 = vector.broadcast %648 : vector<1x1xf32> to vector<1x128xf32>
    %657 = arith.cmpf oeq, %646, %656 : vector<1x128xf32>
    %c128_i32 = arith.constant 128 : i32
    %658 = vector.broadcast %c128_i32 : i32 to vector<1x128xi32>
    %659 = arith.select %657, %581, %658 : vector<1x128xi1>, vector<1x128xi32>
    %cst_164 = arith.constant dense<2147483647> : vector<1xi32>
    %660 = vector.multi_reduction <minsi>, %659, %cst_164 [1] : vector<1x128xi32> to vector<1xi32>
    %661 = vector.shape_cast %660 : vector<1xi32> to vector<1x1xi32>
    %c0_i32_165 = arith.constant 0 : i32
    %662 = vector.broadcast %c0_i32_165 : i32 to vector<1x6xi32>
    %663 = arith.cmpi eq, %582, %662 : vector<1x6xi32>
    %664 = vector.shape_cast %661 : vector<1x1xi32> to vector<1x1xi32>
    %665 = vector.broadcast %664 : vector<1x1xi32> to vector<1x6xi32>
    %666 = arith.select %663, %665, %590 : vector<1x6xi1>, vector<1x6xi32>
    %c0_i32_166 = arith.constant 0 : i32
    %667 = vector.broadcast %c0_i32_166 : i32 to vector<1x6xi32>
    %668 = arith.cmpi eq, %582, %667 : vector<1x6xi32>
    %669 = vector.shape_cast %655 : vector<1x1xf32> to vector<1x1xf32>
    %670 = vector.broadcast %669 : vector<1x1xf32> to vector<1x6xf32>
    %671 = arith.select %668, %670, %591 : vector<1x6xi1>, vector<1x6xf32>
    %672 = vector.broadcast %661 : vector<1x1xi32> to vector<1x128xi32>
    %673 = arith.cmpi eq, %581, %672 : vector<1x128xi32>
    %674 = arith.extui %673 : vector<1x128xi1> to vector<1x128xi32>
    %675 = arith.sitofp %674 : vector<1x128xi32> to vector<1x128xf32>
    %676 = arith.truncf %675 : vector<1x128xf32> to vector<1x128xbf16>
    %c0_167 = arith.constant 0 : index
    %c0_168 = arith.constant 0 : index
    %677 = vector.load %arg23[%c0_167, %c0_168] : memref<128x384xbf16, #tpu.memory_space<vmem>>, vector<128x384xbf16>
    %cst_169 = arith.constant dense<0.000000e+00> : vector<1x384xf32>
    %678 = tpu.matmul %676, %677, %cst_169 {dimension_numbers = #tpu.dot_dimension_numbers<[1], [0], [0], [1], [0, 0, 1, 1], [], []>} : vector<1x128xbf16>, vector<128x384xbf16>, vector<1x384xf32> -> vector<1x384xf32>
    %679 = arith.addf %678, %583 : vector<1x384xf32>
    %680 = arith.truncf %621 : vector<1x128xf32> to vector<1x128xbf16>
    %c0_170 = arith.constant 0 : index
    %c0_171 = arith.constant 0 : index
    %681 = vector.load %arg11[%c0_170, %c0_171] : memref<128x384xbf16, #tpu.memory_space<vmem>>, vector<128x384xbf16>
    %cst_172 = arith.constant dense<0.000000e+00> : vector<1x384xf32>
    %682 = tpu.matmul %680, %681, %cst_172 {dimension_numbers = #tpu.dot_dimension_numbers<[1], [0], [0], [1], [0, 0, 1, 1], [], []>} : vector<1x128xbf16>, vector<128x384xbf16>, vector<1x384xf32> -> vector<1x384xf32>
    %683 = arith.addf %682, %584 : vector<1x384xf32>
    %684 = vector.extract_strided_slice %679 {offsets = [0, 0], sizes = [1, 128], strides = [1, 1]} : vector<1x384xf32> to vector<1x128xf32>
    %685 = vector.extract_strided_slice %683 {offsets = [0, 0], sizes = [1, 128], strides = [1, 1]} : vector<1x384xf32> to vector<1x128xf32>
    %686 = arith.addf %684, %685 : vector<1x128xf32>
    %687 = arith.negf %686 : vector<1x128xf32>
    %688 = math.exp %687 : vector<1x128xf32>
    %cst_173 = arith.constant 1.000000e+00 : f32
    %689 = vector.broadcast %cst_173 : f32 to vector<1x128xf32>
    %690 = arith.addf %689, %688 : vector<1x128xf32>
    %691 = arith.divf %689, %690 : vector<1x128xf32>
    %692 = vector.extract_strided_slice %679 {offsets = [0, 128], sizes = [1, 128], strides = [1, 1]} : vector<1x384xf32> to vector<1x128xf32>
    %693 = vector.extract_strided_slice %683 {offsets = [0, 128], sizes = [1, 128], strides = [1, 1]} : vector<1x384xf32> to vector<1x128xf32>
    %694 = arith.addf %692, %693 : vector<1x128xf32>
    %695 = arith.negf %694 : vector<1x128xf32>
    %696 = math.exp %695 : vector<1x128xf32>
    %cst_174 = arith.constant 1.000000e+00 : f32
    %697 = vector.broadcast %cst_174 : f32 to vector<1x128xf32>
    %698 = arith.addf %697, %696 : vector<1x128xf32>
    %699 = arith.divf %697, %698 : vector<1x128xf32>
    %700 = vector.extract_strided_slice %679 {offsets = [0, 256], sizes = [1, 128], strides = [1, 1]} : vector<1x384xf32> to vector<1x128xf32>
    %701 = vector.extract_strided_slice %683 {offsets = [0, 256], sizes = [1, 128], strides = [1, 1]} : vector<1x384xf32> to vector<1x128xf32>
    %702 = arith.mulf %691, %701 : vector<1x128xf32>
    %703 = arith.addf %700, %702 : vector<1x128xf32>
    %704 = math.tanh %703 : vector<1x128xf32>
    %cst_175 = arith.constant 1.000000e+00 : f32
    %705 = vector.broadcast %cst_175 : f32 to vector<1x128xf32>
    %706 = arith.subf %705, %699 : vector<1x128xf32>
    %707 = arith.mulf %706, %704 : vector<1x128xf32>
    %708 = arith.mulf %699, %621 : vector<1x128xf32>
    %709 = arith.addf %707, %708 : vector<1x128xf32>
    %710 = arith.truncf %709 : vector<1x128xf32> to vector<1x128xbf16>
    %c0_176 = arith.constant 0 : index
    %c0_177 = arith.constant 0 : index
    %711 = vector.load %arg21[%c0_176, %c0_177] : memref<8x128xbf16, #tpu.memory_space<vmem>>, vector<8x128xbf16>
    "tpu.trace_start"() <{level = 10 : i32, message = "qd,kd->qk"}> : () -> ()
    %cst_178 = arith.constant dense<0.000000e+00> : vector<1x8xf32>
    %712 = tpu.matmul %710, %711, %cst_178 {dimension_numbers = #tpu.dot_dimension_numbers<[1], [1], [0], [0], [0, 0, 1, 0], [], []>} : vector<1x128xbf16>, vector<8x128xbf16>, vector<1x8xf32> -> vector<1x8xf32>
    "tpu.trace_stop"() : () -> ()
    %cst_179 = arith.constant dense<0xFF800000> : vector<1xf32>
    %713 = vector.multi_reduction <maximumf>, %712, %cst_179 [1] : vector<1x8xf32> to vector<1xf32>
    %714 = vector.shape_cast %713 : vector<1xf32> to vector<1x1xf32>
    %715 = vector.broadcast %714 : vector<1x1xf32> to vector<1x8xf32>
    %716 = arith.subf %712, %715 : vector<1x8xf32>
    %717 = math.exp %716 : vector<1x8xf32>
    %cst_180 = arith.constant dense<0.000000e+00> : vector<1xf32>
    %718 = vector.multi_reduction <add>, %717, %cst_180 [1] : vector<1x8xf32> to vector<1xf32>
    %719 = vector.shape_cast %718 : vector<1xf32> to vector<1x1xf32>
    %720 = vector.broadcast %719 : vector<1x1xf32> to vector<1x8xf32>
    %721 = arith.divf %717, %720 : vector<1x8xf32>
    %722 = arith.truncf %709 : vector<1x128xf32> to vector<1x128xbf16>
    %c0_181 = arith.constant 0 : index
    %c0_182 = arith.constant 0 : index
    %723 = vector.load %arg14[%c0_181, %c0_182] : memref<128x128xbf16, #tpu.memory_space<vmem>>, vector<128x128xbf16>
    %cst_183 = arith.constant dense<0.000000e+00> : vector<1x128xf32>
    %724 = tpu.matmul %722, %723, %cst_183 {dimension_numbers = #tpu.dot_dimension_numbers<[1], [0], [0], [1], [0, 0, 1, 1], [], []>} : vector<1x128xbf16>, vector<128x128xbf16>, vector<1x128xf32> -> vector<1x128xf32>
    %725 = arith.truncf %721 : vector<1x8xf32> to vector<1x8xbf16>
    %c0_184 = arith.constant 0 : index
    %c0_185 = arith.constant 0 : index
    %726 = vector.load %arg22[%c0_184, %c0_185] : memref<8x128xbf16, #tpu.memory_space<vmem>>, vector<8x128xbf16>
    %cst_186 = arith.constant dense<0.000000e+00> : vector<1x128xf32>
    %727 = tpu.matmul %725, %726, %cst_186 {dimension_numbers = #tpu.dot_dimension_numbers<[1], [0], [0], [1], [0, 0, 1, 1], [], []>} : vector<1x8xbf16>, vector<8x128xbf16>, vector<1x128xf32> -> vector<1x128xf32>
    %728 = arith.addf %724, %727 : vector<1x128xf32>
    %729 = arith.addf %728, %585 : vector<1x128xf32>
    %730 = math.tanh %729 : vector<1x128xf32>
    %731 = arith.truncf %730 : vector<1x128xf32> to vector<1x128xbf16>
    %c0_187 = arith.constant 0 : index
    %c0_188 = arith.constant 0 : index
    %732 = vector.load %arg17[%c0_187, %c0_188] : memref<128x128xbf16, #tpu.memory_space<vmem>>, vector<128x128xbf16>
    %cst_189 = arith.constant dense<0.000000e+00> : vector<1x128xf32>
    %733 = tpu.matmul %731, %732, %cst_189 {dimension_numbers = #tpu.dot_dimension_numbers<[1], [0], [0], [1], [0, 0, 1, 1], [], []>} : vector<1x128xbf16>, vector<128x128xbf16>, vector<1x128xf32> -> vector<1x128xf32>
    %734 = arith.addf %733, %586 : vector<1x128xf32>
    %cst_190 = arith.constant dense<0xFF800000> : vector<1xf32>
    %735 = vector.multi_reduction <maximumf>, %734, %cst_190 [1] : vector<1x128xf32> to vector<1xf32>
    %736 = vector.shape_cast %735 : vector<1xf32> to vector<1x1xf32>
    %737 = vector.broadcast %736 : vector<1x1xf32> to vector<1x128xf32>
    %738 = arith.subf %734, %737 : vector<1x128xf32>
    %739 = math.exp %738 : vector<1x128xf32>
    %cst_191 = arith.constant dense<0.000000e+00> : vector<1xf32>
    %740 = vector.multi_reduction <add>, %739, %cst_191 [1] : vector<1x128xf32> to vector<1xf32>
    %741 = vector.shape_cast %740 : vector<1xf32> to vector<1x1xf32>
    %cst_192 = arith.constant 1.000000e+00 : f32
    %742 = vector.broadcast %cst_192 : f32 to vector<1x1xf32>
    %743 = arith.divf %742, %741 : vector<1x1xf32>
    %744 = vector.broadcast %736 : vector<1x1xf32> to vector<1x128xf32>
    %745 = arith.cmpf oeq, %734, %744 : vector<1x128xf32>
    %c128_i32_193 = arith.constant 128 : i32
    %746 = vector.broadcast %c128_i32_193 : i32 to vector<1x128xi32>
    %747 = arith.select %745, %581, %746 : vector<1x128xi1>, vector<1x128xi32>
    %cst_194 = arith.constant dense<2147483647> : vector<1xi32>
    %748 = vector.multi_reduction <minsi>, %747, %cst_194 [1] : vector<1x128xi32> to vector<1xi32>
    %749 = vector.shape_cast %748 : vector<1xi32> to vector<1x1xi32>
    %c1_i32_195 = arith.constant 1 : i32
    %750 = vector.broadcast %c1_i32_195 : i32 to vector<1x6xi32>
    %751 = arith.cmpi eq, %582, %750 : vector<1x6xi32>
    %752 = vector.shape_cast %749 : vector<1x1xi32> to vector<1x1xi32>
    %753 = vector.broadcast %752 : vector<1x1xi32> to vector<1x6xi32>
    %754 = arith.select %751, %753, %666 : vector<1x6xi1>, vector<1x6xi32>
    %c1_i32_196 = arith.constant 1 : i32
    %755 = vector.broadcast %c1_i32_196 : i32 to vector<1x6xi32>
    %756 = arith.cmpi eq, %582, %755 : vector<1x6xi32>
    %757 = vector.shape_cast %743 : vector<1x1xf32> to vector<1x1xf32>
    %758 = vector.broadcast %757 : vector<1x1xf32> to vector<1x6xf32>
    %759 = arith.select %756, %758, %671 : vector<1x6xi1>, vector<1x6xf32>
    %760 = vector.broadcast %749 : vector<1x1xi32> to vector<1x128xi32>
    %761 = arith.cmpi eq, %581, %760 : vector<1x128xi32>
    %762 = arith.extui %761 : vector<1x128xi1> to vector<1x128xi32>
    %763 = arith.sitofp %762 : vector<1x128xi32> to vector<1x128xf32>
    %764 = arith.truncf %763 : vector<1x128xf32> to vector<1x128xbf16>
    %c0_197 = arith.constant 0 : index
    %c0_198 = arith.constant 0 : index
    %765 = vector.load %arg23[%c0_197, %c0_198] : memref<128x384xbf16, #tpu.memory_space<vmem>>, vector<128x384xbf16>
    %cst_199 = arith.constant dense<0.000000e+00> : vector<1x384xf32>
    %766 = tpu.matmul %764, %765, %cst_199 {dimension_numbers = #tpu.dot_dimension_numbers<[1], [0], [0], [1], [0, 0, 1, 1], [], []>} : vector<1x128xbf16>, vector<128x384xbf16>, vector<1x384xf32> -> vector<1x384xf32>
    %767 = arith.addf %766, %583 : vector<1x384xf32>
    %768 = arith.truncf %709 : vector<1x128xf32> to vector<1x128xbf16>
    %c0_200 = arith.constant 0 : index
    %c0_201 = arith.constant 0 : index
    %769 = vector.load %arg11[%c0_200, %c0_201] : memref<128x384xbf16, #tpu.memory_space<vmem>>, vector<128x384xbf16>
    %cst_202 = arith.constant dense<0.000000e+00> : vector<1x384xf32>
    %770 = tpu.matmul %768, %769, %cst_202 {dimension_numbers = #tpu.dot_dimension_numbers<[1], [0], [0], [1], [0, 0, 1, 1], [], []>} : vector<1x128xbf16>, vector<128x384xbf16>, vector<1x384xf32> -> vector<1x384xf32>
    %771 = arith.addf %770, %584 : vector<1x384xf32>
    %772 = vector.extract_strided_slice %767 {offsets = [0, 0], sizes = [1, 128], strides = [1, 1]} : vector<1x384xf32> to vector<1x128xf32>
    %773 = vector.extract_strided_slice %771 {offsets = [0, 0], sizes = [1, 128], strides = [1, 1]} : vector<1x384xf32> to vector<1x128xf32>
    %774 = arith.addf %772, %773 : vector<1x128xf32>
    %775 = arith.negf %774 : vector<1x128xf32>
    %776 = math.exp %775 : vector<1x128xf32>
    %cst_203 = arith.constant 1.000000e+00 : f32
    %777 = vector.broadcast %cst_203 : f32 to vector<1x128xf32>
    %778 = arith.addf %777, %776 : vector<1x128xf32>
    %779 = arith.divf %777, %778 : vector<1x128xf32>
    %780 = vector.extract_strided_slice %767 {offsets = [0, 128], sizes = [1, 128], strides = [1, 1]} : vector<1x384xf32> to vector<1x128xf32>
    %781 = vector.extract_strided_slice %771 {offsets = [0, 128], sizes = [1, 128], strides = [1, 1]} : vector<1x384xf32> to vector<1x128xf32>
    %782 = arith.addf %780, %781 : vector<1x128xf32>
    %783 = arith.negf %782 : vector<1x128xf32>
    %784 = math.exp %783 : vector<1x128xf32>
    %cst_204 = arith.constant 1.000000e+00 : f32
    %785 = vector.broadcast %cst_204 : f32 to vector<1x128xf32>
    %786 = arith.addf %785, %784 : vector<1x128xf32>
    %787 = arith.divf %785, %786 : vector<1x128xf32>
    %788 = vector.extract_strided_slice %767 {offsets = [0, 256], sizes = [1, 128], strides = [1, 1]} : vector<1x384xf32> to vector<1x128xf32>
    %789 = vector.extract_strided_slice %771 {offsets = [0, 256], sizes = [1, 128], strides = [1, 1]} : vector<1x384xf32> to vector<1x128xf32>
    %790 = arith.mulf %779, %789 : vector<1x128xf32>
    %791 = arith.addf %788, %790 : vector<1x128xf32>
    %792 = math.tanh %791 : vector<1x128xf32>
    %cst_205 = arith.constant 1.000000e+00 : f32
    %793 = vector.broadcast %cst_205 : f32 to vector<1x128xf32>
    %794 = arith.subf %793, %787 : vector<1x128xf32>
    %795 = arith.mulf %794, %792 : vector<1x128xf32>
    %796 = arith.mulf %787, %709 : vector<1x128xf32>
    %797 = arith.addf %795, %796 : vector<1x128xf32>
    %798 = arith.truncf %797 : vector<1x128xf32> to vector<1x128xbf16>
    %c0_206 = arith.constant 0 : index
    %c0_207 = arith.constant 0 : index
    %799 = vector.load %arg21[%c0_206, %c0_207] : memref<8x128xbf16, #tpu.memory_space<vmem>>, vector<8x128xbf16>
    "tpu.trace_start"() <{level = 10 : i32, message = "qd,kd->qk"}> : () -> ()
    %cst_208 = arith.constant dense<0.000000e+00> : vector<1x8xf32>
    %800 = tpu.matmul %798, %799, %cst_208 {dimension_numbers = #tpu.dot_dimension_numbers<[1], [1], [0], [0], [0, 0, 1, 0], [], []>} : vector<1x128xbf16>, vector<8x128xbf16>, vector<1x8xf32> -> vector<1x8xf32>
    "tpu.trace_stop"() : () -> ()
    %cst_209 = arith.constant dense<0xFF800000> : vector<1xf32>
    %801 = vector.multi_reduction <maximumf>, %800, %cst_209 [1] : vector<1x8xf32> to vector<1xf32>
    %802 = vector.shape_cast %801 : vector<1xf32> to vector<1x1xf32>
    %803 = vector.broadcast %802 : vector<1x1xf32> to vector<1x8xf32>
    %804 = arith.subf %800, %803 : vector<1x8xf32>
    %805 = math.exp %804 : vector<1x8xf32>
    %cst_210 = arith.constant dense<0.000000e+00> : vector<1xf32>
    %806 = vector.multi_reduction <add>, %805, %cst_210 [1] : vector<1x8xf32> to vector<1xf32>
    %807 = vector.shape_cast %806 : vector<1xf32> to vector<1x1xf32>
    %808 = vector.broadcast %807 : vector<1x1xf32> to vector<1x8xf32>
    %809 = arith.divf %805, %808 : vector<1x8xf32>
    %810 = arith.truncf %797 : vector<1x128xf32> to vector<1x128xbf16>
    %c0_211 = arith.constant 0 : index
    %c0_212 = arith.constant 0 : index
    %811 = vector.load %arg14[%c0_211, %c0_212] : memref<128x128xbf16, #tpu.memory_space<vmem>>, vector<128x128xbf16>
    %cst_213 = arith.constant dense<0.000000e+00> : vector<1x128xf32>
    %812 = tpu.matmul %810, %811, %cst_213 {dimension_numbers = #tpu.dot_dimension_numbers<[1], [0], [0], [1], [0, 0, 1, 1], [], []>} : vector<1x128xbf16>, vector<128x128xbf16>, vector<1x128xf32> -> vector<1x128xf32>
    %813 = arith.truncf %809 : vector<1x8xf32> to vector<1x8xbf16>
    %c0_214 = arith.constant 0 : index
    %c0_215 = arith.constant 0 : index
    %814 = vector.load %arg22[%c0_214, %c0_215] : memref<8x128xbf16, #tpu.memory_space<vmem>>, vector<8x128xbf16>
    %cst_216 = arith.constant dense<0.000000e+00> : vector<1x128xf32>
    %815 = tpu.matmul %813, %814, %cst_216 {dimension_numbers = #tpu.dot_dimension_numbers<[1], [0], [0], [1], [0, 0, 1, 1], [], []>} : vector<1x8xbf16>, vector<8x128xbf16>, vector<1x128xf32> -> vector<1x128xf32>
    %816 = arith.addf %812, %815 : vector<1x128xf32>
    %817 = arith.addf %816, %585 : vector<1x128xf32>
    %818 = math.tanh %817 : vector<1x128xf32>
    %819 = arith.truncf %818 : vector<1x128xf32> to vector<1x128xbf16>
    %c0_217 = arith.constant 0 : index
    %c0_218 = arith.constant 0 : index
    %820 = vector.load %arg17[%c0_217, %c0_218] : memref<128x128xbf16, #tpu.memory_space<vmem>>, vector<128x128xbf16>
    %cst_219 = arith.constant dense<0.000000e+00> : vector<1x128xf32>
    %821 = tpu.matmul %819, %820, %cst_219 {dimension_numbers = #tpu.dot_dimension_numbers<[1], [0], [0], [1], [0, 0, 1, 1], [], []>} : vector<1x128xbf16>, vector<128x128xbf16>, vector<1x128xf32> -> vector<1x128xf32>
    %822 = arith.addf %821, %586 : vector<1x128xf32>
    %cst_220 = arith.constant dense<0xFF800000> : vector<1xf32>
    %823 = vector.multi_reduction <maximumf>, %822, %cst_220 [1] : vector<1x128xf32> to vector<1xf32>
    %824 = vector.shape_cast %823 : vector<1xf32> to vector<1x1xf32>
    %825 = vector.broadcast %824 : vector<1x1xf32> to vector<1x128xf32>
    %826 = arith.subf %822, %825 : vector<1x128xf32>
    %827 = math.exp %826 : vector<1x128xf32>
    %cst_221 = arith.constant dense<0.000000e+00> : vector<1xf32>
    %828 = vector.multi_reduction <add>, %827, %cst_221 [1] : vector<1x128xf32> to vector<1xf32>
    %829 = vector.shape_cast %828 : vector<1xf32> to vector<1x1xf32>
    %cst_222 = arith.constant 1.000000e+00 : f32
    %830 = vector.broadcast %cst_222 : f32 to vector<1x1xf32>
    %831 = arith.divf %830, %829 : vector<1x1xf32>
    %832 = vector.broadcast %824 : vector<1x1xf32> to vector<1x128xf32>
    %833 = arith.cmpf oeq, %822, %832 : vector<1x128xf32>
    %c128_i32_223 = arith.constant 128 : i32
    %834 = vector.broadcast %c128_i32_223 : i32 to vector<1x128xi32>
    %835 = arith.select %833, %581, %834 : vector<1x128xi1>, vector<1x128xi32>
    %cst_224 = arith.constant dense<2147483647> : vector<1xi32>
    %836 = vector.multi_reduction <minsi>, %835, %cst_224 [1] : vector<1x128xi32> to vector<1xi32>
    %837 = vector.shape_cast %836 : vector<1xi32> to vector<1x1xi32>
    %c2_i32_225 = arith.constant 2 : i32
    %838 = vector.broadcast %c2_i32_225 : i32 to vector<1x6xi32>
    %839 = arith.cmpi eq, %582, %838 : vector<1x6xi32>
    %840 = vector.shape_cast %837 : vector<1x1xi32> to vector<1x1xi32>
    %841 = vector.broadcast %840 : vector<1x1xi32> to vector<1x6xi32>
    %842 = arith.select %839, %841, %754 : vector<1x6xi1>, vector<1x6xi32>
    %c2_i32_226 = arith.constant 2 : i32
    %843 = vector.broadcast %c2_i32_226 : i32 to vector<1x6xi32>
    %844 = arith.cmpi eq, %582, %843 : vector<1x6xi32>
    %845 = vector.shape_cast %831 : vector<1x1xf32> to vector<1x1xf32>
    %846 = vector.broadcast %845 : vector<1x1xf32> to vector<1x6xf32>
    %847 = arith.select %844, %846, %759 : vector<1x6xi1>, vector<1x6xf32>
    %848 = vector.broadcast %837 : vector<1x1xi32> to vector<1x128xi32>
    %849 = arith.cmpi eq, %581, %848 : vector<1x128xi32>
    %850 = arith.extui %849 : vector<1x128xi1> to vector<1x128xi32>
    %851 = arith.sitofp %850 : vector<1x128xi32> to vector<1x128xf32>
    %852 = arith.truncf %851 : vector<1x128xf32> to vector<1x128xbf16>
    %c0_227 = arith.constant 0 : index
    %c0_228 = arith.constant 0 : index
    %853 = vector.load %arg23[%c0_227, %c0_228] : memref<128x384xbf16, #tpu.memory_space<vmem>>, vector<128x384xbf16>
    %cst_229 = arith.constant dense<0.000000e+00> : vector<1x384xf32>
    %854 = tpu.matmul %852, %853, %cst_229 {dimension_numbers = #tpu.dot_dimension_numbers<[1], [0], [0], [1], [0, 0, 1, 1], [], []>} : vector<1x128xbf16>, vector<128x384xbf16>, vector<1x384xf32> -> vector<1x384xf32>
    %855 = arith.addf %854, %583 : vector<1x384xf32>
    %856 = arith.truncf %797 : vector<1x128xf32> to vector<1x128xbf16>
    %c0_230 = arith.constant 0 : index
    %c0_231 = arith.constant 0 : index
    %857 = vector.load %arg11[%c0_230, %c0_231] : memref<128x384xbf16, #tpu.memory_space<vmem>>, vector<128x384xbf16>
    %cst_232 = arith.constant dense<0.000000e+00> : vector<1x384xf32>
    %858 = tpu.matmul %856, %857, %cst_232 {dimension_numbers = #tpu.dot_dimension_numbers<[1], [0], [0], [1], [0, 0, 1, 1], [], []>} : vector<1x128xbf16>, vector<128x384xbf16>, vector<1x384xf32> -> vector<1x384xf32>
    %859 = arith.addf %858, %584 : vector<1x384xf32>
    %860 = vector.extract_strided_slice %855 {offsets = [0, 0], sizes = [1, 128], strides = [1, 1]} : vector<1x384xf32> to vector<1x128xf32>
    %861 = vector.extract_strided_slice %859 {offsets = [0, 0], sizes = [1, 128], strides = [1, 1]} : vector<1x384xf32> to vector<1x128xf32>
    %862 = arith.addf %860, %861 : vector<1x128xf32>
    %863 = arith.negf %862 : vector<1x128xf32>
    %864 = math.exp %863 : vector<1x128xf32>
    %cst_233 = arith.constant 1.000000e+00 : f32
    %865 = vector.broadcast %cst_233 : f32 to vector<1x128xf32>
    %866 = arith.addf %865, %864 : vector<1x128xf32>
    %867 = arith.divf %865, %866 : vector<1x128xf32>
    %868 = vector.extract_strided_slice %855 {offsets = [0, 128], sizes = [1, 128], strides = [1, 1]} : vector<1x384xf32> to vector<1x128xf32>
    %869 = vector.extract_strided_slice %859 {offsets = [0, 128], sizes = [1, 128], strides = [1, 1]} : vector<1x384xf32> to vector<1x128xf32>
    %870 = arith.addf %868, %869 : vector<1x128xf32>
    %871 = arith.negf %870 : vector<1x128xf32>
    %872 = math.exp %871 : vector<1x128xf32>
    %cst_234 = arith.constant 1.000000e+00 : f32
    %873 = vector.broadcast %cst_234 : f32 to vector<1x128xf32>
    %874 = arith.addf %873, %872 : vector<1x128xf32>
    %875 = arith.divf %873, %874 : vector<1x128xf32>
    %876 = vector.extract_strided_slice %855 {offsets = [0, 256], sizes = [1, 128], strides = [1, 1]} : vector<1x384xf32> to vector<1x128xf32>
    %877 = vector.extract_strided_slice %859 {offsets = [0, 256], sizes = [1, 128], strides = [1, 1]} : vector<1x384xf32> to vector<1x128xf32>
    %878 = arith.mulf %867, %877 : vector<1x128xf32>
    %879 = arith.addf %876, %878 : vector<1x128xf32>
    %880 = math.tanh %879 : vector<1x128xf32>
    %cst_235 = arith.constant 1.000000e+00 : f32
    %881 = vector.broadcast %cst_235 : f32 to vector<1x128xf32>
    %882 = arith.subf %881, %875 : vector<1x128xf32>
    %883 = arith.mulf %882, %880 : vector<1x128xf32>
    %884 = arith.mulf %875, %797 : vector<1x128xf32>
    %885 = arith.addf %883, %884 : vector<1x128xf32>
    %886 = arith.truncf %885 : vector<1x128xf32> to vector<1x128xbf16>
    %c0_236 = arith.constant 0 : index
    %c0_237 = arith.constant 0 : index
    %887 = vector.load %arg21[%c0_236, %c0_237] : memref<8x128xbf16, #tpu.memory_space<vmem>>, vector<8x128xbf16>
    "tpu.trace_start"() <{level = 10 : i32, message = "qd,kd->qk"}> : () -> ()
    %cst_238 = arith.constant dense<0.000000e+00> : vector<1x8xf32>
    %888 = tpu.matmul %886, %887, %cst_238 {dimension_numbers = #tpu.dot_dimension_numbers<[1], [1], [0], [0], [0, 0, 1, 0], [], []>} : vector<1x128xbf16>, vector<8x128xbf16>, vector<1x8xf32> -> vector<1x8xf32>
    "tpu.trace_stop"() : () -> ()
    %cst_239 = arith.constant dense<0xFF800000> : vector<1xf32>
    %889 = vector.multi_reduction <maximumf>, %888, %cst_239 [1] : vector<1x8xf32> to vector<1xf32>
    %890 = vector.shape_cast %889 : vector<1xf32> to vector<1x1xf32>
    %891 = vector.broadcast %890 : vector<1x1xf32> to vector<1x8xf32>
    %892 = arith.subf %888, %891 : vector<1x8xf32>
    %893 = math.exp %892 : vector<1x8xf32>
    %cst_240 = arith.constant dense<0.000000e+00> : vector<1xf32>
    %894 = vector.multi_reduction <add>, %893, %cst_240 [1] : vector<1x8xf32> to vector<1xf32>
    %895 = vector.shape_cast %894 : vector<1xf32> to vector<1x1xf32>
    %896 = vector.broadcast %895 : vector<1x1xf32> to vector<1x8xf32>
    %897 = arith.divf %893, %896 : vector<1x8xf32>
    %898 = arith.truncf %885 : vector<1x128xf32> to vector<1x128xbf16>
    %c0_241 = arith.constant 0 : index
    %c0_242 = arith.constant 0 : index
    %899 = vector.load %arg14[%c0_241, %c0_242] : memref<128x128xbf16, #tpu.memory_space<vmem>>, vector<128x128xbf16>
    %cst_243 = arith.constant dense<0.000000e+00> : vector<1x128xf32>
    %900 = tpu.matmul %898, %899, %cst_243 {dimension_numbers = #tpu.dot_dimension_numbers<[1], [0], [0], [1], [0, 0, 1, 1], [], []>} : vector<1x128xbf16>, vector<128x128xbf16>, vector<1x128xf32> -> vector<1x128xf32>
    %901 = arith.truncf %897 : vector<1x8xf32> to vector<1x8xbf16>
    %c0_244 = arith.constant 0 : index
    %c0_245 = arith.constant 0 : index
    %902 = vector.load %arg22[%c0_244, %c0_245] : memref<8x128xbf16, #tpu.memory_space<vmem>>, vector<8x128xbf16>
    %cst_246 = arith.constant dense<0.000000e+00> : vector<1x128xf32>
    %903 = tpu.matmul %901, %902, %cst_246 {dimension_numbers = #tpu.dot_dimension_numbers<[1], [0], [0], [1], [0, 0, 1, 1], [], []>} : vector<1x8xbf16>, vector<8x128xbf16>, vector<1x128xf32> -> vector<1x128xf32>
    %904 = arith.addf %900, %903 : vector<1x128xf32>
    %905 = arith.addf %904, %585 : vector<1x128xf32>
    %906 = math.tanh %905 : vector<1x128xf32>
    %907 = arith.truncf %906 : vector<1x128xf32> to vector<1x128xbf16>
    %c0_247 = arith.constant 0 : index
    %c0_248 = arith.constant 0 : index
    %908 = vector.load %arg17[%c0_247, %c0_248] : memref<128x128xbf16, #tpu.memory_space<vmem>>, vector<128x128xbf16>
    %cst_249 = arith.constant dense<0.000000e+00> : vector<1x128xf32>
    %909 = tpu.matmul %907, %908, %cst_249 {dimension_numbers = #tpu.dot_dimension_numbers<[1], [0], [0], [1], [0, 0, 1, 1], [], []>} : vector<1x128xbf16>, vector<128x128xbf16>, vector<1x128xf32> -> vector<1x128xf32>
    %910 = arith.addf %909, %586 : vector<1x128xf32>
    %cst_250 = arith.constant dense<0xFF800000> : vector<1xf32>
    %911 = vector.multi_reduction <maximumf>, %910, %cst_250 [1] : vector<1x128xf32> to vector<1xf32>
    %912 = vector.shape_cast %911 : vector<1xf32> to vector<1x1xf32>
    %913 = vector.broadcast %912 : vector<1x1xf32> to vector<1x128xf32>
    %914 = arith.subf %910, %913 : vector<1x128xf32>
    %915 = math.exp %914 : vector<1x128xf32>
    %cst_251 = arith.constant dense<0.000000e+00> : vector<1xf32>
    %916 = vector.multi_reduction <add>, %915, %cst_251 [1] : vector<1x128xf32> to vector<1xf32>
    %917 = vector.shape_cast %916 : vector<1xf32> to vector<1x1xf32>
    %cst_252 = arith.constant 1.000000e+00 : f32
    %918 = vector.broadcast %cst_252 : f32 to vector<1x1xf32>
    %919 = arith.divf %918, %917 : vector<1x1xf32>
    %920 = vector.broadcast %912 : vector<1x1xf32> to vector<1x128xf32>
    %921 = arith.cmpf oeq, %910, %920 : vector<1x128xf32>
    %c128_i32_253 = arith.constant 128 : i32
    %922 = vector.broadcast %c128_i32_253 : i32 to vector<1x128xi32>
    %923 = arith.select %921, %581, %922 : vector<1x128xi1>, vector<1x128xi32>
    %cst_254 = arith.constant dense<2147483647> : vector<1xi32>
    %924 = vector.multi_reduction <minsi>, %923, %cst_254 [1] : vector<1x128xi32> to vector<1xi32>
    %925 = vector.shape_cast %924 : vector<1xi32> to vector<1x1xi32>
    %c3_i32_255 = arith.constant 3 : i32
    %926 = vector.broadcast %c3_i32_255 : i32 to vector<1x6xi32>
    %927 = arith.cmpi eq, %582, %926 : vector<1x6xi32>
    %928 = vector.shape_cast %925 : vector<1x1xi32> to vector<1x1xi32>
    %929 = vector.broadcast %928 : vector<1x1xi32> to vector<1x6xi32>
    %930 = arith.select %927, %929, %842 : vector<1x6xi1>, vector<1x6xi32>
    %c3_i32_256 = arith.constant 3 : i32
    %931 = vector.broadcast %c3_i32_256 : i32 to vector<1x6xi32>
    %932 = arith.cmpi eq, %582, %931 : vector<1x6xi32>
    %933 = vector.shape_cast %919 : vector<1x1xf32> to vector<1x1xf32>
    %934 = vector.broadcast %933 : vector<1x1xf32> to vector<1x6xf32>
    %935 = arith.select %932, %934, %847 : vector<1x6xi1>, vector<1x6xf32>
    %936 = vector.broadcast %925 : vector<1x1xi32> to vector<1x128xi32>
    %937 = arith.cmpi eq, %581, %936 : vector<1x128xi32>
    %938 = arith.extui %937 : vector<1x128xi1> to vector<1x128xi32>
    %939 = arith.sitofp %938 : vector<1x128xi32> to vector<1x128xf32>
    %940 = arith.truncf %939 : vector<1x128xf32> to vector<1x128xbf16>
    %c0_257 = arith.constant 0 : index
    %c0_258 = arith.constant 0 : index
    %941 = vector.load %arg23[%c0_257, %c0_258] : memref<128x384xbf16, #tpu.memory_space<vmem>>, vector<128x384xbf16>
    %cst_259 = arith.constant dense<0.000000e+00> : vector<1x384xf32>
    %942 = tpu.matmul %940, %941, %cst_259 {dimension_numbers = #tpu.dot_dimension_numbers<[1], [0], [0], [1], [0, 0, 1, 1], [], []>} : vector<1x128xbf16>, vector<128x384xbf16>, vector<1x384xf32> -> vector<1x384xf32>
    %943 = arith.addf %942, %583 : vector<1x384xf32>
    %944 = arith.truncf %885 : vector<1x128xf32> to vector<1x128xbf16>
    %c0_260 = arith.constant 0 : index
    %c0_261 = arith.constant 0 : index
    %945 = vector.load %arg11[%c0_260, %c0_261] : memref<128x384xbf16, #tpu.memory_space<vmem>>, vector<128x384xbf16>
    %cst_262 = arith.constant dense<0.000000e+00> : vector<1x384xf32>
    %946 = tpu.matmul %944, %945, %cst_262 {dimension_numbers = #tpu.dot_dimension_numbers<[1], [0], [0], [1], [0, 0, 1, 1], [], []>} : vector<1x128xbf16>, vector<128x384xbf16>, vector<1x384xf32> -> vector<1x384xf32>
    %947 = arith.addf %946, %584 : vector<1x384xf32>
    %948 = vector.extract_strided_slice %943 {offsets = [0, 0], sizes = [1, 128], strides = [1, 1]} : vector<1x384xf32> to vector<1x128xf32>
    %949 = vector.extract_strided_slice %947 {offsets = [0, 0], sizes = [1, 128], strides = [1, 1]} : vector<1x384xf32> to vector<1x128xf32>
    %950 = arith.addf %948, %949 : vector<1x128xf32>
    %951 = arith.negf %950 : vector<1x128xf32>
    %952 = math.exp %951 : vector<1x128xf32>
    %cst_263 = arith.constant 1.000000e+00 : f32
    %953 = vector.broadcast %cst_263 : f32 to vector<1x128xf32>
    %954 = arith.addf %953, %952 : vector<1x128xf32>
    %955 = arith.divf %953, %954 : vector<1x128xf32>
    %956 = vector.extract_strided_slice %943 {offsets = [0, 128], sizes = [1, 128], strides = [1, 1]} : vector<1x384xf32> to vector<1x128xf32>
    %957 = vector.extract_strided_slice %947 {offsets = [0, 128], sizes = [1, 128], strides = [1, 1]} : vector<1x384xf32> to vector<1x128xf32>
    %958 = arith.addf %956, %957 : vector<1x128xf32>
    %959 = arith.negf %958 : vector<1x128xf32>
    %960 = math.exp %959 : vector<1x128xf32>
    %cst_264 = arith.constant 1.000000e+00 : f32
    %961 = vector.broadcast %cst_264 : f32 to vector<1x128xf32>
    %962 = arith.addf %961, %960 : vector<1x128xf32>
    %963 = arith.divf %961, %962 : vector<1x128xf32>
    %964 = vector.extract_strided_slice %943 {offsets = [0, 256], sizes = [1, 128], strides = [1, 1]} : vector<1x384xf32> to vector<1x128xf32>
    %965 = vector.extract_strided_slice %947 {offsets = [0, 256], sizes = [1, 128], strides = [1, 1]} : vector<1x384xf32> to vector<1x128xf32>
    %966 = arith.mulf %955, %965 : vector<1x128xf32>
    %967 = arith.addf %964, %966 : vector<1x128xf32>
    %968 = math.tanh %967 : vector<1x128xf32>
    %cst_265 = arith.constant 1.000000e+00 : f32
    %969 = vector.broadcast %cst_265 : f32 to vector<1x128xf32>
    %970 = arith.subf %969, %963 : vector<1x128xf32>
    %971 = arith.mulf %970, %968 : vector<1x128xf32>
    %972 = arith.mulf %963, %885 : vector<1x128xf32>
    %973 = arith.addf %971, %972 : vector<1x128xf32>
    %974 = arith.truncf %973 : vector<1x128xf32> to vector<1x128xbf16>
    %c0_266 = arith.constant 0 : index
    %c0_267 = arith.constant 0 : index
    %975 = vector.load %arg21[%c0_266, %c0_267] : memref<8x128xbf16, #tpu.memory_space<vmem>>, vector<8x128xbf16>
    "tpu.trace_start"() <{level = 10 : i32, message = "qd,kd->qk"}> : () -> ()
    %cst_268 = arith.constant dense<0.000000e+00> : vector<1x8xf32>
    %976 = tpu.matmul %974, %975, %cst_268 {dimension_numbers = #tpu.dot_dimension_numbers<[1], [1], [0], [0], [0, 0, 1, 0], [], []>} : vector<1x128xbf16>, vector<8x128xbf16>, vector<1x8xf32> -> vector<1x8xf32>
    "tpu.trace_stop"() : () -> ()
    %cst_269 = arith.constant dense<0xFF800000> : vector<1xf32>
    %977 = vector.multi_reduction <maximumf>, %976, %cst_269 [1] : vector<1x8xf32> to vector<1xf32>
    %978 = vector.shape_cast %977 : vector<1xf32> to vector<1x1xf32>
    %979 = vector.broadcast %978 : vector<1x1xf32> to vector<1x8xf32>
    %980 = arith.subf %976, %979 : vector<1x8xf32>
    %981 = math.exp %980 : vector<1x8xf32>
    %cst_270 = arith.constant dense<0.000000e+00> : vector<1xf32>
    %982 = vector.multi_reduction <add>, %981, %cst_270 [1] : vector<1x8xf32> to vector<1xf32>
    %983 = vector.shape_cast %982 : vector<1xf32> to vector<1x1xf32>
    %984 = vector.broadcast %983 : vector<1x1xf32> to vector<1x8xf32>
    %985 = arith.divf %981, %984 : vector<1x8xf32>
    %986 = arith.truncf %973 : vector<1x128xf32> to vector<1x128xbf16>
    %c0_271 = arith.constant 0 : index
    %c0_272 = arith.constant 0 : index
    %987 = vector.load %arg14[%c0_271, %c0_272] : memref<128x128xbf16, #tpu.memory_space<vmem>>, vector<128x128xbf16>
    %cst_273 = arith.constant dense<0.000000e+00> : vector<1x128xf32>
    %988 = tpu.matmul %986, %987, %cst_273 {dimension_numbers = #tpu.dot_dimension_numbers<[1], [0], [0], [1], [0, 0, 1, 1], [], []>} : vector<1x128xbf16>, vector<128x128xbf16>, vector<1x128xf32> -> vector<1x128xf32>
    %989 = arith.truncf %985 : vector<1x8xf32> to vector<1x8xbf16>
    %c0_274 = arith.constant 0 : index
    %c0_275 = arith.constant 0 : index
    %990 = vector.load %arg22[%c0_274, %c0_275] : memref<8x128xbf16, #tpu.memory_space<vmem>>, vector<8x128xbf16>
    %cst_276 = arith.constant dense<0.000000e+00> : vector<1x128xf32>
    %991 = tpu.matmul %989, %990, %cst_276 {dimension_numbers = #tpu.dot_dimension_numbers<[1], [0], [0], [1], [0, 0, 1, 1], [], []>} : vector<1x8xbf16>, vector<8x128xbf16>, vector<1x128xf32> -> vector<1x128xf32>
    %992 = arith.addf %988, %991 : vector<1x128xf32>
    %993 = arith.addf %992, %585 : vector<1x128xf32>
    %994 = math.tanh %993 : vector<1x128xf32>
    %995 = arith.truncf %994 : vector<1x128xf32> to vector<1x128xbf16>
    %c0_277 = arith.constant 0 : index
    %c0_278 = arith.constant 0 : index
    %996 = vector.load %arg17[%c0_277, %c0_278] : memref<128x128xbf16, #tpu.memory_space<vmem>>, vector<128x128xbf16>
    %cst_279 = arith.constant dense<0.000000e+00> : vector<1x128xf32>
    %997 = tpu.matmul %995, %996, %cst_279 {dimension_numbers = #tpu.dot_dimension_numbers<[1], [0], [0], [1], [0, 0, 1, 1], [], []>} : vector<1x128xbf16>, vector<128x128xbf16>, vector<1x128xf32> -> vector<1x128xf32>
    %998 = arith.addf %997, %586 : vector<1x128xf32>
    %cst_280 = arith.constant dense<0xFF800000> : vector<1xf32>
    %999 = vector.multi_reduction <maximumf>, %998, %cst_280 [1] : vector<1x128xf32> to vector<1xf32>
    %1000 = vector.shape_cast %999 : vector<1xf32> to vector<1x1xf32>
    %1001 = vector.broadcast %1000 : vector<1x1xf32> to vector<1x128xf32>
    %1002 = arith.subf %998, %1001 : vector<1x128xf32>
    %1003 = math.exp %1002 : vector<1x128xf32>
    %cst_281 = arith.constant dense<0.000000e+00> : vector<1xf32>
    %1004 = vector.multi_reduction <add>, %1003, %cst_281 [1] : vector<1x128xf32> to vector<1xf32>
    %1005 = vector.shape_cast %1004 : vector<1xf32> to vector<1x1xf32>
    %cst_282 = arith.constant 1.000000e+00 : f32
    %1006 = vector.broadcast %cst_282 : f32 to vector<1x1xf32>
    %1007 = arith.divf %1006, %1005 : vector<1x1xf32>
    %1008 = vector.broadcast %1000 : vector<1x1xf32> to vector<1x128xf32>
    %1009 = arith.cmpf oeq, %998, %1008 : vector<1x128xf32>
    %c128_i32_283 = arith.constant 128 : i32
    %1010 = vector.broadcast %c128_i32_283 : i32 to vector<1x128xi32>
    %1011 = arith.select %1009, %581, %1010 : vector<1x128xi1>, vector<1x128xi32>
    %cst_284 = arith.constant dense<2147483647> : vector<1xi32>
    %1012 = vector.multi_reduction <minsi>, %1011, %cst_284 [1] : vector<1x128xi32> to vector<1xi32>
    %1013 = vector.shape_cast %1012 : vector<1xi32> to vector<1x1xi32>
    %c4_i32_285 = arith.constant 4 : i32
    %1014 = vector.broadcast %c4_i32_285 : i32 to vector<1x6xi32>
    %1015 = arith.cmpi eq, %582, %1014 : vector<1x6xi32>
    %1016 = vector.shape_cast %1013 : vector<1x1xi32> to vector<1x1xi32>
    %1017 = vector.broadcast %1016 : vector<1x1xi32> to vector<1x6xi32>
    %1018 = arith.select %1015, %1017, %930 : vector<1x6xi1>, vector<1x6xi32>
    %c4_i32_286 = arith.constant 4 : i32
    %1019 = vector.broadcast %c4_i32_286 : i32 to vector<1x6xi32>
    %1020 = arith.cmpi eq, %582, %1019 : vector<1x6xi32>
    %1021 = vector.shape_cast %1007 : vector<1x1xf32> to vector<1x1xf32>
    %1022 = vector.broadcast %1021 : vector<1x1xf32> to vector<1x6xf32>
    %1023 = arith.select %1020, %1022, %935 : vector<1x6xi1>, vector<1x6xf32>
    %1024 = vector.broadcast %1013 : vector<1x1xi32> to vector<1x128xi32>
    %1025 = arith.cmpi eq, %581, %1024 : vector<1x128xi32>
    %1026 = arith.extui %1025 : vector<1x128xi1> to vector<1x128xi32>
    %1027 = arith.sitofp %1026 : vector<1x128xi32> to vector<1x128xf32>
    %1028 = arith.truncf %1027 : vector<1x128xf32> to vector<1x128xbf16>
    %c0_287 = arith.constant 0 : index
    %c0_288 = arith.constant 0 : index
    %1029 = vector.load %arg23[%c0_287, %c0_288] : memref<128x384xbf16, #tpu.memory_space<vmem>>, vector<128x384xbf16>
    %cst_289 = arith.constant dense<0.000000e+00> : vector<1x384xf32>
    %1030 = tpu.matmul %1028, %1029, %cst_289 {dimension_numbers = #tpu.dot_dimension_numbers<[1], [0], [0], [1], [0, 0, 1, 1], [], []>} : vector<1x128xbf16>, vector<128x384xbf16>, vector<1x384xf32> -> vector<1x384xf32>
    %1031 = arith.addf %1030, %583 : vector<1x384xf32>
    %1032 = arith.truncf %973 : vector<1x128xf32> to vector<1x128xbf16>
    %c0_290 = arith.constant 0 : index
    %c0_291 = arith.constant 0 : index
    %1033 = vector.load %arg11[%c0_290, %c0_291] : memref<128x384xbf16, #tpu.memory_space<vmem>>, vector<128x384xbf16>
    %cst_292 = arith.constant dense<0.000000e+00> : vector<1x384xf32>
    %1034 = tpu.matmul %1032, %1033, %cst_292 {dimension_numbers = #tpu.dot_dimension_numbers<[1], [0], [0], [1], [0, 0, 1, 1], [], []>} : vector<1x128xbf16>, vector<128x384xbf16>, vector<1x384xf32> -> vector<1x384xf32>
    %1035 = arith.addf %1034, %584 : vector<1x384xf32>
    %1036 = vector.extract_strided_slice %1031 {offsets = [0, 0], sizes = [1, 128], strides = [1, 1]} : vector<1x384xf32> to vector<1x128xf32>
    %1037 = vector.extract_strided_slice %1035 {offsets = [0, 0], sizes = [1, 128], strides = [1, 1]} : vector<1x384xf32> to vector<1x128xf32>
    %1038 = arith.addf %1036, %1037 : vector<1x128xf32>
    %1039 = arith.negf %1038 : vector<1x128xf32>
    %1040 = math.exp %1039 : vector<1x128xf32>
    %cst_293 = arith.constant 1.000000e+00 : f32
    %1041 = vector.broadcast %cst_293 : f32 to vector<1x128xf32>
    %1042 = arith.addf %1041, %1040 : vector<1x128xf32>
    %1043 = arith.divf %1041, %1042 : vector<1x128xf32>
    %1044 = vector.extract_strided_slice %1031 {offsets = [0, 128], sizes = [1, 128], strides = [1, 1]} : vector<1x384xf32> to vector<1x128xf32>
    %1045 = vector.extract_strided_slice %1035 {offsets = [0, 128], sizes = [1, 128], strides = [1, 1]} : vector<1x384xf32> to vector<1x128xf32>
    %1046 = arith.addf %1044, %1045 : vector<1x128xf32>
    %1047 = arith.negf %1046 : vector<1x128xf32>
    %1048 = math.exp %1047 : vector<1x128xf32>
    %cst_294 = arith.constant 1.000000e+00 : f32
    %1049 = vector.broadcast %cst_294 : f32 to vector<1x128xf32>
    %1050 = arith.addf %1049, %1048 : vector<1x128xf32>
    %1051 = arith.divf %1049, %1050 : vector<1x128xf32>
    %1052 = vector.extract_strided_slice %1031 {offsets = [0, 256], sizes = [1, 128], strides = [1, 1]} : vector<1x384xf32> to vector<1x128xf32>
    %1053 = vector.extract_strided_slice %1035 {offsets = [0, 256], sizes = [1, 128], strides = [1, 1]} : vector<1x384xf32> to vector<1x128xf32>
    %1054 = arith.mulf %1043, %1053 : vector<1x128xf32>
    %1055 = arith.addf %1052, %1054 : vector<1x128xf32>
    %1056 = math.tanh %1055 : vector<1x128xf32>
    %cst_295 = arith.constant 1.000000e+00 : f32
    %1057 = vector.broadcast %cst_295 : f32 to vector<1x128xf32>
    %1058 = arith.subf %1057, %1051 : vector<1x128xf32>
    %1059 = arith.mulf %1058, %1056 : vector<1x128xf32>
    %1060 = arith.mulf %1051, %973 : vector<1x128xf32>
    %1061 = arith.addf %1059, %1060 : vector<1x128xf32>
    %1062 = arith.truncf %1061 : vector<1x128xf32> to vector<1x128xbf16>
    %c0_296 = arith.constant 0 : index
    %c0_297 = arith.constant 0 : index
    %1063 = vector.load %arg21[%c0_296, %c0_297] : memref<8x128xbf16, #tpu.memory_space<vmem>>, vector<8x128xbf16>
    "tpu.trace_start"() <{level = 10 : i32, message = "qd,kd->qk"}> : () -> ()
    %cst_298 = arith.constant dense<0.000000e+00> : vector<1x8xf32>
    %1064 = tpu.matmul %1062, %1063, %cst_298 {dimension_numbers = #tpu.dot_dimension_numbers<[1], [1], [0], [0], [0, 0, 1, 0], [], []>} : vector<1x128xbf16>, vector<8x128xbf16>, vector<1x8xf32> -> vector<1x8xf32>
    "tpu.trace_stop"() : () -> ()
    %cst_299 = arith.constant dense<0xFF800000> : vector<1xf32>
    %1065 = vector.multi_reduction <maximumf>, %1064, %cst_299 [1] : vector<1x8xf32> to vector<1xf32>
    %1066 = vector.shape_cast %1065 : vector<1xf32> to vector<1x1xf32>
    %1067 = vector.broadcast %1066 : vector<1x1xf32> to vector<1x8xf32>
    %1068 = arith.subf %1064, %1067 : vector<1x8xf32>
    %1069 = math.exp %1068 : vector<1x8xf32>
    %cst_300 = arith.constant dense<0.000000e+00> : vector<1xf32>
    %1070 = vector.multi_reduction <add>, %1069, %cst_300 [1] : vector<1x8xf32> to vector<1xf32>
    %1071 = vector.shape_cast %1070 : vector<1xf32> to vector<1x1xf32>
    %1072 = vector.broadcast %1071 : vector<1x1xf32> to vector<1x8xf32>
    %1073 = arith.divf %1069, %1072 : vector<1x8xf32>
    %1074 = arith.truncf %1061 : vector<1x128xf32> to vector<1x128xbf16>
    %c0_301 = arith.constant 0 : index
    %c0_302 = arith.constant 0 : index
    %1075 = vector.load %arg14[%c0_301, %c0_302] : memref<128x128xbf16, #tpu.memory_space<vmem>>, vector<128x128xbf16>
    %cst_303 = arith.constant dense<0.000000e+00> : vector<1x128xf32>
    %1076 = tpu.matmul %1074, %1075, %cst_303 {dimension_numbers = #tpu.dot_dimension_numbers<[1], [0], [0], [1], [0, 0, 1, 1], [], []>} : vector<1x128xbf16>, vector<128x128xbf16>, vector<1x128xf32> -> vector<1x128xf32>
    %1077 = arith.truncf %1073 : vector<1x8xf32> to vector<1x8xbf16>
    %c0_304 = arith.constant 0 : index
    %c0_305 = arith.constant 0 : index
    %1078 = vector.load %arg22[%c0_304, %c0_305] : memref<8x128xbf16, #tpu.memory_space<vmem>>, vector<8x128xbf16>
    %cst_306 = arith.constant dense<0.000000e+00> : vector<1x128xf32>
    %1079 = tpu.matmul %1077, %1078, %cst_306 {dimension_numbers = #tpu.dot_dimension_numbers<[1], [0], [0], [1], [0, 0, 1, 1], [], []>} : vector<1x8xbf16>, vector<8x128xbf16>, vector<1x128xf32> -> vector<1x128xf32>
    %1080 = arith.addf %1076, %1079 : vector<1x128xf32>
    %1081 = arith.addf %1080, %585 : vector<1x128xf32>
    %1082 = math.tanh %1081 : vector<1x128xf32>
    %1083 = arith.truncf %1082 : vector<1x128xf32> to vector<1x128xbf16>
    %c0_307 = arith.constant 0 : index
    %c0_308 = arith.constant 0 : index
    %1084 = vector.load %arg17[%c0_307, %c0_308] : memref<128x128xbf16, #tpu.memory_space<vmem>>, vector<128x128xbf16>
    %cst_309 = arith.constant dense<0.000000e+00> : vector<1x128xf32>
    %1085 = tpu.matmul %1083, %1084, %cst_309 {dimension_numbers = #tpu.dot_dimension_numbers<[1], [0], [0], [1], [0, 0, 1, 1], [], []>} : vector<1x128xbf16>, vector<128x128xbf16>, vector<1x128xf32> -> vector<1x128xf32>
    %1086 = arith.addf %1085, %586 : vector<1x128xf32>
    %cst_310 = arith.constant dense<0xFF800000> : vector<1xf32>
    %1087 = vector.multi_reduction <maximumf>, %1086, %cst_310 [1] : vector<1x128xf32> to vector<1xf32>
    %1088 = vector.shape_cast %1087 : vector<1xf32> to vector<1x1xf32>
    %1089 = vector.broadcast %1088 : vector<1x1xf32> to vector<1x128xf32>
    %1090 = arith.subf %1086, %1089 : vector<1x128xf32>
    %1091 = math.exp %1090 : vector<1x128xf32>
    %cst_311 = arith.constant dense<0.000000e+00> : vector<1xf32>
    %1092 = vector.multi_reduction <add>, %1091, %cst_311 [1] : vector<1x128xf32> to vector<1xf32>
    %1093 = vector.shape_cast %1092 : vector<1xf32> to vector<1x1xf32>
    %cst_312 = arith.constant 1.000000e+00 : f32
    %1094 = vector.broadcast %cst_312 : f32 to vector<1x1xf32>
    %1095 = arith.divf %1094, %1093 : vector<1x1xf32>
    %1096 = vector.broadcast %1088 : vector<1x1xf32> to vector<1x128xf32>
    %1097 = arith.cmpf oeq, %1086, %1096 : vector<1x128xf32>
    %c128_i32_313 = arith.constant 128 : i32
    %1098 = vector.broadcast %c128_i32_313 : i32 to vector<1x128xi32>
    %1099 = arith.select %1097, %581, %1098 : vector<1x128xi1>, vector<1x128xi32>
    %cst_314 = arith.constant dense<2147483647> : vector<1xi32>
    %1100 = vector.multi_reduction <minsi>, %1099, %cst_314 [1] : vector<1x128xi32> to vector<1xi32>
    %1101 = vector.shape_cast %1100 : vector<1xi32> to vector<1x1xi32>
    %c5_i32_315 = arith.constant 5 : i32
    %1102 = vector.broadcast %c5_i32_315 : i32 to vector<1x6xi32>
    %1103 = arith.cmpi eq, %582, %1102 : vector<1x6xi32>
    %1104 = vector.shape_cast %1101 : vector<1x1xi32> to vector<1x1xi32>
    %1105 = vector.broadcast %1104 : vector<1x1xi32> to vector<1x6xi32>
    %1106 = arith.select %1103, %1105, %1018 : vector<1x6xi1>, vector<1x6xi32>
    %c5_i32_316 = arith.constant 5 : i32
    %1107 = vector.broadcast %c5_i32_316 : i32 to vector<1x6xi32>
    %1108 = arith.cmpi eq, %582, %1107 : vector<1x6xi32>
    %1109 = vector.shape_cast %1095 : vector<1x1xf32> to vector<1x1xf32>
    %1110 = vector.broadcast %1109 : vector<1x1xf32> to vector<1x6xf32>
    %1111 = arith.select %1108, %1110, %1023 : vector<1x6xi1>, vector<1x6xf32>
    %c0_317 = arith.constant 0 : index
    %c0_318 = arith.constant 0 : index
    %1112 = vector.load %arg19[%c0_317, %c0_318] : memref<1x6xi32, #tpu.memory_space<vmem>>, vector<1x6xi32>
    tpu.vector_store %arg19[%c0_317, %c0_318], %1106 {strides = array<i32>} : memref<1x6xi32, #tpu.memory_space<vmem>>, vector<1x6xi32>,
    %c0_319 = arith.constant 0 : index
    %c0_320 = arith.constant 0 : index
    %1113 = vector.load %arg20[%c0_319, %c0_320] : memref<1x6xf32, #tpu.memory_space<vmem>>, vector<1x6xf32>
    tpu.vector_store %arg20[%c0_319, %c0_320], %1111 {strides = array<i32>} : memref<1x6xf32, #tpu.memory_space<vmem>>, vector<1x6xf32>,
    return
  }
}

</mosaic_0001>

<bundles_post_ra>
// kernel: greedy_search_decode.1
= control target key start
LH: loop header
LB: loop body
LE: loop exit
PB: predicated region body
PF: predicated region fallthrough
CT: control target
= control target key end

     0   :  { %s14299_s0 = inlined_call_operand.hbm [shape: s32[8], index: 0, kind: input, shape index: {}]   ;;  %s14300_s1 = inlined_call_operand.hbm [shape: bf16[128,128], index: 1, kind: input, shape index: {}]   ;;  %s14301_s2 = inlined_call_operand.hbm [shape: bf16[128,384], index: 2, kind: input, shape index: {}]   ;;  %s14302_s3 = inlined_call_operand.hbm [shape: bf16[128,384], index: 3, kind: input, shape index: {}]   ;;  %s14303_s4 = inlined_call_operand.vmem [shape: f32[1,384], index: 4, kind: input, shape index: {}]   ;;  %s14304_s5 = inlined_call_operand.vmem [shape: f32[1,384], index: 5, kind: input, shape index: {}]   ;;  %s14305_s6 = inlined_call_operand.hbm [shape: bf16[128,384], index: 6, kind: input, shape index: {}]   ;;  %s14306_s7 = inlined_call_operand.hbm [shape: bf16[128,384], index: 7, kind: input, shape index: {}]   ;;  %s14307_s8 = inlined_call_operand.vmem [shape: f32[1,384], index: 8, kind: input, shape index: {}]   ;;  %s14308_s9 = inlined_call_operand.vmem [shape: f32[1,384], index: 9, kind: input, shape index: {}]   ;;  %s14309_s10 = inlined_call_operand.hbm [shape: bf16[128,384], index: 10, kind: input, shape index: {}]   ;;  %s14310_s11 = inlined_call_operand.hbm [shape: bf16[128,384], index: 11, kind: input, shape index: {}]   ;;  %s14311_s12 = inlined_call_operand.vmem [shape: f32[1,384], index: 12, kind: input, shape index: {}]   ;;  %s14312_s13 = inlined_call_operand.vmem [shape: f32[1,384], index: 13, kind: input, shape index: {}]   ;;  %s14313_s14 = inlined_call_operand.hbm [shape: bf16[128,128], index: 14, kind: input, shape index: {}]   ;;  %s14314_s15 = inlined_call_operand.hbm [shape: bf16[128,128], index: 15, kind: input, shape index: {}]   ;;  %s14315_s16 = inlined_call_operand.vmem [shape: f32[1,128], index: 16, kind: input, shape index: {}]   ;;  %s14316_s17 = inlined_call_operand.hbm [shape: bf16[128,128], index: 17, kind: input, shape index: {}]   ;;  %s14317_s18 = inlined_call_operand.vmem [shape: f32[1,128], index: 18, kind: input, shape index: {}]   ;;  %s14318_s19 = inlined_call_operand.hbm [shape: s32[1,6], index: 19, kind: output, shape index: {0}]   ;;  %s14319_s20 = inlined_call_operand.hbm [shape: f32[1,6], index: 20, kind: output, shape index: {1}]  }
   0x1   :  { %14400 = sst [smem:[#allocation72_spill]] %s14299_s0 }
   0x2   :  { %14401 = sst [smem:[#allocation73_spill]] %s14300_s1 }
   0x3   :  { %14402 = sst [smem:[#allocation74_spill]] %s14301_s2 }
   0x4   :  { %14403 = sst [smem:[#allocation75_spill]] %s14302_s3 }
   0x5   :  { %14404 = sst [smem:[#allocation76_spill]] %s14303_s4 }
   0x6   :  { %26 = vsyncpa [#allocation8], 0 }
   0x7   :  { %27 = vsyncpa [#allocation6], 0 }
   0x8   :  { %28 = vsyncpa [#allocation11], 0 }
   0x9   :  { %29 = vsyncpa [#allocation14], 0 }
   0xa   :  { %30 = vsyncpa [#allocation17], 0 }
   0xb   :  { %31 = vsyncpa [#allocation20], 0 }
   0xc   :  { %32 = vsyncpa [#allocation23], 0 }
   0xd   :  { %33 = vsyncpa [#allocation7], 0 }
   0xe   :  { %34 = vsyncpa [#allocation26], 0  ;;  %s11965_s1 = smov [#allocation10]  }
   0xf   :  { %s60_s22 = sshll.u32 %s11965_s1, 4  ;;  %s61_s22 = int_to_ptr.vmem [resolvable:$true] %s60_s22 }
  0x10   :  { %s11707_s23 = scalar_lea.vmem %s61_s22, 3072  ;;  %p11712_p1 = scmp.lt.s32.totalorder %s61_s22, %s61_s22 }
  0x11   :  { %p11708_p0 = scmp.ne.s32.totalorder %s61_s22, %s11707_s23  ;;  %p11713_p2 = scmp.lt.s32.totalorder %s11707_s23, %s11707_s23 }
  0x13   :  { %p11714_p3 = por %p11713_p2, %p11712_p1 }
  0x15   :  { %p11715_p4 = pnand %p11714_p3, %p11708_p0 }
  0x17   :  { %11718 = shalt.err (!%p11715_p4)
}
  0x18   :  { %s11966_s24 = smov 192   ;;  %s11967_s2 = smov 12  }
  0x19   :  { %s14405_s26 = sld [smem:[#allocation74_spill]]  ;;  %s11968_s27 = smov [#allocation13]  }
  0x1a   :  { %s88_s28 = sshll.u32 %s11968_s27, 4  ;;  %s11969_s4 = smov [#allocation16]   ;;  %s89_s28 = int_to_ptr.vmem [resolvable:$true] %s88_s28 }
  0x1b   :  { %s116_s29 = sshll.u32 %s11969_s4, 4  ;;  %s11727_s30 = scalar_lea.vmem %s89_s28, 3072  ;;  %s117_s29 = int_to_ptr.vmem [resolvable:$true] %s116_s29 }
  0x1c   :  { %p11728_p5 = scmp.ne.s32.totalorder %s89_s28, %s11727_s30  ;;  %p11732_p6 = scmp.lt.s32.totalorder %s89_s28, %s89_s28 }
  0x1d   :  { %p11733_p7 = scmp.lt.s32.totalorder %s11727_s30, %s11727_s30 }
  0x1f   :  { %66 = dma.hbm_to_vmem [thread:$0]  %s14405_s26, 3072, %s61_s22, [#allocation11], %s11966_s24, %s11966_s24, %s11967_s2  }
  0x20   :  { %p11734_p8 = por %p11733_p7, %p11732_p6 }
  0x22   :  { %p11735_p9 = pnand %p11734_p8, %p11728_p5 }
  0x24   :  { %11738 = shalt.err (!%p11735_p9)
}
  0x25   :  { %94 = dma.hbm_to_vmem [thread:$0]  %s14305_s6, 3072, %s89_s28, [#allocation14], %s11966_s24, %s11966_s24, %s11967_s2  }
  0x26   :  { %s11747_s1 = scalar_lea.vmem %s117_s29, 3072  ;;  %p11752_p11 = scmp.lt.s32.totalorder %s117_s29, %s117_s29 }
  0x27   :  { %p11748_p10 = scmp.ne.s32.totalorder %s117_s29, %s11747_s1  ;;  %p11753_p12 = scmp.lt.s32.totalorder %s11747_s1, %s11747_s1 }
  0x29   :  { %p11754_p13 = por %p11753_p12, %p11752_p11 }
  0x2b   :  { %p11755_p0 = pnand %p11754_p13, %p11748_p10 }
  0x2d   :  { %11758 = shalt.err (!%p11755_p0)
}
  0x2e   :  { %122 = dma.hbm_to_vmem [thread:$0]  %s14309_s10, 3072, %s117_s29, [#allocation17], %s11966_s24, %s11966_s24, %s11967_s2  }
  0x2f   :  { %s11970_s25 = smov [#allocation19]  }
  0x30   :  { %s144_s3 = sshll.u32 %s11970_s25, 4  ;;  %s145_s3 = int_to_ptr.vmem [resolvable:$true] %s144_s3 }
  0x31   :  { %s11767_s26 = scalar_lea.vmem %s145_s3, 1024  ;;  %p11772_p2 = scmp.lt.s32.totalorder %s145_s3, %s145_s3 }
  0x32   :  { %p11768_p1 = scmp.ne.s32.totalorder %s145_s3, %s11767_s26  ;;  %p11773_p3 = scmp.lt.s32.totalorder %s11767_s26, %s11767_s26 }
  0x34   :  { %p11774_p4 = por %p11773_p3, %p11772_p2 }
  0x36   :  { %p11775_p5 = pnand %p11774_p4, %p11768_p1 }
  0x38   :  { %11778 = shalt.err (!%p11775_p5)
}
  0x39   :  { %s11971_s6 = smov 64   ;;  %s11972_s27 = smov 4  }
  0x3a   :  { %150 = dma.hbm_to_vmem [thread:$0]  %s14313_s14, 1024, %s145_s3, [#allocation20], %s11971_s6, %s11971_s6, %s11972_s27  }
  0x3b   :  { %s11973_s10 = smov [#allocation5]   ;;  %s14406_s0 = sld [smem:[#allocation72_spill]] }
  0x3c   :  { %s11974_s21 = smov [#allocation9]   ;;  %s11975_s22 = smov [#allocation12]  }
  0x3d   :  { %s48_s1 = sshll.u32 %s11974_s21, 4  ;;  %s72_s23 = sshll.u32 %s11975_s22, 4  ;;  %s49_s1 = int_to_ptr.vmem [resolvable:$true] %s48_s1  ;;  %s73_s23 = int_to_ptr.vmem [resolvable:$true] %s72_s23 }
  0x3e   :  { %s11795_s25 = scalar_lea.vmem %s49_s1, 1024  ;;  %p11800_p7 = scmp.lt.s32.totalorder %s49_s1, %s49_s1 }
  0x3f   :  { %p11796_p6 = scmp.ne.s32.totalorder %s49_s1, %s11795_s25  ;;  %p11801_p8 = scmp.lt.s32.totalorder %s11795_s25, %s11795_s25 }
  0x41   :  { %42 = dma.hbm_to_smem %s14406_s0, 16, %s11973_s10, [#allocation8]  }
  0x42   :  { %p11802_p9 = por %p11801_p8, %p11800_p7 }
  0x44   :  { %p11803_p10 = pnand %p11802_p9, %p11796_p6 }
  0x46   :  { %11806 = shalt.err (!%p11803_p10)
}
  0x47   :  { %s14407_s26 = sld [smem:[#allocation73_spill]]  ;;  %s11815_s28 = scalar_lea.vmem %s73_s23, 3072 }
  0x48   :  { %p11816_p11 = scmp.ne.s32.totalorder %s73_s23, %s11815_s28  ;;  %p11820_p12 = scmp.lt.s32.totalorder %s73_s23, %s73_s23 }
  0x49   :  { %p11821_p13 = scmp.lt.s32.totalorder %s11815_s28, %s11815_s28 }
  0x4b   :  { %p11822_p0 = por %p11821_p13, %p11820_p12 }
  0x4d   :  { %54 = dma.hbm_to_vmem [thread:$0]  %s14407_s26, 1024, %s49_s1, [#allocation6], %s11971_s6, %s11971_s6, %s11972_s27  }
  0x4e   :  { %p11823_p1 = pnand %p11822_p0, %p11816_p11 }
  0x50   :  { %11826 = shalt.err (!%p11823_p1)
}
  0x51   :  { %s14408_s29 = sld [smem:[#allocation75_spill]]  ;;  %s11976_s30 = smov [#allocation15]  }
  0x52   :  { %s100_s0 = sshll.u32 %s11976_s30, 4  ;;  %s11977_s21 = smov [#allocation18]   ;;  %s101_s0 = int_to_ptr.vmem [resolvable:$true] %s100_s0 }
  0x53   :  { %s128_s1 = sshll.u32 %s11977_s21, 4  ;;  %s11835_s22 = scalar_lea.vmem %s101_s0, 3072  ;;  %s129_s1 = int_to_ptr.vmem [resolvable:$true] %s128_s1 }
  0x54   :  { %p11836_p2 = scmp.ne.s32.totalorder %s101_s0, %s11835_s22  ;;  %p11840_p3 = scmp.lt.s32.totalorder %s101_s0, %s101_s0 }
  0x55   :  { %p11841_p4 = scmp.lt.s32.totalorder %s11835_s22, %s11835_s22 }
  0x57   :  { %78 = dma.hbm_to_vmem [thread:$0]  %s14408_s29, 3072, %s73_s23, [#allocation11], %s11966_s24, %s11966_s24, %s11967_s2  }
  0x58   :  { %p11842_p5 = por %p11841_p4, %p11840_p3 }
  0x5a   :  { %p11843_p6 = pnand %p11842_p5, %p11836_p2 }
  0x5c   :  { %11846 = shalt.err (!%p11843_p6)
}
  0x5d   :  { %106 = dma.hbm_to_vmem [thread:$0]  %s14306_s7, 3072, %s101_s0, [#allocation14], %s11966_s24, %s11966_s24, %s11967_s2  }
  0x5e   :  { %s11855_s23 = scalar_lea.vmem %s129_s1, 3072  ;;  %p11860_p8 = scmp.lt.s32.totalorder %s129_s1, %s129_s1 }
  0x5f   :  { %p11856_p7 = scmp.ne.s32.totalorder %s129_s1, %s11855_s23  ;;  %p11861_p9 = scmp.lt.s32.totalorder %s11855_s23, %s11855_s23 }
  0x61   :  { %p11862_p10 = por %p11861_p9, %p11860_p8 }
  0x63   :  { %p11863_p11 = pnand %p11862_p10, %p11856_p7 }
  0x65   :  { %11866 = shalt.err (!%p11863_p11)
}
  0x66   :  { %134 = dma.hbm_to_vmem [thread:$0]  %s14310_s11, 3072, %s129_s1, [#allocation17], %s11966_s24, %s11966_s24, %s11967_s2  }
  0x67   :  { %s11978_s28 = smov [#allocation21]   ;;  %s11979_s10 = smov [#allocation22]  }
  0x68   :  { %s156_s4 = sshll.u32 %s11978_s28, 4  ;;  %s170_s7 = sshll.u32 %s11979_s10, 4  ;;  %s157_s4 = int_to_ptr.vmem [resolvable:$true] %s156_s4  ;;  %s171_s7 = int_to_ptr.vmem [resolvable:$true] %s170_s7 }
  0x69   :  { %s11875_s29 = scalar_lea.vmem %s157_s4, 1024  ;;  %p11880_p13 = scmp.lt.s32.totalorder %s157_s4, %s157_s4 }
  0x6a   :  { %p11876_p12 = scmp.ne.s32.totalorder %s157_s4, %s11875_s29  ;;  %p11881_p0 = scmp.lt.s32.totalorder %s11875_s29, %s11875_s29 }
  0x6c   :  { %p11882_p1 = por %p11881_p0, %p11880_p13 }
  0x6e   :  { %p11883_p2 = pnand %p11882_p1, %p11876_p12 }
  0x70   :  { %11886 = shalt.err (!%p11883_p2)
}
  0x71   :  { %162 = dma.hbm_to_vmem [thread:$0]  %s14314_s15, 1024, %s157_s4, [#allocation20], %s11971_s6, %s11971_s6, %s11972_s27  }
  0x72   :  { %s11895_s11 = scalar_lea.vmem %s171_s7, 1024  ;;  %p11900_p4 = scmp.lt.s32.totalorder %s171_s7, %s171_s7 }
  0x73   :  { %p11896_p3 = scmp.ne.s32.totalorder %s171_s7, %s11895_s11  ;;  %p11901_p5 = scmp.lt.s32.totalorder %s11895_s11, %s11895_s11 }
  0x75   :  { %p11902_p6 = por %p11901_p5, %p11900_p4 }
  0x77   :  { %p11903_p7 = pnand %p11902_p6, %p11896_p3 }
  0x79   :  { %11906 = shalt.err (!%p11903_p7)
}
  0x7a   :  { %176 = dma.hbm_to_vmem [thread:$0]  %s14316_s17, 1024, %s171_s7, [#allocation23], %s11971_s6, %s11971_s6, %s11972_s27  }
  0x7b   :  { %11947 = dma.done.wait [#allocation8], 16  }
  0x7c   :  { %11948 = vsyncadd [#allocation8], 4294967280 }
  0x7d   :  { %11949 = dma.done.wait [#allocation6], 1024  }
  0x7e   :  { %11950 = vsyncadd [#allocation6], 4294966272 }
  0x7f   :  { %11951 = dma.done.wait [#allocation11], 6144  }
  0x80   :  { %11952 = vsyncadd [#allocation11], 4294961152 }
  0x81   :  { %11953 = dma.done.wait [#allocation14], 6144  }
  0x82   :  { %11954 = vsyncadd [#allocation14], 4294961152 }
  0x83   :  { %11955 = dma.done.wait [#allocation17], 6144  }
  0x84   :  { %11956 = vsyncadd [#allocation17], 4294961152 }
  0x85   :  { %11957 = dma.done.wait [#allocation20], 2048  }
  0x86   :  { %11958 = vsyncadd [#allocation20], 4294965248 }
  0x87   :  { %11959 = dma.done.wait [#allocation23], 1024  }
  0x88   :  { %11960 = vsyncadd [#allocation23], 4294966272 }
  0x89   :  { %212 = sfence }
  0x8a   :  { %v10807_v0 = vld [vmem:[#allocation9 + $0x38] sm:$0xff]   ;;  %v14362_v1 = vmov 0.0   ;;  %v214_v2 = vlaneseq  ;;  %v10808_v3 = vld [vmem:[#allocation9 + $0x30] sm:$0xff]   ;;  %vm11981_vm0 = vmmov 0   ;;  %v10809_v5 = vld [vmem:[#allocation9 + $0x28] sm:$0xff]   ;;  %s219_s15 = sld [smem:[#allocation5]] }
  0x8b   :  { %9822 = vmatprep.subr.bf16.mxu0 %v14362_v1  ;;  %9838 = vmatprep.mubr.msk.bf16.mxu0 %vm11981_vm0, %v14362_v1  ;;  %v10810_v6 = vld [vmem:[#allocation9 + $0x20] sm:$0xff]   ;;  %s8750_s17 = sld [smem:[#allocation5 + $0x1]]  ;;  %v10815_v7 = vld [vmem:[#allocation10 + $0xac] ss:$12 sps:$4 sm:$0xff]   ;;  %v10817_v8 = vld [vmem:[#allocation10 + $0xa8] ss:$12 sps:$4 sm:$0xff]  }
  0x8c   :  { %9823 = vmatpush3.bf16.msra.mxu0 %v10807_v0  ;;  %v12158_v4 = vshrl.u32 %v214_v2, 7  ;;  %s8751_s6 = sld [smem:[#allocation5 + $0x2]]  ;;  %v10811_v9 = vld [vmem:[#allocation9 + $0x18] sm:$0xff]   ;;  %536 = vmatprep.subr.bf16.mxu1 %v10815_v7  ;;  %v10819_v10 = vld [vmem:[#allocation10 + $0x94] ss:$12 sps:$4 sm:$0xff]   ;;  %v10813_v29 = vld [vmem:[#allocation9 + $0x8] sm:$0xff]  }
  0x8d   :  { %9824 = vmatprep.subr.bf16.mxu0 %v14362_v1  ;;  %s8752_s27 = sld [smem:[#allocation5 + $0x3]]  ;;  %537 = vmatpush1.bf16.msra.mxu1 %v10817_v8  ;;  %v10821_v12 = vld [vmem:[#allocation10 + $0x90] ss:$12 sps:$4 sm:$0xff]   ;;  %v10825_v21 = vld [vmem:[#allocation10 + $0x78] ss:$12 sps:$4 sm:$0xff]   ;;  %v12193_v30 = vand.u32 127, %v214_v2 }
  0x8e   :  { %vm218_vm1 = vcmp.eq.s32.totalorder %v12158_v4, 0  ;;  %vm222_vm2 = vcmp.eq.s32.totalorder %v12158_v4, 1  ;;  %vm226_vm3 = vcmp.eq.s32.totalorder %v12158_v4, 2  ;;  %vm230_vm4 = vcmp.eq.s32.totalorder %v12158_v4, 3  ;;  %s12166_s21 = sld [smem:[#allocation5 + $0x4]]  ;;  %538 = vmatprep.subr.bf16.mxu1 %v10819_v10  ;;  %v10812_v15 = vld [vmem:[#allocation9 + $0x10] sm:$0xff]  }
  0x8f   :  { %s12168_s1 = sld [smem:[#allocation5 + $0x5]]  ;;  %vm234_vm5 = vcmp.eq.s32.totalorder %v12158_v4, 4  ;;  %vm238_vm6 = vcmp.eq.s32.totalorder %v12158_v4, 5  ;;  %v10823_v18 = vld [vmem:[#allocation10 + $0x7c] ss:$12 sps:$4 sm:$0xff]   ;;  %vm242_vm7 = vcmp.eq.s32.totalorder %v12158_v4, 6 }
  0x90   :  { %9825 = vmatpush3.bf16.msra.mxu0 %v10808_v3  ;;  %v220_v11 = vstv %s219_s15  ;;  %s12170_s22 = sld [smem:[#allocation5 + $0x6]]  ;;  %v10827_v24 = vld [vmem:[#allocation10 + $0x64] ss:$12 sps:$4 sm:$0xff]   ;;  %vm246_vm8 = vcmp.eq.s32.totalorder %v12158_v4, 7  ;;  %14409 = vst [vmem:[#allocation36_spill] sm:$0xff] %v12193_v30  ;;  %v14322_v54 = vmov 0  }
  0x91   :  { %9826 = vmatprep.subr.bf16.mxu0 %v14362_v1  ;;  %v221_v13 = vsel %vm218_vm1, %v220_v11, 0  ;;  %v224_v14 = vstv %s8750_s17  ;;  %s12175_s25 = sld [smem:[#allocation5 + $0x7]]  ;;  %539 = vmatpush1.bf16.msra.mxu1 %v10821_v12  ;;  %v10829_v33 = vld [vmem:[#allocation10 + $0x60] ss:$12 sps:$4 sm:$0xff]   ;;  %v10833_v36 = vld [vmem:[#allocation10 + $0x48] ss:$12 sps:$4 sm:$0xff]  }
  0x92   :  { %v225_v16 = vsel %vm222_vm2, %v224_v14, %v221_v13  ;;  %v228_v17 = vstv %s8751_s6  ;;  %540 = vmatprep.subr.bf16.mxu1 %v10823_v18  ;;  %v10831_v35 = vld [vmem:[#allocation10 + $0x4c] ss:$12 sps:$4 sm:$0xff]   ;;  %v10814_v37 = vld [vmem:[#allocation9] sm:$0xff]   ;;  %v10818_v39 = vld [vmem:[#allocation10 + $0xb0] ss:$12 sps:$4 sm:$0xff]   ;;  %568 = vmatprep.mubr.bf16.mxu1 %v14322_v54  ;;  %s14410_s3 = sld [smem:[#allocation76_spill]] }
  0x93   :  { %v229_v19 = vsel %vm226_vm3, %v228_v17, %v225_v16  ;;  %v232_v20 = vstv %s8752_s27  ;;  %v10835_v38 = vld [vmem:[#allocation10 + $0x34] ss:$12 sps:$4 sm:$0xff]   ;;  %v10837_v40 = vld [vmem:[#allocation10 + $0x30] ss:$12 sps:$4 sm:$0xff]   ;;  %v10841_v42 = vld [vmem:[#allocation10 + $0x18] ss:$12 sps:$4 sm:$0xff]  }
  0x94   :  { %9827 = vmatpush3.bf16.msra.mxu0 %v10809_v5  ;;  %v233_v22 = vsel %vm230_vm4, %v232_v20, %v229_v19  ;;  %v236_v23 = vstv %s12166_s21  ;;  %v10839_v41 = vld [vmem:[#allocation10 + $0x1c] ss:$12 sps:$4 sm:$0xff]   ;;  %v10822_v43 = vld [vmem:[#allocation10 + $0x98] ss:$12 sps:$4 sm:$0xff]   ;;  %v14320_v45 = vmov 1.0|1.0  }
  0x95   :  { %9828 = vmatprep.subr.bf16.mxu0 %v14362_v1  ;;  %v237_v25 = vsel %vm234_vm5, %v236_v23, %v233_v22  ;;  %v240_v26 = vstv %s12168_s1  ;;  %541 = vmatpush1.bf16.msra.mxu1 %v10825_v21  ;;  %v10843_v44 = vld [vmem:[#allocation10 + $0x4] ss:$12 sps:$4 sm:$0xff]   ;;  %v10845_v46 = vld [vmem:[#allocation10] ss:$12 sps:$4 sm:$0xff]   ;;  %v10830_v48 = vld [vmem:[#allocation10 + $0x68] ss:$12 sps:$4 sm:$0xff]  }
  0x96   :  { %v241_v27 = vsel %vm238_vm6, %v240_v26, %v237_v25  ;;  %v244_v28 = vstv %s12170_s22  ;;  %542 = vmatprep.subr.bf16.mxu1 %v10827_v24  ;;  %v10826_v47 = vld [vmem:[#allocation10 + $0x80] ss:$12 sps:$4 sm:$0xff]   ;;  %v10834_v49 = vld [vmem:[#allocation10 + $0x50] ss:$12 sps:$4 sm:$0xff]   ;;  %v10838_v50 = vld [vmem:[#allocation10 + $0x38] ss:$12 sps:$4 sm:$0xff]  }
  0x97   :  { %v245_v31 = vsel %vm242_vm7, %v244_v28, %v241_v27  ;;  %v248_v32 = vstv %s12175_s25  ;;  %v10842_v51 = vld [vmem:[#allocation10 + $0x20] ss:$12 sps:$4 sm:$0xff]   ;;  %v10846_v52 = vld [vmem:[#allocation10 + $0x8] ss:$12 sps:$4 sm:$0xff]   ;;  %v10850_v57 = vld [vmem:[#allocation13 + $0xb0] ss:$12 sps:$4 sm:$0xff]  }
  0x98   :  { %9829 = vmatpush3.bf16.msra.mxu0 %v10810_v6  ;;  %v249_v34 = vsel %vm246_vm8, %v248_v32, %v245_v31  ;;  %v10849_v53 = vld [vmem:[#allocation13 + $0xac] ss:$12 sps:$4 sm:$0xff]   ;;  %v10847_v56 = vld [vmem:[#allocation13 + $0xa8] ss:$12 sps:$4 sm:$0xff]   ;;  %v10851_v62 = vld [vmem:[#allocation13 + $0x90] ss:$12 sps:$4 sm:$0xff]  }
  0x99   :  { %9830 = vmatprep.subr.bf16.mxu0 %v14362_v1  ;;  %vm250_vm9 = vcmp.eq.s32.totalorder %v12193_v30, %v249_v34  ;;  %543 = vmatpush1.bf16.msra.mxu1 %v10829_v33  ;;  %v10853_v59 = vld [vmem:[#allocation13 + $0x94] ss:$12 sps:$4 sm:$0xff]   ;;  %v10854_v63 = vld [vmem:[#allocation13 + $0x98] ss:$12 sps:$4 sm:$0xff]   ;;  %v10857_v0 = vld [vmem:[#allocation13 + $0x7c] ss:$12 sps:$4 sm:$0xff]  }
  0x9a   :  { %544 = vmatprep.subr.bf16.mxu1 %v10831_v35  ;;  %vm8766_vm10 = vmpackc.low %vm250_vm9, %vm250_vm9  ;;  %v10855_v3 = vld [vmem:[#allocation13 + $0x78] ss:$12 sps:$4 sm:$0xff]   ;;  %v10858_v5 = vld [vmem:[#allocation13 + $0x80] ss:$12 sps:$4 sm:$0xff]   ;;  %vm3664_vm11 = vcmask 1040384   ;;  %vm3666_vm12 = vcmask 1041408  }
  0x9b   :  { %v10861_v6 = vld [vmem:[#allocation13 + $0x64] ss:$12 sps:$4 sm:$0xff]   ;;  %v10859_v7 = vld [vmem:[#allocation13 + $0x60] ss:$12 sps:$4 sm:$0xff]   ;;  %v10862_v8 = vld [vmem:[#allocation13 + $0x68] ss:$12 sps:$4 sm:$0xff]  }
  0x9c   :  { %9831 = vmatpush3.bf16.msra.mxu0 %v10811_v9  ;;  %v10865_v9 = vld [vmem:[#allocation13 + $0x4c] ss:$12 sps:$4 sm:$0xff]   ;;  %v10863_v10 = vld [vmem:[#allocation13 + $0x48] ss:$12 sps:$4 sm:$0xff]   ;;  %v10866_v11 = vld [vmem:[#allocation13 + $0x50] ss:$12 sps:$4 sm:$0xff]  }
  0x9d   :  { %9832 = vmatprep.subr.bf16.mxu0 %v14362_v1  ;;  %545 = vmatpush1.bf16.msra.mxu1 %v10833_v36  ;;  %v10869_v12 = vld [vmem:[#allocation13 + $0x34] ss:$12 sps:$4 sm:$0xff]   ;;  %v10867_v13 = vld [vmem:[#allocation13 + $0x30] ss:$12 sps:$4 sm:$0xff]   ;;  %v10870_v14 = vld [vmem:[#allocation13 + $0x38] ss:$12 sps:$4 sm:$0xff]  }
  0x9e   :  { %546 = vmatprep.subr.bf16.mxu1 %v10835_v38  ;;  %v10871_v16 = vld [vmem:[#allocation13 + $0x18] ss:$12 sps:$4 sm:$0xff]   ;;  %v10874_v17 = vld [vmem:[#allocation13 + $0x20] ss:$12 sps:$4 sm:$0xff]   ;;  %v10878_v20 = vld [vmem:[#allocation13 + $0x8] ss:$12 sps:$4 sm:$0xff]  }
  0x9f   :  { %v10877_v18 = vld [vmem:[#allocation13 + $0x4] ss:$12 sps:$4 sm:$0xff]   ;;  %v10875_v19 = vld [vmem:[#allocation13] ss:$12 sps:$4 sm:$0xff]   ;;  %v10879_v23 = vld [vmem:[#allocation16 + $0xa8] ss:$12 sps:$4 sm:$0xff]  }
  0xa0   :  { %9833 = vmatpush3.bf16.msra.mxu0 %v10812_v15  ;;  %v10873_v15 = vld [vmem:[#allocation13 + $0x1c] ss:$12 sps:$4 sm:$0xff]   ;;  %v10881_v21 = vld [vmem:[#allocation16 + $0xac] ss:$12 sps:$4 sm:$0xff]   ;;  %v10885_v24 = vld [vmem:[#allocation16 + $0x94] ss:$12 sps:$4 sm:$0xff]  }
  0xa1   :  { %9834 = vmatprep.subr.bf16.mxu0 %v14362_v1  ;;  %547 = vmatpush1.bf16.msra.mxu1 %v10837_v40  ;;  %v10882_v22 = vld [vmem:[#allocation16 + $0xb0] ss:$12 sps:$4 sm:$0xff]   ;;  %v10886_v25 = vld [vmem:[#allocation16 + $0x98] ss:$12 sps:$4 sm:$0xff]   ;;  %v10890_v28 = vld [vmem:[#allocation16 + $0x80] ss:$12 sps:$4 sm:$0xff]  }
  0xa2   :  { %548 = vmatprep.subr.bf16.mxu1 %v10839_v41  ;;  %v10883_v26 = vld [vmem:[#allocation16 + $0x90] ss:$12 sps:$4 sm:$0xff]   ;;  %v10887_v31 = vld [vmem:[#allocation16 + $0x78] ss:$12 sps:$4 sm:$0xff]   ;;  %v10894_v33 = vld [vmem:[#allocation16 + $0x68] ss:$12 sps:$4 sm:$0xff]  }
  0xa3   :  { %v10889_v27 = vld [vmem:[#allocation16 + $0x7c] ss:$12 sps:$4 sm:$0xff]   ;;  %v10893_v32 = vld [vmem:[#allocation16 + $0x64] ss:$12 sps:$4 sm:$0xff]   ;;  %v10891_v34 = vld [vmem:[#allocation16 + $0x60] ss:$12 sps:$4 sm:$0xff]  }
  0xa4   :  { %9835 = vmatpush3.bf16.msra.mxu0 %v10813_v29  ;;  %v11591_v29 = vld [vmem:[#allocation9] sm:$0xff]   ;;  %v10897_v35 = vld [vmem:[#allocation16 + $0x4c] ss:$12 sps:$4 sm:$0xff]   ;;  %v10898_v36 = vld [vmem:[#allocation16 + $0x50] ss:$12 sps:$4 sm:$0xff]   ;;  %vm3668_vm13 = vcmask 1042432  }
  0xa5   :  { %9836 = vmatprep.subr.bf16.mxu0 %v14362_v1  ;;  %549 = vmatpush1.bf16.msra.mxu1 %v10841_v42  ;;  %v10901_v38 = vld [vmem:[#allocation16 + $0x34] ss:$12 sps:$4 sm:$0xff]   ;;  %v10899_v40 = vld [vmem:[#allocation16 + $0x30] ss:$12 sps:$4 sm:$0xff]   ;;  %vm3670_vm14 = vcmask 1043456   ;;  %vm3672_vm15 = vcmask 1044480  }
  0xa6   :  { %550 = vmatprep.subr.bf16.mxu1 %v10843_v44  ;;  %v10905_v41 = vld [vmem:[#allocation16 + $0x1c] ss:$12 sps:$4 sm:$0xff]   ;;  %v10906_v42 = vld [vmem:[#allocation16 + $0x20] ss:$12 sps:$4 sm:$0xff]   ;;  %v10909_v44 = vld [vmem:[#allocation16 + $0x4] ss:$12 sps:$4 sm:$0xff]  }
  0xa7   :  { %v12756_v30 = vld [vmem:[#allocation15 + $0x20] ss:$12 sps:$4 sm:$0xff]   ;;  %vm3674_vm1 = vcmask 1045504   ;;  %vm3676_vm2 = vcmask 1046528   ;;  %vm4156_vm3 = vcmask 57344   ;;  %vm4186_vm4 = vcmask 64512  }
  0xa8   :  { %9837 = vmatpush3.bf16.msra.mxu0 %v10814_v37  ;;  %v10895_v37 = vld [vmem:[#allocation16 + $0x48] ss:$12 sps:$4 sm:$0xff]   ;;  %14441 = vst [vmem:[#allocation67_spill] sm:$0xff] %v12756_v30 }
  0xa9   :  { %9842 = vmatprep.subr.bf16.mxu0 %v14362_v1  ;;  %551 = vmatpush1.bf16.msra.mxu1 %v10845_v46  ;;  %v10910_v46 = vld [vmem:[#allocation16 + $0x8] ss:$12 sps:$4 sm:$0xff]  }
  0xaa   :  { %794 = vmatprep.subr.bf16.mxu1 %v10849_v53  ;;  %v12241_v53 = vld [vmem:[#allocation12 + $0x90] ss:$12 sps:$4 sm:$0xff]  }
  0xab   :  { %9839 = vmatmul.mubr.msk.bf16.vlgmr.msra.gmra.mxu0 %vm8766_vm10, %v14320_v45 }
  0xac   :  { %9843 = vmatpush3.bf16.msra.mxu0 %v10818_v39  ;;  %9858 = vmatprep.mubr.msk.bf16.mxu0 %vm11981_vm0, %v14362_v1  ;;  %v10902_v39 = vld [vmem:[#allocation16 + $0x38] ss:$12 sps:$4 sm:$0xff]  }
  0xad   :  { %9844 = vmatprep.subr.bf16.mxu0 %v14362_v1 }
  0xb0   :  { %9845 = vmatpush3.bf16.msra.mxu0 %v10822_v43  ;;  %v10903_v43 = vld [vmem:[#allocation16 + $0x18] ss:$12 sps:$4 sm:$0xff]  }
  0xb1   :  { %9846 = vmatprep.subr.bf16.mxu0 %v14362_v1 }
  0xb4   :  { %9847 = vmatpush3.bf16.msra.mxu0 %v10826_v47  ;;  %v10907_v47 = vld [vmem:[#allocation16] ss:$12 sps:$4 sm:$0xff]  }
  0xb5   :  { %9848 = vmatprep.subr.bf16.mxu0 %v14362_v1 }
  0xb8   :  { %9849 = vmatpush3.bf16.msra.mxu0 %v10830_v48  ;;  %v12229_v48 = vld [vmem:[#allocation12 + $0xac] ss:$12 sps:$4 sm:$0xff]  }
  0xb9   :  { %9850 = vmatprep.subr.bf16.mxu0 %v14362_v1 }
  0xbc   :  { %9851 = vmatpush3.bf16.msra.mxu0 %v10834_v49  ;;  %v12231_v49 = vld [vmem:[#allocation12 + $0xa8] ss:$12 sps:$4 sm:$0xff]  }
  0xbd   :  { %9852 = vmatprep.subr.bf16.mxu0 %v14362_v1 }
  0xc0   :  { %9853 = vmatpush3.bf16.msra.mxu0 %v10838_v50  ;;  %v12233_v50 = vld [vmem:[#allocation12 + $0xb0] ss:$12 sps:$4 sm:$0xff]  }
  0xc1   :  { %9854 = vmatprep.subr.bf16.mxu0 %v14362_v1 }
  0xc4   :  { %9855 = vmatpush3.bf16.msra.mxu0 %v10842_v51  ;;  %v12237_v51 = vld [vmem:[#allocation12 + $0x94] ss:$12 sps:$4 sm:$0xff]  }
  0xc5   :  { %9856 = vmatprep.subr.bf16.mxu0 %v14362_v1 }
  0xc8   :  { %9857 = vmatpush3.bf16.msra.mxu0 %v10846_v52  ;;  %v11592_v52 = vld [vmem:[#allocation9 + $0x8] sm:$0xff]  }
  0xc9   :  { %9862 = vmatprep.subr.bf16.mxu0 %v14362_v1 }
 0x16b   :  { %v352_v55 = vpop.f32.mrf.mxu0 }
 0x16c   :  { %v12212_v58 = vpack.c.bf16 %v352_v55, %v352_v55  ;;  %v12243_v55 = vld [vmem:[#allocation12 + $0x98] ss:$12 sps:$4 sm:$0xff]  }
 0x16d   :  { %v9840_v60 = vpop.f32.mrf.mxu0 }
 0x16e   :  { %569 = vmatmul.mubr.bf16.vlgmr.msra.gmra.mxu1 %v12212_v58  ;;  %9859 = vmatmul.mubr.bf16.vlgmr.msra.gmra.mxu0 %v12212_v58  ;;  %v12258_v60 = vld [vmem:[#allocation12 + $0x80] ss:$12 sps:$4 sm:$0xff]  }
 0x16f   :  { %795 = vmatpush1.bf16.msra.mxu1 %v10847_v56  ;;  %9863 = vmatpush3.bf16.msra.mxu0 %v10850_v57  ;;  %v355_v61 = vpop.f32.mrf.mxu0  ;;  %v12247_v56 = vld [vmem:[#allocation12 + $0x7c] ss:$12 sps:$4 sm:$0xff]   ;;  %v11593_v57 = vld [vmem:[#allocation9 + $0x10] sm:$0xff]  }
 0x170   :  { %796 = vmatprep.subr.bf16.mxu1 %v10853_v59  ;;  %9864 = vmatprep.subr.bf16.mxu0 %v14362_v1  ;;  %v12255_v59 = vld [vmem:[#allocation12 + $0x64] ss:$12 sps:$4 sm:$0xff]   ;;  %v11594_v61 = vld [vmem:[#allocation9 + $0x18] sm:$0xff]  }
 0x171   :  { %v9841_v2 = vpop.f32.mrf.mxu0  ;;  %826 = vmatprep.mubr.bf16.mxu1 %v14322_v54  ;;  %9878 = vmatprep.mubr.msk.bf16.mxu0 %vm11981_vm0, %v14362_v1 }
 0x172   :  { %v12268_v2 = vld [vmem:[#allocation12 + $0x68] ss:$12 sps:$4 sm:$0xff]  }
 0x173   :  { %797 = vmatpush1.bf16.msra.mxu1 %v10851_v62  ;;  %9865 = vmatpush3.bf16.msra.mxu0 %v10854_v63  ;;  %v12261_v62 = vld [vmem:[#allocation12 + $0x60] ss:$12 sps:$4 sm:$0xff]  }
 0x174   :  { %798 = vmatprep.subr.bf16.mxu1 %v10857_v0  ;;  %9866 = vmatprep.subr.bf16.mxu0 %v14362_v1  ;;  %v11595_v63 = vld [vmem:[#allocation9 + $0x20] sm:$0xff]   ;;  %v12265_v0 = vld [vmem:[#allocation12 + $0x4c] ss:$12 sps:$4 sm:$0xff]  }
 0x177   :  { %799 = vmatpush1.bf16.msra.mxu1 %v10855_v3  ;;  %9867 = vmatpush3.bf16.msra.mxu0 %v10858_v5  ;;  %v12272_v3 = vld [vmem:[#allocation12 + $0x48] ss:$12 sps:$4 sm:$0xff]  }
 0x178   :  { %800 = vmatprep.subr.bf16.mxu1 %v10861_v6  ;;  %9868 = vmatprep.subr.bf16.mxu0 %v14362_v1  ;;  %v12275_v5 = vld [vmem:[#allocation12 + $0x34] ss:$12 sps:$4 sm:$0xff]   ;;  %v11596_v6 = vld [vmem:[#allocation9 + $0x28] sm:$0xff]  }
 0x17b   :  { %801 = vmatpush1.bf16.msra.mxu1 %v10859_v7  ;;  %9869 = vmatpush3.bf16.msra.mxu0 %v10862_v8  ;;  %v12278_v7 = vld [vmem:[#allocation12 + $0x50] ss:$12 sps:$4 sm:$0xff]  }
 0x17c   :  { %802 = vmatprep.subr.bf16.mxu1 %v10865_v9  ;;  %9870 = vmatprep.subr.bf16.mxu0 %v14362_v1  ;;  %v12281_v8 = vld [vmem:[#allocation12 + $0x30] ss:$12 sps:$4 sm:$0xff]  }
 0x17d   :  { %v11597_v9 = vld [vmem:[#allocation9 + $0x30] sm:$0xff]  }
 0x17f   :  { %803 = vmatpush1.bf16.msra.mxu1 %v10863_v10  ;;  %9871 = vmatpush3.bf16.msra.mxu0 %v10866_v11  ;;  %v12285_v10 = vld [vmem:[#allocation12 + $0x1c] ss:$12 sps:$4 sm:$0xff]   ;;  %v12290_v11 = vld [vmem:[#allocation12 + $0x18] ss:$12 sps:$4 sm:$0xff]  }
 0x180   :  { %804 = vmatprep.subr.bf16.mxu1 %v10869_v12  ;;  %9872 = vmatprep.subr.bf16.mxu0 %v14362_v1  ;;  %v12294_v12 = vld [vmem:[#allocation12 + $0x4] ss:$12 sps:$4 sm:$0xff]  }
 0x183   :  { %805 = vmatpush1.bf16.msra.mxu1 %v10867_v13  ;;  %9873 = vmatpush3.bf16.msra.mxu0 %v10870_v14  ;;  %v12296_v13 = vld [vmem:[#allocation12 + $0x38] ss:$12 sps:$4 sm:$0xff]  }
 0x184   :  { %806 = vmatprep.subr.bf16.mxu1 %v10873_v15  ;;  %9874 = vmatprep.subr.bf16.mxu0 %v14362_v1  ;;  %v11598_v14 = vld [vmem:[#allocation9 + $0x38] sm:$0xff]   ;;  %v12299_v15 = vld [vmem:[#allocation12] ss:$12 sps:$4 sm:$0xff]  }
 0x187   :  { %807 = vmatpush1.bf16.msra.mxu1 %v10871_v16  ;;  %9875 = vmatpush3.bf16.msra.mxu0 %v10874_v17  ;;  %v12304_v16 = vld [vmem:[#allocation15 + $0xac] ss:$12 sps:$4 sm:$0xff]  }
 0x188   :  { %808 = vmatprep.subr.bf16.mxu1 %v10877_v18  ;;  %9876 = vmatprep.subr.bf16.mxu0 %v14362_v1  ;;  %v12307_v17 = vld [vmem:[#allocation12 + $0x20] ss:$12 sps:$4 sm:$0xff]   ;;  %v12311_v18 = vld [vmem:[#allocation15 + $0xa8] ss:$12 sps:$4 sm:$0xff]  }
 0x18b   :  { %809 = vmatpush1.bf16.msra.mxu1 %v10875_v19  ;;  %9877 = vmatpush3.bf16.msra.mxu0 %v10878_v20  ;;  %v12314_v19 = vld [vmem:[#allocation15 + $0x94] ss:$12 sps:$4 sm:$0xff]  }
 0x18c   :  { %1035 = vmatprep.subr.bf16.mxu1 %v10881_v21  ;;  %9882 = vmatprep.subr.bf16.mxu0 %v10882_v22  ;;  %v12317_v20 = vld [vmem:[#allocation12 + $0x8] ss:$12 sps:$4 sm:$0xff]   ;;  %v12321_v21 = vld [vmem:[#allocation15 + $0x90] ss:$12 sps:$4 sm:$0xff]  }
 0x18e   :  { %827 = vmatmul.mubr.bf16.vlgmr.msra.gmra.mxu1 %v12212_v58  ;;  %9879 = vmatmul.mubr.bf16.vlgmr.msra.gmra.mxu0 %v12212_v58  ;;  %v12251_v58 = vld [vmem:[#allocation12 + $0x78] ss:$12 sps:$4 sm:$0xff]  }
 0x18f   :  { %1036 = vmatpush1.bf16.msra.mxu1 %v10879_v23  ;;  %9883 = vmatpush3.bf16.msra.mxu0 %v10882_v22  ;;  %v12325_v22 = vld [vmem:[#allocation15 + $0x7c] ss:$12 sps:$4 sm:$0xff]   ;;  %v12332_v23 = vld [vmem:[#allocation15 + $0x78] ss:$12 sps:$4 sm:$0xff]  }
 0x190   :  { %1037 = vmatprep.subr.bf16.mxu1 %v10885_v24  ;;  %9884 = vmatprep.subr.bf16.mxu0 %v10886_v25  ;;  %v12335_v24 = vld [vmem:[#allocation15 + $0x64] ss:$12 sps:$4 sm:$0xff]  }
 0x191   :  { %1067 = vmatprep.mubr.bf16.mxu1 %v14322_v54  ;;  %9898 = vmatprep.mubr.bf16.mxu0 %v11591_v29 }
 0x193   :  { %1038 = vmatpush1.bf16.msra.mxu1 %v10883_v26  ;;  %9885 = vmatpush3.bf16.msra.mxu0 %v10886_v25  ;;  %v12338_v25 = vld [vmem:[#allocation15 + $0x60] ss:$12 sps:$4 sm:$0xff]  }
 0x194   :  { %1039 = vmatprep.subr.bf16.mxu1 %v10889_v27  ;;  %9886 = vmatprep.subr.bf16.mxu0 %v10890_v28  ;;  %v12342_v26 = vld [vmem:[#allocation15 + $0x4c] ss:$12 sps:$4 sm:$0xff]   ;;  %v12345_v27 = vld [vmem:[#allocation15 + $0x48] ss:$12 sps:$4 sm:$0xff]  }
 0x197   :  { %1040 = vmatpush1.bf16.msra.mxu1 %v10887_v31  ;;  %9887 = vmatpush3.bf16.msra.mxu0 %v10890_v28  ;;  %v12348_v28 = vld [vmem:[#allocation15 + $0x34] ss:$12 sps:$4 sm:$0xff]   ;;  %v12355_v31 = vld [vmem:[#allocation15 + $0x1c] ss:$12 sps:$4 sm:$0xff]  }
 0x198   :  { %1041 = vmatprep.subr.bf16.mxu1 %v10893_v32  ;;  %9888 = vmatprep.subr.bf16.mxu0 %v10894_v33  ;;  %v12358_v32 = vld [vmem:[#allocation15 + $0x18] ss:$12 sps:$4 sm:$0xff]  }
 0x19b   :  { %1042 = vmatpush1.bf16.msra.mxu1 %v10891_v34  ;;  %9889 = vmatpush3.bf16.msra.mxu0 %v10894_v33  ;;  %v12361_v33 = vld [vmem:[#allocation15 + $0x4] ss:$12 sps:$4 sm:$0xff]   ;;  %v12364_v34 = vld [vmem:[#allocation15] ss:$12 sps:$4 sm:$0xff]  }
 0x19c   :  { %1043 = vmatprep.subr.bf16.mxu1 %v10897_v35  ;;  %9890 = vmatprep.subr.bf16.mxu0 %v10898_v36  ;;  %v12370_v35 = vld [vmem:[#allocation15 + $0xb0] ss:$12 sps:$4 sm:$0xff]  }
 0x19f   :  { %1044 = vmatpush1.bf16.msra.mxu1 %v10895_v37  ;;  %9891 = vmatpush3.bf16.msra.mxu0 %v10898_v36  ;;  %v12376_v36 = vld [vmem:[#allocation15 + $0x98] ss:$12 sps:$4 sm:$0xff]   ;;  %v12385_v37 = vld [vmem:[#allocation15 + $0x80] ss:$12 sps:$4 sm:$0xff]  }
 0x1a0   :  { %1045 = vmatprep.subr.bf16.mxu1 %v10901_v38  ;;  %9892 = vmatprep.subr.bf16.mxu0 %v10902_v39  ;;  %v12391_v38 = vld [vmem:[#allocation15 + $0x68] ss:$12 sps:$4 sm:$0xff]  }
 0x1a3   :  { %1046 = vmatpush1.bf16.msra.mxu1 %v10899_v40  ;;  %9893 = vmatpush3.bf16.msra.mxu0 %v10902_v39  ;;  %v12397_v39 = vld [vmem:[#allocation15 + $0x50] ss:$12 sps:$4 sm:$0xff]   ;;  %v12403_v40 = vld [vmem:[#allocation15 + $0x38] ss:$12 sps:$4 sm:$0xff]  }
 0x1a4   :  { %1047 = vmatprep.subr.bf16.mxu1 %v10905_v41  ;;  %9894 = vmatprep.subr.bf16.mxu0 %v10906_v42  ;;  %v12409_v41 = vld [vmem:[#allocation15 + $0x20] ss:$12 sps:$4 sm:$0xff]  }
 0x1a7   :  { %1048 = vmatpush1.bf16.msra.mxu1 %v10903_v43  ;;  %9895 = vmatpush3.bf16.msra.mxu0 %v10906_v42  ;;  %v12415_v42 = vld [vmem:[#allocation15 + $0x8] ss:$12 sps:$4 sm:$0xff]  }
 0x1a8   :  { %1049 = vmatprep.subr.bf16.mxu1 %v10909_v44  ;;  %9896 = vmatprep.subr.bf16.mxu0 %v10910_v46 }
 0x1ab   :  { %1050 = vmatpush1.bf16.msra.mxu1 %v10907_v47  ;;  %9897 = vmatpush3.bf16.msra.mxu0 %v10910_v46 }
 0x1ac   :  { %1615 = vmatprep.subr.bf16.mxu0 %v12229_v48  ;;  %9914 = vmatprep.subr.bf16.mxu1 %v14362_v1 }
 0x1ae   :  { %1068 = vmatmul.mubr.bf16.vlgmr.msra.gmra.mxu1 %v11591_v29  ;;  %9899 = vmatmul.mubr.bf16.vlgmr.msra.gmra.mxu0 %v11592_v52  ;;  %v12351_v29 = vld [vmem:[#allocation15 + $0x30] ss:$12 sps:$4 sm:$0xff]  }
 0x1af   :  { %1616 = vmatpush1.bf16.msra.mxu0 %v12231_v49  ;;  %9915 = vmatpush3.bf16.msra.mxu1 %v12233_v50 }
 0x1b0   :  { %1617 = vmatprep.subr.bf16.mxu0 %v12237_v51  ;;  %1077 = vmatprep.mubr.bf16.mxu1 %v14322_v54 }
 0x1b1   :  { %9902 = vmatprep.mubr.bf16.mxu0 %v11593_v57  ;;  %9916 = vmatprep.subr.bf16.mxu1 %v14362_v1 }
 0x1b3   :  { %1618 = vmatpush1.bf16.msra.mxu0 %v12241_v53  ;;  %9917 = vmatpush3.bf16.msra.mxu1 %v12243_v55 }
 0x1b4   :  { %1619 = vmatprep.subr.bf16.mxu0 %v12247_v56  ;;  %9918 = vmatprep.subr.bf16.mxu1 %v14362_v1 }
 0x1b6   :  { %1078 = vmatmul.mubr.bf16.gmra.mxu1 %v11592_v52  ;;  %9903 = vmatmul.mubr.bf16.gmra.mxu0 %v11594_v61 }
 0x1b7   :  { %1620 = vmatpush1.bf16.msra.mxu0 %v12251_v58  ;;  %1087 = vmatprep.mubr.bf16.mxu1 %v14322_v54 }
 0x1b8   :  { %1621 = vmatprep.subr.bf16.mxu0 %v12255_v59  ;;  %9906 = vmatprep.mubr.bf16.mxu0 %v11595_v63 }
 0x1b9   :  { %9919 = vmatpush3.bf16.msra.mxu1 %v12258_v60 }
 0x1ba   :  { %9920 = vmatprep.subr.bf16.mxu1 %v14362_v1 }
 0x1bb   :  { %1622 = vmatpush1.bf16.msra.mxu0 %v12261_v62 }
 0x1bc   :  { %1623 = vmatprep.subr.bf16.mxu0 %v12265_v0 }
 0x1bd   :  { %9921 = vmatpush3.bf16.msra.mxu1 %v12268_v2 }
 0x1be   :  { %1088 = vmatmul.mubr.bf16.gmra.mxu1 %v11593_v57  ;;  %9907 = vmatmul.mubr.bf16.gmra.mxu0 %v11596_v6 }
 0x1bf   :  { %1624 = vmatpush1.bf16.msra.mxu0 %v12272_v3  ;;  %1097 = vmatprep.mubr.bf16.mxu1 %v14322_v54 }
 0x1c0   :  { %1625 = vmatprep.subr.bf16.mxu0 %v12275_v5  ;;  %9910 = vmatprep.mubr.bf16.mxu0 %v11597_v9 }
 0x1c1   :  { %9922 = vmatprep.subr.bf16.mxu1 %v14362_v1 }
 0x1c2   :  { %9923 = vmatpush3.bf16.msra.mxu1 %v12278_v7 }
 0x1c3   :  { %1626 = vmatpush1.bf16.msra.mxu0 %v12281_v8  ;;  %9924 = vmatprep.subr.bf16.mxu1 %v14362_v1 }
 0x1c4   :  { %1627 = vmatprep.subr.bf16.mxu0 %v12285_v10 }
 0x1c6   :  { %1098 = vmatmul.mubr.bf16.gmra.mxu1 %v11594_v61  ;;  %9911 = vmatmul.mubr.bf16.gmra.mxu0 %v11598_v14 }
 0x1c7   :  { %1628 = vmatpush1.bf16.msra.mxu0 %v12290_v11  ;;  %1107 = vmatprep.mubr.bf16.mxu1 %v14322_v54 }
 0x1c8   :  { %1629 = vmatprep.subr.bf16.mxu0 %v12294_v12  ;;  %1647 = vmatprep.mubr.bf16.mxu0 %v14322_v54 }
 0x1c9   :  { %9925 = vmatpush3.bf16.msra.mxu1 %v12296_v13 }
 0x1ca   :  { %9926 = vmatprep.subr.bf16.mxu1 %v14362_v1 }
 0x1cb   :  { %1630 = vmatpush1.bf16.msra.mxu0 %v12299_v15 }
 0x1cc   :  { %1893 = vmatprep.subr.bf16.mxu0 %v12304_v16 }
 0x1cd   :  { %9927 = vmatpush3.bf16.msra.mxu1 %v12307_v17 }
 0x1ce   :  { %1108 = vmatmul.mubr.bf16.gmra.mxu1 %v11595_v63  ;;  %1648 = vmatmul.mubr.bf16.vlgmr.msra.gmra.mxu0 %v14322_v54 }
 0x1cf   :  { %1894 = vmatpush1.bf16.msra.mxu0 %v12311_v18  ;;  %1117 = vmatprep.mubr.bf16.mxu1 %v14322_v54 }
 0x1d0   :  { %1895 = vmatprep.subr.bf16.mxu0 %v12314_v19  ;;  %9928 = vmatprep.subr.bf16.mxu1 %v14362_v1 }
 0x1d1   :  { %9929 = vmatpush3.bf16.msra.mxu1 %v12317_v20  ;;  %1925 = vmatprep.mubr.bf16.mxu0 %v14322_v54 }
 0x1d2   :  { %9934 = vmatprep.subr.bf16.mxu1 %v14362_v1 }
 0x1d3   :  { %1896 = vmatpush1.bf16.msra.mxu0 %v12321_v21 }
 0x1d4   :  { %1897 = vmatprep.subr.bf16.mxu0 %v12325_v22 }
 0x1d6   :  { %1118 = vmatmul.mubr.bf16.gmra.mxu1 %v11596_v6 }
 0x1d7   :  { %1898 = vmatpush1.bf16.msra.mxu0 %v12332_v23  ;;  %1127 = vmatprep.mubr.bf16.mxu1 %v14322_v54 }
 0x1d8   :  { %1899 = vmatprep.subr.bf16.mxu0 %v12335_v24 }
 0x1db   :  { %1900 = vmatpush1.bf16.msra.mxu0 %v12338_v25 }
 0x1dc   :  { %1901 = vmatprep.subr.bf16.mxu0 %v12342_v26 }
 0x1de   :  { %1128 = vmatmul.mubr.bf16.gmra.mxu1 %v11597_v9 }
 0x1df   :  { %1902 = vmatpush1.bf16.msra.mxu0 %v12345_v27  ;;  %1137 = vmatprep.mubr.bf16.mxu1 %v14322_v54 }
 0x1e0   :  { %1903 = vmatprep.subr.bf16.mxu0 %v12348_v28 }
 0x1e3   :  { %1904 = vmatpush1.bf16.msra.mxu0 %v12351_v29 }
 0x1e4   :  { %1905 = vmatprep.subr.bf16.mxu0 %v12355_v31 }
 0x1e6   :  { %1138 = vmatmul.mubr.bf16.gmra.mxu1 %v11598_v14 }
 0x1e7   :  { %1906 = vmatpush1.bf16.msra.mxu0 %v12358_v32  ;;  %9930 = vmatprep.mubr.msk.bf16.mxu1 %vm11981_vm0, %v14362_v1 }
 0x1e8   :  { %1907 = vmatprep.subr.bf16.mxu0 %v12361_v33 }
 0x1eb   :  { %1908 = vmatpush1.bf16.msra.mxu0 %v12364_v34 }
 0x1ec   :  { %2005 = vmatprep.subr.bf16.mxu0 %v12229_v48 }
 0x1ee   :  { %9931 = vmatmul.mubr.bf16.vlgmr.msra.gmra.mxu1 %v14322_v54  ;;  %1926 = vmatmul.mubr.bf16.vlgmr.msra.gmra.mxu0 %v14322_v54 }
 0x1ef   :  { %9935 = vmatpush3.bf16.msra.mxu1 %v12370_v35  ;;  %9950 = vmatprep.mubr.msk.bf16.mxu1 %vm11981_vm0, %v14362_v1 }
 0x1f0   :  { %9936 = vmatprep.subr.bf16.mxu1 %v14362_v1  ;;  %2006 = vmatpush1.bf16.msra.mxu0 %v12231_v49 }
 0x1f1   :  { %2007 = vmatprep.subr.bf16.mxu0 %v12237_v51  ;;  %2037 = vmatprep.mubr.bf16.mxu0 %v14322_v54 }
 0x1f3   :  { %9937 = vmatpush3.bf16.msra.mxu1 %v12376_v36 }
 0x1f4   :  { %9938 = vmatprep.subr.bf16.mxu1 %v14362_v1  ;;  %2008 = vmatpush1.bf16.msra.mxu0 %v12241_v53 }
 0x1f5   :  { %2009 = vmatprep.subr.bf16.mxu0 %v12247_v56 }
 0x1f7   :  { %9939 = vmatpush3.bf16.msra.mxu1 %v12385_v37 }
 0x1f8   :  { %9940 = vmatprep.subr.bf16.mxu1 %v14362_v1  ;;  %2010 = vmatpush1.bf16.msra.mxu0 %v12251_v58 }
 0x1f9   :  { %2011 = vmatprep.subr.bf16.mxu0 %v12255_v59 }
 0x1fb   :  { %9941 = vmatpush3.bf16.msra.mxu1 %v12391_v38 }
 0x1fc   :  { %9942 = vmatprep.subr.bf16.mxu1 %v14362_v1  ;;  %2012 = vmatpush1.bf16.msra.mxu0 %v12261_v62 }
 0x1fd   :  { %2013 = vmatprep.subr.bf16.mxu0 %v12265_v0 }
 0x1ff   :  { %9943 = vmatpush3.bf16.msra.mxu1 %v12397_v39 }
 0x200   :  { %9944 = vmatprep.subr.bf16.mxu1 %v14362_v1  ;;  %2014 = vmatpush1.bf16.msra.mxu0 %v12272_v3 }
 0x201   :  { %2015 = vmatprep.subr.bf16.mxu0 %v12275_v5 }
 0x203   :  { %9945 = vmatpush3.bf16.msra.mxu1 %v12403_v40 }
 0x204   :  { %9946 = vmatprep.subr.bf16.mxu1 %v14362_v1  ;;  %2016 = vmatpush1.bf16.msra.mxu0 %v12281_v8 }
 0x205   :  { %2017 = vmatprep.subr.bf16.mxu0 %v12285_v10 }
 0x207   :  { %9947 = vmatpush3.bf16.msra.mxu1 %v12409_v41 }
 0x208   :  { %9948 = vmatprep.subr.bf16.mxu1 %v14362_v1  ;;  %2018 = vmatpush1.bf16.msra.mxu0 %v12290_v11 }
 0x209   :  { %2019 = vmatprep.subr.bf16.mxu0 %v12294_v12 }
 0x20b   :  { %9949 = vmatpush3.bf16.msra.mxu1 %v12415_v42 }
 0x20c   :  { %9954 = vmatprep.subr.bf16.mxu1 %v14362_v1  ;;  %2020 = vmatpush1.bf16.msra.mxu0 %v12299_v15 }
 0x20d   :  { %2125 = vmatprep.subr.bf16.mxu0 %v12304_v16 }
 0x20e   :  { %9951 = vmatmul.mubr.bf16.vlgmr.msra.gmra.mxu1 %v14322_v54 }
 0x20f   :  { %9955 = vmatpush3.bf16.msra.mxu1 %v12233_v50  ;;  %9970 = vmatprep.mubr.msk.bf16.mxu1 %vm11981_vm0, %v14362_v1 }
 0x210   :  { %9956 = vmatprep.subr.bf16.mxu1 %v14362_v1 }
 0x213   :  { %9957 = vmatpush3.bf16.msra.mxu1 %v12243_v55 }
 0x214   :  { %9958 = vmatprep.subr.bf16.mxu1 %v14362_v1 }
 0x217   :  { %9959 = vmatpush3.bf16.msra.mxu1 %v12258_v60 }
 0x218   :  { %9960 = vmatprep.subr.bf16.mxu1 %v14362_v1 }
 0x21b   :  { %9961 = vmatpush3.bf16.msra.mxu1 %v12268_v2 }
 0x21c   :  { %9962 = vmatprep.subr.bf16.mxu1 %v14362_v1 }
 0x21f   :  { %9963 = vmatpush3.bf16.msra.mxu1 %v12278_v7 }
 0x220   :  { %9964 = vmatprep.subr.bf16.mxu1 %v14362_v1 }
 0x223   :  { %9965 = vmatpush3.bf16.msra.mxu1 %v12296_v13 }
 0x224   :  { %9966 = vmatprep.subr.bf16.mxu1 %v14362_v1 }
 0x227   :  { %9967 = vmatpush3.bf16.msra.mxu1 %v12307_v17 }
 0x228   :  { %9968 = vmatprep.subr.bf16.mxu1 %v14362_v1 }
 0x22b   :  { %9969 = vmatpush3.bf16.msra.mxu1 %v12317_v20 }
 0x22c   :  { %9974 = vmatprep.subr.bf16.mxu1 %v14362_v1 }
 0x22e   :  { %v12443_v43 = vpop.f32.mrf.mxu1  ;;  %v12445_v44 = vpop.f32.mrf.mxu0 }
 0x230   :  { %v12447_v46 = vpop.f32.mrf.mxu1  ;;  %v9860_v47 = vpop.f32.mrf.mxu0 }
 0x232   :  { %v574_v48 = vpop.f32.mrf.mxu1  ;;  %v614_v49 = vpop.f32.mrf.mxu0 }
 0x234   :  { %v575_v50 = vpop.f32.mrf.mxu1  ;;  %v9861_v51 = vpop.f32.mrf.mxu0 }
 0x24e   :  { %v12449_v52 = vpop.f32.mrf.mxu1  ;;  %v12451_v53 = vpop.f32.mrf.mxu0 }
 0x250   :  { %v12453_v55 = vpop.f32.mrf.mxu1  ;;  %v9880_v56 = vpop.f32.mrf.mxu0 }
 0x252   :  { %v832_v57 = vpop.f32.mrf.mxu1  ;;  %v872_v58 = vpop.f32.mrf.mxu0 }
 0x254   :  { %v833_v59 = vpop.f32.mrf.mxu1  ;;  %v9881_v60 = vpop.f32.mrf.mxu0 }
 0x26e   :  { %v1069_v61 = vpop.f32.mrf.mxu1  ;;  %v9900_v62 = vpop.f32.mrf.mxu0 }
 0x26f   :  { %v9368_v63 = vpack.c.bf16 %v9900_v62, %v9900_v62 }
 0x270   :  { %v1071_v0 = vpop.f32.mrf.mxu1  ;;  %v1182_v2 = vpop.f32.mrf.mxu0 }
 0x271   :  { %1410 = vst [vmem:[#allocation4 + $0x20] sm:$0xf] %v9368_v63  ;;  %v9363_v3 = vpack.c.bf16 %v1071_v0, %v1069_v61  ;;  %v9364_v5 = vpack.c.bf16 %v1182_v2, %v1182_v2 }
 0x272   :  { %v1073_v6 = vpop.f32.mrf.mxu1  ;;  %v9901_v7 = vpop.f32.mrf.mxu0 }
 0x273   :  { %1405 = vst [vmem:[#allocation4] sm:$0xff] %v9363_v3  ;;  %1406 = vst [vmem:[#allocation4 + $0x8] sm:$0xf] %v9364_v5  ;;  %v9370_v8 = vpack.c.bf16 %v9901_v7, %v9901_v7 }
 0x274   :  { %v1075_v9 = vpop.f32.mrf.mxu1  ;;  %v1185_v10 = vpop.f32.mrf.mxu0 }
 0x275   :  { %1412 = vst [vmem:[#allocation4 + $0x2c] sm:$0xf] %v9370_v8  ;;  %v9365_v11 = vpack.c.bf16 %v1075_v9, %v1073_v6  ;;  %v9366_v12 = vpack.c.bf16 %v1185_v10, %v1185_v10 }
 0x276   :  { %v1079_v13 = vpop.f32.mrf.mxu1  ;;  %v9904_v14 = vpop.f32.mrf.mxu0 }
 0x277   :  { %1407 = vst [vmem:[#allocation4 + $0xc] sm:$0xff] %v9365_v11  ;;  %1408 = vst [vmem:[#allocation4 + $0x14] sm:$0xf] %v9366_v12  ;;  %v9376_v15 = vpack.c.bf16 %v9904_v14, %v9904_v14  ;;  %v12458_v11 = vld [vmem:[%s14410_s3] sm:$0x7]  ;;  %v12461_v14 = vsub.s32 0, %v12158_v4 }
 0x278   :  { %v1081_v16 = vpop.f32.mrf.mxu1  ;;  %v1198_v17 = vpop.f32.mrf.mxu0 }
 0x279   :  { %1418 = vst [vmem:[#allocation4 + $0x50] sm:$0xf] %v9376_v15  ;;  %v9367_v20 = vpack.c.bf16 %v1081_v16, %v1079_v13  ;;  %v9372_v47 = vpack.c.bf16 %v1198_v17, %v1198_v17  ;;  %14411 = vst [vmem:[#allocation37_spill] sm:$0xff] %v12461_v14 }
 0x27a   :  { %v1083_v48 = vpop.f32.mrf.mxu1  ;;  %v9905_v49 = vpop.f32.mrf.mxu0 }
 0x27b   :  { %1409 = vst [vmem:[#allocation4 + $0x18] sm:$0xff] %v9367_v20  ;;  %1414 = vst [vmem:[#allocation4 + $0x38] sm:$0xf] %v9372_v47  ;;  %v9378_v50 = vpack.c.bf16 %v9905_v49, %v9905_v49  ;;  %v12466_v20 = vld [vmem:[%s14304_s5] sm:$0x7] }
 0x27c   :  { %v1085_v51 = vpop.f32.mrf.mxu1  ;;  %v1201_v56 = vpop.f32.mrf.mxu0 }
 0x27d   :  { %1420 = vst [vmem:[#allocation4 + $0x5c] sm:$0xf] %v9378_v50  ;;  %v9369_v57 = vpack.c.bf16 %v1085_v51, %v1083_v48  ;;  %v9374_v58 = vpack.c.bf16 %v1201_v56, %v1201_v56  ;;  %v396_v51 = vrot.slane %v12458_v11, %v12461_v14 }
 0x27e   :  { %v1089_v59 = vpop.f32.mrf.mxu1  ;;  %v9908_v60 = vpop.f32.mrf.mxu0 }
 0x27f   :  { %1411 = vst [vmem:[#allocation4 + $0x24] sm:$0xff] %v9369_v57  ;;  %1416 = vst [vmem:[#allocation4 + $0x44] sm:$0xf] %v9374_v58  ;;  %v9384_v61 = vpack.c.bf16 %v9908_v60, %v9908_v60  ;;  %v12472_v57 = vrot.slane %v12466_v20, %v12461_v14  ;;  %v12475_v60 = vsub.s32 1, %v12158_v4 }
 0x280   :  { %v1091_v62 = vpop.f32.mrf.mxu1  ;;  %v1214_v63 = vpop.f32.mrf.mxu0 }
 0x281   :  { %1426 = vst [vmem:[#allocation4 + $0x80] sm:$0xf] %v9384_v61  ;;  %v9371_v0 = vpack.c.bf16 %v1091_v62, %v1089_v59  ;;  %v9380_v2 = vpack.c.bf16 %v1214_v63, %v1214_v63  ;;  %14412 = vst [vmem:[#allocation38_spill] sm:$0xff] %v12475_v60 }
 0x282   :  { %v1093_v3 = vpop.f32.mrf.mxu1  ;;  %v9909_v5 = vpop.f32.mrf.mxu0 }
 0x283   :  { %1413 = vst [vmem:[#allocation4 + $0x30] sm:$0xff] %v9371_v0  ;;  %1422 = vst [vmem:[#allocation4 + $0x68] sm:$0xf] %v9380_v2  ;;  %v9386_v6 = vpack.c.bf16 %v9909_v5, %v9909_v5  ;;  %v12478_v2 = vadd.f32 %v12443_v43, %v396_v51  ;;  %v12483_v5 = vrot.slane %v12466_v20, %v12475_v60 }
 0x284   :  { %v1095_v7 = vpop.f32.mrf.mxu1  ;;  %v1217_v8 = vpop.f32.mrf.mxu0 }
 0x285   :  { %1428 = vst [vmem:[#allocation4 + $0x8c] sm:$0xf] %v9386_v6  ;;  %v9373_v9 = vpack.c.bf16 %v1095_v7, %v1093_v3  ;;  %v9382_v10 = vpack.c.bf16 %v1217_v8, %v1217_v8  ;;  %14413 = vst [vmem:[#allocation39_spill] sm:$0xff] %v12483_v5  ;;  %v400_v8 = vrot.slane %v12458_v11, %v12475_v60 }
 0x286   :  { %v1099_v12 = vpop.f32.mrf.mxu1  ;;  %v9912_v13 = vpop.f32.mrf.mxu0 }
 0x287   :  { %1415 = vst [vmem:[#allocation4 + $0x3c] sm:$0xff] %v9373_v9  ;;  %1424 = vst [vmem:[#allocation4 + $0x74] sm:$0xf] %v9382_v10  ;;  %v9392_v15 = vpack.c.bf16 %v9912_v13, %v9912_v13 }
 0x288   :  { %v1101_v16 = vpop.f32.mrf.mxu1  ;;  %v1230_v17 = vpop.f32.mrf.mxu0 }
 0x289   :  { %1434 = vst [vmem:[#allocation4 + $0xb0] sm:$0xf] %v9392_v15  ;;  %v9375_v47 = vpack.c.bf16 %v1101_v16, %v1099_v12  ;;  %v9388_v48 = vpack.c.bf16 %v1230_v17, %v1230_v17 }
 0x28a   :  { %v1103_v49 = vpop.f32.mrf.mxu1  ;;  %v9913_v50 = vpop.f32.mrf.mxu0 }
 0x28b   :  { %1417 = vst [vmem:[#allocation4 + $0x48] sm:$0xff] %v9375_v47  ;;  %1430 = vst [vmem:[#allocation4 + $0x98] sm:$0xf] %v9388_v48  ;;  %v9394_v56 = vpack.c.bf16 %v9913_v50, %v9913_v50  ;;  %v12490_v47 = vadd.f32 %v12447_v46, %v400_v8 }
 0x28c   :  { %v1105_v58 = vpop.f32.mrf.mxu1  ;;  %v1233_v59 = vpop.f32.mrf.mxu0 }
 0x28d   :  { %1436 = vst [vmem:[#allocation4 + $0xbc] sm:$0xf] %v9394_v56  ;;  %v9377_v61 = vpack.c.bf16 %v1105_v58, %v1103_v49  ;;  %v9390_v62 = vpack.c.bf16 %v1233_v59, %v1233_v59 }
 0x28e   :  { %v1109_v63 = vpop.f32.mrf.mxu1  ;;  %v1649_v0 = vpop.f32.mrf.mxu0 }
 0x28f   :  { %1419 = vst [vmem:[#allocation4 + $0x54] sm:$0xff] %v9377_v61  ;;  %1432 = vst [vmem:[#allocation4 + $0xa4] sm:$0xf] %v9390_v62  ;;  %v1650_v3 = vadd.f32 %v1649_v0, %v12472_v57 }
 0x290   :  { %v1111_v6 = vpop.f32.mrf.mxu1  ;;  %v1651_v7 = vpop.f32.mrf.mxu0 }
 0x291   :  { %v1696_v9 = vadd.f32 %v1650_v3, %v12478_v2  ;;  %v9379_v10 = vpack.c.bf16 %v1111_v6, %v1109_v63  ;;  %v1652_v15 = vadd.f32 %v1651_v7, %v12483_v5 }
 0x292   :  { %v1113_v12 = vpop.f32.mrf.mxu1  ;;  %v1653_v13 = vpop.f32.mrf.mxu0 }
 0x293   :  { %v8896_v43 = vmul.f32 -1.442695, %v1696_v9  ;;  %1421 = vst [vmem:[#allocation4 + $0x60] sm:$0xff] %v9379_v10  ;;  %v1703_v50 = vadd.f32 %v1652_v15, %v12490_v47  ;;  %v12502_v15 = vld [vmem:[%s14307_s8] sm:$0x7] }
 0x294   :  { %v1115_v16 = vpop.f32.mrf.mxu1  ;;  %v1654_v17 = vpop.f32.mrf.mxu0 }
 0x295   :  { %11311 = vpow2.f32 %v8896_v43  ;;  %v9381_v48 = vpack.c.bf16 %v1115_v16, %v1113_v12  ;;  %v8897_v59 = vmul.f32 -1.442695, %v1703_v50  ;;  %v12494_v12 = vsub.s32 2, %v12158_v4  ;;  %v1438_v43 = vld [vmem:[%s14308_s9] sm:$0x7] }
 0x296   :  { %v1119_v49 = vpop.f32.mrf.mxu1  ;;  %v12509_v4 = vrot.slane %v1438_v43, %v12461_v14 }
 0x297   :  { %1423 = vst [vmem:[#allocation4 + $0x6c] sm:$0xff] %v9381_v48  ;;  %11313 = vpow2.f32 %v8897_v59  ;;  %14414 = vst [vmem:[#allocation40_spill] sm:$0xff] %v12494_v12  ;;  %v12506_v48 = vrot.slane %v12466_v20, %v12494_v12 }
 0x298   :  { %v1121_v51 = vpop.f32.mrf.mxu1  ;;  %14415 = vst [vmem:[#allocation41_spill] sm:$0xff] %v12509_v4 }
 0x299   :  { %v9383_v56 = vpack.c.bf16 %v1121_v51, %v1119_v49  ;;  %v654_v51 = vrot.slane %v12502_v15, %v12461_v14  ;;  %v12763_v14 = vld [vmem:[#allocation15] ss:$12 sps:$4 sm:$0xff]  }
 0x29a   :  { %v1123_v58 = vpop.f32.mrf.mxu1  ;;  %14443 = vst [vmem:[#allocation69_spill] sm:$0xff] %v12763_v14 }
 0x29b   :  { %1425 = vst [vmem:[#allocation4 + $0x78] sm:$0xff] %v9383_v56 }
 0x29c   :  { %v1125_v61 = vpop.f32.mrf.mxu1 }
 0x29d   :  { %v9385_v62 = vpack.c.bf16 %v1125_v61, %v1123_v58  ;;  %v12514_v61 = vrot.slane %v1438_v43, %v12475_v60 }
 0x29e   :  { %v1129_v63 = vpop.f32.mrf.mxu1 }
 0x29f   :  { %1427 = vst [vmem:[#allocation4 + $0x84] sm:$0xff] %v9385_v62  ;;  %v404_v62 = vrot.slane %v12458_v11, %v12494_v12 }
 0x2a0   :  { %v1131_v0 = vpop.f32.mrf.mxu1 }
 0x2a1   :  { %v9387_v3 = vpack.c.bf16 %v1131_v0, %v1129_v63 }
 0x2a2   :  { %v11312_v46 = vpop.eup %11311  ;;  %v1133_v6 = vpop.f32.mrf.mxu1 }
 0x2a3   :  { %v1700_v7 = vadd.f32 1.0, %v11312_v46  ;;  %1429 = vst [vmem:[#allocation4 + $0x90] sm:$0xff] %v9387_v3 }
 0x2a4   :  { %v1135_v8 = vpop.f32.mrf.mxu1  ;;  %v11314_v49 = vpop.eup %11313 }
 0x2a5   :  { %11315 = vrcp.f32 %v1700_v7  ;;  %v9389_v9 = vpack.c.bf16 %v1135_v8, %v1133_v6  ;;  %v1707_v63 = vadd.f32 1.0, %v11314_v49  ;;  %v12521_v6 = vadd.f32 %v12449_v52, %v654_v51 }
 0x2a6   :  { %v1139_v10 = vpop.f32.mrf.mxu1  ;;  %v658_v49 = vrot.slane %v12502_v15, %v12475_v60  ;;  %v12759_v60 = vld [vmem:[#allocation15 + $0x4] ss:$12 sps:$4 sm:$0xff]  }
 0x2a7   :  { %1431 = vst [vmem:[#allocation4 + $0x9c] sm:$0xff] %v9389_v9  ;;  %11317 = vrcp.f32 %v1707_v63  ;;  %14442 = vst [vmem:[#allocation68_spill] sm:$0xff] %v12759_v60 }
 0x2a8   :  { %v1141_v13 = vpop.f32.mrf.mxu1 }
 0x2a9   :  { %v9391_v16 = vpack.c.bf16 %v1141_v13, %v1139_v10 }
 0x2aa   :  { %v1143_v17 = vpop.f32.mrf.mxu1 }
 0x2ab   :  { %1433 = vst [vmem:[#allocation4 + $0xa8] sm:$0xff] %v9391_v16  ;;  %v12525_v16 = vadd.f32 %v12445_v44, %v404_v62 }
 0x2ac   :  { %v1145_v50 = vpop.f32.mrf.mxu1 }
 0x2ad   :  { %v9393_v56 = vpack.c.bf16 %v1145_v50, %v1143_v17  ;;  %14416 = vst [vmem:[#allocation42_spill] sm:$0xff] %v12525_v16 }
 0x2ae   :  { %v1690_v58 = vpop.f32.mrf.mxu1  ;;  %v1927_v59 = vpop.f32.mrf.mxu0 }
 0x2af   :  { %1435 = vst [vmem:[#allocation4 + $0xb4] sm:$0xff] %v9393_v56  ;;  %v1691_v20 = vadd.f32 %v1690_v58, %v12506_v48  ;;  %v1928_v0 = vadd.f32 %v1927_v59, %v12509_v4  ;;  %v12532_v59 = vadd.f32 %v12453_v55, %v658_v49  ;;  %v12540_v55 = vrot.slane %v1438_v43, %v12494_v12 }
 0x2b0   :  { %v9932_v3 = vpop.f32.mrf.mxu1  ;;  %v1929_v46 = vpop.f32.mrf.mxu0 }
 0x2b1   :  { %v1975_v7 = vrot.slane %v1928_v0, 1  ;;  %v1930_v9 = vadd.f32 %v1929_v46, %v12514_v61 }
 0x2b2   :  { %v11316_v8 = vpop.eup %11315  ;;  %v1693_v10 = vpop.f32.mrf.mxu1 }
 0x2b3   :  { %v1931_v13 = vpop.f32.mrf.mxu0  ;;  %v1710_v11 = vmul.f32 %v11316_v8, %v1691_v20  ;;  %v1977_v17 = vadd.f32 %v1975_v7, %v12521_v6  ;;  %v1985_v58 = vrot.slane %v1930_v9, 1 }
 0x2b4   :  { %v9933_v50 = vpop.f32.mrf.mxu1  ;;  %v11318_v63 = vpop.eup %11317 }
 0x2b5   :  { %v1932_v56 = vpop.f32.mrf.mxu0  ;;  %v1711_v52 = vadd.f32 %v1710_v11, %v12525_v16  ;;  %v8922_v51 = vmul.f32 -1.442695, %v1977_v17  ;;  %v1987_v44 = vadd.f32 %v1985_v58, %v12532_v59  ;;  %v1713_v20 = vsub.f32 1.0, %v11318_v63  ;;  %v12629_v58 = vld [vmem:[#allocation12 + $0x4c] ss:$12 sps:$4 sm:$0xff]  }
 0x2b6   :  { %v1715_v7 = vmul.f32 0.0, %v11318_v63  ;;  %14422 = vst [vmem:[#allocation48_spill] sm:$0xff] %v12629_v58  ;;  %v12639_v63 = vld [vmem:[#allocation12 + $0x34] ss:$12 sps:$4 sm:$0xff]  }
 0x2b7   :  { %11319 = vtanh.f32 %v1711_v52  ;;  %v8923_v62 = vmul.f32 -1.442695, %v1987_v44  ;;  %v12623_v52 = vld [vmem:[#allocation12 + $0x60] ss:$12 sps:$4 sm:$0xff]   ;;  %v12633_v44 = vld [vmem:[#allocation12 + $0x48] ss:$12 sps:$4 sm:$0xff]  }
 0x2b8   :  { %11321 = vpow2.f32 %v8922_v51  ;;  %14420 = vst [vmem:[#allocation46_spill] sm:$0xff] %v12623_v52  ;;  %v12626_v51 = vld [vmem:[#allocation12 + $0x68] ss:$12 sps:$4 sm:$0xff]   ;;  %14423 = vst [vmem:[#allocation49_spill] sm:$0xff] %v12633_v44 }
 0x2b9   :  { %11323 = vpow2.f32 %v8923_v62  ;;  %14421 = vst [vmem:[#allocation47_spill] sm:$0xff] %v12626_v51  ;;  %v12636_v62 = vld [vmem:[#allocation12 + $0x50] ss:$12 sps:$4 sm:$0xff]   ;;  %14425 = vst [vmem:[#allocation51_spill] sm:$0xff] %v12639_v63 }
 0x2ba   :  { %14424 = vst [vmem:[#allocation50_spill] sm:$0xff] %v12636_v62 }
 0x2c4   :  { %v11320_v0 = vpop.eup %11319 }
 0x2c5   :  { %v11322_v3 = vpop.eup %11321  ;;  %v1714_v46 = vmul.f32 %v11320_v0, %v1713_v20  ;;  %v12643_v20 = vld [vmem:[#allocation12 + $0x30] ss:$12 sps:$4 sm:$0xff]   ;;  %v12646_v0 = vld [vmem:[#allocation12 + $0x38] ss:$12 sps:$4 sm:$0xff]  }
 0x2c6   :  { %v1981_v8 = vadd.f32 1.0, %v11322_v3  ;;  %v11324_v11 = vpop.eup %11323  ;;  %14426 = vst [vmem:[#allocation52_spill] sm:$0xff] %v12643_v20  ;;  %14427 = vst [vmem:[#allocation53_spill] sm:$0xff] %v12646_v0  ;;  %v12649_v3 = vld [vmem:[#allocation12 + $0x1c] ss:$12 sps:$4 sm:$0xff]  }
 0x2c7   :  { %v12535_v10 = vadd.f32 %v1715_v7, %v1714_v46  ;;  %14428 = vst [vmem:[#allocation54_spill] sm:$0xff] %v12649_v3  ;;  %v12653_v46 = vld [vmem:[#allocation12 + $0x18] ss:$12 sps:$4 sm:$0xff]   ;;  %v12656_v7 = vld [vmem:[#allocation12 + $0x20] ss:$12 sps:$4 sm:$0xff]  }
 0x2c8   :  { %11325 = vrcp.f32 %v1981_v8  ;;  %14429 = vst [vmem:[#allocation55_spill] sm:$0xff] %v12653_v46  ;;  %14430 = vst [vmem:[#allocation56_spill] sm:$0xff] %v12656_v7  ;;  %v12659_v8 = vld [vmem:[#allocation12 + $0x4] ss:$12 sps:$4 sm:$0xff]  }
 0x2c9   :  { %14417 = vst [vmem:[#allocation43_spill] sm:$0xff] %v12535_v10  ;;  %v2004_v9 = vpack.c.bf16 %v12535_v10, %v12535_v10  ;;  %14431 = vst [vmem:[#allocation57_spill] sm:$0xff] %v12659_v8 }
 0x2cb   :  { %2038 = vmatmul.mubr.bf16.vlgmr.msra.gmra.mxu0 %v2004_v9  ;;  %9971 = vmatmul.mubr.bf16.vlgmr.msra.gmra.mxu1 %v2004_v9  ;;  %v12663_v9 = vld [vmem:[#allocation12] ss:$12 sps:$4 sm:$0xff]  }
 0x2cc   :  { %2126 = vmatpush1.bf16.msra.mxu0 %v12311_v18  ;;  %9975 = vmatpush3.bf16.msra.mxu1 %v12370_v35  ;;  %v662_v18 = vrot.slane %v12502_v15, %v12494_v12  ;;  %v12619_v15 = vld [vmem:[#allocation12 + $0x64] ss:$12 sps:$4 sm:$0xff]   ;;  %14432 = vst [vmem:[#allocation58_spill] sm:$0xff] %v12663_v9 }
 0x2cd   :  { %2127 = vmatprep.subr.bf16.mxu0 %v12314_v19  ;;  %9976 = vmatprep.subr.bf16.mxu1 %v14362_v1  ;;  %v1991_v19 = vadd.f32 1.0, %v11324_v11  ;;  %14419 = vst [vmem:[#allocation45_spill] sm:$0xff] %v12619_v15  ;;  %v12669_v11 = vld [vmem:[#allocation15 + $0xac] ss:$12 sps:$4 sm:$0xff]  }
 0x2ce   :  { %v1968_v13 = vpop.f32.mrf.mxu1  ;;  %2157 = vmatprep.mubr.bf16.mxu0 %v14322_v54  ;;  %9990 = vmatprep.mubr.msk.bf16.mxu1 %vm11981_vm0, %v14362_v1  ;;  %14434 = vst [vmem:[#allocation60_spill] sm:$0xff] %v12669_v11 }
 0x2cf   :  { %v1969_v17 = vadd.f32 %v1968_v13, %v12540_v55  ;;  %11327 = vrcp.f32 %v1991_v19  ;;  %v12666_v13 = vld [vmem:[#allocation12 + $0x8] ss:$12 sps:$4 sm:$0xff]  }
 0x2d0   :  { %v9952_v49 = vpop.f32.mrf.mxu1  ;;  %2128 = vmatpush1.bf16.msra.mxu0 %v12321_v21  ;;  %9977 = vmatpush3.bf16.msra.mxu1 %v12376_v36  ;;  %v12561_v21 = vadd.f32 %v12451_v53, %v662_v18  ;;  %v12616_v53 = vld [vmem:[#allocation12 + $0x80] ss:$12 sps:$4 sm:$0xff]   ;;  %14433 = vst [vmem:[#allocation59_spill] sm:$0xff] %v12666_v13 }
 0x2d1   :  { %2129 = vmatprep.subr.bf16.mxu0 %v12325_v22  ;;  %9978 = vmatprep.subr.bf16.mxu1 %v14362_v1  ;;  %v1995_v35 = vrot.slane %v1969_v17, 1 }
 0x2d2   :  { %v1971_v43 = vpop.f32.mrf.mxu1 }
 0x2d4   :  { %v9953_v50 = vpop.f32.mrf.mxu1  ;;  %2130 = vmatpush1.bf16.msra.mxu0 %v12332_v23  ;;  %9979 = vmatpush3.bf16.msra.mxu1 %v12385_v37  ;;  %v12593_v37 = vld [vmem:[#allocation12 + $0xb0] ss:$12 sps:$4 sm:$0xff]  }
 0x2d5   :  { %v11326_v56 = vpop.eup %11325  ;;  %2131 = vmatprep.subr.bf16.mxu0 %v12335_v24  ;;  %9980 = vmatprep.subr.bf16.mxu1 %v14362_v1 }
 0x2d6   :  { %v1997_v22 = vmul.f32 %v11326_v56, %v1995_v35 }
 0x2d8   :  { %v1998_v36 = vadd.f32 %v1997_v22, %v12561_v21  ;;  %2132 = vmatpush1.bf16.msra.mxu0 %v12338_v25  ;;  %9981 = vmatpush3.bf16.msra.mxu1 %v12391_v38  ;;  %v12596_v38 = vld [vmem:[#allocation12 + $0x94] ss:$12 sps:$4 sm:$0xff]  }
 0x2d9   :  { %2133 = vmatprep.subr.bf16.mxu0 %v12342_v26  ;;  %9982 = vmatprep.subr.bf16.mxu1 %v14362_v1 }
 0x2da   :  { %11329 = vtanh.f32 %v1998_v36 }
 0x2dc   :  { %2134 = vmatpush1.bf16.msra.mxu0 %v12345_v27  ;;  %9983 = vmatpush3.bf16.msra.mxu1 %v12397_v39  ;;  %v11328_v23 = vpop.eup %11327  ;;  %v12603_v39 = vld [vmem:[#allocation12 + $0x90] ss:$12 sps:$4 sm:$0xff]  }
 0x2dd   :  { %2135 = vmatprep.subr.bf16.mxu0 %v12348_v28  ;;  %9984 = vmatprep.subr.bf16.mxu1 %v14362_v1  ;;  %v2000_v24 = vsub.f32 1.0, %v11328_v23  ;;  %v2002_v27 = vmul.f32 0.0, %v11328_v23  ;;  %v12582_v28 = vld [vmem:[#allocation12 + $0xac] ss:$12 sps:$4 sm:$0xff]  }
 0x2e0   :  { %2136 = vmatpush1.bf16.msra.mxu0 %v12351_v29  ;;  %9985 = vmatpush3.bf16.msra.mxu1 %v12403_v40  ;;  %v12606_v40 = vld [vmem:[#allocation12 + $0x98] ss:$12 sps:$4 sm:$0xff]  }
 0x2e1   :  { %2137 = vmatprep.subr.bf16.mxu0 %v12355_v31  ;;  %9986 = vmatprep.subr.bf16.mxu1 %v14362_v1 }
 0x2e4   :  { %2138 = vmatpush1.bf16.msra.mxu0 %v12358_v32  ;;  %9987 = vmatpush3.bf16.msra.mxu1 %v12409_v41  ;;  %v12609_v41 = vld [vmem:[#allocation12 + $0x7c] ss:$12 sps:$4 sm:$0xff]  }
 0x2e5   :  { %2139 = vmatprep.subr.bf16.mxu0 %v12361_v33  ;;  %9988 = vmatprep.subr.bf16.mxu1 %v14362_v1 }
 0x2e7   :  { %v11330_v25 = vpop.eup %11329 }
 0x2e8   :  { %2140 = vmatpush1.bf16.msra.mxu0 %v12364_v34  ;;  %9989 = vmatpush3.bf16.msra.mxu1 %v12415_v42  ;;  %v2001_v26 = vmul.f32 %v11330_v25, %v2000_v24  ;;  %v12590_v34 = vld [vmem:[#allocation12 + $0xa8] ss:$12 sps:$4 sm:$0xff]   ;;  %v12613_v42 = vld [vmem:[#allocation12 + $0x78] ss:$12 sps:$4 sm:$0xff]  }
 0x2e9   :  { %2244 = vmatprep.subr.bf16.mxu0 %v12582_v28  ;;  %9994 = vmatprep.subr.bf16.mxu1 %v14362_v1 }
 0x2ea   :  { %v12586_v29 = vadd.f32 %v2002_v27, %v2001_v26 }
 0x2ec   :  { %14418 = vst [vmem:[#allocation44_spill] sm:$0xff] %v12586_v29  ;;  %v2119_v31 = vpack.c.bf16 %v12586_v29, %v12586_v29 }
 0x2ee   :  { %v2121_v32 = vshrl.u32 %v2119_v31, 16 }
 0x2f0   :  { %v2123_v33 = vrot.slane %v2121_v32, 3 }
 0x2f2   :  { %2158 = vmatmul.mubr.bf16.vlgmr.msra.gmra.mxu0 %v2123_v33  ;;  %9991 = vmatmul.mubr.bf16.vlgmr.msra.gmra.mxu1 %v2123_v33 }
 0x2f3   :  { %2245 = vmatpush1.bf16.msra.mxu0 %v12590_v34  ;;  %9995 = vmatpush3.bf16.msra.mxu1 %v12593_v37 }
 0x2f4   :  { %2246 = vmatprep.subr.bf16.mxu0 %v12596_v38  ;;  %9996 = vmatprep.subr.bf16.mxu1 %v14362_v1 }
 0x2f5   :  { %2276 = vmatprep.mubr.bf16.mxu0 %v14322_v54  ;;  %10010 = vmatprep.mubr.msk.bf16.mxu1 %vm11981_vm0, %v14362_v1 }
 0x2f7   :  { %2247 = vmatpush1.bf16.msra.mxu0 %v12603_v39  ;;  %9997 = vmatpush3.bf16.msra.mxu1 %v12606_v40 }
 0x2f8   :  { %2248 = vmatprep.subr.bf16.mxu0 %v12609_v41  ;;  %9998 = vmatprep.subr.bf16.mxu1 %v14362_v1 }
 0x2fb   :  { %2249 = vmatpush1.bf16.msra.mxu0 %v12613_v42  ;;  %9999 = vmatpush3.bf16.msra.mxu1 %v12616_v53 }
 0x2fc   :  { %2250 = vmatprep.subr.bf16.mxu0 %v12619_v15  ;;  %10000 = vmatprep.subr.bf16.mxu1 %v14362_v1 }
 0x2ff   :  { %2251 = vmatpush1.bf16.msra.mxu0 %v12623_v52  ;;  %10001 = vmatpush3.bf16.msra.mxu1 %v12626_v51 }
 0x300   :  { %2252 = vmatprep.subr.bf16.mxu0 %v12629_v58  ;;  %10002 = vmatprep.subr.bf16.mxu1 %v14362_v1 }
 0x303   :  { %2253 = vmatpush1.bf16.msra.mxu0 %v12633_v44  ;;  %10003 = vmatpush3.bf16.msra.mxu1 %v12636_v62 }
 0x304   :  { %2254 = vmatprep.subr.bf16.mxu0 %v12639_v63  ;;  %10004 = vmatprep.subr.bf16.mxu1 %v14362_v1 }
 0x307   :  { %2255 = vmatpush1.bf16.msra.mxu0 %v12643_v20  ;;  %10005 = vmatpush3.bf16.msra.mxu1 %v12646_v0 }
 0x308   :  { %2256 = vmatprep.subr.bf16.mxu0 %v12649_v3  ;;  %10006 = vmatprep.subr.bf16.mxu1 %v14362_v1 }
 0x30b   :  { %2257 = vmatpush1.bf16.msra.mxu0 %v12653_v46  ;;  %10007 = vmatpush3.bf16.msra.mxu1 %v12656_v7 }
 0x30c   :  { %2258 = vmatprep.subr.bf16.mxu0 %v12659_v8  ;;  %10008 = vmatprep.subr.bf16.mxu1 %v14362_v1 }
 0x30f   :  { %2259 = vmatpush1.bf16.msra.mxu0 %v12663_v9  ;;  %10009 = vmatpush3.bf16.msra.mxu1 %v12666_v13 }
 0x310   :  { %2362 = vmatprep.subr.bf16.mxu0 %v12669_v11  ;;  %10014 = vmatprep.subr.bf16.mxu1 %v14362_v1 }
 0x38b   :  { %v2039_v17 = vpop.f32.mrf.mxu0  ;;  %v2080_v49 = vpop.f32.mrf.mxu1 }
 0x38c   :  { %v2040_v18 = vadd.f32 %v2039_v17, %v12472_v57 }
 0x38d   :  { %v2041_v19 = vpop.f32.mrf.mxu0  ;;  %v9972_v35 = vpop.f32.mrf.mxu1 }
 0x38e   :  { %v2087_v43 = vrot.slane %v2040_v18, 7  ;;  %v2042_v50 = vadd.f32 %v2041_v19, %v12483_v5  ;;  %v2081_v18 = vadd.f32 %v2080_v49, %v12506_v48 }
 0x38f   :  { %v2043_v56 = vpop.f32.mrf.mxu0  ;;  %v2083_v22 = vpop.f32.mrf.mxu1 }
 0x390   :  { %v2089_v36 = vadd.f32 %v2087_v43, %v12478_v2  ;;  %v2097_v26 = vrot.slane %v2042_v50, 7  ;;  %v2107_v35 = vrot.slane %v2081_v18, 7 }
 0x391   :  { %v2044_v23 = vpop.f32.mrf.mxu0  ;;  %v9973_v24 = vpop.f32.mrf.mxu1 }
 0x392   :  { %v8924_v25 = vmul.f32 -1.442695, %v2089_v36  ;;  %v2099_v27 = vadd.f32 %v2097_v26, %v12490_v47 }
 0x394   :  { %11331 = vpow2.f32 %v8924_v25  ;;  %v8925_v31 = vmul.f32 -1.442695, %v2099_v27 }
 0x396   :  { %11333 = vpow2.f32 %v8925_v31 }
 0x3a1   :  { %v11332_v32 = vpop.eup %11331 }
 0x3a2   :  { %v2093_v33 = vadd.f32 1.0, %v11332_v32 }
 0x3a3   :  { %v11334_v17 = vpop.eup %11333 }
 0x3a4   :  { %11335 = vrcp.f32 %v2093_v33  ;;  %v2103_v19 = vadd.f32 1.0, %v11334_v17 }
 0x3a6   :  { %11337 = vrcp.f32 %v2103_v19 }
 0x3b1   :  { %v11336_v56 = vpop.eup %11335 }
 0x3b2   :  { %v2109_v22 = vmul.f32 %v11336_v56, %v2107_v35  ;;  %v2159_v43 = vpop.f32.mrf.mxu0  ;;  %v2200_v23 = vpop.f32.mrf.mxu1 }
 0x3b3   :  { %v2160_v50 = vadd.f32 %v2159_v43, %v12509_v4  ;;  %v11338_v56 = vpop.eup %11337 }
 0x3b4   :  { %v2110_v36 = vadd.f32 %v2109_v22, %v12525_v16  ;;  %v2161_v24 = vpop.f32.mrf.mxu0  ;;  %v9992_v25 = vpop.f32.mrf.mxu1  ;;  %v2112_v22 = vsub.f32 1.0, %v11338_v56 }
 0x3b5   :  { %v2207_v26 = vrot.slane %v2160_v50, 2  ;;  %v2162_v27 = vadd.f32 %v2161_v24, %v12514_v61  ;;  %v2115_v25 = vrot.slane %v12535_v10, 7  ;;  %v12766_v10 = vld [vmem:[#allocation15 + $0x8] ss:$12 sps:$4 sm:$0xff]  }
 0x3b6   :  { %11339 = vtanh.f32 %v2110_v36  ;;  %v2163_v31 = vpop.f32.mrf.mxu0  ;;  %v2203_v32 = vpop.f32.mrf.mxu1 }
 0x3b7   :  { %v2209_v49 = vadd.f32 %v2207_v26, %v12521_v6  ;;  %v2217_v19 = vrot.slane %v2162_v27, 2  ;;  %v2117_v24 = vmul.f32 %v11338_v56, %v2115_v25  ;;  %v2201_v56 = vadd.f32 %v2200_v23, %v12540_v55  ;;  %v12715_v25 = vld [vmem:[#allocation15 + $0x80] ss:$12 sps:$4 sm:$0xff]  }
 0x3b8   :  { %v2164_v33 = vpop.f32.mrf.mxu0  ;;  %v9993_v17 = vpop.f32.mrf.mxu1  ;;  %v12722_v23 = vld [vmem:[#allocation15 + $0x60] ss:$12 sps:$4 sm:$0xff]  }
 0x3b9   :  { %v8926_v18 = vmul.f32 -1.442695, %v2209_v49  ;;  %v2219_v35 = vadd.f32 %v2217_v19, %v12532_v59  ;;  %v12688_v49 = vld [vmem:[#allocation15 + $0xa8] ss:$12 sps:$4 sm:$0xff]   ;;  %v12691_v33 = vld [vmem:[#allocation15 + $0xb0] ss:$12 sps:$4 sm:$0xff]  }
 0x3ba   :  { %v12694_v17 = vld [vmem:[#allocation15 + $0x94] ss:$12 sps:$4 sm:$0xff]  }
 0x3bb   :  { %11341 = vpow2.f32 %v8926_v18  ;;  %v8927_v43 = vmul.f32 -1.442695, %v2219_v35  ;;  %v12704_v18 = vld [vmem:[#allocation15 + $0x98] ss:$12 sps:$4 sm:$0xff]   ;;  %v12707_v35 = vld [vmem:[#allocation15 + $0x7c] ss:$12 sps:$4 sm:$0xff]  }
 0x3bd   :  { %11343 = vpow2.f32 %v8927_v43 }
 0x3c3   :  { %v11340_v50 = vpop.eup %11339 }
 0x3c4   :  { %v2113_v45 = vmul.f32 %v11340_v50, %v2112_v22  ;;  %v12712_v22 = vld [vmem:[#allocation15 + $0x78] ss:$12 sps:$4 sm:$0xff]  }
 0x3c5   :  { %v12718_v50 = vld [vmem:[#allocation15 + $0x64] ss:$12 sps:$4 sm:$0xff]  }
 0x3c6   :  { %v12684_v36 = vadd.f32 %v2117_v24, %v2113_v45  ;;  %v12701_v45 = vld [vmem:[#allocation15 + $0x90] ss:$12 sps:$4 sm:$0xff]   ;;  %v2227_v24 = vrot.slane %v2201_v56, 2  ;;  %v12733_v56 = vld [vmem:[#allocation15 + $0x48] ss:$12 sps:$4 sm:$0xff]  }
 0x3c8   :  { %14435 = vst [vmem:[#allocation61_spill] sm:$0xff] %v12684_v36  ;;  %v11342_v31 = vpop.eup %11341  ;;  %v2239_v26 = vpack.c.bf16 %v12684_v36, %v12684_v36 }
 0x3c9   :  { %v2213_v32 = vadd.f32 1.0, %v11342_v31 }
 0x3ca   :  { %v2241_v27 = vshrl.u32 %v2239_v26, 16  ;;  %v11344_v19 = vpop.eup %11343 }
 0x3cb   :  { %11345 = vrcp.f32 %v2213_v32  ;;  %v2223_v43 = vadd.f32 1.0, %v11344_v19  ;;  %v12725_v32 = vld [vmem:[#allocation15 + $0x68] ss:$12 sps:$4 sm:$0xff]  }
 0x3cc   :  { %2277 = vmatmul.mubr.bf16.vlgmr.msra.gmra.mxu0 %v2241_v27  ;;  %10011 = vmatmul.mubr.bf16.vlgmr.msra.gmra.mxu1 %v2241_v27  ;;  %v12728_v27 = vld [vmem:[#allocation15 + $0x4c] ss:$12 sps:$4 sm:$0xff]  }
 0x3cd   :  { %2363 = vmatpush1.bf16.msra.mxu0 %v12688_v49  ;;  %10015 = vmatpush3.bf16.msra.mxu1 %v12691_v33  ;;  %11347 = vrcp.f32 %v2223_v43  ;;  %v12736_v43 = vld [vmem:[#allocation15 + $0x50] ss:$12 sps:$4 sm:$0xff]  }
 0x3ce   :  { %2364 = vmatprep.subr.bf16.mxu0 %v12694_v17  ;;  %10016 = vmatprep.subr.bf16.mxu1 %v14362_v1 }
 0x3cf   :  { %2394 = vmatprep.mubr.bf16.mxu0 %v14322_v54  ;;  %10030 = vmatprep.mubr.msk.bf16.mxu1 %vm11981_vm0, %v14362_v1  ;;  %v12753_v54 = vld [vmem:[#allocation15 + $0x18] ss:$12 sps:$4 sm:$0xff]  }
 0x3d0   :  { %14440 = vst [vmem:[#allocation66_spill] sm:$0xff] %v12753_v54 }
 0x3d1   :  { %2365 = vmatpush1.bf16.msra.mxu0 %v12701_v45  ;;  %10017 = vmatpush3.bf16.msra.mxu1 %v12704_v18 }
 0x3d2   :  { %2366 = vmatprep.subr.bf16.mxu0 %v12707_v35  ;;  %10018 = vmatprep.subr.bf16.mxu1 %v14362_v1 }
 0x3d5   :  { %2367 = vmatpush1.bf16.msra.mxu0 %v12712_v22  ;;  %10019 = vmatpush3.bf16.msra.mxu1 %v12715_v25 }
 0x3d6   :  { %2368 = vmatprep.subr.bf16.mxu0 %v12718_v50  ;;  %10020 = vmatprep.subr.bf16.mxu1 %v14362_v1 }
 0x3d8   :  { %v11346_v31 = vpop.eup %11345 }
 0x3d9   :  { %v2229_v26 = vmul.f32 %v11346_v31, %v2227_v24  ;;  %2369 = vmatpush1.bf16.msra.mxu0 %v12722_v23  ;;  %10021 = vmatpush3.bf16.msra.mxu1 %v12725_v32  ;;  %v12739_v24 = vld [vmem:[#allocation15 + $0x34] ss:$12 sps:$4 sm:$0xff]   ;;  %v12743_v31 = vld [vmem:[#allocation15 + $0x30] ss:$12 sps:$4 sm:$0xff]  }
 0x3da   :  { %2370 = vmatprep.subr.bf16.mxu0 %v12728_v27  ;;  %10022 = vmatprep.subr.bf16.mxu1 %v14362_v1  ;;  %14436 = vst [vmem:[#allocation62_spill] sm:$0xff] %v12739_v24  ;;  %14437 = vst [vmem:[#allocation63_spill] sm:$0xff] %v12743_v31  ;;  %v11348_v12 = vpop.eup %11347 }
 0x3db   :  { %v2230_v19 = vadd.f32 %v2229_v26, %v12561_v21  ;;  %v12746_v26 = vld [vmem:[#allocation15 + $0x38] ss:$12 sps:$4 sm:$0xff]  }
 0x3dc   :  { %14438 = vst [vmem:[#allocation64_spill] sm:$0xff] %v12746_v26 }
 0x3dd   :  { %11349 = vtanh.f32 %v2230_v19  ;;  %2371 = vmatpush1.bf16.msra.mxu0 %v12733_v56  ;;  %10023 = vmatpush3.bf16.msra.mxu1 %v12736_v43  ;;  %v12749_v19 = vld [vmem:[#allocation15 + $0x1c] ss:$12 sps:$4 sm:$0xff]  }
 0x3de   :  { %2372 = vmatprep.subr.bf16.mxu0 %v12739_v24  ;;  %10024 = vmatprep.subr.bf16.mxu1 %v14362_v1  ;;  %14439 = vst [vmem:[#allocation65_spill] sm:$0xff] %v12749_v19 }
 0x3e1   :  { %2373 = vmatpush1.bf16.msra.mxu0 %v12743_v31  ;;  %10025 = vmatpush3.bf16.msra.mxu1 %v12746_v26 }
 0x3e2   :  { %2374 = vmatprep.subr.bf16.mxu0 %v12749_v19  ;;  %10026 = vmatprep.subr.bf16.mxu1 %v14362_v1  ;;  %v2235_v19 = vrot.slane %v12586_v29, 1  ;;  %v14445_v29 = vmov 0  }
 0x3e5   :  { %2375 = vmatpush1.bf16.msra.mxu0 %v12753_v54  ;;  %10027 = vmatpush3.bf16.msra.mxu1 %v12756_v30  ;;  %v2232_v54 = vsub.f32 1.0, %v11348_v12 }
 0x3e6   :  { %2376 = vmatprep.subr.bf16.mxu0 %v12759_v60  ;;  %10028 = vmatprep.subr.bf16.mxu1 %v14362_v1  ;;  %v2237_v60 = vmul.f32 %v11348_v12, %v2235_v19 }
 0x3e9   :  { %2377 = vmatpush1.bf16.msra.mxu0 %v12763_v14  ;;  %10029 = vmatpush3.bf16.msra.mxu1 %v12766_v10 }
 0x3ea   :  { %v11350_v26 = vpop.eup %11349  ;;  %2480 = vmatprep.subr.bf16.mxu0 %v12582_v28  ;;  %10034 = vmatprep.subr.bf16.mxu1 %v14362_v1 }
 0x3eb   :  { %v2233_v30 = vmul.f32 %v11350_v26, %v2232_v54 }
 0x3ed   :  { %v12772_v31 = vadd.f32 %v2237_v60, %v2233_v30 }
 0x3ef   :  { %14444 = vst [vmem:[#allocation70_spill] sm:$0xff] %v12772_v31  ;;  %v2358_v24 = vpack.c.bf16 %v12772_v31, %v12772_v31 }
 0x3f1   :  { %v2360_v14 = vrot.slane %v2358_v24, 3 }
 0x3f3   :  { %2395 = vmatmul.mubr.bf16.vlgmr.msra.gmra.mxu0 %v2360_v14  ;;  %10031 = vmatmul.mubr.bf16.vlgmr.msra.gmra.mxu1 %v2360_v14 }
 0x3f4   :  { %2481 = vmatpush1.bf16.msra.mxu0 %v12590_v34  ;;  %10035 = vmatpush3.bf16.msra.mxu1 %v12593_v37 }
 0x3f5   :  { %2482 = vmatprep.subr.bf16.mxu0 %v12596_v38  ;;  %10036 = vmatprep.subr.bf16.mxu1 %v14362_v1 }
 0x3f6   :  { %2512 = vmatprep.mubr.bf16.mxu0 %v14445_v29  ;;  %10050 = vmatprep.mubr.msk.bf16.mxu1 %vm11981_vm0, %v14362_v1 }
 0x3f8   :  { %2483 = vmatpush1.bf16.msra.mxu0 %v12603_v39  ;;  %10037 = vmatpush3.bf16.msra.mxu1 %v12606_v40 }
 0x3f9   :  { %2484 = vmatprep.subr.bf16.mxu0 %v12609_v41  ;;  %10038 = vmatprep.subr.bf16.mxu1 %v14362_v1 }
 0x3fc   :  { %2485 = vmatpush1.bf16.msra.mxu0 %v12613_v42  ;;  %10039 = vmatpush3.bf16.msra.mxu1 %v12616_v53 }
 0x3fd   :  { %2486 = vmatprep.subr.bf16.mxu0 %v12619_v15  ;;  %10040 = vmatprep.subr.bf16.mxu1 %v14362_v1 }
 0x400   :  { %2487 = vmatpush1.bf16.msra.mxu0 %v12623_v52  ;;  %10041 = vmatpush3.bf16.msra.mxu1 %v12626_v51 }
 0x401   :  { %2488 = vmatprep.subr.bf16.mxu0 %v12629_v58  ;;  %10042 = vmatprep.subr.bf16.mxu1 %v14362_v1 }
 0x404   :  { %2489 = vmatpush1.bf16.msra.mxu0 %v12633_v44  ;;  %10043 = vmatpush3.bf16.msra.mxu1 %v12636_v62 }
 0x405   :  { %2490 = vmatprep.subr.bf16.mxu0 %v12639_v63  ;;  %10044 = vmatprep.subr.bf16.mxu1 %v14362_v1 }
 0x408   :  { %2491 = vmatpush1.bf16.msra.mxu0 %v12643_v20  ;;  %10045 = vmatpush3.bf16.msra.mxu1 %v12646_v0 }
 0x409   :  { %2492 = vmatprep.subr.bf16.mxu0 %v12649_v3  ;;  %10046 = vmatprep.subr.bf16.mxu1 %v14362_v1 }
 0x40c   :  { %2493 = vmatpush1.bf16.msra.mxu0 %v12653_v46  ;;  %10047 = vmatpush3.bf16.msra.mxu1 %v12656_v7 }
 0x40d   :  { %2494 = vmatprep.subr.bf16.mxu0 %v12659_v8  ;;  %10048 = vmatprep.subr.bf16.mxu1 %v14362_v1 }
 0x410   :  { %2495 = vmatpush1.bf16.msra.mxu0 %v12663_v9  ;;  %10049 = vmatpush3.bf16.msra.mxu1 %v12666_v13 }
 0x411   :  { %2600 = vmatprep.subr.bf16.mxu0 %v12669_v11  ;;  %10054 = vmatprep.subr.bf16.mxu1 %v14362_v1 }
 0x48c   :  { %v2278_v30 = vpop.f32.mrf.mxu0  ;;  %v2319_v54 = vpop.f32.mrf.mxu1 }
 0x48d   :  { %v2279_v14 = vadd.f32 %v2278_v30, %v12472_v57 }
 0x48e   :  { %v2280_v60 = vpop.f32.mrf.mxu0  ;;  %v10012_v12 = vpop.f32.mrf.mxu1 }
 0x48f   :  { %v2326_v24 = vrot.slane %v2279_v14, 6  ;;  %v2281_v26 = vadd.f32 %v2280_v60, %v12483_v5  ;;  %v2320_v14 = vadd.f32 %v2319_v54, %v12506_v48 }
 0x490   :  { %v2282_v19 = vpop.f32.mrf.mxu0  ;;  %v2322_v8 = vpop.f32.mrf.mxu1 }
 0x491   :  { %v2328_v7 = vadd.f32 %v2326_v24, %v12478_v2  ;;  %v2336_v3 = vrot.slane %v2281_v26, 6  ;;  %v2346_v19 = vrot.slane %v2320_v14, 6 }
 0x492   :  { %v2283_v9 = vpop.f32.mrf.mxu0  ;;  %v10013_v46 = vpop.f32.mrf.mxu1 }
 0x493   :  { %v8928_v13 = vmul.f32 -1.442695, %v2328_v7  ;;  %v2338_v1 = vadd.f32 %v2336_v3, %v12490_v47 }
 0x495   :  { %11351 = vpow2.f32 %v8928_v13  ;;  %v8929_v11 = vmul.f32 -1.442695, %v2338_v1 }
 0x497   :  { %11353 = vpow2.f32 %v8929_v11 }
 0x4a2   :  { %v11352_v0 = vpop.eup %11351 }
 0x4a3   :  { %v2332_v30 = vadd.f32 1.0, %v11352_v0 }
 0x4a4   :  { %v11354_v12 = vpop.eup %11353 }
 0x4a5   :  { %11355 = vrcp.f32 %v2332_v30  ;;  %v2342_v60 = vadd.f32 1.0, %v11354_v12 }
 0x4a7   :  { %11357 = vrcp.f32 %v2342_v60 }
 0x4b2   :  { %v11356_v8 = vpop.eup %11355 }
 0x4b3   :  { %v2348_v5 = vmul.f32 %v11356_v8, %v2346_v19  ;;  %v2396_v9 = vpop.f32.mrf.mxu0  ;;  %v2437_v46 = vpop.f32.mrf.mxu1 }
 0x4b4   :  { %v2397_v7 = vadd.f32 %v2396_v9, %v12509_v4  ;;  %v11358_v8 = vpop.eup %11357 }
 0x4b5   :  { %v2349_v13 = vadd.f32 %v2348_v5, %v12525_v16  ;;  %v2398_v3 = vpop.f32.mrf.mxu0  ;;  %v10032_v1 = vpop.f32.mrf.mxu1  ;;  %v2351_v5 = vsub.f32 1.0, %v11358_v8 }
 0x4b6   :  { %v2444_v11 = vrot.slane %v2397_v7, 3  ;;  %v2399_v0 = vadd.f32 %v2398_v3, %v12514_v61  ;;  %v2354_v1 = vrot.slane %v12684_v36, 7 }
 0x4b7   :  { %11359 = vtanh.f32 %v2349_v13  ;;  %v2400_v24 = vpop.f32.mrf.mxu0  ;;  %v2440_v26 = vpop.f32.mrf.mxu1 }
 0x4b8   :  { %v2446_v54 = vadd.f32 %v2444_v11, %v12521_v6  ;;  %v2454_v60 = vrot.slane %v2399_v0, 3  ;;  %v2356_v3 = vmul.f32 %v11358_v8, %v2354_v1  ;;  %v14448_v8 = vld [vmem:[#allocation62_spill] sm:$0xff]  ;;  %v14451_v1 = vld [vmem:[#allocation65_spill] sm:$0xff] }
 0x4b9   :  { %v2401_v30 = vpop.f32.mrf.mxu0  ;;  %v10033_v12 = vpop.f32.mrf.mxu1 }
 0x4ba   :  { %v8930_v14 = vmul.f32 -1.442695, %v2446_v54  ;;  %v2456_v19 = vadd.f32 %v2454_v60, %v12532_v59  ;;  %v14447_v54 = vmov 0.0   ;;  %v2438_v30 = vadd.f32 %v2437_v46, %v12540_v55 }
 0x4bc   :  { %11361 = vpow2.f32 %v8930_v14  ;;  %v8931_v9 = vmul.f32 -1.442695, %v2456_v19  ;;  %v2464_v14 = vrot.slane %v2438_v30, 3 }
 0x4be   :  { %11363 = vpow2.f32 %v8931_v9  ;;  %v14449_v9 = vld [vmem:[#allocation63_spill] sm:$0xff] }
 0x4c4   :  { %v11360_v7 = vpop.eup %11359 }
 0x4c5   :  { %v2352_v4 = vmul.f32 %v11360_v7, %v2351_v5  ;;  %v14450_v5 = vld [vmem:[#allocation64_spill] sm:$0xff]  ;;  %v14452_v7 = vld [vmem:[#allocation66_spill] sm:$0xff] }
 0x4c7   :  { %v12822_v13 = vadd.f32 %v2356_v3, %v2352_v4  ;;  %v14453_v3 = vld [vmem:[#allocation67_spill] sm:$0xff] }
 0x4c9   :  { %14446 = vst [vmem:[#allocation71_spill] sm:$0xff] %v12822_v13  ;;  %v11362_v24 = vpop.eup %11361  ;;  %v2476_v11 = vpack.c.bf16 %v12822_v13, %v12822_v13 }
 0x4ca   :  { %v2450_v26 = vadd.f32 1.0, %v11362_v24 }
 0x4cb   :  { %v2478_v0 = vrot.slane %v2476_v11, 1  ;;  %v11364_v4 = vpop.eup %11363  ;;  %v14454_v11 = vld [vmem:[#allocation68_spill] sm:$0xff] }
 0x4cc   :  { %11365 = vrcp.f32 %v2450_v26  ;;  %v2460_v12 = vadd.f32 1.0, %v11364_v4  ;;  %v14455_v26 = vld [vmem:[#allocation69_spill] sm:$0xff]  ;;  %v2472_v4 = vrot.slane %v12772_v31, 1 }
 0x4cd   :  { %2513 = vmatmul.mubr.bf16.vlgmr.msra.gmra.mxu0 %v2478_v0  ;;  %10051 = vmatmul.mubr.bf16.vlgmr.msra.gmra.mxu1 %v2478_v0 }
 0x4ce   :  { %2601 = vmatpush1.bf16.msra.mxu0 %v12688_v49  ;;  %10055 = vmatpush3.bf16.msra.mxu1 %v12691_v33  ;;  %11367 = vrcp.f32 %v2460_v12 }
 0x4cf   :  { %2602 = vmatprep.subr.bf16.mxu0 %v12694_v17  ;;  %10056 = vmatprep.subr.bf16.mxu1 %v14447_v54 }
 0x4d0   :  { %2632 = vmatprep.mubr.bf16.mxu0 %v14445_v29  ;;  %10070 = vmatprep.mubr.msk.bf16.mxu1 %vm11981_vm0, %v14447_v54 }
 0x4d2   :  { %2603 = vmatpush1.bf16.msra.mxu0 %v12701_v45  ;;  %10057 = vmatpush3.bf16.msra.mxu1 %v12704_v18 }
 0x4d3   :  { %2604 = vmatprep.subr.bf16.mxu0 %v12707_v35  ;;  %10058 = vmatprep.subr.bf16.mxu1 %v14447_v54 }
 0x4d6   :  { %2605 = vmatpush1.bf16.msra.mxu0 %v12712_v22  ;;  %10059 = vmatpush3.bf16.msra.mxu1 %v12715_v25 }
 0x4d7   :  { %2606 = vmatprep.subr.bf16.mxu0 %v12718_v50  ;;  %10060 = vmatprep.subr.bf16.mxu1 %v14447_v54 }
 0x4d9   :  { %v11366_v60 = vpop.eup %11365 }
 0x4da   :  { %v2466_v19 = vmul.f32 %v11366_v60, %v2464_v14  ;;  %2607 = vmatpush1.bf16.msra.mxu0 %v12722_v23  ;;  %10061 = vmatpush3.bf16.msra.mxu1 %v12725_v32 }
 0x4db   :  { %2608 = vmatprep.subr.bf16.mxu0 %v12728_v27  ;;  %10062 = vmatprep.subr.bf16.mxu1 %v14447_v54  ;;  %v11368_v24 = vpop.eup %11367 }
 0x4dc   :  { %v2467_v46 = vadd.f32 %v2466_v19, %v12561_v21  ;;  %v2469_v0 = vsub.f32 1.0, %v11368_v24  ;;  %v2474_v14 = vmul.f32 %v11368_v24, %v2472_v4  ;;  %v14458_v24 = vld [vmem:[#allocation54_spill] sm:$0xff]  ;;  %v14460_v4 = vld [vmem:[#allocation56_spill] sm:$0xff] }
 0x4de   :  { %11369 = vtanh.f32 %v2467_v46  ;;  %2609 = vmatpush1.bf16.msra.mxu0 %v12733_v56  ;;  %10063 = vmatpush3.bf16.msra.mxu1 %v12736_v43 }
 0x4df   :  { %2610 = vmatprep.subr.bf16.mxu0 %v14448_v8  ;;  %10064 = vmatprep.subr.bf16.mxu1 %v14447_v54 }
 0x4e2   :  { %2611 = vmatpush1.bf16.msra.mxu0 %v14449_v9  ;;  %10065 = vmatpush3.bf16.msra.mxu1 %v14450_v5 }
 0x4e3   :  { %2612 = vmatprep.subr.bf16.mxu0 %v14451_v1  ;;  %10066 = vmatprep.subr.bf16.mxu1 %v14447_v54 }
 0x4e6   :  { %2613 = vmatpush1.bf16.msra.mxu0 %v14452_v7  ;;  %10067 = vmatpush3.bf16.msra.mxu1 %v14453_v3 }
 0x4e7   :  { %2614 = vmatprep.subr.bf16.mxu0 %v14454_v11  ;;  %10068 = vmatprep.subr.bf16.mxu1 %v14447_v54 }
 0x4ea   :  { %2615 = vmatpush1.bf16.msra.mxu0 %v14455_v26  ;;  %10069 = vmatpush3.bf16.msra.mxu1 %v12766_v10 }
 0x4eb   :  { %v11370_v30 = vpop.eup %11369  ;;  %2720 = vmatprep.subr.bf16.mxu0 %v12582_v28  ;;  %10074 = vmatprep.subr.bf16.mxu1 %v14447_v54 }
 0x4ec   :  { %v2470_v12 = vmul.f32 %v11370_v30, %v2469_v0  ;;  %v14459_v0 = vld [vmem:[#allocation55_spill] sm:$0xff]  ;;  %v14461_v30 = vld [vmem:[#allocation57_spill] sm:$0xff] }
 0x4ee   :  { %v12864_v60 = vadd.f32 %v2474_v14, %v2470_v12  ;;  %v14462_v12 = vld [vmem:[#allocation58_spill] sm:$0xff]  ;;  %v14463_v14 = vld [vmem:[#allocation59_spill] sm:$0xff] }
 0x4f0   :  { %14456 = vst [vmem:[#allocation62_spill] sm:$0xff] %v12864_v60  ;;  %v2594_v19 = vpack.c.bf16 %v12864_v60, %v12864_v60 }
 0x4f2   :  { %v2596_v46 = vshrl.u32 %v2594_v19, 16  ;;  %v14464_v19 = vld [vmem:[#allocation60_spill] sm:$0xff] }
 0x4f4   :  { %v2598_v36 = vrot.slane %v2596_v46, 2 }
 0x4f6   :  { %2633 = vmatmul.mubr.bf16.vlgmr.msra.gmra.mxu0 %v2598_v36  ;;  %10071 = vmatmul.mubr.bf16.vlgmr.msra.gmra.mxu1 %v2598_v36  ;;  %v14457_v36 = vld [vmem:[#allocation53_spill] sm:$0xff] }
 0x4f7   :  { %2721 = vmatpush1.bf16.msra.mxu0 %v12590_v34  ;;  %10075 = vmatpush3.bf16.msra.mxu1 %v12593_v37 }
 0x4f8   :  { %2722 = vmatprep.subr.bf16.mxu0 %v12596_v38  ;;  %10076 = vmatprep.subr.bf16.mxu1 %v14447_v54 }
 0x4f9   :  { %2752 = vmatprep.mubr.bf16.mxu0 %v14445_v29  ;;  %10090 = vmatprep.mubr.msk.bf16.mxu1 %vm11981_vm0, %v14447_v54 }
 0x4fb   :  { %2723 = vmatpush1.bf16.msra.mxu0 %v12603_v39  ;;  %10077 = vmatpush3.bf16.msra.mxu1 %v12606_v40 }
 0x4fc   :  { %2724 = vmatprep.subr.bf16.mxu0 %v12609_v41  ;;  %10078 = vmatprep.subr.bf16.mxu1 %v14447_v54 }
 0x4ff   :  { %2725 = vmatpush1.bf16.msra.mxu0 %v12613_v42  ;;  %10079 = vmatpush3.bf16.msra.mxu1 %v12616_v53 }
 0x500   :  { %2726 = vmatprep.subr.bf16.mxu0 %v12619_v15  ;;  %10080 = vmatprep.subr.bf16.mxu1 %v14447_v54 }
 0x503   :  { %2727 = vmatpush1.bf16.msra.mxu0 %v12623_v52  ;;  %10081 = vmatpush3.bf16.msra.mxu1 %v12626_v51 }
 0x504   :  { %2728 = vmatprep.subr.bf16.mxu0 %v12629_v58  ;;  %10082 = vmatprep.subr.bf16.mxu1 %v14447_v54 }
 0x507   :  { %2729 = vmatpush1.bf16.msra.mxu0 %v12633_v44  ;;  %10083 = vmatpush3.bf16.msra.mxu1 %v12636_v62 }
 0x508   :  { %2730 = vmatprep.subr.bf16.mxu0 %v12639_v63  ;;  %10084 = vmatprep.subr.bf16.mxu1 %v14447_v54 }
 0x50b   :  { %2731 = vmatpush1.bf16.msra.mxu0 %v12643_v20  ;;  %10085 = vmatpush3.bf16.msra.mxu1 %v14457_v36 }
 0x50c   :  { %2732 = vmatprep.subr.bf16.mxu0 %v14458_v24  ;;  %10086 = vmatprep.subr.bf16.mxu1 %v14447_v54 }
 0x50f   :  { %2733 = vmatpush1.bf16.msra.mxu0 %v14459_v0  ;;  %10087 = vmatpush3.bf16.msra.mxu1 %v14460_v4  ;;  %v14465_v4 = vld [vmem:[#allocation39_spill] sm:$0xff] }
 0x510   :  { %2734 = vmatprep.subr.bf16.mxu0 %v14461_v30  ;;  %10088 = vmatprep.subr.bf16.mxu1 %v14447_v54 }
 0x513   :  { %2735 = vmatpush1.bf16.msra.mxu0 %v14462_v12  ;;  %10089 = vmatpush3.bf16.msra.mxu1 %v14463_v14 }
 0x514   :  { %2838 = vmatprep.subr.bf16.mxu0 %v14464_v19  ;;  %10094 = vmatprep.subr.bf16.mxu1 %v14447_v54 }
 0x58d   :  { %v2514_v46 = vpop.f32.mrf.mxu0  ;;  %v2555_v31 = vpop.f32.mrf.mxu1 }
 0x58e   :  { %v2515_v24 = vadd.f32 %v2514_v46, %v12472_v57 }
 0x58f   :  { %v2516_v36 = vpop.f32.mrf.mxu0  ;;  %v10052_v0 = vpop.f32.mrf.mxu1 }
 0x590   :  { %v2562_v20 = vrot.slane %v2515_v24, 5  ;;  %v2517_v63 = vadd.f32 %v2516_v36, %v14465_v4  ;;  %v2556_v24 = vadd.f32 %v2555_v31, %v12506_v48 }
 0x591   :  { %v2518_v30 = vpop.f32.mrf.mxu0  ;;  %v2558_v62 = vpop.f32.mrf.mxu1 }
 0x592   :  { %v2564_v44 = vadd.f32 %v2562_v20, %v12478_v2  ;;  %v2572_v51 = vrot.slane %v2517_v63, 5  ;;  %v2582_v30 = vrot.slane %v2556_v24, 5  ;;  %v14466_v20 = vld [vmem:[#allocation41_spill] sm:$0xff] }
 0x593   :  { %v2519_v12 = vpop.f32.mrf.mxu0  ;;  %v10053_v58 = vpop.f32.mrf.mxu1 }
 0x594   :  { %v8932_v14 = vmul.f32 -1.442695, %v2564_v44  ;;  %v2574_v19 = vadd.f32 %v2572_v51, %v12490_v47 }
 0x596   :  { %11371 = vpow2.f32 %v8932_v14  ;;  %v8933_v52 = vmul.f32 -1.442695, %v2574_v19 }
 0x598   :  { %11373 = vpow2.f32 %v8933_v52 }
 0x5a3   :  { %v11372_v15 = vpop.eup %11371 }
 0x5a4   :  { %v2568_v46 = vadd.f32 1.0, %v11372_v15 }
 0x5a5   :  { %v11374_v0 = vpop.eup %11373 }
 0x5a6   :  { %11375 = vrcp.f32 %v2568_v46  ;;  %v2578_v36 = vadd.f32 1.0, %v11374_v0 }
 0x5a8   :  { %11377 = vrcp.f32 %v2578_v36 }
 0x5b3   :  { %v11376_v62 = vpop.eup %11375 }
 0x5b4   :  { %v2584_v4 = vmul.f32 %v11376_v62, %v2582_v30 }
 0x5b6   :  { %v2585_v58 = vadd.f32 %v2584_v4, %v12525_v16  ;;  %v2634_v44 = vpop.f32.mrf.mxu0  ;;  %v2675_v63 = vpop.f32.mrf.mxu1 }
 0x5b7   :  { %v2635_v12 = vadd.f32 %v2634_v44, %v14466_v20  ;;  %v11378_v4 = vpop.eup %11377 }
 0x5b8   :  { %11379 = vtanh.f32 %v2585_v58  ;;  %v2636_v51 = vpop.f32.mrf.mxu0  ;;  %v10072_v52 = vpop.f32.mrf.mxu1  ;;  %v2587_v16 = vsub.f32 1.0, %v11378_v4  ;;  %v2590_v58 = vrot.slane %v12822_v13, 7  ;;  %v13227_v13 = vld [vmem:[#allocation15] ss:$12 sps:$4 sm:$0xff]  }
 0x5b9   :  { %v2682_v14 = vrot.slane %v2635_v12, 4  ;;  %v2637_v15 = vadd.f32 %v2636_v51, %v12514_v61 }
 0x5ba   :  { %v2638_v19 = vpop.f32.mrf.mxu0  ;;  %v2678_v46 = vpop.f32.mrf.mxu1  ;;  %v2592_v20 = vmul.f32 %v11378_v4, %v2590_v58  ;;  %v2710_v58 = vrot.slane %v12864_v60, 1  ;;  %v13217_v60 = vld [vmem:[#allocation15 + $0x18] ss:$12 sps:$4 sm:$0xff]  }
 0x5bb   :  { %v2684_v31 = vadd.f32 %v2682_v14, %v12521_v6  ;;  %v2692_v36 = vrot.slane %v2637_v15, 4 }
 0x5bc   :  { %v2639_v0 = vpop.f32.mrf.mxu0  ;;  %v10073_v24 = vpop.f32.mrf.mxu1 }
 0x5bd   :  { %v8934_v30 = vmul.f32 -1.442695, %v2684_v31  ;;  %v2694_v62 = vadd.f32 %v2692_v36, %v12532_v59 }
 0x5bf   :  { %11381 = vpow2.f32 %v8934_v30  ;;  %v8935_v52 = vmul.f32 -1.442695, %v2694_v62 }
 0x5c1   :  { %11383 = vpow2.f32 %v8935_v52 }
 0x5c5   :  { %v11380_v44 = vpop.eup %11379 }
 0x5c6   :  { %v2588_v12 = vmul.f32 %v11380_v44, %v2587_v16 }
 0x5c8   :  { %v12914_v51 = vadd.f32 %v2592_v20, %v2588_v12  ;;  %v2676_v20 = vadd.f32 %v2675_v63, %v12540_v55 }
 0x5ca   :  { %14467 = vst [vmem:[#allocation63_spill] sm:$0xff] %v12914_v51  ;;  %v2714_v14 = vpack.c.bf16 %v12914_v51, %v12914_v51  ;;  %v2702_v24 = vrot.slane %v2676_v20, 4  ;;  %v14481_v20 = vld [vmem:[#allocation57_spill] sm:$0xff] }
 0x5cc   :  { %v11382_v19 = vpop.eup %11381  ;;  %v2716_v46 = vshrl.u32 %v2714_v14, 16 }
 0x5cd   :  { %v2688_v15 = vadd.f32 1.0, %v11382_v19 }
 0x5ce   :  { %v2718_v31 = vrot.slane %v2716_v46, 1  ;;  %v11384_v16 = vpop.eup %11383 }
 0x5cf   :  { %11385 = vrcp.f32 %v2688_v15  ;;  %v2698_v0 = vadd.f32 1.0, %v11384_v16  ;;  %v14478_v15 = vld [vmem:[#allocation54_spill] sm:$0xff]  ;;  %v14480_v16 = vld [vmem:[#allocation56_spill] sm:$0xff] }
 0x5d0   :  { %2753 = vmatmul.mubr.bf16.vlgmr.msra.gmra.mxu0 %v2718_v31  ;;  %10091 = vmatmul.mubr.bf16.vlgmr.msra.gmra.mxu1 %v2718_v31  ;;  %v14479_v31 = vld [vmem:[#allocation55_spill] sm:$0xff] }
 0x5d1   :  { %2839 = vmatpush1.bf16.msra.mxu0 %v12688_v49  ;;  %10095 = vmatpush3.bf16.msra.mxu1 %v12691_v33  ;;  %11387 = vrcp.f32 %v2698_v0  ;;  %v14482_v0 = vld [vmem:[#allocation58_spill] sm:$0xff] }
 0x5d2   :  { %2840 = vmatprep.subr.bf16.mxu0 %v12694_v17  ;;  %10096 = vmatprep.subr.bf16.mxu1 %v14447_v54 }
 0x5d3   :  { %2870 = vmatprep.mubr.bf16.mxu0 %v14445_v29  ;;  %10110 = vmatprep.mubr.msk.bf16.mxu1 %vm11981_vm0, %v14447_v54 }
 0x5d5   :  { %2841 = vmatpush1.bf16.msra.mxu0 %v12701_v45  ;;  %10097 = vmatpush3.bf16.msra.mxu1 %v12704_v18 }
 0x5d6   :  { %2842 = vmatprep.subr.bf16.mxu0 %v12707_v35  ;;  %10098 = vmatprep.subr.bf16.mxu1 %v14447_v54 }
 0x5d9   :  { %2843 = vmatpush1.bf16.msra.mxu0 %v12712_v22  ;;  %10099 = vmatpush3.bf16.msra.mxu1 %v12715_v25 }
 0x5da   :  { %2844 = vmatprep.subr.bf16.mxu0 %v12718_v50  ;;  %10100 = vmatprep.subr.bf16.mxu1 %v14447_v54 }
 0x5dc   :  { %v11386_v30 = vpop.eup %11385 }
 0x5dd   :  { %v2704_v36 = vmul.f32 %v11386_v30, %v2702_v24  ;;  %2845 = vmatpush1.bf16.msra.mxu0 %v12722_v23  ;;  %10101 = vmatpush3.bf16.msra.mxu1 %v12725_v32  ;;  %v14483_v24 = vld [vmem:[#allocation59_spill] sm:$0xff]  ;;  %v14484_v30 = vld [vmem:[#allocation60_spill] sm:$0xff] }
 0x5de   :  { %2846 = vmatprep.subr.bf16.mxu0 %v12728_v27  ;;  %10102 = vmatprep.subr.bf16.mxu1 %v14447_v54  ;;  %v11388_v4 = vpop.eup %11387 }
 0x5df   :  { %v2705_v63 = vadd.f32 %v2704_v36, %v12561_v21  ;;  %v2707_v62 = vsub.f32 1.0, %v11388_v4  ;;  %v2712_v12 = vmul.f32 %v11388_v4, %v2710_v58 }
 0x5e1   :  { %11389 = vtanh.f32 %v2705_v63  ;;  %2847 = vmatpush1.bf16.msra.mxu0 %v12733_v56  ;;  %10103 = vmatpush3.bf16.msra.mxu1 %v12736_v43 }
 0x5e2   :  { %2848 = vmatprep.subr.bf16.mxu0 %v14448_v8  ;;  %10104 = vmatprep.subr.bf16.mxu1 %v14447_v54 }
 0x5e5   :  { %2849 = vmatpush1.bf16.msra.mxu0 %v14449_v9  ;;  %10105 = vmatpush3.bf16.msra.mxu1 %v14450_v5 }
 0x5e6   :  { %2850 = vmatprep.subr.bf16.mxu0 %v14451_v1  ;;  %10106 = vmatprep.subr.bf16.mxu1 %v14447_v54 }
 0x5e9   :  { %2851 = vmatpush1.bf16.msra.mxu0 %v14452_v7  ;;  %10107 = vmatpush3.bf16.msra.mxu1 %v14453_v3 }
 0x5ea   :  { %2852 = vmatprep.subr.bf16.mxu0 %v14454_v11  ;;  %10108 = vmatprep.subr.bf16.mxu1 %v14447_v54 }
 0x5ed   :  { %2853 = vmatpush1.bf16.msra.mxu0 %v14455_v26  ;;  %10109 = vmatpush3.bf16.msra.mxu1 %v12766_v10 }
 0x5ee   :  { %v11390_v44 = vpop.eup %11389  ;;  %2956 = vmatprep.subr.bf16.mxu0 %v12582_v28  ;;  %10114 = vmatprep.subr.bf16.mxu1 %v14447_v54  ;;  %v14469_v28 = vld [vmem:[#allocation45_spill] sm:$0xff] }
 0x5ef   :  { %v2708_v52 = vmul.f32 %v11390_v44, %v2707_v62 }
 0x5f1   :  { %v12956_v14 = vadd.f32 %v2712_v12, %v2708_v52  ;;  %v14485_v52 = vld [vmem:[#allocation39_spill] sm:$0xff] }
 0x5f3   :  { %14468 = vst [vmem:[#allocation64_spill] sm:$0xff] %v12956_v14  ;;  %v2834_v19 = vpack.c.bf16 %v12956_v14, %v12956_v14 }
 0x5f5   :  { %v2836_v46 = vrot.slane %v2834_v19, 2 }
 0x5f7   :  { %2871 = vmatmul.mubr.bf16.vlgmr.msra.gmra.mxu0 %v2836_v46  ;;  %10111 = vmatmul.mubr.bf16.vlgmr.msra.gmra.mxu1 %v2836_v46 }
 0x5f8   :  { %2957 = vmatpush1.bf16.msra.mxu0 %v12590_v34  ;;  %10115 = vmatpush3.bf16.msra.mxu1 %v12593_v37  ;;  %v14470_v34 = vld [vmem:[#allocation46_spill] sm:$0xff]  ;;  %v14471_v37 = vld [vmem:[#allocation47_spill] sm:$0xff] }
 0x5f9   :  { %2958 = vmatprep.subr.bf16.mxu0 %v12596_v38  ;;  %10116 = vmatprep.subr.bf16.mxu1 %v14447_v54  ;;  %v14472_v38 = vld [vmem:[#allocation48_spill] sm:$0xff]  ;;  %14494 = vst [vmem:[#allocation46_spill] sm:$0xff] %v13217_v60 }
 0x5fa   :  { %2988 = vmatprep.mubr.bf16.mxu0 %v14445_v29  ;;  %10130 = vmatprep.mubr.msk.bf16.mxu1 %vm11981_vm0, %v14447_v54 }
 0x5fc   :  { %2959 = vmatpush1.bf16.msra.mxu0 %v12603_v39  ;;  %10117 = vmatpush3.bf16.msra.mxu1 %v12606_v40  ;;  %v14473_v39 = vld [vmem:[#allocation49_spill] sm:$0xff]  ;;  %v14474_v40 = vld [vmem:[#allocation50_spill] sm:$0xff] }
 0x5fd   :  { %2960 = vmatprep.subr.bf16.mxu0 %v12609_v41  ;;  %10118 = vmatprep.subr.bf16.mxu1 %v14447_v54  ;;  %v14475_v41 = vld [vmem:[#allocation51_spill] sm:$0xff]  ;;  %14497 = vst [vmem:[#allocation49_spill] sm:$0xff] %v13227_v13 }
 0x600   :  { %2961 = vmatpush1.bf16.msra.mxu0 %v12613_v42  ;;  %10119 = vmatpush3.bf16.msra.mxu1 %v12616_v53  ;;  %v14476_v42 = vld [vmem:[#allocation52_spill] sm:$0xff]  ;;  %v14477_v53 = vld [vmem:[#allocation53_spill] sm:$0xff] }
 0x601   :  { %2962 = vmatprep.subr.bf16.mxu0 %v14469_v28  ;;  %10120 = vmatprep.subr.bf16.mxu1 %v14447_v54 }
 0x604   :  { %2963 = vmatpush1.bf16.msra.mxu0 %v14470_v34  ;;  %10121 = vmatpush3.bf16.msra.mxu1 %v14471_v37 }
 0x605   :  { %2964 = vmatprep.subr.bf16.mxu0 %v14472_v38  ;;  %10122 = vmatprep.subr.bf16.mxu1 %v14447_v54 }
 0x608   :  { %2965 = vmatpush1.bf16.msra.mxu0 %v14473_v39  ;;  %10123 = vmatpush3.bf16.msra.mxu1 %v14474_v40 }
 0x609   :  { %2966 = vmatprep.subr.bf16.mxu0 %v14475_v41  ;;  %10124 = vmatprep.subr.bf16.mxu1 %v14447_v54 }
 0x60c   :  { %2967 = vmatpush1.bf16.msra.mxu0 %v14476_v42  ;;  %10125 = vmatpush3.bf16.msra.mxu1 %v14477_v53 }
 0x60d   :  { %2968 = vmatprep.subr.bf16.mxu0 %v14478_v15  ;;  %10126 = vmatprep.subr.bf16.mxu1 %v14447_v54 }
 0x610   :  { %2969 = vmatpush1.bf16.msra.mxu0 %v14479_v31  ;;  %10127 = vmatpush3.bf16.msra.mxu1 %v14480_v16 }
 0x611   :  { %2970 = vmatprep.subr.bf16.mxu0 %v14481_v20  ;;  %10128 = vmatprep.subr.bf16.mxu1 %v14447_v54 }
 0x614   :  { %2971 = vmatpush1.bf16.msra.mxu0 %v14482_v0  ;;  %10129 = vmatpush3.bf16.msra.mxu1 %v14483_v24 }
 0x615   :  { %3076 = vmatprep.subr.bf16.mxu0 %v14484_v30  ;;  %10134 = vmatprep.subr.bf16.mxu1 %v14447_v54 }
 0x690   :  { %v2754_v36 = vpop.f32.mrf.mxu0  ;;  %v2795_v63 = vpop.f32.mrf.mxu1 }
 0x691   :  { %v2755_v4 = vadd.f32 %v2754_v36, %v12472_v57  ;;  %v2796_v31 = vadd.f32 %v2795_v63, %v12506_v48 }
 0x692   :  { %v2756_v62 = vpop.f32.mrf.mxu0  ;;  %v10092_v58 = vpop.f32.mrf.mxu1 }
 0x693   :  { %v2802_v44 = vrot.slane %v2755_v4, 4  ;;  %v2757_v12 = vadd.f32 %v2756_v62, %v14485_v52  ;;  %v2822_v20 = vrot.slane %v2796_v31, 4  ;;  %v14486_v4 = vld [vmem:[#allocation41_spill] sm:$0xff]  ;;  %v14487_v58 = vld [vmem:[#allocation42_spill] sm:$0xff] }
 0x694   :  { %v2758_v19 = vpop.f32.mrf.mxu0  ;;  %v2798_v46 = vpop.f32.mrf.mxu1 }
 0x695   :  { %v2804_v28 = vadd.f32 %v2802_v44, %v12478_v2  ;;  %v2812_v39 = vrot.slane %v2757_v12, 4 }
 0x696   :  { %v2759_v34 = vpop.f32.mrf.mxu0  ;;  %v10093_v37 = vpop.f32.mrf.mxu1 }
 0x697   :  { %v8936_v38 = vmul.f32 -1.442695, %v2804_v28  ;;  %v2814_v40 = vadd.f32 %v2812_v39, %v12490_v47 }
 0x699   :  { %11391 = vpow2.f32 %v8936_v38  ;;  %v8937_v41 = vmul.f32 -1.442695, %v2814_v40 }
 0x69b   :  { %11393 = vpow2.f32 %v8937_v41 }
 0x6a6   :  { %v11392_v42 = vpop.eup %11391 }
 0x6a7   :  { %v2808_v53 = vadd.f32 1.0, %v11392_v42 }
 0x6a8   :  { %v11394_v15 = vpop.eup %11393 }
 0x6a9   :  { %11395 = vrcp.f32 %v2808_v53  ;;  %v2818_v16 = vadd.f32 1.0, %v11394_v15 }
 0x6ab   :  { %11397 = vrcp.f32 %v2818_v16  ;;  %v2830_v16 = vrot.slane %v12914_v51, 7  ;;  %v13223_v51 = vld [vmem:[#allocation15 + $0x4] ss:$12 sps:$4 sm:$0xff]  }
 0x6ac   :  { %14496 = vst [vmem:[#allocation48_spill] sm:$0xff] %v13223_v51 }
 0x6b6   :  { %v11396_v0 = vpop.eup %11395 }
 0x6b7   :  { %v2824_v24 = vmul.f32 %v11396_v0, %v2822_v20  ;;  %v2872_v30 = vpop.f32.mrf.mxu0  ;;  %v2913_v36 = vpop.f32.mrf.mxu1 }
 0x6b8   :  { %v2873_v62 = vadd.f32 %v2872_v30, %v14486_v4  ;;  %v11398_v53 = vpop.eup %11397 }
 0x6b9   :  { %v2825_v44 = vadd.f32 %v2824_v24, %v14487_v58  ;;  %v2874_v12 = vpop.f32.mrf.mxu0  ;;  %v10112_v19 = vpop.f32.mrf.mxu1  ;;  %v2827_v31 = vsub.f32 1.0, %v11398_v53  ;;  %v2832_v24 = vmul.f32 %v11398_v53, %v2830_v16  ;;  %v13110_v53 = vld [vmem:[#allocation12 + $0x38] ss:$12 sps:$4 sm:$0xff]   ;;  %v13120_v16 = vld [vmem:[#allocation12 + $0x20] ss:$12 sps:$4 sm:$0xff]  }
 0x6ba   :  { %v2920_v46 = vrot.slane %v2873_v62, 5  ;;  %v2875_v28 = vadd.f32 %v2874_v12, %v12514_v61 }
 0x6bb   :  { %11399 = vtanh.f32 %v2825_v44  ;;  %v2876_v34 = vpop.f32.mrf.mxu0  ;;  %v2916_v37 = vpop.f32.mrf.mxu1 }
 0x6bc   :  { %v2922_v63 = vadd.f32 %v2920_v46, %v12521_v6  ;;  %v2930_v41 = vrot.slane %v2875_v28, 5  ;;  %v13083_v34 = vld [vmem:[#allocation12 + $0x64] ss:$12 sps:$4 sm:$0xff]   ;;  %v13087_v37 = vld [vmem:[#allocation12 + $0x60] ss:$12 sps:$4 sm:$0xff]  }
 0x6bd   :  { %v2877_v38 = vpop.f32.mrf.mxu0  ;;  %v10113_v39 = vpop.f32.mrf.mxu1 }
 0x6be   :  { %v8938_v40 = vmul.f32 -1.442695, %v2922_v63  ;;  %v2932_v42 = vadd.f32 %v2930_v41, %v12532_v59  ;;  %v13090_v63 = vld [vmem:[#allocation12 + $0x68] ss:$12 sps:$4 sm:$0xff]   ;;  %v13093_v38 = vld [vmem:[#allocation12 + $0x4c] ss:$12 sps:$4 sm:$0xff]  }
 0x6bf   :  { %v13097_v39 = vld [vmem:[#allocation12 + $0x48] ss:$12 sps:$4 sm:$0xff]  }
 0x6c0   :  { %11401 = vpow2.f32 %v8938_v40  ;;  %v8939_v15 = vmul.f32 -1.442695, %v2932_v42  ;;  %v13100_v40 = vld [vmem:[#allocation12 + $0x50] ss:$12 sps:$4 sm:$0xff]   ;;  %v13103_v41 = vld [vmem:[#allocation12 + $0x34] ss:$12 sps:$4 sm:$0xff]  }
 0x6c1   :  { %v13107_v42 = vld [vmem:[#allocation12 + $0x30] ss:$12 sps:$4 sm:$0xff]  }
 0x6c2   :  { %11403 = vpow2.f32 %v8939_v15  ;;  %v13113_v15 = vld [vmem:[#allocation12 + $0x1c] ss:$12 sps:$4 sm:$0xff]  }
 0x6c8   :  { %v11400_v20 = vpop.eup %11399 }
 0x6c9   :  { %v2828_v0 = vmul.f32 %v11400_v20, %v2827_v31  ;;  %v13117_v31 = vld [vmem:[#allocation12 + $0x18] ss:$12 sps:$4 sm:$0xff]  }
 0x6ca   :  { %v13123_v20 = vld [vmem:[#allocation12 + $0x4] ss:$12 sps:$4 sm:$0xff]  }
 0x6cb   :  { %v13006_v30 = vadd.f32 %v2832_v24, %v2828_v0  ;;  %v13127_v0 = vld [vmem:[#allocation12] ss:$12 sps:$4 sm:$0xff]   ;;  %v13130_v24 = vld [vmem:[#allocation12 + $0x8] ss:$12 sps:$4 sm:$0xff]  }
 0x6cd   :  { %14488 = vst [vmem:[#allocation65_spill] sm:$0xff] %v13006_v30  ;;  %v11402_v62 = vpop.eup %11401  ;;  %v2952_v44 = vpack.c.bf16 %v13006_v30, %v13006_v30 }
 0x6ce   :  { %v2926_v12 = vadd.f32 1.0, %v11402_v62  ;;  %v13133_v62 = vld [vmem:[#allocation15 + $0xac] ss:$12 sps:$4 sm:$0xff]  }
 0x6cf   :  { %v2954_v19 = vrot.slane %v2952_v44, 2  ;;  %v11404_v46 = vpop.eup %11403 }
 0x6d0   :  { %11405 = vrcp.f32 %v2926_v12 }
 0x6d1   :  { %2989 = vmatmul.mubr.bf16.vlgmr.msra.gmra.mxu0 %v2954_v19  ;;  %10131 = vmatmul.mubr.bf16.vlgmr.msra.gmra.mxu1 %v2954_v19 }
 0x6d2   :  { %3077 = vmatpush1.bf16.msra.mxu0 %v12688_v49  ;;  %10135 = vmatpush3.bf16.msra.mxu1 %v12691_v33  ;;  %v2914_v49 = vadd.f32 %v2913_v36, %v12540_v55  ;;  %v2936_v33 = vadd.f32 1.0, %v11404_v46  ;;  %v13080_v36 = vld [vmem:[#allocation12 + $0x80] ss:$12 sps:$4 sm:$0xff]  }
 0x6d3   :  { %3078 = vmatprep.subr.bf16.mxu0 %v12694_v17  ;;  %10136 = vmatprep.subr.bf16.mxu1 %v14447_v54 }
 0x6d4   :  { %3108 = vmatprep.mubr.bf16.mxu0 %v14445_v29  ;;  %10150 = vmatprep.mubr.msk.bf16.mxu1 %vm11981_vm0, %v14447_v54  ;;  %v2940_v17 = vrot.slane %v2914_v49, 5  ;;  %11407 = vrcp.f32 %v2936_v33 }
 0x6d6   :  { %3079 = vmatpush1.bf16.msra.mxu0 %v12701_v45  ;;  %10137 = vmatpush3.bf16.msra.mxu1 %v12704_v18 }
 0x6d7   :  { %3080 = vmatprep.subr.bf16.mxu0 %v12707_v35  ;;  %10138 = vmatprep.subr.bf16.mxu1 %v14447_v54 }
 0x6da   :  { %3081 = vmatpush1.bf16.msra.mxu0 %v12712_v22  ;;  %10139 = vmatpush3.bf16.msra.mxu1 %v12715_v25  ;;  %v2948_v25 = vrot.slane %v12956_v14, 1 }
 0x6db   :  { %3082 = vmatprep.subr.bf16.mxu0 %v12718_v50  ;;  %10140 = vmatprep.subr.bf16.mxu1 %v14447_v54 }
 0x6dd   :  { %v11406_v45 = vpop.eup %11405 }
 0x6de   :  { %v2942_v28 = vmul.f32 %v11406_v45, %v2940_v17  ;;  %3083 = vmatpush1.bf16.msra.mxu0 %v12722_v23  ;;  %10141 = vmatpush3.bf16.msra.mxu1 %v12725_v32  ;;  %v13046_v23 = vld [vmem:[#allocation12 + $0xac] ss:$12 sps:$4 sm:$0xff]  }
 0x6df   :  { %3084 = vmatprep.subr.bf16.mxu0 %v12728_v27  ;;  %10142 = vmatprep.subr.bf16.mxu1 %v14447_v54 }
 0x6e0   :  { %v2943_v18 = vadd.f32 %v2942_v28, %v12561_v21 }
 0x6e1   :  { %v11408_v35 = vpop.eup %11407 }
 0x6e2   :  { %11409 = vtanh.f32 %v2943_v18  ;;  %3085 = vmatpush1.bf16.msra.mxu0 %v12733_v56  ;;  %10143 = vmatpush3.bf16.msra.mxu1 %v12736_v43  ;;  %v2945_v22 = vsub.f32 1.0, %v11408_v35  ;;  %v2950_v27 = vmul.f32 %v11408_v35, %v2948_v25 }
 0x6e3   :  { %3086 = vmatprep.subr.bf16.mxu0 %v14448_v8  ;;  %10144 = vmatprep.subr.bf16.mxu1 %v14447_v54 }
 0x6e6   :  { %3087 = vmatpush1.bf16.msra.mxu0 %v14449_v9  ;;  %10145 = vmatpush3.bf16.msra.mxu1 %v14450_v5  ;;  %v13057_v5 = vld [vmem:[#allocation12 + $0xb0] ss:$12 sps:$4 sm:$0xff]  }
 0x6e7   :  { %3088 = vmatprep.subr.bf16.mxu0 %v14451_v1  ;;  %10146 = vmatprep.subr.bf16.mxu1 %v14447_v54  ;;  %v13060_v1 = vld [vmem:[#allocation12 + $0x94] ss:$12 sps:$4 sm:$0xff]  }
 0x6ea   :  { %3089 = vmatpush1.bf16.msra.mxu0 %v14452_v7  ;;  %10147 = vmatpush3.bf16.msra.mxu1 %v14453_v3  ;;  %v13067_v7 = vld [vmem:[#allocation12 + $0x90] ss:$12 sps:$4 sm:$0xff]   ;;  %v13070_v3 = vld [vmem:[#allocation12 + $0x98] ss:$12 sps:$4 sm:$0xff]  }
 0x6eb   :  { %3090 = vmatprep.subr.bf16.mxu0 %v14454_v11  ;;  %10148 = vmatprep.subr.bf16.mxu1 %v14447_v54  ;;  %v13073_v11 = vld [vmem:[#allocation12 + $0x7c] ss:$12 sps:$4 sm:$0xff]  }
 0x6ee   :  { %3091 = vmatpush1.bf16.msra.mxu0 %v14455_v26  ;;  %10149 = vmatpush3.bf16.msra.mxu1 %v12766_v10  ;;  %v13054_v10 = vld [vmem:[#allocation12 + $0xa8] ss:$12 sps:$4 sm:$0xff]   ;;  %v13077_v26 = vld [vmem:[#allocation12 + $0x78] ss:$12 sps:$4 sm:$0xff]  }
 0x6ef   :  { %v11410_v50 = vpop.eup %11409  ;;  %3196 = vmatprep.subr.bf16.mxu0 %v13046_v23  ;;  %10154 = vmatprep.subr.bf16.mxu1 %v14447_v54 }
 0x6f0   :  { %v2946_v32 = vmul.f32 %v11410_v50, %v2945_v22 }
 0x6f2   :  { %v13050_v56 = vadd.f32 %v2950_v27, %v2946_v32 }
 0x6f4   :  { %v3070_v43 = vpack.c.bf16 %v13050_v56, %v13050_v56 }
 0x6f6   :  { %v3072_v8 = vshrl.u32 %v3070_v43, 16 }
 0x6f8   :  { %v3074_v9 = vrot.slane %v3072_v8, 1 }
 0x6fa   :  { %3109 = vmatmul.mubr.bf16.vlgmr.msra.gmra.mxu0 %v3074_v9  ;;  %10151 = vmatmul.mubr.bf16.vlgmr.msra.gmra.mxu1 %v3074_v9 }
 0x6fb   :  { %3197 = vmatpush1.bf16.msra.mxu0 %v13054_v10  ;;  %10155 = vmatpush3.bf16.msra.mxu1 %v13057_v5 }
 0x6fc   :  { %3198 = vmatprep.subr.bf16.mxu0 %v13060_v1  ;;  %10156 = vmatprep.subr.bf16.mxu1 %v14447_v54 }
 0x6fd   :  { %3228 = vmatprep.mubr.bf16.mxu0 %v14445_v29  ;;  %10170 = vmatprep.mubr.msk.bf16.mxu1 %vm11981_vm0, %v14447_v54 }
 0x6ff   :  { %3199 = vmatpush1.bf16.msra.mxu0 %v13067_v7  ;;  %10157 = vmatpush3.bf16.msra.mxu1 %v13070_v3 }
 0x700   :  { %3200 = vmatprep.subr.bf16.mxu0 %v13073_v11  ;;  %10158 = vmatprep.subr.bf16.mxu1 %v14447_v54 }
 0x703   :  { %3201 = vmatpush1.bf16.msra.mxu0 %v13077_v26  ;;  %10159 = vmatpush3.bf16.msra.mxu1 %v13080_v36 }
 0x704   :  { %3202 = vmatprep.subr.bf16.mxu0 %v13083_v34  ;;  %10160 = vmatprep.subr.bf16.mxu1 %v14447_v54 }
 0x707   :  { %3203 = vmatpush1.bf16.msra.mxu0 %v13087_v37  ;;  %10161 = vmatpush3.bf16.msra.mxu1 %v13090_v63 }
 0x708   :  { %3204 = vmatprep.subr.bf16.mxu0 %v13093_v38  ;;  %10162 = vmatprep.subr.bf16.mxu1 %v14447_v54 }
 0x70b   :  { %3205 = vmatpush1.bf16.msra.mxu0 %v13097_v39  ;;  %10163 = vmatpush3.bf16.msra.mxu1 %v13100_v40 }
 0x70c   :  { %3206 = vmatprep.subr.bf16.mxu0 %v13103_v41  ;;  %10164 = vmatprep.subr.bf16.mxu1 %v14447_v54 }
 0x70f   :  { %3207 = vmatpush1.bf16.msra.mxu0 %v13107_v42  ;;  %10165 = vmatpush3.bf16.msra.mxu1 %v13110_v53 }
 0x710   :  { %3208 = vmatprep.subr.bf16.mxu0 %v13113_v15  ;;  %10166 = vmatprep.subr.bf16.mxu1 %v14447_v54 }
 0x713   :  { %3209 = vmatpush1.bf16.msra.mxu0 %v13117_v31  ;;  %10167 = vmatpush3.bf16.msra.mxu1 %v13120_v16 }
 0x714   :  { %3210 = vmatprep.subr.bf16.mxu0 %v13123_v20  ;;  %10168 = vmatprep.subr.bf16.mxu1 %v14447_v54 }
 0x717   :  { %3211 = vmatpush1.bf16.msra.mxu0 %v13127_v0  ;;  %10169 = vmatpush3.bf16.msra.mxu1 %v13130_v24 }
 0x718   :  { %3314 = vmatprep.subr.bf16.mxu0 %v13133_v62  ;;  %10174 = vmatprep.subr.bf16.mxu1 %v14447_v54 }
 0x791   :  { %v2990_v44 = vpop.f32.mrf.mxu0  ;;  %v3031_v12 = vpop.f32.mrf.mxu1 }
 0x792   :  { %v2991_v19 = vadd.f32 %v2990_v44, %v12472_v57  ;;  %v3032_v44 = vadd.f32 %v3031_v12, %v12506_v48 }
 0x793   :  { %v2992_v46 = vpop.f32.mrf.mxu0  ;;  %v10132_v49 = vpop.f32.mrf.mxu1 }
 0x794   :  { %v3038_v33 = vrot.slane %v2991_v19, 3  ;;  %v2993_v17 = vadd.f32 %v2992_v46, %v14485_v52  ;;  %v3058_v46 = vrot.slane %v3032_v44, 3 }
 0x795   :  { %v2994_v45 = vpop.f32.mrf.mxu0  ;;  %v3034_v28 = vpop.f32.mrf.mxu1 }
 0x796   :  { %v3040_v18 = vadd.f32 %v3038_v33, %v12478_v2  ;;  %v3048_v50 = vrot.slane %v2993_v17, 3 }
 0x797   :  { %v2995_v35 = vpop.f32.mrf.mxu0  ;;  %v10133_v22 = vpop.f32.mrf.mxu1 }
 0x798   :  { %v8940_v25 = vmul.f32 -1.442695, %v3040_v18  ;;  %v3050_v32 = vadd.f32 %v3048_v50, %v12490_v47 }
 0x79a   :  { %11411 = vpow2.f32 %v8940_v25  ;;  %v8941_v27 = vmul.f32 -1.442695, %v3050_v32 }
 0x79c   :  { %11413 = vpow2.f32 %v8941_v27 }
 0x7a7   :  { %v11412_v43 = vpop.eup %11411 }
 0x7a8   :  { %v3044_v8 = vadd.f32 1.0, %v11412_v43 }
 0x7a9   :  { %v11414_v9 = vpop.eup %11413 }
 0x7aa   :  { %11415 = vrcp.f32 %v3044_v8  ;;  %v3054_v19 = vadd.f32 1.0, %v11414_v9 }
 0x7ac   :  { %11417 = vrcp.f32 %v3054_v19 }
 0x7b7   :  { %v11416_v49 = vpop.eup %11415 }
 0x7b8   :  { %v3060_v45 = vmul.f32 %v11416_v49, %v3058_v46 }
 0x7b9   :  { %v11418_v19 = vpop.eup %11417 }
 0x7ba   :  { %v3061_v33 = vadd.f32 %v3060_v45, %v14487_v58  ;;  %v3110_v28 = vpop.f32.mrf.mxu0  ;;  %v3151_v17 = vpop.f32.mrf.mxu1  ;;  %v3063_v49 = vsub.f32 1.0, %v11418_v19  ;;  %v3066_v45 = vrot.slane %v13006_v30, 7  ;;  %v13220_v30 = vld [vmem:[#allocation15 + $0x20] ss:$12 sps:$4 sm:$0xff]  }
 0x7bb   :  { %v3111_v18 = vadd.f32 %v3110_v28, %v14486_v4  ;;  %14495 = vst [vmem:[#allocation47_spill] sm:$0xff] %v13220_v30 }
 0x7bc   :  { %11419 = vtanh.f32 %v3061_v33  ;;  %v3112_v35 = vpop.f32.mrf.mxu0  ;;  %v10152_v22 = vpop.f32.mrf.mxu1 }
 0x7bd   :  { %v3158_v25 = vrot.slane %v3111_v18, 6  ;;  %v3113_v50 = vadd.f32 %v3112_v35, %v12514_v61  ;;  %v3068_v22 = vmul.f32 %v11418_v19, %v3066_v45  ;;  %v13168_v19 = vld [vmem:[#allocation15 + $0x98] ss:$12 sps:$4 sm:$0xff]   ;;  %v3152_v45 = vadd.f32 %v3151_v17, %v12540_v55  ;;  %v13186_v17 = vld [vmem:[#allocation15 + $0x60] ss:$12 sps:$4 sm:$0xff]  }
 0x7be   :  { %v3114_v32 = vpop.f32.mrf.mxu0  ;;  %v3154_v27 = vpop.f32.mrf.mxu1 }
 0x7bf   :  { %v3160_v12 = vadd.f32 %v3158_v25, %v12521_v6  ;;  %v3168_v44 = vrot.slane %v3113_v50, 6 }
 0x7c0   :  { %v3115_v43 = vpop.f32.mrf.mxu0  ;;  %v10153_v8 = vpop.f32.mrf.mxu1 }
 0x7c1   :  { %v8942_v9 = vmul.f32 -1.442695, %v3160_v12  ;;  %v3170_v46 = vadd.f32 %v3168_v44, %v12532_v59  ;;  %v13152_v43 = vld [vmem:[#allocation15 + $0xa8] ss:$12 sps:$4 sm:$0xff]   ;;  %v13155_v8 = vld [vmem:[#allocation15 + $0xb0] ss:$12 sps:$4 sm:$0xff]  }
 0x7c2   :  { %v13165_v44 = vld [vmem:[#allocation15 + $0x90] ss:$12 sps:$4 sm:$0xff]  }
 0x7c3   :  { %11421 = vpow2.f32 %v8942_v9  ;;  %v8943_v28 = vmul.f32 -1.442695, %v3170_v46  ;;  %v13158_v9 = vld [vmem:[#allocation15 + $0x94] ss:$12 sps:$4 sm:$0xff]  }
 0x7c5   :  { %11423 = vpow2.f32 %v8943_v28  ;;  %v13176_v28 = vld [vmem:[#allocation15 + $0x78] ss:$12 sps:$4 sm:$0xff]  }
 0x7c9   :  { %v11420_v33 = vpop.eup %11419 }
 0x7ca   :  { %v3064_v18 = vmul.f32 %v11420_v33, %v3063_v49  ;;  %v13171_v49 = vld [vmem:[#allocation15 + $0x7c] ss:$12 sps:$4 sm:$0xff]  }
 0x7cc   :  { %v13148_v35 = vadd.f32 %v3068_v22, %v3064_v18  ;;  %v13179_v18 = vld [vmem:[#allocation15 + $0x80] ss:$12 sps:$4 sm:$0xff]   ;;  %v13182_v22 = vld [vmem:[#allocation15 + $0x64] ss:$12 sps:$4 sm:$0xff]  }
 0x7ce   :  { %v3190_v25 = vpack.c.bf16 %v13148_v35, %v13148_v35 }
 0x7d0   :  { %v11422_v32 = vpop.eup %11421  ;;  %v3192_v27 = vshrl.u32 %v3190_v25, 16  ;;  %v3178_v25 = vrot.slane %v3152_v45, 6  ;;  %v13197_v45 = vld [vmem:[#allocation15 + $0x48] ss:$12 sps:$4 sm:$0xff]  }
 0x7d1   :  { %v3164_v50 = vadd.f32 1.0, %v11422_v32 }
 0x7d2   :  { %v3194_v12 = vrot.slane %v3192_v27, 2  ;;  %v11424_v46 = vpop.eup %11423 }
 0x7d3   :  { %11425 = vrcp.f32 %v3164_v50  ;;  %v3174_v33 = vadd.f32 1.0, %v11424_v46  ;;  %v13189_v50 = vld [vmem:[#allocation15 + $0x68] ss:$12 sps:$4 sm:$0xff]  }
 0x7d4   :  { %3229 = vmatmul.mubr.bf16.vlgmr.msra.gmra.mxu0 %v3194_v12  ;;  %10171 = vmatmul.mubr.bf16.vlgmr.msra.gmra.mxu1 %v3194_v12  ;;  %v13192_v12 = vld [vmem:[#allocation15 + $0x4c] ss:$12 sps:$4 sm:$0xff]  }
 0x7d5   :  { %3315 = vmatpush1.bf16.msra.mxu0 %v13152_v43  ;;  %10175 = vmatpush3.bf16.msra.mxu1 %v13155_v8  ;;  %11427 = vrcp.f32 %v3174_v33  ;;  %v13200_v33 = vld [vmem:[#allocation15 + $0x50] ss:$12 sps:$4 sm:$0xff]  }
 0x7d6   :  { %3316 = vmatprep.subr.bf16.mxu0 %v13158_v9  ;;  %10176 = vmatprep.subr.bf16.mxu1 %v14447_v54  ;;  %14489 = vst [vmem:[#allocation66_spill] sm:$0xff] %v13200_v33 }
 0x7d7   :  { %3346 = vmatprep.mubr.bf16.mxu0 %v14445_v29  ;;  %10190 = vmatprep.mubr.msk.bf16.mxu1 %vm11981_vm0, %v14447_v54 }
 0x7d9   :  { %3317 = vmatpush1.bf16.msra.mxu0 %v13165_v44  ;;  %10177 = vmatpush3.bf16.msra.mxu1 %v13168_v19 }
 0x7da   :  { %3318 = vmatprep.subr.bf16.mxu0 %v13171_v49  ;;  %10178 = vmatprep.subr.bf16.mxu1 %v14447_v54 }
 0x7dd   :  { %3319 = vmatpush1.bf16.msra.mxu0 %v13176_v28  ;;  %10179 = vmatpush3.bf16.msra.mxu1 %v13179_v18 }
 0x7de   :  { %3320 = vmatprep.subr.bf16.mxu0 %v13182_v22  ;;  %10180 = vmatprep.subr.bf16.mxu1 %v14447_v54 }
 0x7e0   :  { %v11426_v32 = vpop.eup %11425 }
 0x7e1   :  { %v3180_v27 = vmul.f32 %v11426_v32, %v3178_v25  ;;  %3321 = vmatpush1.bf16.msra.mxu0 %v13186_v17  ;;  %10181 = vmatpush3.bf16.msra.mxu1 %v13189_v50  ;;  %v13203_v25 = vld [vmem:[#allocation15 + $0x34] ss:$12 sps:$4 sm:$0xff]   ;;  %v13207_v32 = vld [vmem:[#allocation15 + $0x30] ss:$12 sps:$4 sm:$0xff]  }
 0x7e2   :  { %3322 = vmatprep.subr.bf16.mxu0 %v13192_v12  ;;  %10182 = vmatprep.subr.bf16.mxu1 %v14447_v54  ;;  %14490 = vst [vmem:[#allocation67_spill] sm:$0xff] %v13203_v25  ;;  %14491 = vst [vmem:[#allocation68_spill] sm:$0xff] %v13207_v32  ;;  %v11428_v14 = vpop.eup %11427 }
 0x7e3   :  { %v3181_v46 = vadd.f32 %v3180_v27, %v12561_v21  ;;  %v13210_v27 = vld [vmem:[#allocation15 + $0x38] ss:$12 sps:$4 sm:$0xff]  }
 0x7e4   :  { %14492 = vst [vmem:[#allocation69_spill] sm:$0xff] %v13210_v27 }
 0x7e5   :  { %11429 = vtanh.f32 %v3181_v46  ;;  %3323 = vmatpush1.bf16.msra.mxu0 %v13197_v45  ;;  %10183 = vmatpush3.bf16.msra.mxu1 %v13200_v33  ;;  %v13213_v46 = vld [vmem:[#allocation15 + $0x1c] ss:$12 sps:$4 sm:$0xff]  }
 0x7e6   :  { %3324 = vmatprep.subr.bf16.mxu0 %v13203_v25  ;;  %10184 = vmatprep.subr.bf16.mxu1 %v14447_v54  ;;  %14493 = vst [vmem:[#allocation45_spill] sm:$0xff] %v13213_v46 }
 0x7e9   :  { %3325 = vmatpush1.bf16.msra.mxu0 %v13207_v32  ;;  %10185 = vmatpush3.bf16.msra.mxu1 %v13210_v27  ;;  %v3186_v27 = vrot.slane %v13050_v56, 1 }
 0x7ea   :  { %3326 = vmatprep.subr.bf16.mxu0 %v13213_v46  ;;  %10186 = vmatprep.subr.bf16.mxu1 %v14447_v54  ;;  %v13230_v46 = vld [vmem:[#allocation15 + $0x8] ss:$12 sps:$4 sm:$0xff]  }
 0x7ed   :  { %3327 = vmatpush1.bf16.msra.mxu0 %v13217_v60  ;;  %10187 = vmatpush3.bf16.msra.mxu1 %v13220_v30  ;;  %v3183_v60 = vsub.f32 1.0, %v11428_v14 }
 0x7ee   :  { %3328 = vmatprep.subr.bf16.mxu0 %v13223_v51  ;;  %10188 = vmatprep.subr.bf16.mxu1 %v14447_v54  ;;  %v3188_v51 = vmul.f32 %v11428_v14, %v3186_v27 }
 0x7f1   :  { %3329 = vmatpush1.bf16.msra.mxu0 %v13227_v13  ;;  %10189 = vmatpush3.bf16.msra.mxu1 %v13230_v46 }
 0x7f2   :  { %v11430_v32 = vpop.eup %11429  ;;  %3432 = vmatprep.subr.bf16.mxu0 %v13046_v23  ;;  %10194 = vmatprep.subr.bf16.mxu1 %v14447_v54 }
 0x7f3   :  { %v3184_v30 = vmul.f32 %v11430_v32, %v3183_v60 }
 0x7f5   :  { %v13236_v25 = vadd.f32 %v3188_v51, %v3184_v30 }
 0x7f7   :  { %v3310_v33 = vpack.c.bf16 %v13236_v25, %v13236_v25 }
 0x7f9   :  { %v3312_v13 = vrot.slane %v3310_v33, 1 }
 0x7fb   :  { %3347 = vmatmul.mubr.bf16.vlgmr.msra.gmra.mxu0 %v3312_v13  ;;  %10191 = vmatmul.mubr.bf16.vlgmr.msra.gmra.mxu1 %v3312_v13 }
 0x7fc   :  { %3433 = vmatpush1.bf16.msra.mxu0 %v13054_v10  ;;  %10195 = vmatpush3.bf16.msra.mxu1 %v13057_v5 }
 0x7fd   :  { %3434 = vmatprep.subr.bf16.mxu0 %v13060_v1  ;;  %10196 = vmatprep.subr.bf16.mxu1 %v14447_v54 }
 0x7fe   :  { %3464 = vmatprep.mubr.bf16.mxu0 %v14445_v29  ;;  %10210 = vmatprep.mubr.msk.bf16.mxu1 %vm11981_vm0, %v14447_v54 }
 0x800   :  { %3435 = vmatpush1.bf16.msra.mxu0 %v13067_v7  ;;  %10197 = vmatpush3.bf16.msra.mxu1 %v13070_v3 }
 0x801   :  { %3436 = vmatprep.subr.bf16.mxu0 %v13073_v11  ;;  %10198 = vmatprep.subr.bf16.mxu1 %v14447_v54 }
 0x804   :  { %3437 = vmatpush1.bf16.msra.mxu0 %v13077_v26  ;;  %10199 = vmatpush3.bf16.msra.mxu1 %v13080_v36 }
 0x805   :  { %3438 = vmatprep.subr.bf16.mxu0 %v13083_v34  ;;  %10200 = vmatprep.subr.bf16.mxu1 %v14447_v54 }
 0x808   :  { %3439 = vmatpush1.bf16.msra.mxu0 %v13087_v37  ;;  %10201 = vmatpush3.bf16.msra.mxu1 %v13090_v63 }
 0x809   :  { %3440 = vmatprep.subr.bf16.mxu0 %v13093_v38  ;;  %10202 = vmatprep.subr.bf16.mxu1 %v14447_v54 }
 0x80c   :  { %3441 = vmatpush1.bf16.msra.mxu0 %v13097_v39  ;;  %10203 = vmatpush3.bf16.msra.mxu1 %v13100_v40 }
 0x80d   :  { %3442 = vmatprep.subr.bf16.mxu0 %v13103_v41  ;;  %10204 = vmatprep.subr.bf16.mxu1 %v14447_v54 }
 0x810   :  { %3443 = vmatpush1.bf16.msra.mxu0 %v13107_v42  ;;  %10205 = vmatpush3.bf16.msra.mxu1 %v13110_v53 }
 0x811   :  { %3444 = vmatprep.subr.bf16.mxu0 %v13113_v15  ;;  %10206 = vmatprep.subr.bf16.mxu1 %v14447_v54 }
 0x814   :  { %3445 = vmatpush1.bf16.msra.mxu0 %v13117_v31  ;;  %10207 = vmatpush3.bf16.msra.mxu1 %v13120_v16 }
 0x815   :  { %3446 = vmatprep.subr.bf16.mxu0 %v13123_v20  ;;  %10208 = vmatprep.subr.bf16.mxu1 %v14447_v54 }
 0x818   :  { %3447 = vmatpush1.bf16.msra.mxu0 %v13127_v0  ;;  %10209 = vmatpush3.bf16.msra.mxu1 %v13130_v24 }
 0x819   :  { %3551 = vmatprep.subr.bf16.mxu0 %v13133_v62  ;;  %10214 = vmatprep.subr.bf16.mxu1 %v14447_v54 }
 0x894   :  { %v3230_v13 = vpop.f32.mrf.mxu0  ;;  %v3271_v60 = vpop.f32.mrf.mxu1 }
 0x895   :  { %v3231_v51 = vadd.f32 %v3230_v13, %v12472_v57  ;;  %v3272_v40 = vadd.f32 %v3271_v60, %v12506_v48 }
 0x896   :  { %v3232_v14 = vpop.f32.mrf.mxu0  ;;  %v10172_v30 = vpop.f32.mrf.mxu1 }
 0x897   :  { %v3278_v23 = vrot.slane %v3231_v51, 2  ;;  %v3233_v10 = vadd.f32 %v3232_v14, %v14485_v52  ;;  %v3298_v42 = vrot.slane %v3272_v40, 2 }
 0x898   :  { %v3234_v5 = vpop.f32.mrf.mxu0  ;;  %v3274_v1 = vpop.f32.mrf.mxu1 }
 0x899   :  { %v3280_v7 = vadd.f32 %v3278_v23, %v12478_v2  ;;  %v3288_v36 = vrot.slane %v3233_v10, 2 }
 0x89a   :  { %v3235_v3 = vpop.f32.mrf.mxu0  ;;  %v10173_v11 = vpop.f32.mrf.mxu1 }
 0x89b   :  { %v8944_v26 = vmul.f32 -1.442695, %v3280_v7  ;;  %v3290_v34 = vadd.f32 %v3288_v36, %v12490_v47  ;;  %v3306_v3 = vrot.slane %v13148_v35, 7 }
 0x89d   :  { %11431 = vpow2.f32 %v8944_v26  ;;  %v8945_v37 = vmul.f32 -1.442695, %v3290_v34 }
 0x89f   :  { %11433 = vpow2.f32 %v8945_v37 }
 0x8aa   :  { %v11432_v63 = vpop.eup %11431 }
 0x8ab   :  { %v3284_v38 = vadd.f32 1.0, %v11432_v63 }
 0x8ac   :  { %v11434_v39 = vpop.eup %11433 }
 0x8ad   :  { %11435 = vrcp.f32 %v3284_v38  ;;  %v3294_v41 = vadd.f32 1.0, %v11434_v39 }
 0x8af   :  { %11437 = vrcp.f32 %v3294_v41 }
 0x8ba   :  { %v11436_v53 = vpop.eup %11435 }
 0x8bb   :  { %v3300_v15 = vmul.f32 %v11436_v53, %v3298_v42  ;;  %v3348_v31 = vpop.f32.mrf.mxu0  ;;  %v3389_v16 = vpop.f32.mrf.mxu1  ;;  %v14506_v53 = vld [vmem:[#allocation49_spill] sm:$0xff] }
 0x8bc   :  { %v3349_v20 = vadd.f32 %v3348_v31, %v14486_v4  ;;  %v11438_v5 = vpop.eup %11437  ;;  %v3424_v31 = vrot.slane %v13236_v25, 1 }
 0x8bd   :  { %v3301_v0 = vadd.f32 %v3300_v15, %v14487_v58  ;;  %v3350_v24 = vpop.f32.mrf.mxu0  ;;  %v10192_v62 = vpop.f32.mrf.mxu1  ;;  %v3303_v7 = vsub.f32 1.0, %v11438_v5  ;;  %v3308_v36 = vmul.f32 %v11438_v5, %v3306_v3  ;;  %v13364_v5 = vld [vmem:[#allocation18 + $0x34] ss:$12 sps:$4 sm:$0xff]   ;;  %v13372_v3 = vld [vmem:[#allocation18 + $0x18] ss:$12 sps:$4 sm:$0xff]  }
 0x8be   :  { %v3396_v33 = vrot.slane %v3349_v20, 7  ;;  %v3351_v32 = vadd.f32 %v3350_v24, %v12514_v61 }
 0x8bf   :  { %11439 = vtanh.f32 %v3301_v0  ;;  %v3352_v27 = vpop.f32.mrf.mxu0  ;;  %v3392_v13 = vpop.f32.mrf.mxu1 }
 0x8c0   :  { %v3398_v60 = vadd.f32 %v3396_v33, %v12521_v6  ;;  %v3406_v23 = vrot.slane %v3351_v32, 7  ;;  %v13336_v32 = vld [vmem:[#allocation18 + $0xa8] ss:$12 sps:$4 sm:$0xff]   ;;  %v13342_v13 = vld [vmem:[#allocation18 + $0x90] ss:$12 sps:$4 sm:$0xff]  }
 0x8c1   :  { %v3353_v51 = vpop.f32.mrf.mxu0  ;;  %v10193_v14 = vpop.f32.mrf.mxu1  ;;  %v13340_v27 = vld [vmem:[#allocation18 + $0x94] ss:$12 sps:$4 sm:$0xff]  }
 0x8c2   :  { %v8946_v30 = vmul.f32 -1.442695, %v3398_v60  ;;  %v3408_v10 = vadd.f32 %v3406_v23, %v12532_v59  ;;  %v13346_v60 = vld [vmem:[#allocation18 + $0x7c] ss:$12 sps:$4 sm:$0xff]   ;;  %v13348_v51 = vld [vmem:[#allocation18 + $0x78] ss:$12 sps:$4 sm:$0xff]  }
 0x8c3   :  { %v13352_v14 = vld [vmem:[#allocation18 + $0x64] ss:$12 sps:$4 sm:$0xff]   ;;  %v13358_v23 = vld [vmem:[#allocation18 + $0x4c] ss:$12 sps:$4 sm:$0xff]  }
 0x8c4   :  { %11441 = vpow2.f32 %v8946_v30  ;;  %v8947_v1 = vmul.f32 -1.442695, %v3408_v10  ;;  %v13354_v30 = vld [vmem:[#allocation18 + $0x60] ss:$12 sps:$4 sm:$0xff]   ;;  %v13360_v10 = vld [vmem:[#allocation18 + $0x48] ss:$12 sps:$4 sm:$0xff]  }
 0x8c6   :  { %11443 = vpow2.f32 %v8947_v1  ;;  %v13366_v1 = vld [vmem:[#allocation18 + $0x30] ss:$12 sps:$4 sm:$0xff]  }
 0x8cc   :  { %v11440_v11 = vpop.eup %11439 }
 0x8cd   :  { %v3304_v26 = vmul.f32 %v11440_v11, %v3303_v7  ;;  %v13370_v7 = vld [vmem:[#allocation18 + $0x1c] ss:$12 sps:$4 sm:$0xff]   ;;  %v13376_v11 = vld [vmem:[#allocation18 + $0x4] ss:$12 sps:$4 sm:$0xff]  }
 0x8cf   :  { %v13286_v34 = vadd.f32 %v3308_v36, %v3304_v26  ;;  %v13378_v26 = vld [vmem:[#allocation18] ss:$12 sps:$4 sm:$0xff]   ;;  %v10999_v36 = vld [vmem:[#allocation21 + $0x38] sm:$0xff]  }
 0x8d1   :  { %v11442_v37 = vpop.eup %11441  ;;  %v3428_v63 = vpack.c.bf16 %v13286_v34, %v13286_v34 }
 0x8d2   :  { %v3402_v38 = vadd.f32 1.0, %v11442_v37  ;;  %v11000_v37 = vld [vmem:[#allocation21 + $0x30] sm:$0xff]  }
 0x8d3   :  { %v3430_v39 = vrot.slane %v3428_v63, 3  ;;  %v11444_v40 = vpop.eup %11443  ;;  %v11001_v63 = vld [vmem:[#allocation21 + $0x28] sm:$0xff]  }
 0x8d4   :  { %11445 = vrcp.f32 %v3402_v38  ;;  %v11002_v38 = vld [vmem:[#allocation21 + $0x20] sm:$0xff]  }
 0x8d5   :  { %3465 = vmatmul.mubr.bf16.vlgmr.msra.gmra.mxu0 %v3430_v39  ;;  %10211 = vmatmul.mubr.bf16.vlgmr.msra.gmra.mxu1 %v3430_v39  ;;  %v11003_v39 = vld [vmem:[#allocation21 + $0x18] sm:$0xff]  }
 0x8d6   :  { %3552 = vmatpush1.bf16.msra.mxu0 %v13152_v43  ;;  %10215 = vmatpush3.bf16.msra.mxu1 %v13155_v8  ;;  %v3390_v43 = vadd.f32 %v3389_v16, %v12540_v55  ;;  %v3412_v8 = vadd.f32 1.0, %v11444_v40  ;;  %v11004_v40 = vld [vmem:[#allocation21 + $0x10] sm:$0xff]  }
 0x8d7   :  { %3553 = vmatprep.subr.bf16.mxu0 %v13158_v9  ;;  %10216 = vmatprep.subr.bf16.mxu1 %v14447_v54 }
 0x8d8   :  { %3583 = vmatprep.mubr.bf16.mxu0 %v14445_v29  ;;  %10230 = vmatprep.mubr.msk.bf16.mxu1 %vm11981_vm0, %v14447_v54  ;;  %v3416_v9 = vrot.slane %v3390_v43, 7  ;;  %11447 = vrcp.f32 %v3412_v8  ;;  %v11005_v43 = vld [vmem:[#allocation21 + $0x8] sm:$0xff]   ;;  %v11006_v8 = vld [vmem:[#allocation21] sm:$0xff]  }
 0x8da   :  { %3554 = vmatpush1.bf16.msra.mxu0 %v13165_v44  ;;  %10217 = vmatpush3.bf16.msra.mxu1 %v13168_v19 }
 0x8db   :  { %3555 = vmatprep.subr.bf16.mxu0 %v13171_v49  ;;  %10218 = vmatprep.subr.bf16.mxu1 %v14447_v54  ;;  %v14498_v49 = vld [vmem:[#allocation66_spill] sm:$0xff] }
 0x8de   :  { %3556 = vmatpush1.bf16.msra.mxu0 %v13176_v28  ;;  %10219 = vmatpush3.bf16.msra.mxu1 %v13179_v18  ;;  %v14499_v28 = vld [vmem:[#allocation67_spill] sm:$0xff]  ;;  %v14500_v18 = vld [vmem:[#allocation68_spill] sm:$0xff] }
 0x8df   :  { %3557 = vmatprep.subr.bf16.mxu0 %v13182_v22  ;;  %10220 = vmatprep.subr.bf16.mxu1 %v14447_v54  ;;  %v14501_v22 = vld [vmem:[#allocation69_spill] sm:$0xff] }
 0x8e1   :  { %v11446_v44 = vpop.eup %11445 }
 0x8e2   :  { %v3418_v41 = vmul.f32 %v11446_v44, %v3416_v9  ;;  %3558 = vmatpush1.bf16.msra.mxu0 %v13186_v17  ;;  %10221 = vmatpush3.bf16.msra.mxu1 %v13189_v50  ;;  %v14502_v17 = vld [vmem:[#allocation45_spill] sm:$0xff]  ;;  %v14503_v50 = vld [vmem:[#allocation46_spill] sm:$0xff] }
 0x8e3   :  { %3559 = vmatprep.subr.bf16.mxu0 %v13192_v12  ;;  %10222 = vmatprep.subr.bf16.mxu1 %v14447_v54  ;;  %v14504_v12 = vld [vmem:[#allocation47_spill] sm:$0xff] }
 0x8e4   :  { %v3419_v19 = vadd.f32 %v3418_v41, %v12561_v21 }
 0x8e5   :  { %v11448_v42 = vpop.eup %11447 }
 0x8e6   :  { %11449 = vtanh.f32 %v3419_v19  ;;  %3560 = vmatpush1.bf16.msra.mxu0 %v13197_v45  ;;  %10223 = vmatpush3.bf16.msra.mxu1 %v14498_v49  ;;  %v14505_v45 = vld [vmem:[#allocation48_spill] sm:$0xff]  ;;  %v3421_v15 = vsub.f32 1.0, %v11448_v42  ;;  %v3426_v0 = vmul.f32 %v11448_v42, %v3424_v31 }
 0x8e7   :  { %3561 = vmatprep.subr.bf16.mxu0 %v14499_v28  ;;  %10224 = vmatprep.subr.bf16.mxu1 %v14447_v54 }
 0x8ea   :  { %3562 = vmatpush1.bf16.msra.mxu0 %v14500_v18  ;;  %10225 = vmatpush3.bf16.msra.mxu1 %v14501_v22 }
 0x8eb   :  { %3563 = vmatprep.subr.bf16.mxu0 %v14502_v17  ;;  %10226 = vmatprep.subr.bf16.mxu1 %v14447_v54 }
 0x8ee   :  { %3564 = vmatpush1.bf16.msra.mxu0 %v14503_v50  ;;  %10227 = vmatpush3.bf16.msra.mxu1 %v14504_v12 }
 0x8ef   :  { %3565 = vmatprep.subr.bf16.mxu0 %v14505_v45  ;;  %10228 = vmatprep.subr.bf16.mxu1 %v14447_v54 }
 0x8f2   :  { %3566 = vmatpush1.bf16.msra.mxu0 %v14506_v53  ;;  %10229 = vmatpush3.bf16.msra.mxu1 %v13230_v46  ;;  %v13334_v46 = vld [vmem:[#allocation18 + $0xac] ss:$12 sps:$4 sm:$0xff]  }
 0x8f3   :  { %v11450_v16 = vpop.eup %11449  ;;  %10234 = vmatprep.subr.bf16.mxu0 %v14447_v54  ;;  %3996 = vmatprep.subr.bf16.mxu1 %v13334_v46 }
 0x8f4   :  { %v3422_v20 = vmul.f32 %v11450_v16, %v3421_v15 }
 0x8f6   :  { %v13327_v24 = vadd.f32 %v3426_v0, %v3422_v20 }
 0x8f8   :  { %v3546_v62 = vpack.c.bf16 %v13327_v24, %v13327_v24 }
 0x8fa   :  { %v3548_v33 = vshrl.u32 %v3546_v62, 16 }
 0x8fc   :  { %3584 = vmatmul.mubr.bf16.vlgmr.msra.gmra.mxu0 %v3548_v33  ;;  %10231 = vmatmul.mubr.bf16.vlgmr.msra.gmra.mxu1 %v3548_v33 }
 0x8fd   :  { %4028 = vmatprep.mubr.bf16.mxu1 %v14445_v29  ;;  %10250 = vmatprep.mubr.msk.bf16.mxu0 %vm11981_vm0, %v14447_v54 }
 0x8fe   :  { %3997 = vmatpush1.bf16.msra.mxu1 %v13336_v32  ;;  %10235 = vmatpush3.bf16.msra.mxu0 %v10999_v36 }
 0x8ff   :  { %3998 = vmatprep.subr.bf16.mxu1 %v13340_v27  ;;  %10236 = vmatprep.subr.bf16.mxu0 %v14447_v54 }
 0x902   :  { %3999 = vmatpush1.bf16.msra.mxu1 %v13342_v13  ;;  %10237 = vmatpush3.bf16.msra.mxu0 %v11000_v37 }
 0x903   :  { %4000 = vmatprep.subr.bf16.mxu1 %v13346_v60  ;;  %10238 = vmatprep.subr.bf16.mxu0 %v14447_v54 }
 0x906   :  { %4001 = vmatpush1.bf16.msra.mxu1 %v13348_v51  ;;  %10239 = vmatpush3.bf16.msra.mxu0 %v11001_v63 }
 0x907   :  { %4002 = vmatprep.subr.bf16.mxu1 %v13352_v14  ;;  %10240 = vmatprep.subr.bf16.mxu0 %v14447_v54 }
 0x90a   :  { %4003 = vmatpush1.bf16.msra.mxu1 %v13354_v30  ;;  %10241 = vmatpush3.bf16.msra.mxu0 %v11002_v38 }
 0x90b   :  { %4004 = vmatprep.subr.bf16.mxu1 %v13358_v23  ;;  %10242 = vmatprep.subr.bf16.mxu0 %v14447_v54 }
 0x90e   :  { %4005 = vmatpush1.bf16.msra.mxu1 %v13360_v10  ;;  %10243 = vmatpush3.bf16.msra.mxu0 %v11003_v39 }
 0x90f   :  { %4006 = vmatprep.subr.bf16.mxu1 %v13364_v5  ;;  %10244 = vmatprep.subr.bf16.mxu0 %v14447_v54 }
 0x912   :  { %4007 = vmatpush1.bf16.msra.mxu1 %v13366_v1  ;;  %10245 = vmatpush3.bf16.msra.mxu0 %v11004_v40 }
 0x913   :  { %4008 = vmatprep.subr.bf16.mxu1 %v13370_v7  ;;  %10246 = vmatprep.subr.bf16.mxu0 %v14447_v54 }
 0x916   :  { %4009 = vmatpush1.bf16.msra.mxu1 %v13372_v3  ;;  %10247 = vmatpush3.bf16.msra.mxu0 %v11005_v43 }
 0x917   :  { %4010 = vmatprep.subr.bf16.mxu1 %v13376_v11  ;;  %10248 = vmatprep.subr.bf16.mxu0 %v14447_v54 }
 0x91a   :  { %4011 = vmatpush1.bf16.msra.mxu1 %v13378_v26  ;;  %10249 = vmatpush3.bf16.msra.mxu0 %v11006_v8 }
 0x91b   :  { %10274 = vmatprep.subr.bf16.mxu1 %v14447_v54  ;;  %10254 = vmatprep.subr.bf16.mxu0 %v14447_v54 }
 0x995   :  { %v3466_v9 = vpop.f32.mrf.mxu0  ;;  %v3507_v44 = vpop.f32.mrf.mxu1 }
 0x996   :  { %v3467_v41 = vadd.f32 %v3466_v9, %v12472_v57  ;;  %v3508_v0 = vadd.f32 %v3507_v44, %v12506_v48 }
 0x997   :  { %v3468_v19 = vpop.f32.mrf.mxu0  ;;  %v10212_v49 = vpop.f32.mrf.mxu1 }
 0x998   :  { %v3514_v28 = vrot.slane %v3467_v41, 1  ;;  %v3469_v18 = vadd.f32 %v3468_v19, %v14485_v52  ;;  %v3534_v62 = vrot.slane %v3508_v0, 1  ;;  %v3652_v0 = vrot.slane %v13327_v24, 1 }
 0x999   :  { %v3470_v22 = vpop.f32.mrf.mxu0  ;;  %v3510_v17 = vpop.f32.mrf.mxu1 }
 0x99a   :  { %v3516_v50 = vadd.f32 %v3514_v28, %v12478_v2  ;;  %v3524_v53 = vrot.slane %v3469_v18, 1 }
 0x99b   :  { %v3471_v12 = vpop.f32.mrf.mxu0  ;;  %v10213_v42 = vpop.f32.mrf.mxu1 }
 0x99c   :  { %v8948_v45 = vmul.f32 -1.442695, %v3516_v50  ;;  %v3526_v15 = vadd.f32 %v3524_v53, %v12490_v47 }
 0x99e   :  { %11451 = vpow2.f32 %v8948_v45  ;;  %v8949_v31 = vmul.f32 -1.442695, %v3526_v15 }
 0x9a0   :  { %11453 = vpow2.f32 %v8949_v31 }
 0x9ab   :  { %v11452_v16 = vpop.eup %11451 }
 0x9ac   :  { %v3520_v57 = vadd.f32 1.0, %v11452_v16 }
 0x9ad   :  { %v11454_v20 = vpop.eup %11453 }
 0x9ae   :  { %11455 = vrcp.f32 %v3520_v57  ;;  %v3530_v52 = vadd.f32 1.0, %v11454_v20 }
 0x9b0   :  { %11457 = vrcp.f32 %v3530_v52 }
 0x9bb   :  { %v11456_v33 = vpop.eup %11455 }
 0x9bc   :  { %v3536_v36 = vmul.f32 %v11456_v33, %v3534_v62  ;;  %v3585_v2 = vpop.f32.mrf.mxu0  ;;  %v3626_v37 = vpop.f32.mrf.mxu1 }
 0x9bd   :  { %v3586_v63 = vadd.f32 %v3585_v2, %v14486_v4  ;;  %v11458_v49 = vpop.eup %11457  ;;  %v3627_v15 = vadd.f32 %v3626_v37, %v12540_v55  ;;  %v14509_v37 = vld [vmem:[#allocation71_spill] sm:$0xff] }
 0x9be   :  { %v3537_v38 = vadd.f32 %v3536_v36, %v14487_v58  ;;  %v3587_v47 = vpop.f32.mrf.mxu0  ;;  %v10232_v39 = vpop.f32.mrf.mxu1  ;;  %v3539_v4 = vsub.f32 1.0, %v11458_v49  ;;  %v3542_v58 = vrot.slane %v13286_v34, 7 }
 0x9bf   :  { %v3632_v40 = vadd.f32 %v3586_v63, %v12521_v6  ;;  %v3588_v48 = vadd.f32 %v3587_v47, %v12514_v61  ;;  %v14507_v63 = vld [vmem:[#allocation61_spill] sm:$0xff]  ;;  %v14508_v47 = vld [vmem:[#allocation43_spill] sm:$0xff]  ;;  %v3658_v39 = vadd.f32 %v13236_v25, %v14509_v37  ;;  %v14517_v37 = vld [vmem:[#allocation38_spill] sm:$0xff] }
 0x9c0   :  { %11459 = vtanh.f32 %v3537_v38  ;;  %v3589_v43 = vpop.f32.mrf.mxu0  ;;  %v3629_v8 = vpop.f32.mrf.mxu1  ;;  %v3544_v6 = vmul.f32 %v11458_v49, %v3542_v58  ;;  %v3657_v38 = vadd.f32 %v13327_v24, %v14507_v63  ;;  %v14514_v49 = vld [vmem:[#allocation70_spill] sm:$0xff] }
 0x9c1   :  { %v8950_v9 = vmul.f32 -1.442695, %v3632_v40  ;;  %v3639_v19 = vadd.f32 %v3588_v48, %v12532_v59  ;;  %v14511_v8 = vld [vmem:[#allocation64_spill] sm:$0xff]  ;;  %v3662_v25 = vadd.f32 %v13286_v34, %v14514_v49  ;;  %v11009_v34 = vld [vmem:[#allocation18 + $0x80] ss:$12 sps:$4 sm:$0xff]  }
 0x9c2   :  { %v3590_v44 = vpop.f32.mrf.mxu0  ;;  %v10233_v41 = vpop.f32.mrf.mxu1 }
 0x9c3   :  { %11461 = vpow2.f32 %v8950_v9  ;;  %v8951_v28 = vmul.f32 -1.442695, %v3639_v19  ;;  %v14512_v9 = vld [vmem:[#allocation65_spill] sm:$0xff]  ;;  %v14513_v41 = vld [vmem:[#allocation62_spill] sm:$0xff] }
 0x9c4   :  { %v3660_v48 = vadd.f32 %v14512_v9, %v14511_v8  ;;  %v3661_v24 = vadd.f32 %v13148_v35, %v14513_v41  ;;  %v11008_v35 = vld [vmem:[#allocation18 + $0x98] ss:$12 sps:$4 sm:$0xff]  }
 0x9c5   :  { %11463 = vpow2.f32 %v8951_v28 }
 0x9cd   :  { %v11460_v18 = vpop.eup %11459 }
 0x9ce   :  { %v3540_v22 = vmul.f32 %v11460_v18, %v3539_v4 }
 0x9d0   :  { %v11462_v17 = vpop.eup %11461  ;;  %v13402_v50 = vadd.f32 %v3544_v6, %v3540_v22  ;;  %v11007_v6 = vld [vmem:[#allocation18 + $0xb0] ss:$12 sps:$4 sm:$0xff]  }
 0x9d1   :  { %v3636_v12 = vadd.f32 1.0, %v11462_v17 }
 0x9d2   :  { %v3814_v61 = vpack.c.bf16 %v13402_v50, %v13402_v50  ;;  %v11464_v45 = vpop.eup %11463 }
 0x9d3   :  { %11465 = vrcp.f32 %v3636_v12  ;;  %v3643_v53 = vadd.f32 1.0, %v11464_v45  ;;  %v11011_v45 = vld [vmem:[#allocation18 + $0x50] ss:$12 sps:$4 sm:$0xff]  }
 0x9d4   :  { %v13406_v42 = vshrl.u32 %v3814_v61, 16  ;;  %v11010_v61 = vld [vmem:[#allocation18 + $0x68] ss:$12 sps:$4 sm:$0xff]  }
 0x9d5   :  { %11467 = vrcp.f32 %v3643_v53  ;;  %v11012_v53 = vld [vmem:[#allocation18 + $0x38] ss:$12 sps:$4 sm:$0xff]  }
 0x9d6   :  { %v3850_v59 = vrot.slane %v13406_v42, 3  ;;  %v3790_v42 = vld [vmem:[#allocation4] sm:$0x11] }
 0x9d8   :  { %4029 = vmatmul.mubr.bf16.vlgmr.msra.gmra.mxu1 %v3850_v59 }
 0x9d9   :  { %10276 = vmatprep.mubr.msk.bf16.mxu1 %vm11981_vm0, %v14447_v54 }
 0x9e0   :  { %v11466_v31 = vpop.eup %11465 }
 0x9e1   :  { %v3646_v16 = vmul.f32 %v11466_v31, %v3627_v15  ;;  %v11013_v15 = vld [vmem:[#allocation18 + $0x20] ss:$12 sps:$4 sm:$0xff]   ;;  %v11014_v31 = vld [vmem:[#allocation18 + $0x8] ss:$12 sps:$4 sm:$0xff]  }
 0x9e2   :  { %v11468_v20 = vpop.eup %11467 }
 0x9e3   :  { %v3647_v57 = vadd.f32 %v3646_v16, %v12561_v21  ;;  %v3649_v52 = vsub.f32 1.0, %v11468_v20  ;;  %v3654_v36 = vmul.f32 %v11468_v20, %v3652_v0  ;;  %v14510_v21 = vld [vmem:[#allocation63_spill] sm:$0xff] }
 0x9e4   :  { %v3659_v40 = vadd.f32 %v13050_v56, %v14510_v21  ;;  %v14515_v56 = vld [vmem:[#allocation44_spill] sm:$0xff] }
 0x9e5   :  { %11469 = vtanh.f32 %v3647_v57  ;;  %v3663_v4 = vadd.f32 %v13402_v50, %v14515_v56 }
 0x9f2   :  { %v11470_v62 = vpop.eup %11469 }
 0x9f3   :  { %v3650_v33 = vmul.f32 %v11470_v62, %v3649_v52  ;;  %v3787_v52 = vld [vmem:[%s14312_s13] sm:$0x7]  ;;  %v14516_v62 = vld [vmem:[#allocation37_spill] sm:$0xff] }
 0x9f5   :  { %v3655_v2 = vadd.f32 %v3654_v36, %v3650_v33  ;;  %v13452_v33 = vrot.slane %v3787_v52, %v14516_v62  ;;  %v3786_v36 = vld [vmem:[%s14311_s12] sm:$0x7] }
 0x9f6   :  { %v13459_v63 = vrot.slane %v3786_v36, %v14516_v62 }
 0x9f7   :  { %v3656_v55 = vadd.f32 %v3655_v2, %v14508_v47  ;;  %v3792_v2 = vunpack.c.l.bf16 %v3790_v42 }
 0x9f9   :  { %v3665_v43 = vsel %vm3664_vm11, %v3656_v55, %v3657_v38  ;;  %v3811_v47 = vadd.f32 %v13459_v63, %v3792_v2 }
 0x9fa   :  { %v3667_v44 = vsel %vm3666_vm12, %v3665_v43, %v3658_v39  ;;  %v13463_v39 = vrot.slane %v3787_v52, %v14517_v37 }
 0x9fb   :  { %v3669_v19 = vsel %vm3668_vm13, %v3667_v44, %v3659_v40  ;;  %v13467_v44 = vrot.slane %v3786_v36, %v14517_v37 }
 0x9fc   :  { %v3671_v28 = vsel %vm3670_vm14, %v3669_v19, %v3660_v48  ;;  %v3793_v48 = vunpack.c.h.bf16 %v3790_v42  ;;  %v4106_v42 = vrot.slane %v13402_v50, 6 }
 0x9fd   :  { %v3673_v58 = vsel %vm3672_vm15, %v3671_v28, %v3661_v24 }
 0x9fe   :  { %v3675_v18 = vsel %vm3674_vm1, %v3673_v58, %v3662_v25  ;;  %v3812_v49 = vadd.f32 %v13467_v44, %v3793_v48  ;;  %v14518_v58 = vld [vmem:[#allocation40_spill] sm:$0xff] }
 0x9ff   :  { %v3677_v22 = vsel %vm3676_vm2, %v3675_v18, %v3663_v4  ;;  %v13471_v18 = vrot.slane %v3787_v52, %v14518_v58 }
 0xa00   :  { %v3678_v17 = vpack.c.bf16 %v3677_v22, %v3677_v22 }
 0xa02   :  { %3679 = vst [vmem:[#allocation2] sm:$0xf] %v3678_v17  ;;  %10251 = vmatmul.mubr.bf16.vlgmr.msra.gmra.mxu0 %v3678_v17 }
 0xa03   :  { %10255 = vmatpush3.bf16.msra.mxu0 %v11007_v6  ;;  %10270 = vmatprep.mubr.msk.bf16.mxu0 %vm11981_vm0, %v14447_v54  ;;  %v3791_v6 = vld [vmem:[#allocation4 + $0x8] sm:$0x1] }
 0xa04   :  { %10256 = vmatprep.subr.bf16.mxu0 %v14447_v54 }
 0xa07   :  { %10257 = vmatpush3.bf16.msra.mxu0 %v11008_v35 }
 0xa08   :  { %10258 = vmatprep.subr.bf16.mxu0 %v14447_v54 }
 0xa09   :  { %v4111_v12 = vld [vmem:[#allocation2] sm:$0xf] }
 0xa0a   :  { %10275 = vmatpush3.bf16.xpose.msra.mxu1 %v4111_v12  ;;  %v13474_v12 = vrot.slane %v3786_v36, %v14518_v58 }
 0xa0b   :  { %10259 = vmatpush3.bf16.msra.mxu0 %v11009_v34  ;;  %10280 = vmatprep.subr.bf16.mxu1 %v14447_v54  ;;  %v3794_v34 = vunpack.c.l.bf16 %v3791_v6  ;;  %v11017_v6 = vld [vmem:[#allocation19 + $0x28] sm:$0xff]  }
 0xa0c   :  { %10260 = vmatprep.subr.bf16.mxu0 %v14447_v54 }
 0xa0f   :  { %10261 = vmatpush3.bf16.msra.mxu0 %v11010_v61 }
 0xa10   :  { %10262 = vmatprep.subr.bf16.mxu0 %v14447_v54 }
 0xa13   :  { %10263 = vmatpush3.bf16.msra.mxu0 %v11011_v45 }
 0xa14   :  { %10264 = vmatprep.subr.bf16.mxu0 %v14447_v54 }
 0xa17   :  { %10265 = vmatpush3.bf16.msra.mxu0 %v11012_v53 }
 0xa18   :  { %10266 = vmatprep.subr.bf16.mxu0 %v14447_v54 }
 0xa1b   :  { %10267 = vmatpush3.bf16.msra.mxu0 %v11013_v15 }
 0xa1c   :  { %10268 = vmatprep.subr.bf16.mxu0 %v14447_v54 }
 0xa1f   :  { %10269 = vmatpush3.bf16.msra.mxu0 %v11014_v31 }
 0xa20   :  { %10306 = vmatprep.subr.bf16.mxu0 %v14447_v54 }
 0xa22   :  { %10271 = vmatmul.mubr.bf16.vlgmr.msra.gmra.mxu0 %v3850_v59 }
 0xa23   :  { %10322 = vmatprep.mubr.msk.bf16.mxu0 %vm11981_vm0, %v14447_v54 }
 0xa98   :  { %v4030_v16 = vpop.f32.mrf.mxu1 }
 0xa99   :  { %v4031_v59 = vadd.f32 %v4030_v16, %v13452_v33  ;;  %v3813_v16 = vadd.f32 %v13474_v12, %v3794_v34  ;;  %v11020_v34 = vld [vmem:[#allocation19 + $0x10] sm:$0xff]  }
 0xa9a   :  { %v4032_v57 = vpop.f32.mrf.mxu1 }
 0xa9b   :  { %v4078_v38 = vrot.slane %v4031_v59, 7  ;;  %v4033_v43 = vadd.f32 %v4032_v57, %v13463_v39 }
 0xa9c   :  { %v4034_v20 = vpop.f32.mrf.mxu1 }
 0xa9d   :  { %v4080_v55 = vadd.f32 %v4078_v38, %v3811_v47  ;;  %v4088_v24 = vrot.slane %v4033_v43, 7 }
 0xa9e   :  { %v4035_v0 = vpop.f32.mrf.mxu1 }
 0xa9f   :  { %v8984_v21 = vmul.f32 -1.442695, %v4080_v55  ;;  %v4090_v25 = vadd.f32 %v4088_v24, %v3812_v49 }
 0xaa1   :  { %11471 = vpow2.f32 %v8984_v21  ;;  %v8985_v28 = vmul.f32 -1.442695, %v4090_v25 }
 0xaa3   :  { %11473 = vpow2.f32 %v8985_v28 }
 0xaae   :  { %v11472_v56 = vpop.eup %11471 }
 0xaaf   :  { %v4084_v4 = vadd.f32 1.0, %v11472_v56 }
 0xab0   :  { %v11474_v22 = vpop.eup %11473 }
 0xab1   :  { %11475 = vrcp.f32 %v4084_v4  ;;  %v4094_v35 = vadd.f32 1.0, %v11474_v22  ;;  %v11015_v4 = vld [vmem:[#allocation19 + $0x38] sm:$0xff]   ;;  %v11016_v22 = vld [vmem:[#allocation19 + $0x30] sm:$0xff]  }
 0xab3   :  { %11477 = vrcp.f32 %v4094_v35  ;;  %v11019_v35 = vld [vmem:[#allocation19 + $0x18] sm:$0xff]  }
 0xabe   :  { %v11476_v15 = vpop.eup %11475 }
 0xac0   :  { %v11478_v52 = vpop.eup %11477 }
 0xac1   :  { %v4103_v62 = vsub.f32 1.0, %v11478_v52  ;;  %v4108_v2 = vmul.f32 %v11478_v52, %v4106_v42  ;;  %v13525_v52 = vld [vmem:[#allocation4 + $0x60] ss:$12 sps:$4 sm:$0xff]   ;;  %v13531_v42 = vld [vmem:[#allocation4 + $0x48] ss:$12 sps:$4 sm:$0xff]  }
 0xac2   :  { %v3778_v40 = vpop.f32.mrf.mxu0 }
 0xac3   :  { %v3784_v8 = vpack.c.bf16 %v3778_v40, %v3778_v40 }
 0xac4   :  { %v10252_v9 = vpop.f32.mrf.mxu0 }
 0xac5   :  { %3785 = vst [vmem:[#allocation3] sm:$0xf] %v3784_v8 }
 0xac6   :  { %v3781_v41 = vpop.f32.mrf.mxu0 }
 0xac8   :  { %v10253_v19 = vpop.f32.mrf.mxu0 }
 0xacc   :  { %v4185_v55 = vld [vmem:[#allocation3] sm:$0xf] }
 0xacd   :  { %v4191_v21 = vsel %vm3670_vm14, %v4185_v55, 0  ;;  %v13545_v55 = vld [vmem:[#allocation4 + $0x4] ss:$12 sps:$4 sm:$0xff]  }
 0xae2   :  { %v4071_v17 = vpop.f32.mrf.mxu0 }
 0xae3   :  { %v4072_v61 = vadd.f32 %v4071_v17, %v13471_v18  ;;  %v11018_v17 = vld [vmem:[#allocation19 + $0x20] sm:$0xff]  }
 0xae4   :  { %v10272_v45 = vpop.f32.mrf.mxu0 }
 0xae5   :  { %v4098_v53 = vrot.slane %v4072_v61, 7  ;;  %v11021_v61 = vld [vmem:[#allocation19 + $0x8] sm:$0xff]   ;;  %v11022_v45 = vld [vmem:[#allocation19] sm:$0xff]  }
 0xae6   :  { %v4074_v31 = vpop.f32.mrf.mxu0 }
 0xae7   :  { %v4100_v57 = vmul.f32 %v11476_v15, %v4098_v53  ;;  %v13502_v53 = vld [vmem:[#allocation4 + $0xac] ss:$12 sps:$4 sm:$0xff]   ;;  %v13505_v15 = vld [vmem:[#allocation4 + $0xa8] ss:$12 sps:$4 sm:$0xff]  }
 0xae8   :  { %v10273_v20 = vpop.f32.mrf.mxu0  ;;  %v13508_v31 = vld [vmem:[#allocation4 + $0x94] ss:$12 sps:$4 sm:$0xff]  }
 0xae9   :  { %v4101_v0 = vadd.f32 %v4100_v57, %v3813_v16  ;;  %v13513_v16 = vld [vmem:[#allocation4 + $0x90] ss:$12 sps:$4 sm:$0xff]   ;;  %v13519_v20 = vld [vmem:[#allocation4 + $0x78] ss:$12 sps:$4 sm:$0xff]  }
 0xaea   :  { %v13515_v57 = vld [vmem:[#allocation4 + $0x7c] ss:$12 sps:$4 sm:$0xff]  }
 0xaeb   :  { %11479 = vtanh.f32 %v4101_v0  ;;  %v13521_v0 = vld [vmem:[#allocation4 + $0x64] ss:$12 sps:$4 sm:$0xff]  }
 0xaf8   :  { %v11480_v59 = vpop.eup %11479 }
 0xaf9   :  { %v4104_v36 = vmul.f32 %v11480_v59, %v4103_v62  ;;  %v13527_v62 = vld [vmem:[#allocation4 + $0x4c] ss:$12 sps:$4 sm:$0xff]   ;;  %v13533_v59 = vld [vmem:[#allocation4 + $0x34] ss:$12 sps:$4 sm:$0xff]  }
 0xafb   :  { %v13479_v38 = vadd.f32 %v4108_v2, %v4104_v36  ;;  %v13537_v36 = vld [vmem:[#allocation4 + $0x30] ss:$12 sps:$4 sm:$0xff]  }
 0xafc   :  { %v13539_v2 = vld [vmem:[#allocation4 + $0x1c] ss:$12 sps:$4 sm:$0xff]  }
 0xafd   :  { %v4110_v47 = vpack.c.bf16 %v13479_v38, %v13479_v38 }
 0xaff   :  { %v13483_v37 = vshrl.u32 %v4110_v47, 16  ;;  %v13543_v47 = vld [vmem:[#allocation4 + $0x18] ss:$12 sps:$4 sm:$0xff]  }
 0xb01   :  { %10277 = vmatmul.mubr.bf16.vlgmr.msra.gmra.mxu1 %v13483_v37 }
 0xb02   :  { %10281 = vmatpush3.bf16.msra.mxu1 %v4191_v21  ;;  %10282 = vmatprep.mubr.msk.bf16.mxu1 %vm11981_vm0, %v14447_v54  ;;  %v13549_v21 = vld [vmem:[#allocation4] ss:$12 sps:$4 sm:$0xff]  }
 0xb03   :  { %10286 = vmatprep.subr.bf16.mxu1 %v14447_v54 }
 0xbc1   :  { %v4150_v50 = vpop.f32.mrf.mxu1 }
 0xbc2   :  { %v4157_v40 = vsel %vm4156_vm3, %v4150_v50, -inf }
 0xbc3   :  { %4158 = vmax.xlane.f32.xlu0 %v4157_v40  ;;  %v10278_v43 = vpop.f32.mrf.mxu1  ;;  %v11048_v40 = vld [vmem:[#allocation22 + $0x30] sm:$0xff]  }
 0xbc4   :  { %v11049_v43 = vld [vmem:[#allocation22 + $0x28] sm:$0xff]  }
 0xbc5   :  { %v4153_v8 = vpop.f32.mrf.mxu1 }
 0xbc6   :  { %v11050_v8 = vld [vmem:[#allocation22 + $0x20] sm:$0xff]  }
 0xbc7   :  { %v10279_v9 = vpop.f32.mrf.mxu1 }
 0xbc8   :  { %v11051_v9 = vld [vmem:[#allocation22 + $0x18] sm:$0xff]  }
 0xc4c   :  { %v4159_v48 = vpop.xlane.xlu0 %4158 }
 0xc4d   :  { %v4160_v41 = vsub.f32 %v4150_v50, %v4159_v48  ;;  %v11047_v50 = vld [vmem:[#allocation22 + $0x38] sm:$0xff]   ;;  %v11053_v48 = vld [vmem:[#allocation22 + $0x8] sm:$0xff]  }
 0xc4e   :  { %10307 = vmatpush3.bf16.msra.mxu0 %v11047_v50  ;;  %v11057_v50 = vld [vmem:[#allocation4 + $0x80] ss:$12 sps:$4 sm:$0xff]  }
 0xc4f   :  { %v4161_v24 = vmul.f32 1.442695, %v4160_v41  ;;  %10308 = vmatprep.subr.bf16.mxu0 %v14447_v54  ;;  %v11054_v41 = vld [vmem:[#allocation22] sm:$0xff]  }
 0xc51   :  { %11481 = vpow2.f32 %v4161_v24 }
 0xc52   :  { %10309 = vmatpush3.bf16.msra.mxu0 %v11048_v40  ;;  %v11058_v40 = vld [vmem:[#allocation4 + $0x68] ss:$12 sps:$4 sm:$0xff]  }
 0xc53   :  { %10310 = vmatprep.subr.bf16.mxu0 %v14447_v54 }
 0xc56   :  { %10311 = vmatpush3.bf16.msra.mxu0 %v11049_v43  ;;  %v11059_v43 = vld [vmem:[#allocation4 + $0x50] ss:$12 sps:$4 sm:$0xff]  }
 0xc57   :  { %10312 = vmatprep.subr.bf16.mxu0 %v14447_v54 }
 0xc5a   :  { %10313 = vmatpush3.bf16.msra.mxu0 %v11050_v8  ;;  %v11060_v8 = vld [vmem:[#allocation4 + $0x38] ss:$12 sps:$4 sm:$0xff]  }
 0xc5b   :  { %10314 = vmatprep.subr.bf16.mxu0 %v14447_v54 }
 0xc5e   :  { %v11482_v19 = vpop.eup %11481  ;;  %10315 = vmatpush3.bf16.msra.mxu0 %v11051_v9  ;;  %v11061_v9 = vld [vmem:[#allocation4 + $0x20] ss:$12 sps:$4 sm:$0xff]  }
 0xc5f   :  { %v4163_v49 = vsel %vm4156_vm3, %v11482_v19, 0.0  ;;  %10316 = vmatprep.subr.bf16.mxu0 %v14447_v54 }
 0xc60   :  { %4164 = vadd.xlane.f32.xlu0 %v4163_v49 }
 0xce9   :  { %v4165_v25 = vpop.xlane.xlu0 %4164 }
 0xcea   :  { %11483 = vrcp.f32 %v4165_v25 }
 0xcf7   :  { %v11484_v28 = vpop.eup %11483 }
 0xcf8   :  { %v4167_v56 = vmul.f32 %v11484_v28, %v11482_v19  ;;  %v13564_v28 = vld [vmem:[%s14315_s16] sm:$0x1] }
 0xcfa   :  { %v4184_v58 = vpack.c.bf16 %v4167_v56, %v4167_v56 }
 0xcfc   :  { %10283 = vmatmul.mubr.msk.bf16.vlgmr.msra.gmra.mxu1 %vm4186_vm4, %v4184_v58 }
 0xcfd   :  { %10287 = vmatpush3.bf16.msra.mxu1 %v11015_v4  ;;  %10302 = vmatprep.mubr.msk.bf16.mxu1 %vm11981_vm0, %v14447_v54 }
 0xcfe   :  { %10288 = vmatprep.subr.bf16.mxu1 %v14447_v54 }
 0xd01   :  { %10289 = vmatpush3.bf16.msra.mxu1 %v11016_v22 }
 0xd02   :  { %10290 = vmatprep.subr.bf16.mxu1 %v14447_v54 }
 0xd05   :  { %10291 = vmatpush3.bf16.msra.mxu1 %v11017_v6 }
 0xd06   :  { %10292 = vmatprep.subr.bf16.mxu1 %v14447_v54 }
 0xd09   :  { %10293 = vmatpush3.bf16.msra.mxu1 %v11018_v17 }
 0xd0a   :  { %10294 = vmatprep.subr.bf16.mxu1 %v14447_v54 }
 0xd0d   :  { %10295 = vmatpush3.bf16.msra.mxu1 %v11019_v35 }
 0xd0e   :  { %10296 = vmatprep.subr.bf16.mxu1 %v14447_v54 }
 0xd11   :  { %10297 = vmatpush3.bf16.msra.mxu1 %v11020_v34 }
 0xd12   :  { %10298 = vmatprep.subr.bf16.mxu1 %v14447_v54 }
 0xd15   :  { %10299 = vmatpush3.bf16.msra.mxu1 %v11021_v61  ;;  %v11055_v61 = vld [vmem:[#allocation4 + $0xb0] ss:$12 sps:$4 sm:$0xff]  }
 0xd16   :  { %10300 = vmatprep.subr.bf16.mxu1 %v14447_v54 }
 0xd19   :  { %10301 = vmatpush3.bf16.msra.mxu1 %v11022_v45  ;;  %v11056_v45 = vld [vmem:[#allocation4 + $0x98] ss:$12 sps:$4 sm:$0xff]  }
 0xd1a   :  { %4623 = vmatprep.subr.bf16.mxu1 %v13502_v53 }
 0xd1c   :  { %10303 = vmatmul.mubr.bf16.vlgmr.msra.gmra.mxu1 %v13483_v37 }
 0xd1d   :  { %4624 = vmatpush1.bf16.msra.mxu1 %v13505_v15  ;;  %4655 = vmatprep.mubr.bf16.mxu1 %v14445_v29 }
 0xd1e   :  { %4625 = vmatprep.subr.bf16.mxu1 %v13508_v31 }
 0xd21   :  { %4626 = vmatpush1.bf16.msra.mxu1 %v13513_v16 }
 0xd22   :  { %4627 = vmatprep.subr.bf16.mxu1 %v13515_v57 }
 0xd25   :  { %4628 = vmatpush1.bf16.msra.mxu1 %v13519_v20 }
 0xd26   :  { %4629 = vmatprep.subr.bf16.mxu1 %v13521_v0 }
 0xd29   :  { %4630 = vmatpush1.bf16.msra.mxu1 %v13525_v52 }
 0xd2a   :  { %4631 = vmatprep.subr.bf16.mxu1 %v13527_v62 }
 0xd2d   :  { %4632 = vmatpush1.bf16.msra.mxu1 %v13531_v42 }
 0xd2e   :  { %4633 = vmatprep.subr.bf16.mxu1 %v13533_v59 }
 0xd31   :  { %4634 = vmatpush1.bf16.msra.mxu1 %v13537_v36 }
 0xd32   :  { %4635 = vmatprep.subr.bf16.mxu1 %v13539_v2 }
 0xd35   :  { %4636 = vmatpush1.bf16.msra.mxu1 %v13543_v47 }
 0xd36   :  { %4637 = vmatprep.subr.bf16.mxu1 %v13545_v55 }
 0xd39   :  { %4638 = vmatpush1.bf16.msra.mxu1 %v13549_v21 }
 0xd3a   :  { %4864 = vmatprep.subr.bf16.mxu1 %v13334_v46  ;;  %v11052_v46 = vld [vmem:[#allocation22 + $0x10] sm:$0xff]  }
 0xd3b   :  { %10317 = vmatpush3.bf16.msra.mxu0 %v11052_v46  ;;  %v11062_v46 = vld [vmem:[#allocation4 + $0x8] ss:$12 sps:$4 sm:$0xff]  }
 0xd3c   :  { %10318 = vmatprep.subr.bf16.mxu0 %v14447_v54 }
 0xd3f   :  { %10319 = vmatpush3.bf16.msra.mxu0 %v11053_v48  ;;  %v13580_v48 = vld [vmem:[%s14317_s18] sm:$0x1] }
 0xd40   :  { %10320 = vmatprep.subr.bf16.mxu0 %v14447_v54 }
 0xd43   :  { %10321 = vmatpush3.bf16.msra.mxu0 %v11054_v41 }
 0xd44   :  { %10326 = vmatprep.subr.bf16.mxu0 %v14447_v54 }
 0xdbc   :  { %v4227_v24 = vpop.f32.mrf.mxu1 }
 0xdbe   :  { %v10284_v19 = vpop.f32.mrf.mxu1 }
 0xdc0   :  { %v4230_v49 = vpop.f32.mrf.mxu1 }
 0xdc2   :  { %v10285_v25 = vpop.f32.mrf.mxu1 }
 0xddc   :  { %v4315_v56 = vpop.f32.mrf.mxu1 }
 0xddd   :  { %v4316_v4 = vadd.f32 %v4315_v56, %v4227_v24 }
 0xdde   :  { %v10304_v58 = vpop.f32.mrf.mxu1 }
 0xddf   :  { %v4321_v22 = vadd.f32 %v4316_v4, %v13564_v28  ;;  %v14519_v58 = vld [vmem:[#allocation36_spill] sm:$0xff] }
 0xde0   :  { %v4318_v6 = vpop.f32.mrf.mxu1  ;;  %vm4456_vm12 = vcmp.eq.s32.totalorder %v14519_v58, 0  ;;  %vm5309_vm13 = vcmp.eq.s32.totalorder %v14519_v58, 1 }
 0xde1   :  { %11485 = vtanh.f32 %v4321_v22 }
 0xde2   :  { %v10305_v17 = vpop.f32.mrf.mxu1 }
 0xdee   :  { %v11486_v35 = vpop.eup %11485 }
 0xdef   :  { %v4323_v34 = vpack.c.bf16 %v11486_v35, %v11486_v35 }
 0xdf1   :  { %10323 = vmatmul.mubr.bf16.vlgmr.msra.gmra.mxu0 %v4323_v34 }
 0xdf2   :  { %10327 = vmatpush3.bf16.msra.mxu0 %v11055_v61  ;;  %10342 = vmatprep.mubr.msk.bf16.mxu0 %vm11981_vm0, %v14447_v54 }
 0xdf3   :  { %10328 = vmatprep.subr.bf16.mxu0 %v14447_v54 }
 0xdf6   :  { %10329 = vmatpush3.bf16.msra.mxu0 %v11056_v45 }
 0xdf7   :  { %10330 = vmatprep.subr.bf16.mxu0 %v14447_v54 }
 0xdfa   :  { %10331 = vmatpush3.bf16.msra.mxu0 %v11057_v50 }
 0xdfb   :  { %10332 = vmatprep.subr.bf16.mxu0 %v14447_v54 }
 0xdfe   :  { %10333 = vmatpush3.bf16.msra.mxu0 %v11058_v40 }
 0xdff   :  { %10334 = vmatprep.subr.bf16.mxu0 %v14447_v54 }
 0xe02   :  { %10335 = vmatpush3.bf16.msra.mxu0 %v11059_v43 }
 0xe03   :  { %10336 = vmatprep.subr.bf16.mxu0 %v14447_v54 }
 0xe06   :  { %10337 = vmatpush3.bf16.msra.mxu0 %v11060_v8 }
 0xe07   :  { %10338 = vmatprep.subr.bf16.mxu0 %v14447_v54 }
 0xe0a   :  { %10339 = vmatpush3.bf16.msra.mxu0 %v11061_v9 }
 0xe0b   :  { %10340 = vmatprep.subr.bf16.mxu0 %v14447_v54 }
 0xe0e   :  { %10341 = vmatpush3.bf16.msra.mxu0 %v11062_v46 }
 0xe0f   :  { %10346 = vmatprep.subr.bf16.mxu0 %v14447_v54 }
 0xeb1   :  { %v4422_v41 = vpop.f32.mrf.mxu0 }
 0xeb2   :  { %v13583_v24 = vadd.f32 %v4422_v41, %v13580_v48  ;;  %v11063_v41 = vld [vmem:[#allocation18 + $0xb0] ss:$12 sps:$4 sm:$0xff]  }
 0xeb3   :  { %v10324_v19 = vpop.f32.mrf.mxu0 }
 0xeb4   :  { %v4428_v49 = vsel %vm3664_vm11, %v13583_v24, -inf  ;;  %v14520_v19 = vmov 1.0|1.0  }
 0xeb5   :  { %4429 = vmax.xlane.f32.xlu1 %v4428_v49  ;;  %v4425_v25 = vpop.f32.mrf.mxu0  ;;  %v11064_v49 = vld [vmem:[#allocation18 + $0x98] ss:$12 sps:$4 sm:$0xff]  }
 0xeb6   :  { %v11065_v25 = vld [vmem:[#allocation18 + $0x80] ss:$12 sps:$4 sm:$0xff]  }
 0xeb7   :  { %v10325_v56 = vpop.f32.mrf.mxu0 }
 0xf3e   :  { %v13587_v4 = vpop.xlane.xlu1 %4429 }
 0xf3f   :  { %vm4439_vm5 = vcmp.eq.f32.partialorder %v13583_v24, %v13587_v4 }
 0xf40   :  { %v4440_v22 = vsel %vm4439_vm5, %v14519_v58, 128 }
 0xf41   :  { %v4441_v6 = vsel %vm3664_vm11, %v4440_v22, 2147483647 }
 0xf42   :  { %v4443_v17 = vshra.s32 %v4441_v6, 16  ;;  %v4442_v34 = vand.u32 65535, %v4441_v6 }
 0xf44   :  { %v4445_v35 = vcvt.s32.f32 %v4443_v17  ;;  %v4444_v45 = vcvt.s32.f32 %v4442_v34 }
 0xf46   :  { %4446 = vmin.xlane.f32.xlu1 %v4445_v35 }
 0xfcf   :  { %v4447_v61 = vpop.xlane.xlu1 %4446 }
 0xfd0   :  { %vm4448_vm6 = vcmp.eq.f32.partialorder %v4445_v35, %v4447_v61  ;;  %v4453_v40 = vcvt.f32.s32 %v4447_v61 }
 0xfd1   :  { %v4449_v50 = vsel %vm4448_vm6, %v4444_v45, inf  ;;  %vm6159_vm6 = vcmp.eq.s32.totalorder %v14519_v58, 2 }
 0xfd2   :  { %4450 = vmin.xlane.f32.xlu0 %v4449_v50  ;;  %v4454_v8 = vshll.u32 %v4453_v40, 16 }
0x105b   :  { %v4451_v43 = vpop.xlane.xlu0 %4450 }
0x105c   :  { %v4452_v9 = vcvt.f32.s32 %v4451_v43 }
0x105e   :  { %v13593_v46 = vadd.s32 %v4454_v8, %v4452_v9 }
0x1060   :  { %vm4459_vm7 = vcmp.eq.s32.totalorder %v14519_v58, %v13593_v46 }
0x1061   :  { %vm9028_vm8 = vmpackc.low %vm4459_vm7, %vm4459_vm7 }
0x1062   :  { %9029 = vmatmul.mubr.msk.bf16.vlgmr.msra.gmra.mxu1 %vm9028_vm8, %v14520_v19  ;;  %10343 = vmatmul.mubr.msk.bf16.vlgmr.msra.gmra.mxu0 %vm9028_vm8, %v14520_v19 }
0x1063   :  { %4865 = vmatpush1.bf16.msra.mxu1 %v13336_v32  ;;  %10347 = vmatpush3.bf16.msra.mxu0 %v11063_v41  ;;  %v11066_v32 = vld [vmem:[#allocation18 + $0x68] ss:$12 sps:$4 sm:$0xff]  }
0x1064   :  { %4866 = vmatprep.subr.bf16.mxu1 %v13340_v27  ;;  %10348 = vmatprep.subr.bf16.mxu0 %v14447_v54  ;;  %v11067_v27 = vld [vmem:[#allocation18 + $0x50] ss:$12 sps:$4 sm:$0xff]  }
0x1065   :  { %4896 = vmatprep.mubr.bf16.mxu1 %v14445_v29  ;;  %10362 = vmatprep.mubr.msk.bf16.mxu0 %vm11981_vm0, %v14447_v54 }
0x1067   :  { %4867 = vmatpush1.bf16.msra.mxu1 %v13342_v13  ;;  %10349 = vmatpush3.bf16.msra.mxu0 %v11064_v49  ;;  %v11068_v13 = vld [vmem:[#allocation18 + $0x38] ss:$12 sps:$4 sm:$0xff]  }
0x1068   :  { %4868 = vmatprep.subr.bf16.mxu1 %v13346_v60  ;;  %10350 = vmatprep.subr.bf16.mxu0 %v14447_v54  ;;  %v11069_v60 = vld [vmem:[#allocation18 + $0x20] ss:$12 sps:$4 sm:$0xff]  }
0x106b   :  { %4869 = vmatpush1.bf16.msra.mxu1 %v13348_v51  ;;  %10351 = vmatpush3.bf16.msra.mxu0 %v11065_v25  ;;  %v11070_v51 = vld [vmem:[#allocation18 + $0x8] ss:$12 sps:$4 sm:$0xff]  }
0x106c   :  { %4870 = vmatprep.subr.bf16.mxu1 %v13352_v14  ;;  %10352 = vmatprep.subr.bf16.mxu0 %v14447_v54  ;;  %v11071_v14 = vld [vmem:[#allocation19 + $0x38] sm:$0xff]  }
0x106f   :  { %4871 = vmatpush1.bf16.msra.mxu1 %v13354_v30  ;;  %10353 = vmatpush3.bf16.msra.mxu0 %v11066_v32  ;;  %v4970_v30 = vld [vmem:[#allocation2] sm:$0xf] }
0x1070   :  { %4872 = vmatprep.subr.bf16.mxu1 %v13358_v23  ;;  %10354 = vmatprep.subr.bf16.mxu0 %v14447_v54  ;;  %v11072_v23 = vld [vmem:[#allocation19 + $0x30] sm:$0xff]  }
0x1073   :  { %4873 = vmatpush1.bf16.msra.mxu1 %v13360_v10  ;;  %10355 = vmatpush3.bf16.msra.mxu0 %v11067_v27  ;;  %v11073_v10 = vld [vmem:[#allocation19 + $0x28] sm:$0xff]  }
0x1074   :  { %4874 = vmatprep.subr.bf16.mxu1 %v13364_v5  ;;  %10356 = vmatprep.subr.bf16.mxu0 %v14447_v54  ;;  %v11074_v5 = vld [vmem:[#allocation19 + $0x20] sm:$0xff]  }
0x1077   :  { %4875 = vmatpush1.bf16.msra.mxu1 %v13366_v1  ;;  %10357 = vmatpush3.bf16.msra.mxu0 %v11068_v13  ;;  %v11075_v1 = vld [vmem:[#allocation19 + $0x18] sm:$0xff]  }
0x1078   :  { %4876 = vmatprep.subr.bf16.mxu1 %v13370_v7  ;;  %10358 = vmatprep.subr.bf16.mxu0 %v14447_v54  ;;  %v11076_v7 = vld [vmem:[#allocation19 + $0x10] sm:$0xff]  }
0x107b   :  { %4877 = vmatpush1.bf16.msra.mxu1 %v13372_v3  ;;  %10359 = vmatpush3.bf16.msra.mxu0 %v11069_v60  ;;  %v11077_v3 = vld [vmem:[#allocation19 + $0x8] sm:$0xff]  }
0x107c   :  { %4878 = vmatprep.subr.bf16.mxu1 %v13376_v11  ;;  %10360 = vmatprep.subr.bf16.mxu0 %v14447_v54  ;;  %v11078_v11 = vld [vmem:[#allocation19] sm:$0xff]  }
0x107f   :  { %4879 = vmatpush1.bf16.msra.mxu1 %v13378_v26  ;;  %10361 = vmatpush3.bf16.msra.mxu0 %v11070_v51 }
0x1080   :  { %10366 = vmatprep.subr.bf16.mxu1 %v14447_v54  ;;  %10378 = vmatprep.subr.bf16.mxu0 %v14447_v54 }
0x1082   :  { %4897 = vmatmul.mubr.bf16.vlgmr.msra.gmra.mxu1 %v13483_v37  ;;  %10363 = vmatmul.mubr.bf16.vlgmr.msra.gmra.mxu0 %v13483_v37 }
0x1083   :  { %10367 = vmatpush3.bf16.xpose.msra.mxu1 %v4970_v30  ;;  %10379 = vmatpush3.bf16.msra.mxu0 %v11071_v14 }
0x1084   :  { %10380 = vmatprep.subr.bf16.mxu0 %v14447_v54  ;;  %10368 = vmatprep.mubr.msk.bf16.mxu1 %vm11981_vm0, %v14447_v54 }
0x1085   :  { %10372 = vmatprep.subr.bf16.mxu1 %v14447_v54  ;;  %10394 = vmatprep.mubr.msk.bf16.mxu0 %vm11981_vm0, %v14447_v54 }
0x1087   :  { %10381 = vmatpush3.bf16.msra.mxu0 %v11072_v23 }
0x1088   :  { %10382 = vmatprep.subr.bf16.mxu0 %v14447_v54 }
0x108b   :  { %10383 = vmatpush3.bf16.msra.mxu0 %v11073_v10 }
0x108c   :  { %10384 = vmatprep.subr.bf16.mxu0 %v14447_v54 }
0x108f   :  { %10385 = vmatpush3.bf16.msra.mxu0 %v11074_v5 }
0x1090   :  { %10386 = vmatprep.subr.bf16.mxu0 %v14447_v54 }
0x1093   :  { %10387 = vmatpush3.bf16.msra.mxu0 %v11075_v1 }
0x1094   :  { %10388 = vmatprep.subr.bf16.mxu0 %v14447_v54 }
0x1097   :  { %10389 = vmatpush3.bf16.msra.mxu0 %v11076_v7 }
0x1098   :  { %10390 = vmatprep.subr.bf16.mxu0 %v14447_v54 }
0x109b   :  { %10391 = vmatpush3.bf16.msra.mxu0 %v11077_v3 }
0x109c   :  { %10392 = vmatprep.subr.bf16.mxu0 %v14447_v54 }
0x109f   :  { %10393 = vmatpush3.bf16.msra.mxu0 %v11078_v11 }
0x10a0   :  { %5476 = vmatprep.subr.bf16.mxu0 %v13502_v53 }
0x1122   :  { %v4657_v26 = vpop.f32.mrf.mxu1  ;;  %v4698_v37 = vpop.f32.mrf.mxu0 }
0x1123   :  { %v4658_v50 = vadd.f32 %v4657_v26, %v13459_v63  ;;  %v4699_v7 = vadd.f32 %v4698_v37, %v13474_v12 }
0x1124   :  { %v4659_v56 = vpop.f32.mrf.mxu1  ;;  %v10344_v22 = vpop.f32.mrf.mxu0 }
0x1125   :  { %v4660_v13 = vadd.f32 %v4659_v56, %v13467_v44  ;;  %v4965_v56 = vrot.slane %v13479_v38, 1 }
0x1126   :  { %v4661_v6 = vpop.f32.mrf.mxu1  ;;  %v4701_v17 = vpop.f32.mrf.mxu0 }
0x1128   :  { %v4662_v35 = vpop.f32.mrf.mxu1  ;;  %v10345_v34 = vpop.f32.mrf.mxu0 }
0x1142   :  { %v4898_v61 = vpop.f32.mrf.mxu1  ;;  %v4939_v45 = vpop.f32.mrf.mxu0 }
0x1143   :  { %v4899_v40 = vadd.f32 %v4898_v61, %v13452_v33  ;;  %v4940_v5 = vadd.f32 %v4939_v45, %v13471_v18  ;;  %v5039_v61 = vld [vmem:[#allocation3] sm:$0xf] }
0x1144   :  { %v4900_v43 = vpop.f32.mrf.mxu1  ;;  %v10364_v8 = vpop.f32.mrf.mxu0  ;;  %v5044_v37 = vsel %vm3670_vm14, %v5039_v61, 0 }
0x1145   :  { %v4945_v9 = vadd.f32 %v4899_v40, %v4658_v50  ;;  %v4901_v25 = vadd.f32 %v4900_v43, %v13463_v39  ;;  %v11079_v40 = vld [vmem:[#allocation22 + $0x38] sm:$0xff]   ;;  %v11080_v8 = vld [vmem:[#allocation22 + $0x30] sm:$0xff]  }
0x1146   :  { %v4902_v41 = vpop.f32.mrf.mxu1  ;;  %v4942_v49 = vpop.f32.mrf.mxu0 }
0x1147   :  { %v9056_v53 = vmul.f32 -1.442695, %v4945_v9  ;;  %v4952_v60 = vadd.f32 %v4901_v25, %v4660_v13  ;;  %v11081_v9 = vld [vmem:[#allocation22 + $0x28] sm:$0xff]   ;;  %v11082_v41 = vld [vmem:[#allocation22 + $0x20] sm:$0xff]   ;;  %v11083_v49 = vld [vmem:[#allocation22 + $0x18] sm:$0xff]  }
0x1148   :  { %v4903_v32 = vpop.f32.mrf.mxu1  ;;  %v10365_v27 = vpop.f32.mrf.mxu0  ;;  %v11085_v25 = vld [vmem:[#allocation22 + $0x8] sm:$0xff]  }
0x1149   :  { %11487 = vpow2.f32 %v9056_v53  ;;  %v9057_v51 = vmul.f32 -1.442695, %v4952_v60  ;;  %v11084_v53 = vld [vmem:[#allocation22 + $0x10] sm:$0xff]   ;;  %v11086_v32 = vld [vmem:[#allocation22] sm:$0xff]  }
0x114b   :  { %11489 = vpow2.f32 %v9057_v51 }
0x1156   :  { %v11488_v14 = vpop.eup %11487 }
0x1157   :  { %v4949_v30 = vadd.f32 1.0, %v11488_v14 }
0x1158   :  { %v11490_v23 = vpop.eup %11489 }
0x1159   :  { %11491 = vrcp.f32 %v4949_v30  ;;  %v4956_v10 = vadd.f32 1.0, %v11490_v23 }
0x115b   :  { %11493 = vrcp.f32 %v4956_v10 }
0x1166   :  { %v11492_v1 = vpop.eup %11491 }
0x1167   :  { %v4959_v3 = vmul.f32 %v11492_v1, %v4940_v5  ;;  %v11087_v5 = vld [vmem:[#allocation4 + $0xb0] ss:$12 sps:$4 sm:$0xff]   ;;  %v11088_v1 = vld [vmem:[#allocation4 + $0x98] ss:$12 sps:$4 sm:$0xff]  }
0x1168   :  { %v11494_v26 = vpop.eup %11493 }
0x1169   :  { %v4960_v11 = vadd.f32 %v4959_v3, %v4699_v7  ;;  %v4962_v22 = vsub.f32 1.0, %v11494_v26  ;;  %v4967_v35 = vmul.f32 %v11494_v26, %v4965_v56  ;;  %v11089_v7 = vld [vmem:[#allocation4 + $0x80] ss:$12 sps:$4 sm:$0xff]   ;;  %v11091_v3 = vld [vmem:[#allocation4 + $0x50] ss:$12 sps:$4 sm:$0xff]  }
0x116a   :  { %v11093_v26 = vld [vmem:[#allocation4 + $0x20] ss:$12 sps:$4 sm:$0xff]   ;;  %v11094_v56 = vld [vmem:[#allocation4 + $0x8] ss:$12 sps:$4 sm:$0xff]  }
0x116b   :  { %11495 = vtanh.f32 %v4960_v11  ;;  %v11092_v11 = vld [vmem:[#allocation4 + $0x38] ss:$12 sps:$4 sm:$0xff]  }
0x1178   :  { %v11496_v6 = vpop.eup %11495 }
0x1179   :  { %v4963_v17 = vmul.f32 %v11496_v6, %v4962_v22 }
0x117b   :  { %v13648_v34 = vadd.f32 %v4967_v35, %v4963_v17 }
0x117d   :  { %v13652_v45 = vpack.c.bf16 %v13648_v34, %v13648_v34 }
0x117f   :  { %10369 = vmatmul.mubr.bf16.vlgmr.msra.gmra.mxu1 %v13652_v45  ;;  %10395 = vmatmul.mubr.bf16.vlgmr.msra.gmra.mxu0 %v13652_v45 }
0x1180   :  { %10373 = vmatpush3.bf16.msra.mxu1 %v5044_v37  ;;  %5477 = vmatpush1.bf16.msra.mxu0 %v13505_v15 }
0x1181   :  { %5478 = vmatprep.subr.bf16.mxu0 %v13508_v31  ;;  %10374 = vmatprep.mubr.msk.bf16.mxu1 %vm11981_vm0, %v14447_v54 }
0x1182   :  { %10398 = vmatprep.subr.bf16.mxu1 %v14447_v54  ;;  %5508 = vmatprep.mubr.bf16.mxu0 %v14445_v29 }
0x1184   :  { %5479 = vmatpush1.bf16.msra.mxu0 %v13513_v16 }
0x1185   :  { %5480 = vmatprep.subr.bf16.mxu0 %v13515_v57 }
0x1188   :  { %5481 = vmatpush1.bf16.msra.mxu0 %v13519_v20 }
0x1189   :  { %5482 = vmatprep.subr.bf16.mxu0 %v13521_v0 }
0x118c   :  { %5483 = vmatpush1.bf16.msra.mxu0 %v13525_v52 }
0x118d   :  { %5484 = vmatprep.subr.bf16.mxu0 %v13527_v62 }
0x1190   :  { %5485 = vmatpush1.bf16.msra.mxu0 %v13531_v42 }
0x1191   :  { %5486 = vmatprep.subr.bf16.mxu0 %v13533_v59 }
0x1194   :  { %5487 = vmatpush1.bf16.msra.mxu0 %v13537_v36 }
0x1195   :  { %5488 = vmatprep.subr.bf16.mxu0 %v13539_v2 }
0x1198   :  { %5489 = vmatpush1.bf16.msra.mxu0 %v13543_v47 }
0x1199   :  { %5490 = vmatprep.subr.bf16.mxu0 %v13545_v55 }
0x119c   :  { %5491 = vmatpush1.bf16.msra.mxu0 %v13549_v21 }
0x123f   :  { %v5005_v38 = vpop.f32.mrf.mxu1  ;;  %v5168_v15 = vpop.f32.mrf.mxu0 }
0x1240   :  { %v5011_v31 = vsel %vm4156_vm3, %v5005_v38, -inf }
0x1241   :  { %5012 = vmax.xlane.f32.xlu1 %v5011_v31  ;;  %v10370_v16 = vpop.f32.mrf.mxu1  ;;  %v10396_v57 = vpop.f32.mrf.mxu0 }
0x1243   :  { %v5008_v20 = vpop.f32.mrf.mxu1  ;;  %v5171_v0 = vpop.f32.mrf.mxu0 }
0x1245   :  { %v10371_v52 = vpop.f32.mrf.mxu1  ;;  %v10397_v62 = vpop.f32.mrf.mxu0 }
0x1246   :  { %v13711_v62 = vld [vmem:[#allocation18 + $0xac] ss:$12 sps:$4 sm:$0xff]  }
0x1247   :  { %5717 = vmatprep.subr.bf16.mxu0 %v13711_v62 }
0x12ca   :  { %v5013_v42 = vpop.xlane.xlu1 %5012 }
0x12cb   :  { %v5014_v59 = vsub.f32 %v5005_v38, %v5013_v42 }
0x12cd   :  { %v5015_v36 = vmul.f32 1.442695, %v5014_v59 }
0x12cf   :  { %11497 = vpow2.f32 %v5015_v36 }
0x12dc   :  { %v11498_v2 = vpop.eup %11497 }
0x12dd   :  { %v5017_v47 = vsel %vm4156_vm3, %v11498_v2, 0.0 }
0x12de   :  { %5018 = vadd.xlane.f32.xlu0 %v5017_v47 }
0x1367   :  { %v5019_v55 = vpop.xlane.xlu0 %5018 }
0x1368   :  { %11499 = vrcp.f32 %v5019_v55  ;;  %v4457_v55 = vsel %vm4456_vm12, %v13593_v46, 0  ;;  %v13731_v46 = vld [vmem:[#allocation18 + $0x90] ss:$12 sps:$4 sm:$0xff]  }
0x1375   :  { %v11500_v21 = vpop.eup %11499 }
0x1376   :  { %v5021_v50 = vmul.f32 %v11500_v21, %v11498_v2  ;;  %v13719_v21 = vld [vmem:[#allocation18 + $0xa8] ss:$12 sps:$4 sm:$0xff]  }
0x1378   :  { %v5038_v43 = vpack.c.bf16 %v5021_v50, %v5021_v50  ;;  %v11098_v50 = vld [vmem:[#allocation18 + $0xb0] ss:$12 sps:$4 sm:$0xff]  }
0x137a   :  { %10375 = vmatmul.mubr.msk.bf16.vlgmr.msra.gmra.mxu1 %vm4186_vm4, %v5038_v43  ;;  %v13726_v43 = vld [vmem:[#allocation18 + $0x94] ss:$12 sps:$4 sm:$0xff]  }
0x137b   :  { %10399 = vmatpush3.bf16.msra.mxu1 %v11079_v40  ;;  %10414 = vmatprep.mubr.msk.bf16.mxu1 %vm11981_vm0, %v14447_v54 }
0x137c   :  { %10400 = vmatprep.subr.bf16.mxu1 %v14447_v54 }
0x137f   :  { %10401 = vmatpush3.bf16.msra.mxu1 %v11080_v8  ;;  %v11102_v8 = vld [vmem:[#allocation18 + $0x98] ss:$12 sps:$4 sm:$0xff]  }
0x1380   :  { %10402 = vmatprep.subr.bf16.mxu1 %v14447_v54 }
0x1383   :  { %10403 = vmatpush3.bf16.msra.mxu1 %v11081_v9  ;;  %v13735_v9 = vld [vmem:[#allocation18 + $0x7c] ss:$12 sps:$4 sm:$0xff]  }
0x1384   :  { %10404 = vmatprep.subr.bf16.mxu1 %v14447_v54 }
0x1387   :  { %10405 = vmatpush3.bf16.msra.mxu1 %v11082_v41  ;;  %v13741_v41 = vld [vmem:[#allocation18 + $0x78] ss:$12 sps:$4 sm:$0xff]  }
0x1388   :  { %10406 = vmatprep.subr.bf16.mxu1 %v14447_v54 }
0x138b   :  { %10407 = vmatpush3.bf16.msra.mxu1 %v11083_v49  ;;  %v11106_v49 = vld [vmem:[#allocation18 + $0x80] ss:$12 sps:$4 sm:$0xff]  }
0x138c   :  { %10408 = vmatprep.subr.bf16.mxu1 %v14447_v54 }
0x138f   :  { %10409 = vmatpush3.bf16.msra.mxu1 %v11084_v53  ;;  %v13745_v53 = vld [vmem:[#allocation18 + $0x64] ss:$12 sps:$4 sm:$0xff]  }
0x1390   :  { %10410 = vmatprep.subr.bf16.mxu1 %v14447_v54 }
0x1393   :  { %10411 = vmatpush3.bf16.msra.mxu1 %v11085_v25  ;;  %v13748_v25 = vld [vmem:[#allocation18 + $0x60] ss:$12 sps:$4 sm:$0xff]  }
0x1394   :  { %10412 = vmatprep.subr.bf16.mxu1 %v14447_v54 }
0x1397   :  { %10413 = vmatpush3.bf16.msra.mxu1 %v11086_v32  ;;  %v11110_v32 = vld [vmem:[#allocation18 + $0x68] ss:$12 sps:$4 sm:$0xff]  }
0x1398   :  { %10418 = vmatprep.subr.bf16.mxu1 %v14447_v54 }
0x143a   :  { %v5080_v27 = vpop.f32.mrf.mxu1 }
0x143b   :  { %v5169_v13 = vadd.f32 %v5168_v15, %v5080_v27  ;;  %v13752_v27 = vld [vmem:[#allocation18 + $0x4c] ss:$12 sps:$4 sm:$0xff]  }
0x143c   :  { %v10376_v60 = vpop.f32.mrf.mxu1 }
0x143d   :  { %v5174_v51 = vadd.f32 %v5169_v13, %v13564_v28  ;;  %v11090_v28 = vld [vmem:[#allocation4 + $0x68] ss:$12 sps:$4 sm:$0xff]   ;;  %v11114_v60 = vld [vmem:[#allocation18 + $0x50] ss:$12 sps:$4 sm:$0xff]  }
0x143e   :  { %v5083_v14 = vpop.f32.mrf.mxu1  ;;  %v13755_v13 = vld [vmem:[#allocation18 + $0x48] ss:$12 sps:$4 sm:$0xff]  }
0x143f   :  { %11501 = vtanh.f32 %v5174_v51  ;;  %v13759_v51 = vld [vmem:[#allocation18 + $0x34] ss:$12 sps:$4 sm:$0xff]   ;;  %v13762_v14 = vld [vmem:[#allocation18 + $0x30] ss:$12 sps:$4 sm:$0xff]  }
0x1440   :  { %v10377_v30 = vpop.f32.mrf.mxu1 }
0x1441   :  { %v11118_v30 = vld [vmem:[#allocation18 + $0x38] ss:$12 sps:$4 sm:$0xff]  }
0x144c   :  { %v11502_v23 = vpop.eup %11501 }
0x144d   :  { %v5176_v10 = vpack.c.bf16 %v11502_v23, %v11502_v23  ;;  %v13766_v23 = vld [vmem:[#allocation18 + $0x1c] ss:$12 sps:$4 sm:$0xff]  }
0x144f   :  { %10415 = vmatmul.mubr.bf16.vlgmr.msra.gmra.mxu1 %v5176_v10  ;;  %v13769_v10 = vld [vmem:[#allocation18 + $0x18] ss:$12 sps:$4 sm:$0xff]  }
0x1450   :  { %10419 = vmatpush3.bf16.msra.mxu1 %v11087_v5  ;;  %10434 = vmatprep.mubr.msk.bf16.mxu1 %vm11981_vm0, %v14447_v54  ;;  %v11122_v5 = vld [vmem:[#allocation18 + $0x20] ss:$12 sps:$4 sm:$0xff]  }
0x1451   :  { %10420 = vmatprep.subr.bf16.mxu1 %v14447_v54 }
0x1454   :  { %10421 = vmatpush3.bf16.msra.mxu1 %v11088_v1  ;;  %v13773_v1 = vld [vmem:[#allocation18 + $0x4] ss:$12 sps:$4 sm:$0xff]  }
0x1455   :  { %10422 = vmatprep.subr.bf16.mxu1 %v14447_v54 }
0x1458   :  { %10423 = vmatpush3.bf16.msra.mxu1 %v11089_v7  ;;  %v13776_v7 = vld [vmem:[#allocation18] ss:$12 sps:$4 sm:$0xff]  }
0x1459   :  { %10424 = vmatprep.subr.bf16.mxu1 %v14447_v54 }
0x145c   :  { %10425 = vmatpush3.bf16.msra.mxu1 %v11090_v28  ;;  %v11126_v28 = vld [vmem:[#allocation18 + $0x8] ss:$12 sps:$4 sm:$0xff]  }
0x145d   :  { %10426 = vmatprep.subr.bf16.mxu1 %v14447_v54 }
0x1460   :  { %10427 = vmatpush3.bf16.msra.mxu1 %v11091_v3  ;;  %v5889_v3 = vld [vmem:[#allocation3] sm:$0xf] }
0x1461   :  { %10428 = vmatprep.subr.bf16.mxu1 %v14447_v54 }
0x1464   :  { %10429 = vmatpush3.bf16.msra.mxu1 %v11092_v11  ;;  %v5820_v11 = vld [vmem:[#allocation2] sm:$0xf] }
0x1465   :  { %10430 = vmatprep.subr.bf16.mxu1 %v14447_v54 }
0x1468   :  { %10431 = vmatpush3.bf16.msra.mxu1 %v11093_v26  ;;  %v5894_v26 = vsel %vm3670_vm14, %v5889_v3, 0 }
0x1469   :  { %10432 = vmatprep.subr.bf16.mxu1 %v14447_v54 }
0x146c   :  { %10433 = vmatpush3.bf16.msra.mxu1 %v11094_v56 }
0x146d   :  { %10438 = vmatprep.subr.bf16.mxu1 %v14447_v54 }
0x150f   :  { %v5275_v22 = vpop.f32.mrf.mxu1 }
0x1510   :  { %v13701_v6 = vadd.f32 %v5275_v22, %v13580_v48 }
0x1511   :  { %v10416_v17 = vpop.f32.mrf.mxu1 }
0x1512   :  { %14521 = vst [vmem:[#allocation50_spill] sm:$0xff] %v13701_v6  ;;  %v5281_v35 = vsel %vm3664_vm11, %v13701_v6, -inf }
0x1513   :  { %5282 = vmax.xlane.f32.xlu1 %v5281_v35  ;;  %v5278_v61 = vpop.f32.mrf.mxu1 }
0x1515   :  { %v10417_v37 = vpop.f32.mrf.mxu1 }
0x159c   :  { %v13705_v38 = vpop.xlane.xlu1 %5282 }
0x159d   :  { %14522 = vst [vmem:[#allocation51_spill] sm:$0xff] %v13705_v38  ;;  %vm5292_vm9 = vcmp.eq.f32.partialorder %v13701_v6, %v13705_v38  ;;  %v11175_v38 = vld [vmem:[#allocation18 + $0xb0] ss:$12 sps:$4 sm:$0xff]  }
0x159e   :  { %v5293_v15 = vsel %vm5292_vm9, %v14519_v58, 128 }
0x159f   :  { %v5294_v31 = vsel %vm3664_vm11, %v5293_v15, 2147483647 }
0x15a0   :  { %v5296_v16 = vshra.s32 %v5294_v31, 16  ;;  %v5295_v48 = vand.u32 65535, %v5294_v31 }
0x15a2   :  { %v5298_v57 = vcvt.s32.f32 %v5296_v16  ;;  %v5297_v0 = vcvt.s32.f32 %v5295_v48 }
0x15a4   :  { %5299 = vmin.xlane.f32.xlu0 %v5298_v57 }
0x162d   :  { %v5300_v20 = vpop.xlane.xlu0 %5299 }
0x162e   :  { %vm5301_vm10 = vcmp.eq.f32.partialorder %v5298_v57, %v5300_v20  ;;  %v5306_v42 = vcvt.f32.s32 %v5300_v20 }
0x162f   :  { %v5302_v52 = vsel %vm5301_vm10, %v5297_v0, inf }
0x1630   :  { %5303 = vmin.xlane.f32.xlu1 %v5302_v52  ;;  %v5307_v36 = vshll.u32 %v5306_v42, 16 }
0x16b9   :  { %v5304_v59 = vpop.xlane.xlu1 %5303 }
0x16ba   :  { %v5305_v2 = vcvt.f32.s32 %v5304_v59 }
0x16bc   :  { %v5308_v47 = vadd.s32 %v5307_v36, %v5305_v2 }
0x16be   :  { %v13723_v40 = vsel %vm5309_vm13, %v5308_v47, %v4457_v55  ;;  %vm5312_vm15 = vcmp.eq.s32.totalorder %v14519_v58, %v5308_v47 }
0x16bf   :  { %vm9100_vm1 = vmpackc.low %vm5312_vm15, %vm5312_vm15  ;;  %vm7009_vm15 = vcmp.eq.s32.totalorder %v14519_v58, 3 }
0x16c0   :  { %9101 = vmatmul.mubr.msk.bf16.vlgmr.msra.gmra.mxu0 %vm9100_vm1, %v14520_v19  ;;  %10435 = vmatmul.mubr.msk.bf16.vlgmr.msra.gmra.mxu1 %vm9100_vm1, %v14520_v19 }
0x16c1   :  { %5718 = vmatpush1.bf16.msra.mxu0 %v13719_v21  ;;  %10439 = vmatpush3.bf16.msra.mxu1 %v11098_v50 }
0x16c2   :  { %5719 = vmatprep.subr.bf16.mxu0 %v13726_v43  ;;  %10440 = vmatprep.subr.bf16.mxu1 %v14447_v54 }
0x16c3   :  { %5749 = vmatprep.mubr.bf16.mxu0 %v14445_v29  ;;  %10454 = vmatprep.mubr.msk.bf16.mxu1 %vm11981_vm0, %v14447_v54 }
0x16c5   :  { %5720 = vmatpush1.bf16.msra.mxu0 %v13731_v46  ;;  %10441 = vmatpush3.bf16.msra.mxu1 %v11102_v8 }
0x16c6   :  { %5721 = vmatprep.subr.bf16.mxu0 %v13735_v9  ;;  %10442 = vmatprep.subr.bf16.mxu1 %v14447_v54 }
0x16c9   :  { %5722 = vmatpush1.bf16.msra.mxu0 %v13741_v41  ;;  %10443 = vmatpush3.bf16.msra.mxu1 %v11106_v49 }
0x16ca   :  { %5723 = vmatprep.subr.bf16.mxu0 %v13745_v53  ;;  %10444 = vmatprep.subr.bf16.mxu1 %v14447_v54 }
0x16cd   :  { %5724 = vmatpush1.bf16.msra.mxu0 %v13748_v25  ;;  %10445 = vmatpush3.bf16.msra.mxu1 %v11110_v32 }
0x16ce   :  { %5725 = vmatprep.subr.bf16.mxu0 %v13752_v27  ;;  %10446 = vmatprep.subr.bf16.mxu1 %v14447_v54 }
0x16d1   :  { %5726 = vmatpush1.bf16.msra.mxu0 %v13755_v13  ;;  %10447 = vmatpush3.bf16.msra.mxu1 %v11114_v60 }
0x16d2   :  { %5727 = vmatprep.subr.bf16.mxu0 %v13759_v51  ;;  %10448 = vmatprep.subr.bf16.mxu1 %v14447_v54 }
0x16d5   :  { %5728 = vmatpush1.bf16.msra.mxu0 %v13762_v14  ;;  %10449 = vmatpush3.bf16.msra.mxu1 %v11118_v30 }
0x16d6   :  { %5729 = vmatprep.subr.bf16.mxu0 %v13766_v23  ;;  %10450 = vmatprep.subr.bf16.mxu1 %v14447_v54 }
0x16d9   :  { %5730 = vmatpush1.bf16.msra.mxu0 %v13769_v10  ;;  %10451 = vmatpush3.bf16.msra.mxu1 %v11122_v5 }
0x16da   :  { %5731 = vmatprep.subr.bf16.mxu0 %v13773_v1  ;;  %10452 = vmatprep.subr.bf16.mxu1 %v14447_v54 }
0x16dd   :  { %5732 = vmatpush1.bf16.msra.mxu0 %v13776_v7  ;;  %10453 = vmatpush3.bf16.msra.mxu1 %v11126_v28 }
0x16de   :  { %10458 = vmatprep.subr.bf16.mxu0 %v14447_v54  ;;  %10464 = vmatprep.subr.bf16.mxu1 %v14447_v54 }
0x16e0   :  { %5750 = vmatmul.mubr.bf16.vlgmr.msra.gmra.mxu0 %v13652_v45  ;;  %10455 = vmatmul.mubr.bf16.vlgmr.msra.gmra.mxu1 %v13652_v45 }
0x16e1   :  { %10459 = vmatpush3.bf16.xpose.msra.mxu0 %v5820_v11  ;;  %10465 = vmatpush3.bf16.msra.mxu1 %v5894_v26 }
0x16e2   :  { %10460 = vmatprep.mubr.msk.bf16.mxu0 %vm11981_vm0, %v14447_v54  ;;  %10470 = vmatprep.subr.bf16.mxu0 %v14447_v54 }
0x16e3   :  { %10466 = vmatprep.mubr.msk.bf16.mxu1 %vm11981_vm0, %v14447_v54  ;;  %10490 = vmatprep.subr.bf16.mxu1 %v14447_v54 }
0x1780   :  { %v5510_v56 = vpop.f32.mrf.mxu0  ;;  %v5551_v22 = vpop.f32.mrf.mxu1 }
0x1781   :  { %v5511_v57 = vadd.f32 %v5510_v56, %v13459_v63  ;;  %v5552_v11 = vadd.f32 %v5551_v22, %v13474_v12  ;;  %v11128_v22 = vld [vmem:[#allocation19 + $0x30] sm:$0xff]  }
0x1782   :  { %v5512_v17 = vpop.f32.mrf.mxu0  ;;  %v10436_v35 = vpop.f32.mrf.mxu1 }
0x1783   :  { %v5513_v50 = vadd.f32 %v5512_v17, %v13467_v44 }
0x1784   :  { %v5514_v45 = vpop.f32.mrf.mxu0  ;;  %v5554_v61 = vpop.f32.mrf.mxu1 }
0x1786   :  { %v5515_v37 = vpop.f32.mrf.mxu0  ;;  %v10437_v15 = vpop.f32.mrf.mxu1 }
0x17a0   :  { %v5751_v31 = vpop.f32.mrf.mxu0  ;;  %v5792_v16 = vpop.f32.mrf.mxu1 }
0x17a1   :  { %v5752_v48 = vadd.f32 %v5751_v31, %v13452_v33  ;;  %v5793_v28 = vadd.f32 %v5792_v16, %v13471_v18  ;;  %v11127_v31 = vld [vmem:[#allocation19 + $0x38] sm:$0xff]   ;;  %v11129_v16 = vld [vmem:[#allocation19 + $0x28] sm:$0xff]  }
0x17a2   :  { %v5753_v20 = vpop.f32.mrf.mxu0  ;;  %v10456_v0 = vpop.f32.mrf.mxu1 }
0x17a3   :  { %v5798_v52 = vadd.f32 %v5752_v48, %v5511_v57  ;;  %v5754_v2 = vadd.f32 %v5753_v20, %v13463_v39  ;;  %v11131_v48 = vld [vmem:[#allocation19 + $0x18] sm:$0xff]   ;;  %v11132_v20 = vld [vmem:[#allocation19 + $0x10] sm:$0xff]   ;;  %v11133_v0 = vld [vmem:[#allocation19 + $0x8] sm:$0xff]  }
0x17a4   :  { %v5755_v42 = vpop.f32.mrf.mxu0  ;;  %v5795_v59 = vpop.f32.mrf.mxu1 }
0x17a5   :  { %v9128_v36 = vmul.f32 -1.442695, %v5798_v52  ;;  %v5805_v8 = vadd.f32 %v5754_v2, %v5513_v50  ;;  %v11134_v52 = vld [vmem:[#allocation19] sm:$0xff]   ;;  %v13815_v42 = vld [vmem:[#allocation4 + $0xac] ss:$12 sps:$4 sm:$0xff]  }
0x17a6   :  { %v5756_v47 = vpop.f32.mrf.mxu0  ;;  %v10457_v55 = vpop.f32.mrf.mxu1  ;;  %v13818_v59 = vld [vmem:[#allocation4 + $0xa8] ss:$12 sps:$4 sm:$0xff]   ;;  %v13826_v2 = vld [vmem:[#allocation4 + $0x90] ss:$12 sps:$4 sm:$0xff]  }
0x17a7   :  { %11503 = vpow2.f32 %v9128_v36  ;;  %v9129_v49 = vmul.f32 -1.442695, %v5805_v8  ;;  %v13821_v36 = vld [vmem:[#allocation4 + $0x94] ss:$12 sps:$4 sm:$0xff]   ;;  %v13828_v47 = vld [vmem:[#allocation4 + $0x7c] ss:$12 sps:$4 sm:$0xff]  }
0x17a8   :  { %v13832_v55 = vld [vmem:[#allocation4 + $0x78] ss:$12 sps:$4 sm:$0xff]   ;;  %v13838_v8 = vld [vmem:[#allocation4 + $0x60] ss:$12 sps:$4 sm:$0xff]  }
0x17a9   :  { %11505 = vpow2.f32 %v9129_v49  ;;  %v13834_v50 = vld [vmem:[#allocation4 + $0x64] ss:$12 sps:$4 sm:$0xff]   ;;  %v13840_v49 = vld [vmem:[#allocation4 + $0x4c] ss:$12 sps:$4 sm:$0xff]  }
0x17b4   :  { %v11504_v32 = vpop.eup %11503 }
0x17b5   :  { %v5802_v60 = vadd.f32 1.0, %v11504_v32  ;;  %v13844_v32 = vld [vmem:[#allocation4 + $0x48] ss:$12 sps:$4 sm:$0xff]  }
0x17b6   :  { %v11506_v30 = vpop.eup %11505 }
0x17b7   :  { %11507 = vrcp.f32 %v5802_v60  ;;  %v5809_v5 = vadd.f32 1.0, %v11506_v30  ;;  %v13846_v60 = vld [vmem:[#allocation4 + $0x34] ss:$12 sps:$4 sm:$0xff]   ;;  %v13850_v30 = vld [vmem:[#allocation4 + $0x30] ss:$12 sps:$4 sm:$0xff]  }
0x17b9   :  { %11509 = vrcp.f32 %v5809_v5  ;;  %v13852_v5 = vld [vmem:[#allocation4 + $0x1c] ss:$12 sps:$4 sm:$0xff]  }
0x17c4   :  { %v11508_v3 = vpop.eup %11507 }
0x17c5   :  { %v5812_v26 = vmul.f32 %v11508_v3, %v5793_v28  ;;  %v13856_v28 = vld [vmem:[#allocation4 + $0x18] ss:$12 sps:$4 sm:$0xff]  }
0x17c6   :  { %v11510_v35 = vpop.eup %11509  ;;  %v13858_v3 = vld [vmem:[#allocation4 + $0x4] ss:$12 sps:$4 sm:$0xff]  }
0x17c7   :  { %v5813_v56 = vadd.f32 %v5812_v26, %v5552_v11  ;;  %v5815_v17 = vsub.f32 1.0, %v11510_v35  ;;  %v5817_v37 = vmul.f32 %v11510_v35, %v13648_v34  ;;  %v11130_v34 = vld [vmem:[#allocation19 + $0x20] sm:$0xff]  }
0x17c8   :  { %v13862_v11 = vld [vmem:[#allocation4] ss:$12 sps:$4 sm:$0xff]  }
0x17c9   :  { %11511 = vtanh.f32 %v5813_v56 }
0x17d6   :  { %v11512_v45 = vpop.eup %11511 }
0x17d7   :  { %v5816_v61 = vmul.f32 %v11512_v45, %v5815_v17 }
0x17d9   :  { %v13799_v15 = vadd.f32 %v5817_v37, %v5816_v61 }
0x17db   :  { %v13803_v57 = vpack.c.bf16 %v13799_v15, %v13799_v15 }
0x17dd   :  { %10461 = vmatmul.mubr.bf16.vlgmr.msra.gmra.mxu0 %v13803_v57 }
0x17de   :  { %10471 = vmatpush3.bf16.msra.mxu0 %v11127_v31  ;;  %10486 = vmatprep.mubr.msk.bf16.mxu0 %vm11981_vm0, %v14447_v54 }
0x17df   :  { %10472 = vmatprep.subr.bf16.mxu0 %v14447_v54 }
0x17e2   :  { %10473 = vmatpush3.bf16.msra.mxu0 %v11128_v22 }
0x17e3   :  { %10474 = vmatprep.subr.bf16.mxu0 %v14447_v54 }
0x17e6   :  { %10475 = vmatpush3.bf16.msra.mxu0 %v11129_v16 }
0x17e7   :  { %10476 = vmatprep.subr.bf16.mxu0 %v14447_v54 }
0x17ea   :  { %10477 = vmatpush3.bf16.msra.mxu0 %v11130_v34 }
0x17eb   :  { %10478 = vmatprep.subr.bf16.mxu0 %v14447_v54 }
0x17ee   :  { %10479 = vmatpush3.bf16.msra.mxu0 %v11131_v48 }
0x17ef   :  { %10480 = vmatprep.subr.bf16.mxu0 %v14447_v54 }
0x17f2   :  { %10481 = vmatpush3.bf16.msra.mxu0 %v11132_v20 }
0x17f3   :  { %10482 = vmatprep.subr.bf16.mxu0 %v14447_v54 }
0x17f6   :  { %10483 = vmatpush3.bf16.msra.mxu0 %v11133_v0 }
0x17f7   :  { %10484 = vmatprep.subr.bf16.mxu0 %v14447_v54 }
0x17fa   :  { %10485 = vmatpush3.bf16.msra.mxu0 %v11134_v52 }
0x17fb   :  { %6326 = vmatprep.subr.bf16.mxu0 %v13815_v42 }
0x17fd   :  { %10487 = vmatmul.mubr.bf16.vlgmr.msra.gmra.mxu0 %v13803_v57 }
0x17fe   :  { %6327 = vmatpush1.bf16.msra.mxu0 %v13818_v59  ;;  %6358 = vmatprep.mubr.bf16.mxu0 %v14445_v29 }
0x17ff   :  { %6328 = vmatprep.subr.bf16.mxu0 %v13821_v36 }
0x1802   :  { %6329 = vmatpush1.bf16.msra.mxu0 %v13826_v2 }
0x1803   :  { %6330 = vmatprep.subr.bf16.mxu0 %v13828_v47 }
0x1806   :  { %6331 = vmatpush1.bf16.msra.mxu0 %v13832_v55 }
0x1807   :  { %6332 = vmatprep.subr.bf16.mxu0 %v13834_v50 }
0x180a   :  { %6333 = vmatpush1.bf16.msra.mxu0 %v13838_v8 }
0x180b   :  { %6334 = vmatprep.subr.bf16.mxu0 %v13840_v49 }
0x180e   :  { %6335 = vmatpush1.bf16.msra.mxu0 %v13844_v32 }
0x180f   :  { %6336 = vmatprep.subr.bf16.mxu0 %v13846_v60 }
0x1812   :  { %6337 = vmatpush1.bf16.msra.mxu0 %v13850_v30 }
0x1813   :  { %6338 = vmatprep.subr.bf16.mxu0 %v13852_v5 }
0x1816   :  { %6339 = vmatpush1.bf16.msra.mxu0 %v13856_v28 }
0x1817   :  { %6340 = vmatprep.subr.bf16.mxu0 %v13858_v3 }
0x181a   :  { %6341 = vmatpush1.bf16.msra.mxu0 %v13862_v11 }
0x181b   :  { %6567 = vmatprep.subr.bf16.mxu0 %v13711_v62 }
0x189d   :  { %v5855_v26 = vpop.f32.mrf.mxu0 }
0x189e   :  { %v5861_v56 = vsel %vm4156_vm3, %v5855_v26, -inf }
0x189f   :  { %5862 = vmax.xlane.f32.xlu0 %v5861_v56  ;;  %v10462_v35 = vpop.f32.mrf.mxu0  ;;  %v11159_v56 = vld [vmem:[#allocation22 + $0x38] sm:$0xff]  }
0x18a1   :  { %v5858_v17 = vpop.f32.mrf.mxu0 }
0x18a2   :  { %v11160_v17 = vld [vmem:[#allocation22 + $0x30] sm:$0xff]  }
0x18a3   :  { %v10463_v45 = vpop.f32.mrf.mxu0 }
0x18a4   :  { %v11162_v45 = vld [vmem:[#allocation22 + $0x20] sm:$0xff]  }
0x18bd   :  { %v6018_v61 = vpop.f32.mrf.mxu0 }
0x18bf   :  { %v10488_v37 = vpop.f32.mrf.mxu0 }
0x18c0   :  { %v11164_v37 = vld [vmem:[#allocation22 + $0x10] sm:$0xff]  }
0x18c1   :  { %v6021_v31 = vpop.f32.mrf.mxu0 }
0x18c2   :  { %v11165_v31 = vld [vmem:[#allocation22 + $0x8] sm:$0xff]  }
0x18c3   :  { %v10489_v22 = vpop.f32.mrf.mxu0 }
0x18c4   :  { %v11166_v22 = vld [vmem:[#allocation22] sm:$0xff]  }
0x1928   :  { %v5863_v16 = vpop.xlane.xlu0 %5862 }
0x1929   :  { %v5864_v34 = vsub.f32 %v5855_v26, %v5863_v16  ;;  %v11161_v26 = vld [vmem:[#allocation22 + $0x28] sm:$0xff]  }
0x192b   :  { %v5865_v48 = vmul.f32 1.442695, %v5864_v34 }
0x192d   :  { %11513 = vpow2.f32 %v5865_v48 }
0x193a   :  { %v11514_v20 = vpop.eup %11513 }
0x193b   :  { %v5867_v0 = vsel %vm4156_vm3, %v11514_v20, 0.0 }
0x193c   :  { %5868 = vadd.xlane.f32.xlu1 %v5867_v0 }
0x19c5   :  { %v5869_v62 = vpop.xlane.xlu1 %5868 }
0x19c6   :  { %11515 = vrcp.f32 %v5869_v62 }
0x19d3   :  { %v11516_v52 = vpop.eup %11515 }
0x19d4   :  { %v5871_v6 = vmul.f32 %v11516_v52, %v11514_v20  ;;  %v13882_v20 = vld [vmem:[%s14315_s16] sm:$0x1] }
0x19d6   :  { %v5888_v35 = vpack.c.bf16 %v5871_v6, %v5871_v6  ;;  %v11163_v6 = vld [vmem:[#allocation22 + $0x18] sm:$0xff]  }
0x19d8   :  { %10467 = vmatmul.mubr.msk.bf16.vlgmr.msra.gmra.mxu1 %vm4186_vm4, %v5888_v35 }
0x19d9   :  { %10491 = vmatpush3.bf16.msra.mxu1 %v11159_v56  ;;  %10506 = vmatprep.mubr.msk.bf16.mxu1 %vm11981_vm0, %v14447_v54 }
0x19da   :  { %10492 = vmatprep.subr.bf16.mxu1 %v14447_v54 }
0x19dd   :  { %10493 = vmatpush3.bf16.msra.mxu1 %v11160_v17  ;;  %v11167_v17 = vld [vmem:[#allocation4 + $0xb0] ss:$12 sps:$4 sm:$0xff]  }
0x19de   :  { %10494 = vmatprep.subr.bf16.mxu1 %v14447_v54 }
0x19e1   :  { %10495 = vmatpush3.bf16.msra.mxu1 %v11161_v26  ;;  %v11169_v26 = vld [vmem:[#allocation4 + $0x80] ss:$12 sps:$4 sm:$0xff]  }
0x19e2   :  { %10496 = vmatprep.subr.bf16.mxu1 %v14447_v54 }
0x19e5   :  { %10497 = vmatpush3.bf16.msra.mxu1 %v11162_v45  ;;  %v11170_v45 = vld [vmem:[#allocation4 + $0x68] ss:$12 sps:$4 sm:$0xff]  }
0x19e6   :  { %10498 = vmatprep.subr.bf16.mxu1 %v14447_v54 }
0x19e9   :  { %10499 = vmatpush3.bf16.msra.mxu1 %v11163_v6  ;;  %v11171_v6 = vld [vmem:[#allocation4 + $0x50] ss:$12 sps:$4 sm:$0xff]  }
0x19ea   :  { %10500 = vmatprep.subr.bf16.mxu1 %v14447_v54 }
0x19ed   :  { %10501 = vmatpush3.bf16.msra.mxu1 %v11164_v37  ;;  %v11172_v37 = vld [vmem:[#allocation4 + $0x38] ss:$12 sps:$4 sm:$0xff]  }
0x19ee   :  { %10502 = vmatprep.subr.bf16.mxu1 %v14447_v54 }
0x19f1   :  { %10503 = vmatpush3.bf16.msra.mxu1 %v11165_v31  ;;  %v11173_v31 = vld [vmem:[#allocation4 + $0x20] ss:$12 sps:$4 sm:$0xff]  }
0x19f2   :  { %10504 = vmatprep.subr.bf16.mxu1 %v14447_v54 }
0x19f5   :  { %10505 = vmatpush3.bf16.msra.mxu1 %v11166_v22  ;;  %v11174_v22 = vld [vmem:[#allocation4 + $0x8] ss:$12 sps:$4 sm:$0xff]  }
0x19f6   :  { %10510 = vmatprep.subr.bf16.mxu1 %v14447_v54 }
0x1a98   :  { %v5930_v16 = vpop.f32.mrf.mxu1 }
0x1a99   :  { %v6019_v34 = vadd.f32 %v6018_v61, %v5930_v16  ;;  %v11168_v61 = vld [vmem:[#allocation4 + $0x98] ss:$12 sps:$4 sm:$0xff]  }
0x1a9a   :  { %v10468_v48 = vpop.f32.mrf.mxu1 }
0x1a9b   :  { %v6024_v0 = vadd.f32 %v13882_v20, %v6019_v34  ;;  %v13898_v34 = vld [vmem:[%s14317_s18] sm:$0x1] }
0x1a9c   :  { %v5933_v62 = vpop.f32.mrf.mxu1 }
0x1a9d   :  { %11517 = vtanh.f32 %v6024_v0 }
0x1a9e   :  { %v10469_v52 = vpop.f32.mrf.mxu1 }
0x1aaa   :  { %v11518_v56 = vpop.eup %11517 }
0x1aab   :  { %v6026_v35 = vpack.c.bf16 %v11518_v56, %v11518_v56 }
0x1aad   :  { %10507 = vmatmul.mubr.bf16.vlgmr.msra.gmra.mxu1 %v6026_v35 }
0x1aae   :  { %10511 = vmatpush3.bf16.msra.mxu1 %v11167_v17  ;;  %10526 = vmatprep.mubr.msk.bf16.mxu1 %vm11981_vm0, %v14447_v54 }
0x1aaf   :  { %10512 = vmatprep.subr.bf16.mxu1 %v14447_v54 }
0x1ab2   :  { %10513 = vmatpush3.bf16.msra.mxu1 %v11168_v61 }
0x1ab3   :  { %10514 = vmatprep.subr.bf16.mxu1 %v14447_v54 }
0x1ab6   :  { %10515 = vmatpush3.bf16.msra.mxu1 %v11169_v26 }
0x1ab7   :  { %10516 = vmatprep.subr.bf16.mxu1 %v14447_v54 }
0x1aba   :  { %10517 = vmatpush3.bf16.msra.mxu1 %v11170_v45 }
0x1abb   :  { %10518 = vmatprep.subr.bf16.mxu1 %v14447_v54 }
0x1abe   :  { %10519 = vmatpush3.bf16.msra.mxu1 %v11171_v6 }
0x1abf   :  { %10520 = vmatprep.subr.bf16.mxu1 %v14447_v54 }
0x1ac2   :  { %10521 = vmatpush3.bf16.msra.mxu1 %v11172_v37 }
0x1ac3   :  { %10522 = vmatprep.subr.bf16.mxu1 %v14447_v54 }
0x1ac6   :  { %10523 = vmatpush3.bf16.msra.mxu1 %v11173_v31 }
0x1ac7   :  { %10524 = vmatprep.subr.bf16.mxu1 %v14447_v54 }
0x1aca   :  { %10525 = vmatpush3.bf16.msra.mxu1 %v11174_v22 }
0x1acb   :  { %10530 = vmatprep.subr.bf16.mxu1 %v14447_v54 }
0x1b6d   :  { %v6125_v16 = vpop.f32.mrf.mxu1 }
0x1b6e   :  { %v13901_v48 = vadd.f32 %v13898_v34, %v6125_v16 }
0x1b6f   :  { %v10508_v0 = vpop.f32.mrf.mxu1 }
0x1b70   :  { %v6131_v62 = vsel %vm3664_vm11, %v13901_v48, -inf }
0x1b71   :  { %6132 = vmax.xlane.f32.xlu0 %v6131_v62  ;;  %v6128_v52 = vpop.f32.mrf.mxu1 }
0x1b73   :  { %v10509_v56 = vpop.f32.mrf.mxu1 }
0x1bfa   :  { %v13905_v35 = vpop.xlane.xlu0 %6132 }
0x1bfb   :  { %vm6142_vm2 = vcmp.eq.f32.partialorder %v13901_v48, %v13905_v35 }
0x1bfc   :  { %v6143_v17 = vsel %vm6142_vm2, %v14519_v58, 128 }
0x1bfd   :  { %v6144_v61 = vsel %vm3664_vm11, %v6143_v17, 2147483647 }
0x1bfe   :  { %v6146_v26 = vshra.s32 %v6144_v61, 16  ;;  %v6145_v6 = vand.u32 65535, %v6144_v61  ;;  %v11176_v61 = vld [vmem:[#allocation18 + $0x98] ss:$12 sps:$4 sm:$0xff]  }
0x1c00   :  { %v6148_v45 = vcvt.s32.f32 %v6146_v26  ;;  %v6147_v31 = vcvt.s32.f32 %v6145_v6 }
0x1c02   :  { %6149 = vmin.xlane.f32.xlu1 %v6148_v45 }
0x1c8b   :  { %v6150_v37 = vpop.xlane.xlu1 %6149 }
0x1c8c   :  { %vm6151_vm5 = vcmp.eq.f32.partialorder %v6148_v45, %v6150_v37  ;;  %v6156_v16 = vcvt.f32.s32 %v6150_v37 }
0x1c8d   :  { %v6152_v22 = vsel %vm6151_vm5, %v6147_v31, inf }
0x1c8e   :  { %6153 = vmin.xlane.f32.xlu0 %v6152_v22  ;;  %v6157_v62 = vshll.u32 %v6156_v16, 16 }
0x1d17   :  { %v6154_v0 = vpop.xlane.xlu0 %6153 }
0x1d18   :  { %v6155_v52 = vcvt.f32.s32 %v6154_v0 }
0x1d1a   :  { %v6158_v56 = vadd.s32 %v6157_v62, %v6155_v52 }
0x1d1c   :  { %v13915_v17 = vsel %vm6159_vm6, %v6158_v56, %v13723_v40  ;;  %vm6162_vm7 = vcmp.eq.s32.totalorder %v14519_v58, %v6158_v56  ;;  %v11177_v40 = vld [vmem:[#allocation18 + $0x80] ss:$12 sps:$4 sm:$0xff]  }
0x1d1d   :  { %vm9172_vm8 = vmpackc.low %vm6162_vm7, %vm6162_vm7 }
0x1d1e   :  { %9173 = vmatmul.mubr.msk.bf16.vlgmr.msra.gmra.mxu0 %vm9172_vm8, %v14520_v19  ;;  %10527 = vmatmul.mubr.msk.bf16.vlgmr.msra.gmra.mxu1 %vm9172_vm8, %v14520_v19  ;;  %vm7859_vm8 = vcmp.eq.s32.totalorder %v14519_v58, 4 }
0x1d1f   :  { %6568 = vmatpush1.bf16.msra.mxu0 %v13719_v21  ;;  %10531 = vmatpush3.bf16.msra.mxu1 %v11175_v38  ;;  %v11178_v38 = vld [vmem:[#allocation18 + $0x68] ss:$12 sps:$4 sm:$0xff]   ;;  %v11179_v21 = vld [vmem:[#allocation18 + $0x50] ss:$12 sps:$4 sm:$0xff]  }
0x1d20   :  { %6569 = vmatprep.subr.bf16.mxu0 %v13726_v43  ;;  %10532 = vmatprep.subr.bf16.mxu1 %v14447_v54  ;;  %v11180_v43 = vld [vmem:[#allocation18 + $0x38] ss:$12 sps:$4 sm:$0xff]  }
0x1d21   :  { %6599 = vmatprep.mubr.bf16.mxu0 %v14445_v29  ;;  %10546 = vmatprep.mubr.msk.bf16.mxu1 %vm11981_vm0, %v14447_v54 }
0x1d23   :  { %6570 = vmatpush1.bf16.msra.mxu0 %v13731_v46  ;;  %10533 = vmatpush3.bf16.msra.mxu1 %v11176_v61  ;;  %v11181_v46 = vld [vmem:[#allocation18 + $0x20] ss:$12 sps:$4 sm:$0xff]  }
0x1d24   :  { %6571 = vmatprep.subr.bf16.mxu0 %v13735_v9  ;;  %10534 = vmatprep.subr.bf16.mxu1 %v14447_v54  ;;  %v11182_v9 = vld [vmem:[#allocation18 + $0x8] ss:$12 sps:$4 sm:$0xff]  }
0x1d27   :  { %6572 = vmatpush1.bf16.msra.mxu0 %v13741_v41  ;;  %10535 = vmatpush3.bf16.msra.mxu1 %v11177_v40  ;;  %v6739_v41 = vld [vmem:[#allocation3] sm:$0xf] }
0x1d28   :  { %6573 = vmatprep.subr.bf16.mxu0 %v13745_v53  ;;  %10536 = vmatprep.subr.bf16.mxu1 %v14447_v54  ;;  %v6670_v53 = vld [vmem:[#allocation2] sm:$0xf] }
0x1d2b   :  { %6574 = vmatpush1.bf16.msra.mxu0 %v13748_v25  ;;  %10537 = vmatpush3.bf16.msra.mxu1 %v11178_v38  ;;  %v6744_v25 = vsel %vm3670_vm14, %v6739_v41, 0 }
0x1d2c   :  { %6575 = vmatprep.subr.bf16.mxu0 %v13752_v27  ;;  %10538 = vmatprep.subr.bf16.mxu1 %v14447_v54 }
0x1d2f   :  { %6576 = vmatpush1.bf16.msra.mxu0 %v13755_v13  ;;  %10539 = vmatpush3.bf16.msra.mxu1 %v11179_v21 }
0x1d30   :  { %6577 = vmatprep.subr.bf16.mxu0 %v13759_v51  ;;  %10540 = vmatprep.subr.bf16.mxu1 %v14447_v54 }
0x1d33   :  { %6578 = vmatpush1.bf16.msra.mxu0 %v13762_v14  ;;  %10541 = vmatpush3.bf16.msra.mxu1 %v11180_v43 }
0x1d34   :  { %6579 = vmatprep.subr.bf16.mxu0 %v13766_v23  ;;  %10542 = vmatprep.subr.bf16.mxu1 %v14447_v54 }
0x1d37   :  { %6580 = vmatpush1.bf16.msra.mxu0 %v13769_v10  ;;  %10543 = vmatpush3.bf16.msra.mxu1 %v11181_v46 }
0x1d38   :  { %6581 = vmatprep.subr.bf16.mxu0 %v13773_v1  ;;  %10544 = vmatprep.subr.bf16.mxu1 %v14447_v54 }
0x1d3b   :  { %6582 = vmatpush1.bf16.msra.mxu0 %v13776_v7  ;;  %10545 = vmatpush3.bf16.msra.mxu1 %v11182_v9 }
0x1d3c   :  { %10550 = vmatprep.subr.bf16.mxu0 %v14447_v54  ;;  %10556 = vmatprep.subr.bf16.mxu1 %v14447_v54 }
0x1d3e   :  { %6600 = vmatmul.mubr.bf16.vlgmr.msra.gmra.mxu0 %v13803_v57  ;;  %10547 = vmatmul.mubr.bf16.vlgmr.msra.gmra.mxu1 %v13803_v57 }
0x1d3f   :  { %10551 = vmatpush3.bf16.xpose.msra.mxu0 %v6670_v53  ;;  %10557 = vmatpush3.bf16.msra.mxu1 %v6744_v25 }
0x1d40   :  { %10552 = vmatprep.mubr.msk.bf16.mxu0 %vm11981_vm0, %v14447_v54  ;;  %10562 = vmatprep.subr.bf16.mxu0 %v14447_v54 }
0x1d41   :  { %10558 = vmatprep.mubr.msk.bf16.mxu1 %vm11981_vm0, %v14447_v54  ;;  %10582 = vmatprep.subr.bf16.mxu1 %v14447_v54 }
0x1dde   :  { %v6360_v27 = vpop.f32.mrf.mxu0  ;;  %v6401_v13 = vpop.f32.mrf.mxu1 }
0x1ddf   :  { %v6361_v45 = vadd.f32 %v6360_v27, %v13459_v63  ;;  %v6402_v27 = vadd.f32 %v6401_v13, %v13474_v12  ;;  %v11184_v13 = vld [vmem:[#allocation19 + $0x30] sm:$0xff]  }
0x1de0   :  { %v6362_v51 = vpop.f32.mrf.mxu0  ;;  %v10528_v14 = vpop.f32.mrf.mxu1 }
0x1de1   :  { %v6363_v40 = vadd.f32 %v6362_v51, %v13467_v44 }
0x1de2   :  { %v6364_v23 = vpop.f32.mrf.mxu0  ;;  %v6404_v10 = vpop.f32.mrf.mxu1 }
0x1de4   :  { %v6365_v1 = vpop.f32.mrf.mxu0  ;;  %v10529_v7 = vpop.f32.mrf.mxu1 }
0x1dfe   :  { %v6601_v57 = vpop.f32.mrf.mxu0  ;;  %v6642_v26 = vpop.f32.mrf.mxu1 }
0x1dff   :  { %v6602_v6 = vadd.f32 %v6601_v57, %v13452_v33  ;;  %v6643_v53 = vadd.f32 %v6642_v26, %v13471_v18  ;;  %v11185_v26 = vld [vmem:[#allocation19 + $0x28] sm:$0xff]  }
0x1e00   :  { %v6603_v37 = vpop.f32.mrf.mxu0  ;;  %v10548_v31 = vpop.f32.mrf.mxu1 }
0x1e01   :  { %v6648_v22 = vadd.f32 %v6602_v6, %v6361_v45  ;;  %v6604_v52 = vadd.f32 %v6603_v37, %v13463_v39  ;;  %v11183_v6 = vld [vmem:[#allocation19 + $0x38] sm:$0xff]  }
0x1e02   :  { %v6605_v16 = vpop.f32.mrf.mxu0  ;;  %v6645_v0 = vpop.f32.mrf.mxu1  ;;  %v11187_v31 = vld [vmem:[#allocation19 + $0x18] sm:$0xff]  }
0x1e03   :  { %v9200_v62 = vmul.f32 -1.442695, %v6648_v22  ;;  %v6655_v38 = vadd.f32 %v6604_v52, %v6363_v40  ;;  %v11188_v22 = vld [vmem:[#allocation19 + $0x10] sm:$0xff]   ;;  %v11189_v16 = vld [vmem:[#allocation19 + $0x8] sm:$0xff]   ;;  %v11190_v0 = vld [vmem:[#allocation19] sm:$0xff]  }
0x1e04   :  { %v6606_v56 = vpop.f32.mrf.mxu0  ;;  %v10549_v61 = vpop.f32.mrf.mxu1  ;;  %v11191_v52 = vld [vmem:[#allocation22 + $0x38] sm:$0xff]   ;;  %v11193_v40 = vld [vmem:[#allocation22 + $0x28] sm:$0xff]  }
0x1e05   :  { %11519 = vpow2.f32 %v9200_v62  ;;  %v9201_v21 = vmul.f32 -1.442695, %v6655_v38  ;;  %v11192_v61 = vld [vmem:[#allocation22 + $0x30] sm:$0xff]   ;;  %v11194_v38 = vld [vmem:[#allocation22 + $0x20] sm:$0xff]  }
0x1e07   :  { %11521 = vpow2.f32 %v9201_v21  ;;  %v11195_v21 = vld [vmem:[#allocation22 + $0x18] sm:$0xff]  }
0x1e12   :  { %v11520_v43 = vpop.eup %11519 }
0x1e13   :  { %v6652_v46 = vadd.f32 1.0, %v11520_v43  ;;  %v11196_v43 = vld [vmem:[#allocation22 + $0x10] sm:$0xff]  }
0x1e14   :  { %v11522_v9 = vpop.eup %11521 }
0x1e15   :  { %11523 = vrcp.f32 %v6652_v46  ;;  %v6659_v41 = vadd.f32 1.0, %v11522_v9  ;;  %v11197_v46 = vld [vmem:[#allocation22 + $0x8] sm:$0xff]   ;;  %v11198_v9 = vld [vmem:[#allocation22] sm:$0xff]  }
0x1e17   :  { %11525 = vrcp.f32 %v6659_v41 }
0x1e22   :  { %v11524_v25 = vpop.eup %11523 }
0x1e23   :  { %v6662_v14 = vmul.f32 %v11524_v25, %v6643_v53 }
0x1e24   :  { %v11526_v10 = vpop.eup %11525 }
0x1e25   :  { %v6663_v23 = vadd.f32 %v6662_v14, %v6402_v27  ;;  %v6665_v51 = vsub.f32 1.0, %v11526_v10  ;;  %v6667_v57 = vmul.f32 %v11526_v10, %v13799_v15  ;;  %v11186_v15 = vld [vmem:[#allocation19 + $0x20] sm:$0xff]  }
0x1e27   :  { %11527 = vtanh.f32 %v6663_v23 }
0x1e34   :  { %v11528_v1 = vpop.eup %11527 }
0x1e35   :  { %v6666_v7 = vmul.f32 %v11528_v1, %v6665_v51  ;;  %v11199_v1 = vld [vmem:[#allocation4 + $0xb0] ss:$12 sps:$4 sm:$0xff]  }
0x1e37   :  { %v13963_v45 = vadd.f32 %v6667_v57, %v6666_v7  ;;  %v11200_v7 = vld [vmem:[#allocation4 + $0x98] ss:$12 sps:$4 sm:$0xff]   ;;  %v11201_v57 = vld [vmem:[#allocation4 + $0x80] ss:$12 sps:$4 sm:$0xff]  }
0x1e39   :  { %v13967_v37 = vpack.c.bf16 %v13963_v45, %v13963_v45 }
0x1e3b   :  { %10553 = vmatmul.mubr.bf16.vlgmr.msra.gmra.mxu0 %v13967_v37 }
0x1e3c   :  { %10563 = vmatpush3.bf16.msra.mxu0 %v11183_v6  ;;  %10578 = vmatprep.mubr.msk.bf16.mxu0 %vm11981_vm0, %v14447_v54  ;;  %v11203_v6 = vld [vmem:[#allocation4 + $0x50] ss:$12 sps:$4 sm:$0xff]  }
0x1e3d   :  { %10564 = vmatprep.subr.bf16.mxu0 %v14447_v54 }
0x1e40   :  { %10565 = vmatpush3.bf16.msra.mxu0 %v11184_v13  ;;  %v11204_v13 = vld [vmem:[#allocation4 + $0x38] ss:$12 sps:$4 sm:$0xff]  }
0x1e41   :  { %10566 = vmatprep.subr.bf16.mxu0 %v14447_v54 }
0x1e44   :  { %10567 = vmatpush3.bf16.msra.mxu0 %v11185_v26  ;;  %v11205_v26 = vld [vmem:[#allocation4 + $0x20] ss:$12 sps:$4 sm:$0xff]  }
0x1e45   :  { %10568 = vmatprep.subr.bf16.mxu0 %v14447_v54 }
0x1e48   :  { %10569 = vmatpush3.bf16.msra.mxu0 %v11186_v15  ;;  %v11206_v15 = vld [vmem:[#allocation4 + $0x8] ss:$12 sps:$4 sm:$0xff]  }
0x1e49   :  { %10570 = vmatprep.subr.bf16.mxu0 %v14447_v54 }
0x1e4c   :  { %10571 = vmatpush3.bf16.msra.mxu0 %v11187_v31 }
0x1e4d   :  { %10572 = vmatprep.subr.bf16.mxu0 %v14447_v54 }
0x1e50   :  { %10573 = vmatpush3.bf16.msra.mxu0 %v11188_v22 }
0x1e51   :  { %10574 = vmatprep.subr.bf16.mxu0 %v14447_v54 }
0x1e54   :  { %10575 = vmatpush3.bf16.msra.mxu0 %v11189_v16 }
0x1e55   :  { %10576 = vmatprep.subr.bf16.mxu0 %v14447_v54 }
0x1e58   :  { %10577 = vmatpush3.bf16.msra.mxu0 %v11190_v0 }
0x1e59   :  { %7176 = vmatprep.subr.bf16.mxu0 %v13815_v42 }
0x1e5b   :  { %10579 = vmatmul.mubr.bf16.vlgmr.msra.gmra.mxu0 %v13967_v37 }
0x1e5c   :  { %7177 = vmatpush1.bf16.msra.mxu0 %v13818_v59  ;;  %7208 = vmatprep.mubr.bf16.mxu0 %v14445_v29 }
0x1e5d   :  { %7178 = vmatprep.subr.bf16.mxu0 %v13821_v36 }
0x1e60   :  { %7179 = vmatpush1.bf16.msra.mxu0 %v13826_v2 }
0x1e61   :  { %7180 = vmatprep.subr.bf16.mxu0 %v13828_v47 }
0x1e64   :  { %7181 = vmatpush1.bf16.msra.mxu0 %v13832_v55 }
0x1e65   :  { %7182 = vmatprep.subr.bf16.mxu0 %v13834_v50 }
0x1e68   :  { %7183 = vmatpush1.bf16.msra.mxu0 %v13838_v8 }
0x1e69   :  { %7184 = vmatprep.subr.bf16.mxu0 %v13840_v49 }
0x1e6c   :  { %7185 = vmatpush1.bf16.msra.mxu0 %v13844_v32 }
0x1e6d   :  { %7186 = vmatprep.subr.bf16.mxu0 %v13846_v60 }
0x1e70   :  { %7187 = vmatpush1.bf16.msra.mxu0 %v13850_v30 }
0x1e71   :  { %7188 = vmatprep.subr.bf16.mxu0 %v13852_v5 }
0x1e74   :  { %7189 = vmatpush1.bf16.msra.mxu0 %v13856_v28 }
0x1e75   :  { %7190 = vmatprep.subr.bf16.mxu0 %v13858_v3 }
0x1e78   :  { %7191 = vmatpush1.bf16.msra.mxu0 %v13862_v11 }
0x1efb   :  { %v6705_v42 = vpop.f32.mrf.mxu0 }
0x1efc   :  { %v6711_v59 = vsel %vm4156_vm3, %v6705_v42, -inf }
0x1efd   :  { %6712 = vmax.xlane.f32.xlu1 %v6711_v59  ;;  %v10554_v36 = vpop.f32.mrf.mxu0 }
0x1eff   :  { %v6708_v2 = vpop.f32.mrf.mxu0 }
0x1f01   :  { %v10555_v47 = vpop.f32.mrf.mxu0 }
0x1f1b   :  { %v6868_v55 = vpop.f32.mrf.mxu0 }
0x1f1d   :  { %v10580_v50 = vpop.f32.mrf.mxu0 }
0x1f1f   :  { %v6871_v8 = vpop.f32.mrf.mxu0 }
0x1f21   :  { %v10581_v49 = vpop.f32.mrf.mxu0 }
0x1f86   :  { %v6713_v32 = vpop.xlane.xlu1 %6712 }
0x1f87   :  { %v6714_v60 = vsub.f32 %v6705_v42, %v6713_v32 }
0x1f89   :  { %v6715_v30 = vmul.f32 1.442695, %v6714_v60  ;;  %v14032_v60 = vld [vmem:[#allocation18 + $0xac] ss:$12 sps:$4 sm:$0xff]  }
0x1f8a   :  { %7417 = vmatprep.subr.bf16.mxu0 %v14032_v60 }
0x1f8b   :  { %11529 = vpow2.f32 %v6715_v30 }
0x1f98   :  { %v11530_v5 = vpop.eup %11529 }
0x1f99   :  { %v6717_v28 = vsel %vm4156_vm3, %v11530_v5, 0.0 }
0x1f9a   :  { %6718 = vadd.xlane.f32.xlu0 %v6717_v28 }
0x2023   :  { %v6719_v3 = vpop.xlane.xlu0 %6718 }
0x2024   :  { %11531 = vrcp.f32 %v6719_v3 }
0x2031   :  { %v11532_v11 = vpop.eup %11531 }
0x2032   :  { %v6721_v62 = vmul.f32 %v11532_v11, %v11530_v5 }
0x2034   :  { %v6738_v56 = vpack.c.bf16 %v6721_v62, %v6721_v62  ;;  %v14036_v62 = vld [vmem:[#allocation18 + $0xa8] ss:$12 sps:$4 sm:$0xff]  }
0x2036   :  { %10559 = vmatmul.mubr.msk.bf16.vlgmr.msra.gmra.mxu1 %vm4186_vm4, %v6738_v56  ;;  %v14039_v56 = vld [vmem:[#allocation18 + $0x94] ss:$12 sps:$4 sm:$0xff]  }
0x2037   :  { %10583 = vmatpush3.bf16.msra.mxu1 %v11191_v52  ;;  %10598 = vmatprep.mubr.msk.bf16.mxu1 %vm11981_vm0, %v14447_v54  ;;  %v11210_v52 = vld [vmem:[#allocation18 + $0xb0] ss:$12 sps:$4 sm:$0xff]  }
0x2038   :  { %10584 = vmatprep.subr.bf16.mxu1 %v14447_v54 }
0x203b   :  { %10585 = vmatpush3.bf16.msra.mxu1 %v11192_v61 }
0x203c   :  { %10586 = vmatprep.subr.bf16.mxu1 %v14447_v54 }
0x203f   :  { %10587 = vmatpush3.bf16.msra.mxu1 %v11193_v40  ;;  %v14049_v40 = vld [vmem:[#allocation18 + $0x90] ss:$12 sps:$4 sm:$0xff]  }
0x2040   :  { %10588 = vmatprep.subr.bf16.mxu1 %v14447_v54 }
0x2043   :  { %10589 = vmatpush3.bf16.msra.mxu1 %v11194_v38  ;;  %v11214_v38 = vld [vmem:[#allocation18 + $0x98] ss:$12 sps:$4 sm:$0xff]  }
0x2044   :  { %10590 = vmatprep.subr.bf16.mxu1 %v14447_v54 }
0x2047   :  { %10591 = vmatpush3.bf16.msra.mxu1 %v11195_v21  ;;  %v14053_v21 = vld [vmem:[#allocation18 + $0x7c] ss:$12 sps:$4 sm:$0xff]  }
0x2048   :  { %10592 = vmatprep.subr.bf16.mxu1 %v14447_v54 }
0x204b   :  { %10593 = vmatpush3.bf16.msra.mxu1 %v11196_v43  ;;  %v11218_v43 = vld [vmem:[#allocation18 + $0x80] ss:$12 sps:$4 sm:$0xff]  }
0x204c   :  { %10594 = vmatprep.subr.bf16.mxu1 %v14447_v54 }
0x204f   :  { %10595 = vmatpush3.bf16.msra.mxu1 %v11197_v46  ;;  %v14063_v46 = vld [vmem:[#allocation18 + $0x64] ss:$12 sps:$4 sm:$0xff]  }
0x2050   :  { %10596 = vmatprep.subr.bf16.mxu1 %v14447_v54 }
0x2053   :  { %10597 = vmatpush3.bf16.msra.mxu1 %v11198_v9  ;;  %v14066_v9 = vld [vmem:[#allocation18 + $0x60] ss:$12 sps:$4 sm:$0xff]  }
0x2054   :  { %10602 = vmatprep.subr.bf16.mxu1 %v14447_v54 }
0x20f6   :  { %v6780_v41 = vpop.f32.mrf.mxu1 }
0x20f7   :  { %v6869_v53 = vadd.f32 %v6868_v55, %v6780_v41  ;;  %v11222_v41 = vld [vmem:[#allocation18 + $0x68] ss:$12 sps:$4 sm:$0xff]  }
0x20f8   :  { %v10560_v25 = vpop.f32.mrf.mxu1 }
0x20f9   :  { %v6874_v27 = vadd.f32 %v13882_v20, %v6869_v53  ;;  %v11202_v20 = vld [vmem:[#allocation4 + $0x68] ss:$12 sps:$4 sm:$0xff]   ;;  %v14070_v53 = vld [vmem:[#allocation18 + $0x4c] ss:$12 sps:$4 sm:$0xff]  }
0x20fa   :  { %v6783_v14 = vpop.f32.mrf.mxu1  ;;  %v14073_v25 = vld [vmem:[#allocation18 + $0x48] ss:$12 sps:$4 sm:$0xff]  }
0x20fb   :  { %11533 = vtanh.f32 %v6874_v27  ;;  %v11226_v27 = vld [vmem:[#allocation18 + $0x50] ss:$12 sps:$4 sm:$0xff]   ;;  %v14077_v14 = vld [vmem:[#allocation18 + $0x34] ss:$12 sps:$4 sm:$0xff]  }
0x20fc   :  { %v10561_v23 = vpop.f32.mrf.mxu1 }
0x20fd   :  { %v14080_v23 = vld [vmem:[#allocation18 + $0x30] ss:$12 sps:$4 sm:$0xff]  }
0x2108   :  { %v11534_v10 = vpop.eup %11533 }
0x2109   :  { %v6876_v51 = vpack.c.bf16 %v11534_v10, %v11534_v10  ;;  %v11230_v10 = vld [vmem:[#allocation18 + $0x38] ss:$12 sps:$4 sm:$0xff]  }
0x210b   :  { %10599 = vmatmul.mubr.bf16.vlgmr.msra.gmra.mxu1 %v6876_v51  ;;  %v14084_v51 = vld [vmem:[#allocation18 + $0x1c] ss:$12 sps:$4 sm:$0xff]  }
0x210c   :  { %10603 = vmatpush3.bf16.msra.mxu1 %v11199_v1  ;;  %10618 = vmatprep.mubr.msk.bf16.mxu1 %vm11981_vm0, %v14447_v54  ;;  %v14087_v1 = vld [vmem:[#allocation18 + $0x18] ss:$12 sps:$4 sm:$0xff]  }
0x210d   :  { %10604 = vmatprep.subr.bf16.mxu1 %v14447_v54 }
0x2110   :  { %10605 = vmatpush3.bf16.msra.mxu1 %v11200_v7  ;;  %v11234_v7 = vld [vmem:[#allocation18 + $0x20] ss:$12 sps:$4 sm:$0xff]  }
0x2111   :  { %10606 = vmatprep.subr.bf16.mxu1 %v14447_v54 }
0x2114   :  { %10607 = vmatpush3.bf16.msra.mxu1 %v11201_v57  ;;  %v14091_v57 = vld [vmem:[#allocation18 + $0x4] ss:$12 sps:$4 sm:$0xff]  }
0x2115   :  { %10608 = vmatprep.subr.bf16.mxu1 %v14447_v54 }
0x2118   :  { %10609 = vmatpush3.bf16.msra.mxu1 %v11202_v20  ;;  %v14094_v20 = vld [vmem:[#allocation18] ss:$12 sps:$4 sm:$0xff]  }
0x2119   :  { %10610 = vmatprep.subr.bf16.mxu1 %v14447_v54 }
0x211c   :  { %10611 = vmatpush3.bf16.msra.mxu1 %v11203_v6  ;;  %v11238_v6 = vld [vmem:[#allocation18 + $0x8] ss:$12 sps:$4 sm:$0xff]  }
0x211d   :  { %10612 = vmatprep.subr.bf16.mxu1 %v14447_v54 }
0x2120   :  { %10613 = vmatpush3.bf16.msra.mxu1 %v11204_v13  ;;  %v7589_v13 = vld [vmem:[#allocation3] sm:$0xf] }
0x2121   :  { %10614 = vmatprep.subr.bf16.mxu1 %v14447_v54 }
0x2124   :  { %10615 = vmatpush3.bf16.msra.mxu1 %v11205_v26  ;;  %v7520_v26 = vld [vmem:[#allocation2] sm:$0xf] }
0x2125   :  { %10616 = vmatprep.subr.bf16.mxu1 %v14447_v54 }
0x2128   :  { %10617 = vmatpush3.bf16.msra.mxu1 %v11206_v15  ;;  %v7594_v15 = vsel %vm3670_vm14, %v7589_v13, 0 }
0x2129   :  { %10622 = vmatprep.subr.bf16.mxu1 %v14447_v54 }
0x21cb   :  { %v6975_v31 = vpop.f32.mrf.mxu1 }
0x21cc   :  { %v14022_v22 = vadd.f32 %v13898_v34, %v6975_v31 }
0x21cd   :  { %v10600_v16 = vpop.f32.mrf.mxu1 }
0x21ce   :  { %v6981_v0 = vsel %vm3664_vm11, %v14022_v22, -inf }
0x21cf   :  { %6982 = vmax.xlane.f32.xlu1 %v6981_v0  ;;  %v6978_v42 = vpop.f32.mrf.mxu1 }
0x21d1   :  { %v10601_v59 = vpop.f32.mrf.mxu1 }
0x2258   :  { %v14026_v36 = vpop.xlane.xlu1 %6982 }
0x2259   :  { %vm6992_vm9 = vcmp.eq.f32.partialorder %v14022_v22, %v14026_v36 }
0x225a   :  { %v6993_v2 = vsel %vm6992_vm9, %v14519_v58, 128 }
0x225b   :  { %v6994_v47 = vsel %vm3664_vm11, %v6993_v2, 2147483647 }
0x225c   :  { %v6996_v55 = vshra.s32 %v6994_v47, 16  ;;  %v6995_v34 = vand.u32 65535, %v6994_v47 }
0x225e   :  { %v6998_v50 = vcvt.s32.f32 %v6996_v55  ;;  %v6997_v49 = vcvt.s32.f32 %v6995_v34 }
0x2260   :  { %6999 = vmin.xlane.f32.xlu0 %v6998_v50 }
0x22e9   :  { %v7000_v8 = vpop.xlane.xlu0 %6999 }
0x22ea   :  { %vm7001_vm10 = vcmp.eq.f32.partialorder %v6998_v50, %v7000_v8  ;;  %v7006_v30 = vcvt.f32.s32 %v7000_v8 }
0x22eb   :  { %v7002_v32 = vsel %vm7001_vm10, %v6997_v49, inf }
0x22ec   :  { %7003 = vmin.xlane.f32.xlu1 %v7002_v32  ;;  %v7007_v28 = vshll.u32 %v7006_v30, 16 }
0x2375   :  { %v7004_v5 = vpop.xlane.xlu1 %7003 }
0x2376   :  { %v7005_v3 = vcvt.f32.s32 %v7004_v5 }
0x2378   :  { %v7008_v11 = vadd.s32 %v7007_v28, %v7005_v3 }
0x237a   :  { %vm7012_vm1 = vcmp.eq.s32.totalorder %v14519_v58, %v7008_v11  ;;  %v14044_v61 = vsel %vm7009_vm15, %v7008_v11, %v13915_v17  ;;  %v14059_v17 = vld [vmem:[#allocation18 + $0x78] ss:$12 sps:$4 sm:$0xff]  }
0x237b   :  { %vm9244_vm2 = vmpackc.low %vm7012_vm1, %vm7012_vm1 }
0x237c   :  { %9245 = vmatmul.mubr.msk.bf16.vlgmr.msra.gmra.mxu0 %vm9244_vm2, %v14520_v19  ;;  %10619 = vmatmul.mubr.msk.bf16.vlgmr.msra.gmra.mxu1 %vm9244_vm2, %v14520_v19 }
0x237d   :  { %7418 = vmatpush1.bf16.msra.mxu0 %v14036_v62  ;;  %10623 = vmatpush3.bf16.msra.mxu1 %v11210_v52 }
0x237e   :  { %7419 = vmatprep.subr.bf16.mxu0 %v14039_v56  ;;  %10624 = vmatprep.subr.bf16.mxu1 %v14447_v54 }
0x237f   :  { %7449 = vmatprep.mubr.bf16.mxu0 %v14445_v29  ;;  %10638 = vmatprep.mubr.msk.bf16.mxu1 %vm11981_vm0, %v14447_v54 }
0x2381   :  { %7420 = vmatpush1.bf16.msra.mxu0 %v14049_v40  ;;  %10625 = vmatpush3.bf16.msra.mxu1 %v11214_v38 }
0x2382   :  { %7421 = vmatprep.subr.bf16.mxu0 %v14053_v21  ;;  %10626 = vmatprep.subr.bf16.mxu1 %v14447_v54 }
0x2385   :  { %7422 = vmatpush1.bf16.msra.mxu0 %v14059_v17  ;;  %10627 = vmatpush3.bf16.msra.mxu1 %v11218_v43 }
0x2386   :  { %7423 = vmatprep.subr.bf16.mxu0 %v14063_v46  ;;  %10628 = vmatprep.subr.bf16.mxu1 %v14447_v54 }
0x2389   :  { %7424 = vmatpush1.bf16.msra.mxu0 %v14066_v9  ;;  %10629 = vmatpush3.bf16.msra.mxu1 %v11222_v41 }
0x238a   :  { %7425 = vmatprep.subr.bf16.mxu0 %v14070_v53  ;;  %10630 = vmatprep.subr.bf16.mxu1 %v14447_v54 }
0x238d   :  { %7426 = vmatpush1.bf16.msra.mxu0 %v14073_v25  ;;  %10631 = vmatpush3.bf16.msra.mxu1 %v11226_v27 }
0x238e   :  { %7427 = vmatprep.subr.bf16.mxu0 %v14077_v14  ;;  %10632 = vmatprep.subr.bf16.mxu1 %v14447_v54 }
0x2391   :  { %7428 = vmatpush1.bf16.msra.mxu0 %v14080_v23  ;;  %10633 = vmatpush3.bf16.msra.mxu1 %v11230_v10 }
0x2392   :  { %7429 = vmatprep.subr.bf16.mxu0 %v14084_v51  ;;  %10634 = vmatprep.subr.bf16.mxu1 %v14447_v54 }
0x2395   :  { %7430 = vmatpush1.bf16.msra.mxu0 %v14087_v1  ;;  %10635 = vmatpush3.bf16.msra.mxu1 %v11234_v7 }
0x2396   :  { %7431 = vmatprep.subr.bf16.mxu0 %v14091_v57  ;;  %10636 = vmatprep.subr.bf16.mxu1 %v14447_v54 }
0x2399   :  { %7432 = vmatpush1.bf16.msra.mxu0 %v14094_v20  ;;  %10637 = vmatpush3.bf16.msra.mxu1 %v11238_v6 }
0x239a   :  { %10642 = vmatprep.subr.bf16.mxu0 %v14447_v54  ;;  %10648 = vmatprep.subr.bf16.mxu1 %v14447_v54 }
0x239c   :  { %7450 = vmatmul.mubr.bf16.vlgmr.msra.gmra.mxu0 %v13967_v37  ;;  %10639 = vmatmul.mubr.bf16.vlgmr.msra.gmra.mxu1 %v13967_v37 }
0x239d   :  { %10643 = vmatpush3.bf16.xpose.msra.mxu0 %v7520_v26  ;;  %10649 = vmatpush3.bf16.msra.mxu1 %v7594_v15 }
0x239e   :  { %10644 = vmatprep.mubr.msk.bf16.mxu0 %vm11981_vm0, %v14447_v54  ;;  %10654 = vmatprep.subr.bf16.mxu0 %v14447_v54 }
0x239f   :  { %10650 = vmatprep.mubr.msk.bf16.mxu1 %vm11981_vm0, %v14447_v54  ;;  %10674 = vmatprep.subr.bf16.mxu1 %v14447_v54 }
0x243c   :  { %v7210_v31 = vpop.f32.mrf.mxu0  ;;  %v7251_v16 = vpop.f32.mrf.mxu1 }
0x243d   :  { %v7211_v34 = vadd.f32 %v7210_v31, %v13459_v63  ;;  %v7252_v31 = vadd.f32 %v7251_v16, %v13474_v12  ;;  %v11240_v16 = vld [vmem:[#allocation19 + $0x30] sm:$0xff]  }
0x243e   :  { %v7212_v0 = vpop.f32.mrf.mxu0  ;;  %v10620_v42 = vpop.f32.mrf.mxu1 }
0x243f   :  { %v7213_v43 = vadd.f32 %v7212_v0, %v13467_v44 }
0x2440   :  { %v7214_v37 = vpop.f32.mrf.mxu0  ;;  %v7254_v59 = vpop.f32.mrf.mxu1 }
0x2442   :  { %v7215_v2 = vpop.f32.mrf.mxu0  ;;  %v10621_v47 = vpop.f32.mrf.mxu1 }
0x245c   :  { %v7451_v55 = vpop.f32.mrf.mxu0  ;;  %v7492_v50 = vpop.f32.mrf.mxu1 }
0x245d   :  { %v7452_v8 = vadd.f32 %v7451_v55, %v13452_v33  ;;  %v7493_v26 = vadd.f32 %v7492_v50, %v13471_v18  ;;  %v11241_v50 = vld [vmem:[#allocation19 + $0x28] sm:$0xff]  }
0x245e   :  { %v7453_v49 = vpop.f32.mrf.mxu0  ;;  %v10640_v32 = vpop.f32.mrf.mxu1 }
0x245f   :  { %v7498_v30 = vadd.f32 %v7452_v8, %v7211_v34  ;;  %v7454_v11 = vadd.f32 %v7453_v49, %v13463_v39  ;;  %v11239_v8 = vld [vmem:[#allocation19 + $0x38] sm:$0xff]  }
0x2460   :  { %v7455_v5 = vpop.f32.mrf.mxu0  ;;  %v7495_v28 = vpop.f32.mrf.mxu1  ;;  %v11243_v32 = vld [vmem:[#allocation19 + $0x18] sm:$0xff]  }
0x2461   :  { %v9272_v3 = vmul.f32 -1.442695, %v7498_v30  ;;  %v7505_v41 = vadd.f32 %v7454_v11, %v7213_v43  ;;  %v11244_v30 = vld [vmem:[#allocation19 + $0x10] sm:$0xff]   ;;  %v11245_v5 = vld [vmem:[#allocation19 + $0x8] sm:$0xff]   ;;  %v11246_v28 = vld [vmem:[#allocation19] sm:$0xff]  }
0x2462   :  { %v7456_v52 = vpop.f32.mrf.mxu0  ;;  %v10641_v38 = vpop.f32.mrf.mxu1  ;;  %v11247_v11 = vld [vmem:[#allocation4 + $0xa8] ss:$12 sps:$4 sm:$0xff]  }
0x2463   :  { %11535 = vpow2.f32 %v9272_v3  ;;  %v9273_v27 = vmul.f32 -1.442695, %v7505_v41  ;;  %v11249_v3 = vld [vmem:[#allocation4 + $0xac] ss:$12 sps:$4 sm:$0xff]   ;;  %v11252_v52 = vld [vmem:[#allocation4 + $0x94] ss:$12 sps:$4 sm:$0xff]  }
0x2464   :  { %v11250_v38 = vld [vmem:[#allocation4 + $0x90] ss:$12 sps:$4 sm:$0xff]   ;;  %v11253_v41 = vld [vmem:[#allocation4 + $0x78] ss:$12 sps:$4 sm:$0xff]  }
0x2465   :  { %11537 = vpow2.f32 %v9273_v27  ;;  %v11255_v43 = vld [vmem:[#allocation4 + $0x7c] ss:$12 sps:$4 sm:$0xff]   ;;  %v11258_v27 = vld [vmem:[#allocation4 + $0x64] ss:$12 sps:$4 sm:$0xff]  }
0x2470   :  { %v11536_v10 = vpop.eup %11535 }
0x2471   :  { %v7502_v7 = vadd.f32 1.0, %v11536_v10  ;;  %v11256_v10 = vld [vmem:[#allocation4 + $0x60] ss:$12 sps:$4 sm:$0xff]  }
0x2472   :  { %v11538_v6 = vpop.eup %11537 }
0x2473   :  { %11539 = vrcp.f32 %v7502_v7  ;;  %v7509_v13 = vadd.f32 1.0, %v11538_v6  ;;  %v11261_v7 = vld [vmem:[#allocation4 + $0x4c] ss:$12 sps:$4 sm:$0xff]   ;;  %v11259_v6 = vld [vmem:[#allocation4 + $0x48] ss:$12 sps:$4 sm:$0xff]  }
0x2475   :  { %11541 = vrcp.f32 %v7509_v13  ;;  %v11264_v13 = vld [vmem:[#allocation4 + $0x34] ss:$12 sps:$4 sm:$0xff]  }
0x2480   :  { %v11540_v15 = vpop.eup %11539 }
0x2481   :  { %v7512_v42 = vmul.f32 %v11540_v15, %v7493_v26  ;;  %v11262_v26 = vld [vmem:[#allocation4 + $0x30] ss:$12 sps:$4 sm:$0xff]  }
0x2482   :  { %v11542_v59 = vpop.eup %11541  ;;  %v11267_v15 = vld [vmem:[#allocation4 + $0x1c] ss:$12 sps:$4 sm:$0xff]  }
0x2483   :  { %v7513_v37 = vadd.f32 %v7512_v42, %v7252_v31  ;;  %v7515_v0 = vsub.f32 1.0, %v11542_v59  ;;  %v7517_v55 = vmul.f32 %v11542_v59, %v13963_v45  ;;  %v11242_v45 = vld [vmem:[#allocation19 + $0x20] sm:$0xff]  }
0x2484   :  { %v11265_v31 = vld [vmem:[#allocation4 + $0x18] ss:$12 sps:$4 sm:$0xff]  }
0x2485   :  { %11543 = vtanh.f32 %v7513_v37  ;;  %v11270_v42 = vld [vmem:[#allocation4 + $0x4] ss:$12 sps:$4 sm:$0xff]   ;;  %v11268_v37 = vld [vmem:[#allocation4] ss:$12 sps:$4 sm:$0xff]  }
0x2492   :  { %v11544_v2 = vpop.eup %11543 }
0x2493   :  { %v7516_v47 = vmul.f32 %v11544_v2, %v7515_v0 }
0x2495   :  { %v14117_v34 = vadd.f32 %v7517_v55, %v7516_v47 }
0x2497   :  { %v14121_v49 = vpack.c.bf16 %v14117_v34, %v14117_v34 }
0x2499   :  { %10645 = vmatmul.mubr.bf16.vlgmr.msra.gmra.mxu0 %v14121_v49 }
0x249a   :  { %10655 = vmatpush3.bf16.msra.mxu0 %v11239_v8  ;;  %10670 = vmatprep.mubr.msk.bf16.mxu0 %vm11981_vm0, %v14447_v54 }
0x249b   :  { %10656 = vmatprep.subr.bf16.mxu0 %v14447_v54 }
0x249e   :  { %10657 = vmatpush3.bf16.msra.mxu0 %v11240_v16 }
0x249f   :  { %10658 = vmatprep.subr.bf16.mxu0 %v14447_v54 }
0x24a2   :  { %10659 = vmatpush3.bf16.msra.mxu0 %v11241_v50 }
0x24a3   :  { %10660 = vmatprep.subr.bf16.mxu0 %v14447_v54 }
0x24a6   :  { %10661 = vmatpush3.bf16.msra.mxu0 %v11242_v45 }
0x24a7   :  { %10662 = vmatprep.subr.bf16.mxu0 %v14447_v54 }
0x24aa   :  { %10663 = vmatpush3.bf16.msra.mxu0 %v11243_v32 }
0x24ab   :  { %10664 = vmatprep.subr.bf16.mxu0 %v14447_v54 }
0x24ae   :  { %10665 = vmatpush3.bf16.msra.mxu0 %v11244_v30 }
0x24af   :  { %10666 = vmatprep.subr.bf16.mxu0 %v14447_v54 }
0x24b2   :  { %10667 = vmatpush3.bf16.msra.mxu0 %v11245_v5 }
0x24b3   :  { %10668 = vmatprep.subr.bf16.mxu0 %v14447_v54 }
0x24b6   :  { %10669 = vmatpush3.bf16.msra.mxu0 %v11246_v28 }
0x24b7   :  { %8026 = vmatprep.subr.bf16.mxu0 %v11249_v3 }
0x24b9   :  { %10671 = vmatmul.mubr.bf16.vlgmr.msra.gmra.mxu0 %v14121_v49 }
0x24ba   :  { %8027 = vmatpush1.bf16.msra.mxu0 %v11247_v11  ;;  %8058 = vmatprep.mubr.bf16.mxu0 %v14445_v29 }
0x24bb   :  { %8028 = vmatprep.subr.bf16.mxu0 %v11252_v52 }
0x24be   :  { %8029 = vmatpush1.bf16.msra.mxu0 %v11250_v38  ;;  %v11271_v38 = vld [vmem:[#allocation22 + $0x38] sm:$0xff]  }
0x24bf   :  { %8030 = vmatprep.subr.bf16.mxu0 %v11255_v43 }
0x24c2   :  { %8031 = vmatpush1.bf16.msra.mxu0 %v11253_v41  ;;  %v11272_v41 = vld [vmem:[#allocation22 + $0x30] sm:$0xff]  }
0x24c3   :  { %8032 = vmatprep.subr.bf16.mxu0 %v11258_v27  ;;  %v11273_v27 = vld [vmem:[#allocation22 + $0x28] sm:$0xff]  }
0x24c6   :  { %8033 = vmatpush1.bf16.msra.mxu0 %v11256_v10  ;;  %v11274_v10 = vld [vmem:[#allocation22 + $0x20] sm:$0xff]  }
0x24c7   :  { %8034 = vmatprep.subr.bf16.mxu0 %v11261_v7  ;;  %v11275_v7 = vld [vmem:[#allocation22 + $0x18] sm:$0xff]  }
0x24ca   :  { %8035 = vmatpush1.bf16.msra.mxu0 %v11259_v6  ;;  %v11276_v6 = vld [vmem:[#allocation22 + $0x10] sm:$0xff]  }
0x24cb   :  { %8036 = vmatprep.subr.bf16.mxu0 %v11264_v13  ;;  %v11277_v13 = vld [vmem:[#allocation22 + $0x8] sm:$0xff]  }
0x24ce   :  { %8037 = vmatpush1.bf16.msra.mxu0 %v11262_v26  ;;  %v11278_v26 = vld [vmem:[#allocation22] sm:$0xff]  }
0x24cf   :  { %8038 = vmatprep.subr.bf16.mxu0 %v11267_v15 }
0x24d2   :  { %8039 = vmatpush1.bf16.msra.mxu0 %v11265_v31 }
0x24d3   :  { %8040 = vmatprep.subr.bf16.mxu0 %v11270_v42 }
0x24d6   :  { %8041 = vmatpush1.bf16.msra.mxu0 %v11268_v37  ;;  %v14152_v37 = vld [vmem:[%s14315_s16] sm:$0x1] }
0x24d7   :  { %8267 = vmatprep.subr.bf16.mxu0 %v14032_v60 }
0x2559   :  { %v7555_v59 = vpop.f32.mrf.mxu0 }
0x255a   :  { %v7561_v0 = vsel %vm4156_vm3, %v7555_v59, -inf }
0x255b   :  { %7562 = vmax.xlane.f32.xlu0 %v7561_v0  ;;  %v10646_v2 = vpop.f32.mrf.mxu0 }
0x255d   :  { %v7558_v47 = vpop.f32.mrf.mxu0 }
0x255f   :  { %v10647_v55 = vpop.f32.mrf.mxu0 }
0x2579   :  { %v7718_v8 = vpop.f32.mrf.mxu0 }
0x257b   :  { %v10672_v16 = vpop.f32.mrf.mxu0 }
0x257c   :  { %v11279_v16 = vld [vmem:[#allocation4 + $0xb0] ss:$12 sps:$4 sm:$0xff]  }
0x257d   :  { %v7721_v50 = vpop.f32.mrf.mxu0 }
0x257e   :  { %v11281_v50 = vld [vmem:[#allocation4 + $0x80] ss:$12 sps:$4 sm:$0xff]  }
0x257f   :  { %v10673_v45 = vpop.f32.mrf.mxu0 }
0x2580   :  { %v11282_v45 = vld [vmem:[#allocation4 + $0x68] ss:$12 sps:$4 sm:$0xff]  }
0x25e4   :  { %v7563_v32 = vpop.xlane.xlu0 %7562 }
0x25e5   :  { %v7564_v30 = vsub.f32 %v7555_v59, %v7563_v32  ;;  %v11283_v32 = vld [vmem:[#allocation4 + $0x50] ss:$12 sps:$4 sm:$0xff]  }
0x25e7   :  { %v7565_v5 = vmul.f32 1.442695, %v7564_v30  ;;  %v11284_v30 = vld [vmem:[#allocation4 + $0x38] ss:$12 sps:$4 sm:$0xff]  }
0x25e9   :  { %11545 = vpow2.f32 %v7565_v5  ;;  %v11285_v5 = vld [vmem:[#allocation4 + $0x20] ss:$12 sps:$4 sm:$0xff]  }
0x25f6   :  { %v11546_v28 = vpop.eup %11545 }
0x25f7   :  { %v7567_v3 = vsel %vm4156_vm3, %v11546_v28, 0.0 }
0x25f8   :  { %7568 = vadd.xlane.f32.xlu1 %v7567_v3 }
0x2681   :  { %v7569_v60 = vpop.xlane.xlu1 %7568 }
0x2682   :  { %11547 = vrcp.f32 %v7569_v60  ;;  %v14168_v60 = vld [vmem:[%s14317_s18] sm:$0x1]  ;;  %s11984_s18 = smov [#allocation25]  }
0x2683   :  { %s8731_s1 = sshll.u32 %s11984_s18, 4  ;;  %s8732_s1 = int_to_ptr.vmem [resolvable:$true] %s8731_s1 }
0x2684   :  { %s11907_s22 = scalar_lea.vmem %s8732_s1, 16  ;;  %s11911_s25 = scalar_lea.vmem %s8732_s1, 32 }
0x2685   :  { %p11908_p8 = scmp.ne.s32.totalorder %s8732_s1, %s11907_s22  ;;  %p11912_p9 = scmp.lt.s32.totalorder %s8732_s1, %s8732_s1 }
0x2686   :  { %p11913_p10 = scmp.lt.s32.totalorder %s11911_s25, %s11907_s22 }
0x2688   :  { %p11914_p11 = por %p11913_p10, %p11912_p9 }
0x268a   :  { %p11915_p12 = pnand %p11914_p11, %p11908_p8 }
0x268f   :  { %v11548_v11 = vpop.eup %11547 }
0x2690   :  { %v7571_v52 = vmul.f32 %v11548_v11, %v11546_v28  ;;  %v11286_v28 = vld [vmem:[#allocation4 + $0x8] ss:$12 sps:$4 sm:$0xff]  }
0x2692   :  { %v7588_v43 = vpack.c.bf16 %v7571_v52, %v7571_v52 }
0x2694   :  { %10651 = vmatmul.mubr.msk.bf16.vlgmr.msra.gmra.mxu1 %vm4186_vm4, %v7588_v43 }
0x2695   :  { %10675 = vmatpush3.bf16.msra.mxu1 %v11271_v38  ;;  %10690 = vmatprep.mubr.msk.bf16.mxu1 %vm11981_vm0, %v14447_v54 }
0x2696   :  { %10676 = vmatprep.subr.bf16.mxu1 %v14447_v54 }
0x2699   :  { %10677 = vmatpush3.bf16.msra.mxu1 %v11272_v41 }
0x269a   :  { %10678 = vmatprep.subr.bf16.mxu1 %v14447_v54 }
0x269d   :  { %10679 = vmatpush3.bf16.msra.mxu1 %v11273_v27 }
0x269e   :  { %10680 = vmatprep.subr.bf16.mxu1 %v14447_v54 }
0x26a1   :  { %10681 = vmatpush3.bf16.msra.mxu1 %v11274_v10 }
0x26a2   :  { %10682 = vmatprep.subr.bf16.mxu1 %v14447_v54 }
0x26a5   :  { %10683 = vmatpush3.bf16.msra.mxu1 %v11275_v7 }
0x26a6   :  { %10684 = vmatprep.subr.bf16.mxu1 %v14447_v54 }
0x26a9   :  { %10685 = vmatpush3.bf16.msra.mxu1 %v11276_v6 }
0x26aa   :  { %10686 = vmatprep.subr.bf16.mxu1 %v14447_v54 }
0x26ad   :  { %10687 = vmatpush3.bf16.msra.mxu1 %v11277_v13 }
0x26ae   :  { %10688 = vmatprep.subr.bf16.mxu1 %v14447_v54 }
0x26b1   :  { %10689 = vmatpush3.bf16.msra.mxu1 %v11278_v26 }
0x26b2   :  { %10694 = vmatprep.subr.bf16.mxu1 %v14447_v54 }
0x2754   :  { %v7630_v15 = vpop.f32.mrf.mxu1 }
0x2755   :  { %v7719_v31 = vadd.f32 %v7718_v8, %v7630_v15  ;;  %v11280_v8 = vld [vmem:[#allocation4 + $0x98] ss:$12 sps:$4 sm:$0xff]  }
0x2756   :  { %v10652_v42 = vpop.f32.mrf.mxu1 }
0x2757   :  { %v7724_v59 = vadd.f32 %v14152_v37, %v7719_v31 }
0x2758   :  { %v7633_v0 = vpop.f32.mrf.mxu1 }
0x2759   :  { %11549 = vtanh.f32 %v7724_v59 }
0x275a   :  { %v10653_v2 = vpop.f32.mrf.mxu1 }
0x2766   :  { %v11550_v47 = vpop.eup %11549 }
0x2767   :  { %v7726_v55 = vpack.c.bf16 %v11550_v47, %v11550_v47 }
0x2769   :  { %10691 = vmatmul.mubr.bf16.vlgmr.msra.gmra.mxu1 %v7726_v55 }
0x276a   :  { %10695 = vmatpush3.bf16.msra.mxu1 %v11279_v16  ;;  %10710 = vmatprep.mubr.msk.bf16.mxu1 %vm11981_vm0, %v14447_v54  ;;  %v11287_v16 = vld [vmem:[#allocation18 + $0xb0] ss:$12 sps:$4 sm:$0xff]  }
0x276b   :  { %10696 = vmatprep.subr.bf16.mxu1 %v14447_v54 }
0x276e   :  { %10697 = vmatpush3.bf16.msra.mxu1 %v11280_v8 }
0x276f   :  { %10698 = vmatprep.subr.bf16.mxu1 %v14447_v54 }
0x2772   :  { %10699 = vmatpush3.bf16.msra.mxu1 %v11281_v50  ;;  %v11288_v50 = vld [vmem:[#allocation18 + $0x98] ss:$12 sps:$4 sm:$0xff]  }
0x2773   :  { %10700 = vmatprep.subr.bf16.mxu1 %v14447_v54 }
0x2776   :  { %10701 = vmatpush3.bf16.msra.mxu1 %v11282_v45 }
0x2777   :  { %10702 = vmatprep.subr.bf16.mxu1 %v14447_v54 }
0x277a   :  { %10703 = vmatpush3.bf16.msra.mxu1 %v11283_v32 }
0x277b   :  { %10704 = vmatprep.subr.bf16.mxu1 %v14447_v54 }
0x277e   :  { %10705 = vmatpush3.bf16.msra.mxu1 %v11284_v30 }
0x277f   :  { %10706 = vmatprep.subr.bf16.mxu1 %v14447_v54 }
0x2782   :  { %10707 = vmatpush3.bf16.msra.mxu1 %v11285_v5 }
0x2783   :  { %10708 = vmatprep.subr.bf16.mxu1 %v14447_v54 }
0x2786   :  { %10709 = vmatpush3.bf16.msra.mxu1 %v11286_v28 }
0x2787   :  { %10714 = vmatprep.subr.bf16.mxu1 %v14447_v54 }
0x2829   :  { %v7825_v3 = vpop.f32.mrf.mxu1 }
0x282a   :  { %v14171_v11 = vadd.f32 %v14168_v60, %v7825_v3 }
0x282b   :  { %v10692_v52 = vpop.f32.mrf.mxu1 }
0x282c   :  { %v7831_v38 = vsel %vm3664_vm11, %v14171_v11, -inf }
0x282d   :  { %7832 = vmax.xlane.f32.xlu0 %v7831_v38  ;;  %v7828_v43 = vpop.f32.mrf.mxu1 }
0x282f   :  { %v10693_v41 = vpop.f32.mrf.mxu1 }
0x28b6   :  { %v14175_v27 = vpop.xlane.xlu0 %7832 }
0x28b7   :  { %vm7842_vm5 = vcmp.eq.f32.partialorder %v14171_v11, %v14175_v27 }
0x28b8   :  { %v7843_v10 = vsel %vm7842_vm5, %v14519_v58, 128 }
0x28b9   :  { %v7844_v7 = vsel %vm3664_vm11, %v7843_v10, 2147483647 }
0x28ba   :  { %v7846_v6 = vshra.s32 %v7844_v7, 16  ;;  %v7845_v26 = vand.u32 65535, %v7844_v7 }
0x28bc   :  { %v7848_v13 = vcvt.s32.f32 %v7846_v6  ;;  %v7847_v31 = vcvt.s32.f32 %v7845_v26 }
0x28be   :  { %7849 = vmin.xlane.f32.xlu1 %v7848_v13 }
0x2947   :  { %v7850_v15 = vpop.xlane.xlu1 %7849 }
0x2948   :  { %vm7851_vm7 = vcmp.eq.f32.partialorder %v7848_v13, %v7850_v15  ;;  %v7856_v59 = vcvt.f32.s32 %v7850_v15 }
0x2949   :  { %v7852_v42 = vsel %vm7851_vm7, %v7847_v31, inf }
0x294a   :  { %7853 = vmin.xlane.f32.xlu0 %v7852_v42  ;;  %v7857_v2 = vshll.u32 %v7856_v59, 16 }
0x29d3   :  { %v7854_v0 = vpop.xlane.xlu0 %7853 }
0x29d4   :  { %v7855_v47 = vcvt.f32.s32 %v7854_v0 }
0x29d6   :  { %v7858_v55 = vadd.s32 %v7857_v2, %v7855_v47 }
0x29d8   :  { %vm7862_vm9 = vcmp.eq.s32.totalorder %v14519_v58, %v7858_v55  ;;  %v14186_v8 = vsel %vm7859_vm8, %v7858_v55, %v14044_v61  ;;  %v11289_v61 = vld [vmem:[#allocation18 + $0x80] ss:$12 sps:$4 sm:$0xff]  }
0x29d9   :  { %vm9316_vm10 = vmpackc.low %vm7862_vm9, %vm7862_vm9 }
0x29da   :  { %9317 = vmatmul.mubr.msk.bf16.vlgmr.msra.gmra.mxu0 %vm9316_vm10, %v14520_v19  ;;  %10711 = vmatmul.mubr.msk.bf16.vlgmr.msra.gmra.mxu1 %vm9316_vm10, %v14520_v19  ;;  %v11290_v19 = vld [vmem:[#allocation18 + $0x68] ss:$12 sps:$4 sm:$0xff]  }
0x29db   :  { %8268 = vmatpush1.bf16.msra.mxu0 %v14036_v62  ;;  %10715 = vmatpush3.bf16.msra.mxu1 %v11287_v16  ;;  %v11292_v62 = vld [vmem:[#allocation18 + $0x38] ss:$12 sps:$4 sm:$0xff]  }
0x29dc   :  { %8269 = vmatprep.subr.bf16.mxu0 %v14039_v56  ;;  %10716 = vmatprep.subr.bf16.mxu1 %v14447_v54  ;;  %v11293_v56 = vld [vmem:[#allocation18 + $0x20] ss:$12 sps:$4 sm:$0xff]  }
0x29dd   :  { %8299 = vmatprep.mubr.bf16.mxu0 %v14445_v29  ;;  %10730 = vmatprep.mubr.msk.bf16.mxu1 %vm11981_vm0, %v14447_v54  ;;  %v11291_v29 = vld [vmem:[#allocation18 + $0x50] ss:$12 sps:$4 sm:$0xff]  }
0x29df   :  { %8270 = vmatpush1.bf16.msra.mxu0 %v14049_v40  ;;  %10717 = vmatpush3.bf16.msra.mxu1 %v11288_v50  ;;  %v11294_v40 = vld [vmem:[#allocation18 + $0x8] ss:$12 sps:$4 sm:$0xff]  }
0x29e0   :  { %8271 = vmatprep.subr.bf16.mxu0 %v14053_v21  ;;  %10718 = vmatprep.subr.bf16.mxu1 %v14447_v54  ;;  %v8439_v21 = vld [vmem:[#allocation3] sm:$0xf] }
0x29e3   :  { %8272 = vmatpush1.bf16.msra.mxu0 %v14059_v17  ;;  %10719 = vmatpush3.bf16.msra.mxu1 %v11289_v61  ;;  %v8370_v17 = vld [vmem:[#allocation2] sm:$0xf] }
0x29e4   :  { %8273 = vmatprep.subr.bf16.mxu0 %v14063_v46  ;;  %10720 = vmatprep.subr.bf16.mxu1 %v14447_v54  ;;  %v8444_v46 = vsel %vm3670_vm14, %v8439_v21, 0  ;;  %v11295_v61 = vld [vmem:[#allocation19 + $0x38] sm:$0xff]  }
0x29e7   :  { %8274 = vmatpush1.bf16.msra.mxu0 %v14066_v9  ;;  %10721 = vmatpush3.bf16.msra.mxu1 %v11290_v19 }
0x29e8   :  { %8275 = vmatprep.subr.bf16.mxu0 %v14070_v53  ;;  %10722 = vmatprep.subr.bf16.mxu1 %v14447_v54 }
0x29eb   :  { %8276 = vmatpush1.bf16.msra.mxu0 %v14073_v25  ;;  %10723 = vmatpush3.bf16.msra.mxu1 %v11291_v29  ;;  %v11296_v29 = vld [vmem:[#allocation19 + $0x30] sm:$0xff]  }
0x29ec   :  { %8277 = vmatprep.subr.bf16.mxu0 %v14077_v14  ;;  %10724 = vmatprep.subr.bf16.mxu1 %v14447_v54 }
0x29ef   :  { %8278 = vmatpush1.bf16.msra.mxu0 %v14080_v23  ;;  %10725 = vmatpush3.bf16.msra.mxu1 %v11292_v62  ;;  %v11300_v62 = vld [vmem:[#allocation19 + $0x10] sm:$0xff]  }
0x29f0   :  { %8279 = vmatprep.subr.bf16.mxu0 %v14084_v51  ;;  %10726 = vmatprep.subr.bf16.mxu1 %v14447_v54 }
0x29f3   :  { %8280 = vmatpush1.bf16.msra.mxu0 %v14087_v1  ;;  %10727 = vmatpush3.bf16.msra.mxu1 %v11293_v56  ;;  %v11301_v56 = vld [vmem:[#allocation19 + $0x8] sm:$0xff]  }
0x29f4   :  { %8281 = vmatprep.subr.bf16.mxu0 %v14091_v57  ;;  %10728 = vmatprep.subr.bf16.mxu1 %v14447_v54 }
0x29f7   :  { %8282 = vmatpush1.bf16.msra.mxu0 %v14094_v20  ;;  %10729 = vmatpush3.bf16.msra.mxu1 %v11294_v40  ;;  %v11302_v40 = vld [vmem:[#allocation19] sm:$0xff]  }
0x29f8   :  { %10734 = vmatprep.subr.bf16.mxu0 %v14447_v54  ;;  %10740 = vmatprep.subr.bf16.mxu1 %v14447_v54 }
0x29fa   :  { %8300 = vmatmul.mubr.bf16.vlgmr.msra.gmra.mxu0 %v14121_v49  ;;  %10731 = vmatmul.mubr.bf16.vlgmr.msra.gmra.mxu1 %v14121_v49 }
0x29fb   :  { %10735 = vmatpush3.bf16.xpose.msra.mxu0 %v8370_v17  ;;  %10741 = vmatpush3.bf16.msra.mxu1 %v8444_v46 }
0x29fc   :  { %10736 = vmatprep.mubr.msk.bf16.mxu0 %vm11981_vm0, %v14447_v54  ;;  %10746 = vmatprep.subr.bf16.mxu0 %v14447_v54 }
0x29fd   :  { %10742 = vmatprep.mubr.msk.bf16.mxu1 %vm11981_vm0, %v14447_v54  ;;  %10766 = vmatprep.subr.bf16.mxu1 %v14447_v54 }
0x2a9a   :  { %v8060_v9 = vpop.f32.mrf.mxu0  ;;  %v8101_v53 = vpop.f32.mrf.mxu1 }
0x2a9b   :  { %v8061_v45 = vadd.f32 %v8060_v9, %v13459_v63  ;;  %v8102_v59 = vadd.f32 %v8101_v53, %v13474_v12  ;;  %v11298_v12 = vld [vmem:[#allocation19 + $0x20] sm:$0xff]  }
0x2a9c   :  { %v8062_v25 = vpop.f32.mrf.mxu0  ;;  %v10712_v14 = vpop.f32.mrf.mxu1 }
0x2a9d   :  { %v8063_v7 = vadd.f32 %v8062_v25, %v13467_v44 }
0x2a9e   :  { %v8064_v23 = vpop.f32.mrf.mxu0  ;;  %v8104_v51 = vpop.f32.mrf.mxu1 }
0x2aa0   :  { %v8065_v1 = vpop.f32.mrf.mxu0  ;;  %v10713_v57 = vpop.f32.mrf.mxu1 }
0x2aba   :  { %v8301_v20 = vpop.f32.mrf.mxu0  ;;  %v8342_v49 = vpop.f32.mrf.mxu1 }
0x2abb   :  { %v8302_v32 = vadd.f32 %v8301_v20, %v13452_v33  ;;  %v8343_v31 = vadd.f32 %v8342_v49, %v13471_v18  ;;  %v11297_v18 = vld [vmem:[#allocation19 + $0x28] sm:$0xff]  }
0x2abc   :  { %v8303_v30 = vpop.f32.mrf.mxu0  ;;  %v10732_v5 = vpop.f32.mrf.mxu1 }
0x2abd   :  { %v8348_v28 = vadd.f32 %v8302_v32, %v8061_v45  ;;  %v8304_v43 = vadd.f32 %v8303_v30, %v13463_v39 }
0x2abe   :  { %v8305_v3 = vpop.f32.mrf.mxu0  ;;  %v8345_v52 = vpop.f32.mrf.mxu1 }
0x2abf   :  { %v9344_v38 = vmul.f32 -1.442695, %v8348_v28  ;;  %v8355_v6 = vadd.f32 %v8304_v43, %v8063_v7  ;;  %v11303_v28 = vld [vmem:[#allocation22 + $0x38] sm:$0xff]   ;;  %v11304_v52 = vld [vmem:[#allocation22 + $0x30] sm:$0xff]   ;;  %v11306_v43 = vld [vmem:[#allocation22 + $0x20] sm:$0xff]  }
0x2ac0   :  { %v8306_v41 = vpop.f32.mrf.mxu0  ;;  %v10733_v10 = vpop.f32.mrf.mxu1  ;;  %v11309_v7 = vld [vmem:[#allocation22 + $0x8] sm:$0xff]  }
0x2ac1   :  { %11551 = vpow2.f32 %v9344_v38  ;;  %v9345_v13 = vmul.f32 -1.442695, %v8355_v6  ;;  %v11305_v38 = vld [vmem:[#allocation22 + $0x28] sm:$0xff]   ;;  %v11307_v41 = vld [vmem:[#allocation22 + $0x18] sm:$0xff]   ;;  %v11308_v10 = vld [vmem:[#allocation22 + $0x10] sm:$0xff]  }
0x2ac2   :  { %v11310_v6 = vld [vmem:[#allocation22] sm:$0xff]  }
0x2ac3   :  { %11553 = vpow2.f32 %v9345_v13 }
0x2ace   :  { %v11552_v26 = vpop.eup %11551 }
0x2acf   :  { %v8352_v63 = vadd.f32 1.0, %v11552_v26 }
0x2ad0   :  { %v11554_v33 = vpop.eup %11553 }
0x2ad1   :  { %11555 = vrcp.f32 %v8352_v63  ;;  %v8359_v15 = vadd.f32 1.0, %v11554_v33 }
0x2ad3   :  { %11557 = vrcp.f32 %v8359_v15 }
0x2ade   :  { %v11556_v42 = vpop.eup %11555 }
0x2adf   :  { %v8362_v0 = vmul.f32 %v11556_v42, %v8343_v31 }
0x2ae0   :  { %v11558_v2 = vpop.eup %11557 }
0x2ae1   :  { %v8363_v39 = vadd.f32 %v8362_v0, %v8102_v59  ;;  %v8365_v44 = vsub.f32 1.0, %v11558_v2  ;;  %v8367_v16 = vmul.f32 %v11558_v2, %v14117_v34  ;;  %v11299_v34 = vld [vmem:[#allocation19 + $0x18] sm:$0xff]   ;;  %v4431_v0 = vsub.f32 %v13583_v24, %v13587_v4 }
0x2ae2   :  { %v6134_v2 = vsub.f32 %v13901_v48, %v13905_v35 }
0x2ae3   :  { %11559 = vtanh.f32 %v8363_v39  ;;  %v4432_v39 = vmul.f32 1.442695, %v4431_v0 }
0x2af0   :  { %v11560_v47 = vpop.eup %11559 }
0x2af1   :  { %v8366_v55 = vmul.f32 %v11560_v47, %v8365_v44  ;;  %v7834_v44 = vsub.f32 %v14171_v11, %v14175_v27 }
0x2af3   :  { %v8368_v50 = vadd.f32 %v8367_v16, %v8366_v55 }
0x2af5   :  { %v8369_v19 = vpack.c.bf16 %v8368_v50, %v8368_v50 }
0x2af7   :  { %10737 = vmatmul.mubr.bf16.vlgmr.msra.gmra.mxu0 %v8369_v19 }
0x2af8   :  { %10747 = vmatpush3.bf16.msra.mxu0 %v11295_v61  ;;  %10762 = vmatprep.mubr.msk.bf16.mxu0 %vm11981_vm0, %v14447_v54 }
0x2af9   :  { %10748 = vmatprep.subr.bf16.mxu0 %v14447_v54 }
0x2afc   :  { %10749 = vmatpush3.bf16.msra.mxu0 %v11296_v29  ;;  %v14523_v29 = vld [vmem:[#allocation51_spill] sm:$0xff] }
0x2afd   :  { %10750 = vmatprep.subr.bf16.mxu0 %v14447_v54 }
0x2b00   :  { %10751 = vmatpush3.bf16.msra.mxu0 %v11297_v18 }
0x2b01   :  { %10752 = vmatprep.subr.bf16.mxu0 %v14447_v54 }
0x2b04   :  { %10753 = vmatpush3.bf16.msra.mxu0 %v11298_v12 }
0x2b05   :  { %10754 = vmatprep.subr.bf16.mxu0 %v14447_v54 }
0x2b08   :  { %10755 = vmatpush3.bf16.msra.mxu0 %v11299_v34  ;;  %v6984_v34 = vsub.f32 %v14022_v22, %v14026_v36 }
0x2b09   :  { %10756 = vmatprep.subr.bf16.mxu0 %v14447_v54 }
0x2b0c   :  { %10757 = vmatpush3.bf16.msra.mxu0 %v11300_v62  ;;  %v6985_v62 = vmul.f32 1.442695, %v6984_v34 }
0x2b0d   :  { %10758 = vmatprep.subr.bf16.mxu0 %v14447_v54 }
0x2b10   :  { %10759 = vmatpush3.bf16.msra.mxu0 %v11301_v56 }
0x2b11   :  { %10760 = vmatprep.subr.bf16.mxu0 %v14447_v54 }
0x2b14   :  { %10761 = vmatpush3.bf16.msra.mxu0 %v11302_v40 }
0x2b17   :  { %10763 = vmatmul.mubr.bf16.vlgmr.msra.gmra.mxu0 %v8369_v19 }
0x2bb7   :  { %v8405_v21 = vpop.f32.mrf.mxu0 }
0x2bb8   :  { %v8411_v17 = vsel %vm4156_vm3, %v8405_v21, -inf }
0x2bb9   :  { %8412 = vmax.xlane.f32.xlu1 %v8411_v17  ;;  %v10738_v46 = vpop.f32.mrf.mxu0 }
0x2bbb   :  { %v8408_v9 = vpop.f32.mrf.mxu0 }
0x2bbd   :  { %v10739_v53 = vpop.f32.mrf.mxu0 }
0x2bd7   :  { %v8568_v25 = vpop.f32.mrf.mxu0 }
0x2bd9   :  { %v10764_v14 = vpop.f32.mrf.mxu0 }
0x2bdb   :  { %v8571_v23 = vpop.f32.mrf.mxu0 }
0x2bdd   :  { %v10765_v51 = vpop.f32.mrf.mxu0 }
0x2c42   :  { %v8413_v1 = vpop.xlane.xlu1 %8412 }
0x2c43   :  { %v8414_v57 = vsub.f32 %v8405_v21, %v8413_v1 }
0x2c45   :  { %v8415_v20 = vmul.f32 1.442695, %v8414_v57 }
0x2c47   :  { %11561 = vpow2.f32 %v8415_v20 }
0x2c54   :  { %v11562_v49 = vpop.eup %11561 }
0x2c55   :  { %v8417_v45 = vsel %vm4156_vm3, %v11562_v49, 0.0  ;;  %vm8712_vm3 = vcmask 40960  }
0x2c56   :  { %8418 = vadd.xlane.f32.xlu0 %v8417_v45 }
0x2cdf   :  { %v8419_v32 = vpop.xlane.xlu0 %8418 }
0x2ce0   :  { %11563 = vrcp.f32 %v8419_v32 }
0x2ced   :  { %v11564_v30 = vpop.eup %11563 }
0x2cee   :  { %v8421_v5 = vmul.f32 %v11564_v30, %v11562_v49 }
0x2cf0   :  { %v8438_v3 = vpack.c.bf16 %v8421_v5, %v8421_v5 }
0x2cf2   :  { %10743 = vmatmul.mubr.msk.bf16.vlgmr.msra.gmra.mxu1 %vm4186_vm4, %v8438_v3 }
0x2cf3   :  { %10767 = vmatpush3.bf16.msra.mxu1 %v11303_v28  ;;  %10782 = vmatprep.mubr.msk.bf16.mxu1 %vm11981_vm0, %v14447_v54 }
0x2cf4   :  { %10768 = vmatprep.subr.bf16.mxu1 %v14447_v54 }
0x2cf7   :  { %10769 = vmatpush3.bf16.msra.mxu1 %v11304_v52 }
0x2cf8   :  { %10770 = vmatprep.subr.bf16.mxu1 %v14447_v54 }
0x2cfb   :  { %10771 = vmatpush3.bf16.msra.mxu1 %v11305_v38 }
0x2cfc   :  { %10772 = vmatprep.subr.bf16.mxu1 %v14447_v54 }
0x2cff   :  { %10773 = vmatpush3.bf16.msra.mxu1 %v11306_v43 }
0x2d00   :  { %10774 = vmatprep.subr.bf16.mxu1 %v14447_v54 }
0x2d03   :  { %10775 = vmatpush3.bf16.msra.mxu1 %v11307_v41 }
0x2d04   :  { %10776 = vmatprep.subr.bf16.mxu1 %v14447_v54 }
0x2d07   :  { %10777 = vmatpush3.bf16.msra.mxu1 %v11308_v10 }
0x2d08   :  { %10778 = vmatprep.subr.bf16.mxu1 %v14447_v54 }
0x2d0b   :  { %10779 = vmatpush3.bf16.msra.mxu1 %v11309_v7 }
0x2d0c   :  { %10780 = vmatprep.subr.bf16.mxu1 %v14447_v54  ;;  %v6135_v54 = vmul.f32 1.442695, %v6134_v2 }
0x2d0f   :  { %10781 = vmatpush3.bf16.msra.mxu1 %v11310_v6 }
0x2db2   :  { %v8480_v13 = vpop.f32.mrf.mxu1 }
0x2db3   :  { %v8569_v26 = vadd.f32 %v8568_v25, %v8480_v13 }
0x2db4   :  { %v10744_v63 = vpop.f32.mrf.mxu1 }
0x2db5   :  { %v8574_v33 = vadd.f32 %v14152_v37, %v8569_v26  ;;  %v7835_v37 = vmul.f32 1.442695, %v7834_v44 }
0x2db6   :  { %v8483_v15 = vpop.f32.mrf.mxu1 }
0x2db7   :  { %11565 = vtanh.f32 %v8574_v33 }
0x2db8   :  { %v10745_v31 = vpop.f32.mrf.mxu1  ;;  %11567 = vpow2.f32 %v4432_v39 }
0x2db9   :  { %11569 = vpow2.f32 %v6135_v54 }
0x2dba   :  { %11571 = vpow2.f32 %v7835_v37 }
0x2dc4   :  { %v11566_v42 = vpop.eup %11565 }
0x2dc5   :  { %v8576_v59 = vpack.c.bf16 %v11566_v42, %v11566_v42  ;;  %v11568_v61 = vpop.eup %11567 }
0x2dc6   :  { %v4434_v48 = vsel %vm3664_vm11, %v11568_v61, 0.0  ;;  %v11570_v35 = vpop.eup %11569 }
0x2dc7   :  { %10783 = vmatmul.mubr.bf16.vlgmr.msra.gmra.mxu1 %v8576_v59  ;;  %v6137_v19 = vsel %vm3664_vm11, %v11570_v35, 0.0  ;;  %v11572_v11 = vpop.eup %11571 }
0x2dc8   :  { %v7837_v27 = vsel %vm3664_vm11, %v11572_v11, 0.0 }
0x2e87   :  { %v8675_v47 = vpop.f32.mrf.mxu1 }
0x2e88   :  { %v8676_v55 = vadd.f32 %v14168_v60, %v8675_v47  ;;  %v14524_v60 = vld [vmem:[#allocation50_spill] sm:$0xff] }
0x2e89   :  { %v10784_v16 = vpop.f32.mrf.mxu1  ;;  %v5284_v18 = vsub.f32 %v14524_v60, %v14523_v29 }
0x2e8a   :  { %v8681_v50 = vsel %vm3664_vm11, %v8676_v55, -inf }
0x2e8b   :  { %8682 = vmax.xlane.f32.xlu1 %v8681_v50  ;;  %v8678_v24 = vpop.f32.mrf.mxu1  ;;  %v5285_v12 = vmul.f32 1.442695, %v5284_v18 }
0x2e8d   :  { %v10785_v4 = vpop.f32.mrf.mxu1  ;;  %11573 = vpow2.f32 %v5285_v12 }
0x2e8e   :  { %11575 = vpow2.f32 %v6985_v62 }
0x2e8f   :  { %4435 = vadd.xlane.f32.xlu1 %v4434_v48 }
0x2e93   :  { %6138 = vadd.xlane.f32.xlu1 %v6137_v19 }
0x2e97   :  { %7838 = vadd.xlane.f32.xlu1 %v7837_v27 }
0x2e9a   :  { %v11574_v25 = vpop.eup %11573 }
0x2e9b   :  { %v5287_v14 = vsel %vm3664_vm11, %v11574_v25, 0.0  ;;  %v11576_v23 = vpop.eup %11575 }
0x2e9c   :  { %v6987_v22 = vsel %vm3664_vm11, %v11576_v23, 0.0 }
0x2f14   :  { %v8683_v56 = vpop.xlane.xlu1 %8682 }
0x2f15   :  { %v8684_v40 = vsub.f32 %v8676_v55, %v8683_v56  ;;  %vm8692_vm0 = vcmp.eq.f32.partialorder %v8676_v55, %v8683_v56 }
0x2f16   :  { %v8693_v21 = vsel %vm8692_vm0, %v14519_v58, 128 }
0x2f17   :  { %v8685_v17 = vmul.f32 1.442695, %v8684_v40  ;;  %v8694_v46 = vsel %vm3664_vm11, %v8693_v21, 2147483647 }
0x2f18   :  { %v8696_v9 = vshra.s32 %v8694_v46, 16  ;;  %v8695_v1 = vand.u32 65535, %v8694_v46  ;;  %v4436_v57 = vpop.xlane.xlu1 %4435 }
0x2f19   :  { %11577 = vpow2.f32 %v8685_v17 }
0x2f1a   :  { %v8698_v53 = vcvt.s32.f32 %v8696_v9  ;;  %v8697_v49 = vcvt.s32.f32 %v8695_v1  ;;  %11579 = vrcp.f32 %v4436_v57 }
0x2f1c   :  { %8699 = vmin.xlane.f32.xlu0 %v8698_v53  ;;  %v6139_v32 = vpop.xlane.xlu1 %6138 }
0x2f20   :  { %5288 = vadd.xlane.f32.xlu0 %v5287_v14  ;;  %v7839_v28 = vpop.xlane.xlu1 %7838 }
0x2f24   :  { %6988 = vadd.xlane.f32.xlu0 %v6987_v22 }
0x2f26   :  { %v11578_v36 = vpop.eup %11577 }
0x2f27   :  { %v8687_v51 = vsel %vm3664_vm11, %v11578_v36, 0.0  ;;  %v11580_v52 = vpop.eup %11579  ;;  %vm8709_vm11 = vcmp.eq.s32.totalorder %v14519_v58, 5 }
0x2f28   :  { %8688 = vadd.xlane.f32.xlu0 %v8687_v51  ;;  %v4458_v43 = vsel %vm4456_vm12, %v11580_v52, 0.0 }
0x2fa5   :  { %v8700_v20 = vpop.xlane.xlu0 %8699 }
0x2fa6   :  { %vm8701_vm14 = vcmp.eq.f32.partialorder %v8698_v53, %v8700_v20 }
0x2fa7   :  { %v8702_v45 = vsel %vm8701_vm14, %v8697_v49, inf }
0x2fa8   :  { %8703 = vmin.xlane.f32.xlu1 %v8702_v45 }
0x2fa9   :  { %v5289_v30 = vpop.xlane.xlu0 %5288 }
0x2faa   :  { %11581 = vrcp.f32 %v5289_v30 }
0x2fab   :  { %11583 = vrcp.f32 %v6139_v32 }
0x2fad   :  { %v6989_v5 = vpop.xlane.xlu0 %6988 }
0x2fae   :  { %11585 = vrcp.f32 %v6989_v5 }
0x2faf   :  { %11587 = vrcp.f32 %v7839_v28 }
0x2fb1   :  { %v8689_v3 = vpop.xlane.xlu0 %8688 }
0x2fb2   :  { %11589 = vrcp.f32 %v8689_v3 }
0x2fb7   :  { %v11582_v38 = vpop.eup %11581 }
0x2fb8   :  { %v5311_v41 = vsel %vm5309_vm13, %v11582_v38, %v4458_v43  ;;  %v11584_v10 = vpop.eup %11583 }
0x2fb9   :  { %v6161_v6 = vsel %vm6159_vm6, %v11584_v10, %v5311_v41 }
0x2fbb   :  { %v11586_v7 = vpop.eup %11585 }
0x2fbc   :  { %v7011_v13 = vsel %vm7009_vm15, %v11586_v7, %v6161_v6  ;;  %v11588_v26 = vpop.eup %11587 }
0x2fbd   :  { %v7861_v33 = vsel %vm7859_vm8, %v11588_v26, %v7011_v13 }
0x2fbf   :  { %v11590_v63 = vpop.eup %11589 }
0x2fc0   :  { %v8711_v15 = vsel %vm8709_vm11, %v11590_v63, %v7861_v33 }
0x2fc1   :  { %8714 = vst.msk [vmem:[#allocation25] sm:$0x1] %vm8712_vm3, %v8711_v15 }
0x2fc2   :  { %11918 = shalt.err (!%p11915_p12)
}
0x2fc3   :  { %8734 = dma.vmem_to_hbm [thread:$0]  %s8732_s1, 16, %s14319_s20, [#allocation26]   ;;  %v8706_v31 = vcvt.f32.s32 %v8700_v20 }
0x2fc4   :  { %s11985_s3 = smov [#allocation24]  }
0x2fc5   :  { %v8707_v59 = vshll.u32 %v8706_v31, 16  ;;  %s8721_s26 = sshll.u32 %s11985_s3, 4  ;;  %s8722_s26 = int_to_ptr.vmem [resolvable:$true] %s8721_s26 }
0x2fc6   :  { %s11927_s28 = scalar_lea.vmem %s8722_s26, 16  ;;  %s11931_s5 = scalar_lea.vmem %s8722_s26, 32 }
0x2fc7   :  { %p11928_p13 = scmp.ne.s32.totalorder %s8722_s26, %s11927_s28  ;;  %p11932_p0 = scmp.lt.s32.totalorder %s8722_s26, %s8722_s26 }
0x2fc8   :  { %p11933_p1 = scmp.lt.s32.totalorder %s11931_s5, %s11927_s28 }
0x2fca   :  { %p11934_p2 = por %p11933_p1, %p11932_p0 }
0x2fcc   :  { %p11935_p3 = pnand %p11934_p2, %p11928_p13 }
0x3031   :  { %v8704_v42 = vpop.xlane.xlu1 %8703 }
0x3032   :  { %v8705_v0 = vcvt.f32.s32 %v8704_v42 }
0x3034   :  { %v8708_v39 = vadd.s32 %v8707_v59, %v8705_v0 }
0x3036   :  { %v8710_v2 = vsel %vm8709_vm11, %v8708_v39, %v14186_v8 }
0x3037   :  { %8713 = vst.msk [vmem:[#allocation24] sm:$0x1] %vm8712_vm3, %v8710_v2 }
0x3038   :  { %11938 = shalt.err (!%p11935_p3)
}
0x3039   :  { %8724 = dma.vmem_to_hbm [thread:$0]  %s8722_s26, 16, %s14318_s19, [#allocation7]  }
0x303a   :  { %11961 = dma.done.wait [#allocation7], 16  }
0x303b   :  { %11962 = vsyncadd [#allocation7], 4294967280 }
0x303c   :  { %11963 = dma.done.wait [#allocation26], 16  }
0x303d   :  { %11964 = vsyncadd [#allocation26], 4294967280 }
0x303e   :  { %8741 = vsyncpa [#allocation6], 1 }
0x303f   :  { %8742 = vsyncpa [#allocation11], 1 }
0x3040   :  { %8743 = vsyncpa [#allocation14], 1 }
0x3041   :  { %8744 = vsyncpa [#allocation17], 1 }
0x3042   :  { %8745 = vsyncpa [#allocation20], 1 }
0x3043   :  { %8746 = vsyncpa [#allocation23], 1 }
0x3044   :  { %8747 = vsyncpa [#allocation7], 1 }
0x3045   :  { %8748 = vsyncpa [#allocation26], 1 }
0x3046   :  { %8749 = vsyncpa [#allocation8], 1 }

</bundles_post_ra>
